<compile_context>
chip_gen: v6e
topology: v6e:2x2x1
jax: 0.10.0
libtpu: 0.0.40
codegen_flags: <defaults>
</compile_context>

<pallas_src>
import math
import numpy as np

import jax
import jax.numpy as jnp
from jax.experimental import pallas as pl
from jax.experimental.pallas import tpu as pltpu  # noqa: F401  (TPU backend)

# ----------------------------- hyperparameters ------------------------------
ENC_INP_SIZE = 2
DEC_INP_SIZE = 3
DEC_OUT_SIZE = 3
N_LAYERS = 2          # N
D_MODEL = 32
D_FF = 64
N_HEADS = 4
DK = D_MODEL // N_HEADS
LN_EPS = 1e-6
SCALE_EMB = math.sqrt(D_MODEL)
INV_SQRT_DK = 1.0 / math.sqrt(DK)


# ------------------------- host-side constant builders -----------------------

def positional_encoding(max_len, d_model):
    pos = np.arange(max_len)[:, None].astype(np.float64)
    div = np.exp(np.arange(0, d_model, 2).astype(np.float64)
                 * -(math.log(10000.0) / d_model))
    pe = np.zeros((max_len, d_model), np.float64)
    pe[:, 0::2] = np.sin(pos * div)
    pe[:, 1::2] = np.cos(pos * div)
    return pe.astype(np.float32)


def _block_keep(mq, mk, sq, sk, causal):
    """keep[r,c] = rows r (block size sq) and c (block size sk) in same batch."""
    r = np.arange(mq)[:, None]
    c = np.arange(mk)[None, :]
    keep = (r // sq) == (c // sk)
    if causal:
        keep = keep & ((r % sq) >= (c % sk))
    return keep


def _block_bias(mq, mk, sq, sk, causal):
    return np.where(_block_keep(mq, mk, sq, sk, causal), 0.0, -1e9).astype(np.float32)


def _r8(n):
    return -(-n // 8) * 8


# ----------------------------- parameter packing -----------------------------

def pack_params(params, pe, B, To, Tp):
    """Pack every weight/bias + compile-time constants into one [R,128] f32 slab.

    Returns (slab (jnp.ndarray [R,128] f32), layout dict name -> (row, nrows, ncols)).
    Constant-scalar folding (sqrt(d_model), 1/sqrt(d_k)) is done here, on the host.
    """
    T = Tp + 1
    M_enc, M_dec = B * To, B * T

    entries = []

    def npf(x):
        return np.asarray(x, np.float32)

    def add(name, arr):
        entries.append((name, npf(arr)))

    # embeddings (sqrt(d_model) folded in)
    add('enc_embed_w', npf(params['enc_embed']['w']) * SCALE_EMB)
    add('enc_embed_b', npf(params['enc_embed']['b']) * SCALE_EMB)
    add('dec_embed_w', npf(params['dec_embed']['w']) * SCALE_EMB)
    add('dec_embed_b', npf(params['dec_embed']['b']) * SCALE_EMB)

    def add_ln(prefix, lp):
        add(prefix + '_g', lp['g'])
        add(prefix + '_b', lp['b'])

    def add_self_attn(prefix, ap):
        wqkv = npf(ap['wqkv']).copy()
        bqkv = npf(ap['bqkv']).copy()
        wqkv[:, :D_MODEL] *= INV_SQRT_DK           # fold 1/sqrt(dk) into Q columns
        bqkv[:, :D_MODEL] *= INV_SQRT_DK
        add(prefix + '_wqkv', wqkv)
        add(prefix + '_bqkv', bqkv)
        add(prefix + '_wo', ap['wo'])
        add(prefix + '_bo', ap['bo'])

    def add_cross_attn(prefix, ap):
        add(prefix + '_wq', npf(ap['wq']) * INV_SQRT_DK)
        add(prefix + '_bq', npf(ap['bq']) * INV_SQRT_DK)
        add(prefix + '_wkv', ap['wkv'])
        add(prefix + '_bkv', ap['bkv'])
        add(prefix + '_wo', ap['wo'])
        add(prefix + '_bo', ap['bo'])

    def add_ff(prefix, fp):
        add(prefix + '_w1', fp['w1'])
        add(prefix + '_b1', fp['b1'])
        add(prefix + '_w2', fp['w2'])
        add(prefix + '_b2', fp['b2'])

    for l, lp in enumerate(params['encoder']['layers']):
        pre = f'enc{l}'
        add_ln(pre + '_ln1', lp['ln1'])
        add_self_attn(pre + '_sa', lp['attn'])
        add_ln(pre + '_ln2', lp['ln2'])
        add_ff(pre + '_ff', lp['ff'])
    add_ln('enc_norm', params['encoder']['norm'])

    for l, lp in enumerate(params['decoder']['layers']):
        pre = f'dec{l}'
        add_ln(pre + '_ln1', lp['ln1'])
        add_self_attn(pre + '_sa', lp['self_attn'])
        add_ln(pre + '_ln2', lp['ln2'])
        add_cross_attn(pre + '_ca', lp['src_attn'])
        add_ln(pre + '_ln3', lp['ln3'])
        add_ff(pre + '_ff', lp['ff'])
    add_ln('dec_norm', params['decoder']['norm'])

    add('gen_w', params['generator']['w'])
    add('gen_b', params['generator']['b'])

    # compile-time constants: tiled positional encodings, additive attention
    # biases (pre-tiled across heads along lanes) and the cumsum matrix.
    pe_np = np.asarray(pe, np.float32)
    add('pe_enc', np.tile(pe_np[:To], (B, 1)))                            # [M_enc,32]
    add('pe_dec', np.tile(pe_np[:T], (B, 1)))                             # [M_dec,32]
    add('enc_bias', np.tile(_block_bias(M_enc, M_enc, To, To, False), (1, N_HEADS)))
    add('dec_bias', np.tile(_block_bias(M_dec, M_dec, T, T, True), (1, N_HEADS)))
    add('x_bias',   np.tile(_block_bias(M_dec, M_enc, T, To, False), (1, N_HEADS)))
    add('csum', _block_keep(M_dec, M_dec, T, T, True).astype(np.float32))  # [M_dec,M_dec]

    layout = {}
    blocks = []
    off = 0
    for name, arr in entries:
        nr, nc = arr.shape
        assert nc <= 128, f'{name} is too wide to pack: {arr.shape}'
        alloc = _r8(nr)                       # 8-aligned row offsets
        blk = np.zeros((alloc, 128), np.float32)
        blk[:nr, :nc] = arr
        blocks.append(blk)
        layout[name] = (off, nr, nc)
        off += alloc
    slab = np.concatenate(blocks, axis=0)
    return jnp.asarray(slab), layout


# ------------------------------- fused kernel --------------------------------

def make_forward(layout, B, To, Tp):
    """Build the fused forward for fixed (B, To, Tp) and a given slab layout."""
    T = Tp + 1
    M_enc, M_dec = B * To, B * T

    # data-slab row offsets (each piece padded to a multiple of 8 rows)
    ROW_DEC = _r8(M_enc)
    ROW_OBS = ROW_DEC + _r8(M_dec)
    ROW_MS = ROW_OBS + _r8(M_dec)

    def kernel(data_ref, slab_ref, out_ref):
        def P(name):
            # Read a parameter/constant from the slab at its use site.
            r0, nr, nc = layout[name]
            return slab_ref[r0:r0 + nr, 0:nc]

        def layer_norm(x, prefix):
            # Annotated-Transformer LayerNorm: g*(x-mu)/(std+eps)+b, unbiased std.
            mu = jnp.mean(x, axis=-1, keepdims=True)
            var = jnp.sum((x - mu) ** 2, axis=-1, keepdims=True) * (1.0 / (D_MODEL - 1))
            inv = pl.reciprocal(jnp.sqrt(var) + LN_EPS, approx=True)
            return P(prefix + '_g') * (x - mu) * inv + P(prefix + '_b')

        def feed_forward(x, prefix):
            h = jnp.maximum(
                jnp.dot(x, P(prefix + '_w1'), preferred_element_type=jnp.float32)
                + P(prefix + '_b1'), 0.0)
            return (jnp.dot(h, P(prefix + '_w2'), preferred_element_type=jnp.float32)
                    + P(prefix + '_b2'))

        def mha(q, k, v, prefix, bias_name):
            # q: [Mq,32] (already pre-scaled by 1/sqrt(dk)), k/v: [Mk,32]
            mk = k.shape[0]
            scores = [
                jax.lax.dot_general(q[:, h * DK:(h + 1) * DK], k[:, h * DK:(h + 1) * DK],
                                    (((1,), (1,)), ((), ())),
                                    preferred_element_type=jnp.float32)
                for h in range(N_HEADS)
            ]
            s = jnp.concatenate(scores, axis=1) + P(bias_name)   # [Mq, H*Mk] + bias
            s = s - jnp.max(s, axis=-1, keepdims=True)           # one wide max
            e = jnp.exp(s)                                       # one wide exp
            outs = []
            for h in range(N_HEADS):
                eh = e[:, h * mk:(h + 1) * mk]
                inv_l = pl.reciprocal(jnp.sum(eh, axis=-1, keepdims=True), approx=True)
                oh = jnp.dot(eh, v[:, h * DK:(h + 1) * DK],
                             preferred_element_type=jnp.float32)
                outs.append(oh * inv_l)
            o = jnp.concatenate(outs, axis=1)                    # [Mq, 32]
            return (jnp.dot(o, P(prefix + '_wo'), preferred_element_type=jnp.float32)
                    + P(prefix + '_bo'))

        def self_attn(y, prefix, bias_name):
            qkv = (jnp.dot(y, P(prefix + '_wqkv'), preferred_element_type=jnp.float32)
                   + P(prefix + '_bqkv'))
            return mha(qkv[:, 0:D_MODEL], qkv[:, D_MODEL:2 * D_MODEL],
                       qkv[:, 2 * D_MODEL:3 * D_MODEL], prefix, bias_name)

        def cross_attn(y, mem, prefix, bias_name):
            q = (jnp.dot(y, P(prefix + '_wq'), preferred_element_type=jnp.float32)
                 + P(prefix + '_bq'))
            kv = (jnp.dot(mem, P(prefix + '_wkv'), preferred_element_type=jnp.float32)
                  + P(prefix + '_bkv'))
            return mha(q, kv[:, 0:D_MODEL], kv[:, D_MODEL:2 * D_MODEL], prefix, bias_name)

        enc_in = data_ref[0:M_enc, 0:ENC_INP_SIZE]
        dec_in = data_ref[ROW_DEC:ROW_DEC + M_dec, 0:DEC_INP_SIZE]
        obs_rep = data_ref[ROW_OBS:ROW_OBS + M_dec, 0:2]
        mean_row = data_ref[ROW_MS:ROW_MS + 1, 0:2]
        std_row = data_ref[ROW_MS + 1:ROW_MS + 2, 0:2]

        # ----- encoder -----
        x = (jnp.dot(enc_in, P('enc_embed_w'), preferred_element_type=jnp.float32)
             + P('enc_embed_b') + P('pe_enc'))
        for l in range(N_LAYERS):
            pre = f'enc{l}'
            x = x + self_attn(layer_norm(x, pre + '_ln1'), pre + '_sa', 'enc_bias')
            x = x + feed_forward(layer_norm(x, pre + '_ln2'), pre + '_ff')
        memory = layer_norm(x, 'enc_norm')

        # ----- decoder -----
        x = (jnp.dot(dec_in, P('dec_embed_w'), preferred_element_type=jnp.float32)
             + P('dec_embed_b') + P('pe_dec'))
        for l in range(N_LAYERS):
            pre = f'dec{l}'
            x = x + self_attn(layer_norm(x, pre + '_ln1'), pre + '_sa', 'dec_bias')
            x = x + cross_attn(layer_norm(x, pre + '_ln2'), memory, pre + '_ca', 'x_bias')
            x = x + feed_forward(layer_norm(x, pre + '_ln3'), pre + '_ff')
        x = layer_norm(x, 'dec_norm')

        # ----- generator + de-normalize + per-batch cumsum + last observed pos -----
        out_vel = (jnp.dot(x, P('gen_w'), preferred_element_type=jnp.float32)
                   + P('gen_b'))                                  # [M_dec, 3]
        vel = out_vel[:, 0:2] * std_row + mean_row                # [M_dec, 2]
        pred = jnp.dot(P('csum'), vel, preferred_element_type=jnp.float32) + obs_rep

        # single lane-dense store: pred -> cols 0:2, out_vel -> cols 2:5
        out_ref[...] = jnp.concatenate(
            [pred, out_vel, jnp.zeros((M_dec, 128 - 5), jnp.float32)], axis=1)

    fused_call = pl.pallas_call(
        kernel,
        out_shape=jax.ShapeDtypeStruct((M_dec, 128), jnp.float32),
        # Grid-less: every operand is a full-array VMEM block; one DMA per operand.
    )

    def forward(slab, obs, obs_vel, pred_vel, mean, std):
        mean2 = jnp.asarray(mean, jnp.float32).reshape(1, 2)
        std2 = jnp.asarray(std, jnp.float32).reshape(1, 2)

        inp = (obs_vel - mean2) / std2                                    # [B,To,2]
        tgt = (pred_vel - mean2) / std2                                   # [B,Tp,2]
        tgt = jnp.concatenate([tgt, jnp.zeros((B, Tp, 1), jnp.float32)], axis=-1)
        sos = jnp.tile(jnp.array([[[0.0, 0.0, 1.0]]], jnp.float32), (B, 1, 1))
        dec = jnp.concatenate([sos, tgt], axis=1).reshape(M_dec, DEC_INP_SIZE)
        enc = inp.reshape(M_enc, ENC_INP_SIZE)
        obs_last = jnp.repeat(obs[:, -1, :], T, axis=0)                   # [M_dec,2]
        ms = jnp.concatenate([mean2, std2], axis=0)                       # [2,2]

        def pad(x):                       # pad each piece to [8k, 128]
            r, c = x.shape
            return jnp.pad(x, ((0, (-r) % 8), (0, 128 - c)))

        data = jnp.concatenate([pad(enc), pad(dec), pad(obs_last), pad(ms)], axis=0)

        out = fused_call(data, slab)                                      # [M_dec,128]
        pred = out[:, 0:2].reshape(B, T, 2)
        out_vel = out[:, 2:5].reshape(B, T, DEC_OUT_SIZE)
        return pred, out_vel

    return forward


# ------------------------------- parameter init ------------------------------

class _KeyGen:
    def __init__(self, key):
        self._key = key

    def __call__(self):
        self._key, sub = jax.random.split(self._key)
        return sub


def _xavier(kg, din, dout):
    bound = math.sqrt(6.0 / (din + dout))
    return jax.random.uniform(kg(), (din, dout), jnp.float32, -bound, bound)


def _init_linear(kg, din, dout):
    return {'w': _xavier(kg, din, dout), 'b': jnp.zeros((1, dout), jnp.float32)}


def _init_self_attn(kg, d):
    wq, wk, wv, wo = (_xavier(kg, d, d) for _ in range(4))
    return {'wqkv': jnp.concatenate([wq, wk, wv], axis=1),
            'bqkv': jnp.zeros((1, 3 * d), jnp.float32),
            'wo': wo, 'bo': jnp.zeros((1, d), jnp.float32)}


def _init_cross_attn(kg, d):
    wq, wk, wv, wo = (_xavier(kg, d, d) for _ in range(4))
    return {'wq': wq, 'bq': jnp.zeros((1, d), jnp.float32),
            'wkv': jnp.concatenate([wk, wv], axis=1),
            'bkv': jnp.zeros((1, 2 * d), jnp.float32),
            'wo': wo, 'bo': jnp.zeros((1, d), jnp.float32)}


def _init_ff(kg, d, dff):
    return {'w1': _xavier(kg, d, dff), 'b1': jnp.zeros((1, dff), jnp.float32),
            'w2': _xavier(kg, dff, d), 'b2': jnp.zeros((1, d), jnp.float32)}


def _init_ln(d):
    return {'g': jnp.ones((1, d), jnp.float32), 'b': jnp.zeros((1, d), jnp.float32)}


def init_params(key):
    kg = _KeyGen(key)
    enc_layers = [{'attn': _init_self_attn(kg, D_MODEL),
                   'ff': _init_ff(kg, D_MODEL, D_FF),
                   'ln1': _init_ln(D_MODEL), 'ln2': _init_ln(D_MODEL)}
                  for _ in range(N_LAYERS)]
    dec_layers = [{'self_attn': _init_self_attn(kg, D_MODEL),
                   'src_attn': _init_cross_attn(kg, D_MODEL),
                   'ff': _init_ff(kg, D_MODEL, D_FF),
                   'ln1': _init_ln(D_MODEL), 'ln2': _init_ln(D_MODEL),
                   'ln3': _init_ln(D_MODEL)}
                  for _ in range(N_LAYERS)]
    return {
        'enc_embed': _init_linear(kg, ENC_INP_SIZE, D_MODEL),
        'dec_embed': _init_linear(kg, DEC_INP_SIZE, D_MODEL),
        'encoder': {'layers': enc_layers, 'norm': _init_ln(D_MODEL)},
        'decoder': {'layers': dec_layers, 'norm': _init_ln(D_MODEL)},
        'generator': _init_linear(kg, D_MODEL, DEC_OUT_SIZE),
    }


# ------------------------------------ main -----------------------------------

if __name__ == "__main__":
    B, OBS_LEN, PRED_LEN = 2, 8, 8

    root = jax.random.PRNGKey(0)
    k_params, k_obs, k_ov, k_pv = jax.random.split(root, 4)

    params = init_params(k_params)
    pe = positional_encoding(64, D_MODEL)
    slab, layout = pack_params(params, pe, B, OBS_LEN, PRED_LEN)

    forward = make_forward(layout, B, OBS_LEN, PRED_LEN)
    fwd = jax.jit(forward)

    obs = jax.random.normal(k_obs, (B, OBS_LEN, 2), jnp.float32)       # positions
    obs_vel = jax.random.normal(k_ov, (B, OBS_LEN, 2), jnp.float32)    # observed vel
    pred_vel = jax.random.normal(k_pv, (B, PRED_LEN, 2), jnp.float32)  # target vel
    mean = jnp.zeros((2,), jnp.float32)
    std = jnp.ones((2,), jnp.float32)

    pred, out_velocity = fwd(slab, obs, obs_vel, pred_vel, mean, std)
    jax.block_until_ready((pred, out_velocity))

    assert pred.shape == (B, PRED_LEN + 1, 2)
    assert out_velocity.shape == (B, PRED_LEN + 1, DEC_OUT_SIZE)
    assert bool(jnp.all(jnp.isfinite(pred))) and bool(jnp.all(jnp.isfinite(out_velocity)))
    print("KERNEL_OK")
</pallas_src>

<mosaic_0001>
module attributes {stable_mosaic.version = 11 : i64} {
  func.func @kernel(%arg0: memref<72x128xf32, #tpu.memory_space<vmem>>, %arg1: memref<1400x128xf32, #tpu.memory_space<vmem>>, %arg2: memref<18x128xf32, #tpu.memory_space<vmem>>) attributes {dimension_semantics = [], scalar_prefetch = 0 : i64, scratch_operands = 0 : i64, tpu.core_type = #tpu.core_type<tc>} {
    %c0 = arith.constant 0 : index
    %c0_0 = arith.constant 0 : index
    %0 = vector.load %arg0[%c0, %c0_0] : memref<72x128xf32, #tpu.memory_space<vmem>>, vector<16x2xf32>
    %c16 = arith.constant 16 : index
    %c0_1 = arith.constant 0 : index
    %1 = vector.load %arg0[%c16, %c0_1] : memref<72x128xf32, #tpu.memory_space<vmem>>, vector<18x3xf32>
    %c40 = arith.constant 40 : index
    %c0_2 = arith.constant 0 : index
    %2 = vector.load %arg0[%c40, %c0_2] : memref<72x128xf32, #tpu.memory_space<vmem>>, vector<18x2xf32>
    %c64 = arith.constant 64 : index
    %c0_3 = arith.constant 0 : index
    %3 = vector.load %arg0[%c64, %c0_3] : memref<72x128xf32, #tpu.memory_space<vmem>>, vector<1x2xf32>
    %c65 = arith.constant 65 : index
    %c0_4 = arith.constant 0 : index
    %4 = vector.load %arg0[%c65, %c0_4] : memref<72x128xf32, #tpu.memory_space<vmem>>, vector<1x2xf32>
    %c0_5 = arith.constant 0 : index
    %c0_6 = arith.constant 0 : index
    %5 = vector.load %arg1[%c0_5, %c0_6] : memref<1400x128xf32, #tpu.memory_space<vmem>>, vector<2x32xf32>
    %cst = arith.constant dense<0.000000e+00> : vector<16x32xf32>
    %6 = tpu.matmul %0, %5, %cst {dimension_numbers = #tpu.dot_dimension_numbers<[1], [0], [0], [1], [0, 0, 1, 1], [], []>} : vector<16x2xf32>, vector<2x32xf32>, vector<16x32xf32> -> vector<16x32xf32>
    %c8 = arith.constant 8 : index
    %c0_7 = arith.constant 0 : index
    %7 = vector.load %arg1[%c8, %c0_7] : memref<1400x128xf32, #tpu.memory_space<vmem>>, vector<1x32xf32>
    %8 = vector.broadcast %7 : vector<1x32xf32> to vector<16x32xf32>
    %9 = arith.addf %6, %8 : vector<16x32xf32>
    %c1272 = arith.constant 1272 : index
    %c0_8 = arith.constant 0 : index
    %10 = vector.load %arg1[%c1272, %c0_8] : memref<1400x128xf32, #tpu.memory_space<vmem>>, vector<16x32xf32>
    %11 = arith.addf %9, %10 : vector<16x32xf32>
    %cst_9 = arith.constant dense<0.000000e+00> : vector<16xf32>
    %12 = vector.multi_reduction <add>, %11, %cst_9 [1] : vector<16x32xf32> to vector<16xf32>
    %13 = vector.shape_cast %12 : vector<16xf32> to vector<16x1xf32>
    %cst_10 = arith.constant 3.200000e+01 : f32
    %14 = vector.broadcast %cst_10 : f32 to vector<16x1xf32>
    %15 = arith.divf %13, %14 : vector<16x1xf32>
    %16 = vector.broadcast %15 : vector<16x1xf32> to vector<16x32xf32>
    %17 = arith.subf %11, %16 : vector<16x32xf32>
    %18 = arith.mulf %17, %17 : vector<16x32xf32>
    %cst_11 = arith.constant dense<0.000000e+00> : vector<16xf32>
    %19 = vector.multi_reduction <add>, %18, %cst_11 [1] : vector<16x32xf32> to vector<16xf32>
    %20 = vector.shape_cast %19 : vector<16xf32> to vector<16x1xf32>
    %cst_12 = arith.constant 0.0322580636 : f32
    %21 = vector.broadcast %cst_12 : f32 to vector<16x1xf32>
    %22 = arith.mulf %20, %21 : vector<16x1xf32>
    %23 = math.sqrt %22 : vector<16x1xf32>
    %cst_13 = arith.constant 9.99999997E-7 : f32
    %24 = vector.broadcast %cst_13 : f32 to vector<16x1xf32>
    %25 = arith.addf %23, %24 : vector<16x1xf32>
    %26 = tpu.reciprocal %25 {approx = true} : vector<16x1xf32> -> vector<16x1xf32>
    %c32 = arith.constant 32 : index
    %c0_14 = arith.constant 0 : index
    %27 = vector.load %arg1[%c32, %c0_14] : memref<1400x128xf32, #tpu.memory_space<vmem>>, vector<1x32xf32>
    %28 = vector.broadcast %15 : vector<16x1xf32> to vector<16x32xf32>
    %29 = arith.subf %11, %28 : vector<16x32xf32>
    %30 = vector.broadcast %27 : vector<1x32xf32> to vector<16x32xf32>
    %31 = arith.mulf %30, %29 : vector<16x32xf32>
    %32 = vector.broadcast %26 : vector<16x1xf32> to vector<16x32xf32>
    %33 = arith.mulf %31, %32 : vector<16x32xf32>
    %c40_15 = arith.constant 40 : index
    %c0_16 = arith.constant 0 : index
    %34 = vector.load %arg1[%c40_15, %c0_16] : memref<1400x128xf32, #tpu.memory_space<vmem>>, vector<1x32xf32>
    %35 = vector.broadcast %34 : vector<1x32xf32> to vector<16x32xf32>
    %36 = arith.addf %33, %35 : vector<16x32xf32>
    %c48 = arith.constant 48 : index
    %c0_17 = arith.constant 0 : index
    %37 = vector.load %arg1[%c48, %c0_17] : memref<1400x128xf32, #tpu.memory_space<vmem>>, vector<32x96xf32>
    %cst_18 = arith.constant dense<0.000000e+00> : vector<16x96xf32>
    %38 = tpu.matmul %36, %37, %cst_18 {dimension_numbers = #tpu.dot_dimension_numbers<[1], [0], [0], [1], [0, 0, 1, 1], [], []>} : vector<16x32xf32>, vector<32x96xf32>, vector<16x96xf32> -> vector<16x96xf32>
    %c80 = arith.constant 80 : index
    %c0_19 = arith.constant 0 : index
    %39 = vector.load %arg1[%c80, %c0_19] : memref<1400x128xf32, #tpu.memory_space<vmem>>, vector<1x96xf32>
    %40 = vector.broadcast %39 : vector<1x96xf32> to vector<16x96xf32>
    %41 = arith.addf %38, %40 : vector<16x96xf32>
    %42 = vector.extract_strided_slice %41 {offsets = [0, 0], sizes = [16, 32], strides = [1, 1]} : vector<16x96xf32> to vector<16x32xf32>
    %43 = vector.extract_strided_slice %41 {offsets = [0, 32], sizes = [16, 32], strides = [1, 1]} : vector<16x96xf32> to vector<16x32xf32>
    %44 = vector.extract_strided_slice %41 {offsets = [0, 64], sizes = [16, 32], strides = [1, 1]} : vector<16x96xf32> to vector<16x32xf32>
    %45 = vector.extract_strided_slice %42 {offsets = [0, 0], sizes = [16, 8], strides = [1, 1]} : vector<16x32xf32> to vector<16x8xf32>
    %46 = vector.extract_strided_slice %43 {offsets = [0, 0], sizes = [16, 8], strides = [1, 1]} : vector<16x32xf32> to vector<16x8xf32>
    %cst_20 = arith.constant dense<0.000000e+00> : vector<16x16xf32>
    %47 = tpu.matmul %45, %46, %cst_20 {dimension_numbers = #tpu.dot_dimension_numbers<[1], [1], [0], [0], [0, 0, 1, 0], [], []>} : vector<16x8xf32>, vector<16x8xf32>, vector<16x16xf32> -> vector<16x16xf32>
    %48 = vector.extract_strided_slice %42 {offsets = [0, 8], sizes = [16, 8], strides = [1, 1]} : vector<16x32xf32> to vector<16x8xf32>
    %49 = vector.extract_strided_slice %43 {offsets = [0, 8], sizes = [16, 8], strides = [1, 1]} : vector<16x32xf32> to vector<16x8xf32>
    %cst_21 = arith.constant dense<0.000000e+00> : vector<16x16xf32>
    %50 = tpu.matmul %48, %49, %cst_21 {dimension_numbers = #tpu.dot_dimension_numbers<[1], [1], [0], [0], [0, 0, 1, 0], [], []>} : vector<16x8xf32>, vector<16x8xf32>, vector<16x16xf32> -> vector<16x16xf32>
    %51 = vector.extract_strided_slice %42 {offsets = [0, 16], sizes = [16, 8], strides = [1, 1]} : vector<16x32xf32> to vector<16x8xf32>
    %52 = vector.extract_strided_slice %43 {offsets = [0, 16], sizes = [16, 8], strides = [1, 1]} : vector<16x32xf32> to vector<16x8xf32>
    %cst_22 = arith.constant dense<0.000000e+00> : vector<16x16xf32>
    %53 = tpu.matmul %51, %52, %cst_22 {dimension_numbers = #tpu.dot_dimension_numbers<[1], [1], [0], [0], [0, 0, 1, 0], [], []>} : vector<16x8xf32>, vector<16x8xf32>, vector<16x16xf32> -> vector<16x16xf32>
    %54 = vector.extract_strided_slice %42 {offsets = [0, 24], sizes = [16, 8], strides = [1, 1]} : vector<16x32xf32> to vector<16x8xf32>
    %55 = vector.extract_strided_slice %43 {offsets = [0, 24], sizes = [16, 8], strides = [1, 1]} : vector<16x32xf32> to vector<16x8xf32>
    %cst_23 = arith.constant dense<0.000000e+00> : vector<16x16xf32>
    %56 = tpu.matmul %54, %55, %cst_23 {dimension_numbers = #tpu.dot_dimension_numbers<[1], [1], [0], [0], [0, 0, 1, 0], [], []>} : vector<16x8xf32>, vector<16x8xf32>, vector<16x16xf32> -> vector<16x16xf32>
    %57 = tpu.concatenate %47, %50, %53, %56 in 1 : vector<16x16xf32>, vector<16x16xf32>, vector<16x16xf32>, vector<16x16xf32> -> vector<16x64xf32>
    %c1312 = arith.constant 1312 : index
    %c0_24 = arith.constant 0 : index
    %58 = vector.load %arg1[%c1312, %c0_24] : memref<1400x128xf32, #tpu.memory_space<vmem>>, vector<16x64xf32>
    %59 = arith.addf %57, %58 : vector<16x64xf32>
    %cst_25 = arith.constant dense<0xFF800000> : vector<16xf32>
    %60 = vector.multi_reduction <maximumf>, %59, %cst_25 [1] : vector<16x64xf32> to vector<16xf32>
    %61 = vector.shape_cast %60 : vector<16xf32> to vector<16x1xf32>
    %62 = vector.broadcast %61 : vector<16x1xf32> to vector<16x64xf32>
    %63 = arith.subf %59, %62 : vector<16x64xf32>
    %64 = math.exp %63 : vector<16x64xf32>
    %65 = vector.extract_strided_slice %64 {offsets = [0, 0], sizes = [16, 16], strides = [1, 1]} : vector<16x64xf32> to vector<16x16xf32>
    %cst_26 = arith.constant dense<0.000000e+00> : vector<16xf32>
    %66 = vector.multi_reduction <add>, %65, %cst_26 [1] : vector<16x16xf32> to vector<16xf32>
    %67 = vector.shape_cast %66 : vector<16xf32> to vector<16x1xf32>
    %68 = tpu.reciprocal %67 {approx = true} : vector<16x1xf32> -> vector<16x1xf32>
    %69 = vector.extract_strided_slice %44 {offsets = [0, 0], sizes = [16, 8], strides = [1, 1]} : vector<16x32xf32> to vector<16x8xf32>
    %cst_27 = arith.constant dense<0.000000e+00> : vector<16x8xf32>
    %70 = tpu.matmul %65, %69, %cst_27 {dimension_numbers = #tpu.dot_dimension_numbers<[1], [0], [0], [1], [0, 0, 1, 1], [], []>} : vector<16x16xf32>, vector<16x8xf32>, vector<16x8xf32> -> vector<16x8xf32>
    %71 = vector.broadcast %68 : vector<16x1xf32> to vector<16x8xf32>
    %72 = arith.mulf %70, %71 : vector<16x8xf32>
    %73 = vector.extract_strided_slice %64 {offsets = [0, 16], sizes = [16, 16], strides = [1, 1]} : vector<16x64xf32> to vector<16x16xf32>
    %cst_28 = arith.constant dense<0.000000e+00> : vector<16xf32>
    %74 = vector.multi_reduction <add>, %73, %cst_28 [1] : vector<16x16xf32> to vector<16xf32>
    %75 = vector.shape_cast %74 : vector<16xf32> to vector<16x1xf32>
    %76 = tpu.reciprocal %75 {approx = true} : vector<16x1xf32> -> vector<16x1xf32>
    %77 = vector.extract_strided_slice %44 {offsets = [0, 8], sizes = [16, 8], strides = [1, 1]} : vector<16x32xf32> to vector<16x8xf32>
    %cst_29 = arith.constant dense<0.000000e+00> : vector<16x8xf32>
    %78 = tpu.matmul %73, %77, %cst_29 {dimension_numbers = #tpu.dot_dimension_numbers<[1], [0], [0], [1], [0, 0, 1, 1], [], []>} : vector<16x16xf32>, vector<16x8xf32>, vector<16x8xf32> -> vector<16x8xf32>
    %79 = vector.broadcast %76 : vector<16x1xf32> to vector<16x8xf32>
    %80 = arith.mulf %78, %79 : vector<16x8xf32>
    %81 = vector.extract_strided_slice %64 {offsets = [0, 32], sizes = [16, 16], strides = [1, 1]} : vector<16x64xf32> to vector<16x16xf32>
    %cst_30 = arith.constant dense<0.000000e+00> : vector<16xf32>
    %82 = vector.multi_reduction <add>, %81, %cst_30 [1] : vector<16x16xf32> to vector<16xf32>
    %83 = vector.shape_cast %82 : vector<16xf32> to vector<16x1xf32>
    %84 = tpu.reciprocal %83 {approx = true} : vector<16x1xf32> -> vector<16x1xf32>
    %85 = vector.extract_strided_slice %44 {offsets = [0, 16], sizes = [16, 8], strides = [1, 1]} : vector<16x32xf32> to vector<16x8xf32>
    %cst_31 = arith.constant dense<0.000000e+00> : vector<16x8xf32>
    %86 = tpu.matmul %81, %85, %cst_31 {dimension_numbers = #tpu.dot_dimension_numbers<[1], [0], [0], [1], [0, 0, 1, 1], [], []>} : vector<16x16xf32>, vector<16x8xf32>, vector<16x8xf32> -> vector<16x8xf32>
    %87 = vector.broadcast %84 : vector<16x1xf32> to vector<16x8xf32>
    %88 = arith.mulf %86, %87 : vector<16x8xf32>
    %89 = vector.extract_strided_slice %64 {offsets = [0, 48], sizes = [16, 16], strides = [1, 1]} : vector<16x64xf32> to vector<16x16xf32>
    %cst_32 = arith.constant dense<0.000000e+00> : vector<16xf32>
    %90 = vector.multi_reduction <add>, %89, %cst_32 [1] : vector<16x16xf32> to vector<16xf32>
    %91 = vector.shape_cast %90 : vector<16xf32> to vector<16x1xf32>
    %92 = tpu.reciprocal %91 {approx = true} : vector<16x1xf32> -> vector<16x1xf32>
    %93 = vector.extract_strided_slice %44 {offsets = [0, 24], sizes = [16, 8], strides = [1, 1]} : vector<16x32xf32> to vector<16x8xf32>
    %cst_33 = arith.constant dense<0.000000e+00> : vector<16x8xf32>
    %94 = tpu.matmul %89, %93, %cst_33 {dimension_numbers = #tpu.dot_dimension_numbers<[1], [0], [0], [1], [0, 0, 1, 1], [], []>} : vector<16x16xf32>, vector<16x8xf32>, vector<16x8xf32> -> vector<16x8xf32>
    %95 = vector.broadcast %92 : vector<16x1xf32> to vector<16x8xf32>
    %96 = arith.mulf %94, %95 : vector<16x8xf32>
    %97 = tpu.concatenate %72, %80, %88, %96 in 1 : vector<16x8xf32>, vector<16x8xf32>, vector<16x8xf32>, vector<16x8xf32> -> vector<16x32xf32>
    %c88 = arith.constant 88 : index
    %c0_34 = arith.constant 0 : index
    %98 = vector.load %arg1[%c88, %c0_34] : memref<1400x128xf32, #tpu.memory_space<vmem>>, vector<32x32xf32>
    %cst_35 = arith.constant dense<0.000000e+00> : vector<16x32xf32>
    %99 = tpu.matmul %97, %98, %cst_35 {dimension_numbers = #tpu.dot_dimension_numbers<[1], [0], [0], [1], [0, 0, 1, 1], [], []>} : vector<16x32xf32>, vector<32x32xf32>, vector<16x32xf32> -> vector<16x32xf32>
    %c120 = arith.constant 120 : index
    %c0_36 = arith.constant 0 : index
    %100 = vector.load %arg1[%c120, %c0_36] : memref<1400x128xf32, #tpu.memory_space<vmem>>, vector<1x32xf32>
    %101 = vector.broadcast %100 : vector<1x32xf32> to vector<16x32xf32>
    %102 = arith.addf %99, %101 : vector<16x32xf32>
    %103 = arith.addf %11, %102 : vector<16x32xf32>
    %cst_37 = arith.constant dense<0.000000e+00> : vector<16xf32>
    %104 = vector.multi_reduction <add>, %103, %cst_37 [1] : vector<16x32xf32> to vector<16xf32>
    %105 = vector.shape_cast %104 : vector<16xf32> to vector<16x1xf32>
    %cst_38 = arith.constant 3.200000e+01 : f32
    %106 = vector.broadcast %cst_38 : f32 to vector<16x1xf32>
    %107 = arith.divf %105, %106 : vector<16x1xf32>
    %108 = vector.broadcast %107 : vector<16x1xf32> to vector<16x32xf32>
    %109 = arith.subf %103, %108 : vector<16x32xf32>
    %110 = arith.mulf %109, %109 : vector<16x32xf32>
    %cst_39 = arith.constant dense<0.000000e+00> : vector<16xf32>
    %111 = vector.multi_reduction <add>, %110, %cst_39 [1] : vector<16x32xf32> to vector<16xf32>
    %112 = vector.shape_cast %111 : vector<16xf32> to vector<16x1xf32>
    %cst_40 = arith.constant 0.0322580636 : f32
    %113 = vector.broadcast %cst_40 : f32 to vector<16x1xf32>
    %114 = arith.mulf %112, %113 : vector<16x1xf32>
    %115 = math.sqrt %114 : vector<16x1xf32>
    %cst_41 = arith.constant 9.99999997E-7 : f32
    %116 = vector.broadcast %cst_41 : f32 to vector<16x1xf32>
    %117 = arith.addf %115, %116 : vector<16x1xf32>
    %118 = tpu.reciprocal %117 {approx = true} : vector<16x1xf32> -> vector<16x1xf32>
    %c128 = arith.constant 128 : index
    %c0_42 = arith.constant 0 : index
    %119 = vector.load %arg1[%c128, %c0_42] : memref<1400x128xf32, #tpu.memory_space<vmem>>, vector<1x32xf32>
    %120 = vector.broadcast %107 : vector<16x1xf32> to vector<16x32xf32>
    %121 = arith.subf %103, %120 : vector<16x32xf32>
    %122 = vector.broadcast %119 : vector<1x32xf32> to vector<16x32xf32>
    %123 = arith.mulf %122, %121 : vector<16x32xf32>
    %124 = vector.broadcast %118 : vector<16x1xf32> to vector<16x32xf32>
    %125 = arith.mulf %123, %124 : vector<16x32xf32>
    %c136 = arith.constant 136 : index
    %c0_43 = arith.constant 0 : index
    %126 = vector.load %arg1[%c136, %c0_43] : memref<1400x128xf32, #tpu.memory_space<vmem>>, vector<1x32xf32>
    %127 = vector.broadcast %126 : vector<1x32xf32> to vector<16x32xf32>
    %128 = arith.addf %125, %127 : vector<16x32xf32>
    %c144 = arith.constant 144 : index
    %c0_44 = arith.constant 0 : index
    %129 = vector.load %arg1[%c144, %c0_44] : memref<1400x128xf32, #tpu.memory_space<vmem>>, vector<32x64xf32>
    %cst_45 = arith.constant dense<0.000000e+00> : vector<16x64xf32>
    %130 = tpu.matmul %128, %129, %cst_45 {dimension_numbers = #tpu.dot_dimension_numbers<[1], [0], [0], [1], [0, 0, 1, 1], [], []>} : vector<16x32xf32>, vector<32x64xf32>, vector<16x64xf32> -> vector<16x64xf32>
    %c176 = arith.constant 176 : index
    %c0_46 = arith.constant 0 : index
    %131 = vector.load %arg1[%c176, %c0_46] : memref<1400x128xf32, #tpu.memory_space<vmem>>, vector<1x64xf32>
    %132 = vector.broadcast %131 : vector<1x64xf32> to vector<16x64xf32>
    %133 = arith.addf %130, %132 : vector<16x64xf32>
    %cst_47 = arith.constant 0.000000e+00 : f32
    %134 = vector.broadcast %cst_47 : f32 to vector<16x64xf32>
    %135 = arith.maximumf %133, %134 : vector<16x64xf32>
    %c184 = arith.constant 184 : index
    %c0_48 = arith.constant 0 : index
    %136 = vector.load %arg1[%c184, %c0_48] : memref<1400x128xf32, #tpu.memory_space<vmem>>, vector<64x32xf32>
    %cst_49 = arith.constant dense<0.000000e+00> : vector<16x32xf32>
    %137 = tpu.matmul %135, %136, %cst_49 {dimension_numbers = #tpu.dot_dimension_numbers<[1], [0], [0], [1], [0, 0, 1, 1], [], []>} : vector<16x64xf32>, vector<64x32xf32>, vector<16x32xf32> -> vector<16x32xf32>
    %c248 = arith.constant 248 : index
    %c0_50 = arith.constant 0 : index
    %138 = vector.load %arg1[%c248, %c0_50] : memref<1400x128xf32, #tpu.memory_space<vmem>>, vector<1x32xf32>
    %139 = vector.broadcast %138 : vector<1x32xf32> to vector<16x32xf32>
    %140 = arith.addf %137, %139 : vector<16x32xf32>
    %141 = arith.addf %103, %140 : vector<16x32xf32>
    %cst_51 = arith.constant dense<0.000000e+00> : vector<16xf32>
    %142 = vector.multi_reduction <add>, %141, %cst_51 [1] : vector<16x32xf32> to vector<16xf32>
    %143 = vector.shape_cast %142 : vector<16xf32> to vector<16x1xf32>
    %cst_52 = arith.constant 3.200000e+01 : f32
    %144 = vector.broadcast %cst_52 : f32 to vector<16x1xf32>
    %145 = arith.divf %143, %144 : vector<16x1xf32>
    %146 = vector.broadcast %145 : vector<16x1xf32> to vector<16x32xf32>
    %147 = arith.subf %141, %146 : vector<16x32xf32>
    %148 = arith.mulf %147, %147 : vector<16x32xf32>
    %cst_53 = arith.constant dense<0.000000e+00> : vector<16xf32>
    %149 = vector.multi_reduction <add>, %148, %cst_53 [1] : vector<16x32xf32> to vector<16xf32>
    %150 = vector.shape_cast %149 : vector<16xf32> to vector<16x1xf32>
    %cst_54 = arith.constant 0.0322580636 : f32
    %151 = vector.broadcast %cst_54 : f32 to vector<16x1xf32>
    %152 = arith.mulf %150, %151 : vector<16x1xf32>
    %153 = math.sqrt %152 : vector<16x1xf32>
    %cst_55 = arith.constant 9.99999997E-7 : f32
    %154 = vector.broadcast %cst_55 : f32 to vector<16x1xf32>
    %155 = arith.addf %153, %154 : vector<16x1xf32>
    %156 = tpu.reciprocal %155 {approx = true} : vector<16x1xf32> -> vector<16x1xf32>
    %c256 = arith.constant 256 : index
    %c0_56 = arith.constant 0 : index
    %157 = vector.load %arg1[%c256, %c0_56] : memref<1400x128xf32, #tpu.memory_space<vmem>>, vector<1x32xf32>
    %158 = vector.broadcast %145 : vector<16x1xf32> to vector<16x32xf32>
    %159 = arith.subf %141, %158 : vector<16x32xf32>
    %160 = vector.broadcast %157 : vector<1x32xf32> to vector<16x32xf32>
    %161 = arith.mulf %160, %159 : vector<16x32xf32>
    %162 = vector.broadcast %156 : vector<16x1xf32> to vector<16x32xf32>
    %163 = arith.mulf %161, %162 : vector<16x32xf32>
    %c264 = arith.constant 264 : index
    %c0_57 = arith.constant 0 : index
    %164 = vector.load %arg1[%c264, %c0_57] : memref<1400x128xf32, #tpu.memory_space<vmem>>, vector<1x32xf32>
    %165 = vector.broadcast %164 : vector<1x32xf32> to vector<16x32xf32>
    %166 = arith.addf %163, %165 : vector<16x32xf32>
    %c272 = arith.constant 272 : index
    %c0_58 = arith.constant 0 : index
    %167 = vector.load %arg1[%c272, %c0_58] : memref<1400x128xf32, #tpu.memory_space<vmem>>, vector<32x96xf32>
    %cst_59 = arith.constant dense<0.000000e+00> : vector<16x96xf32>
    %168 = tpu.matmul %166, %167, %cst_59 {dimension_numbers = #tpu.dot_dimension_numbers<[1], [0], [0], [1], [0, 0, 1, 1], [], []>} : vector<16x32xf32>, vector<32x96xf32>, vector<16x96xf32> -> vector<16x96xf32>
    %c304 = arith.constant 304 : index
    %c0_60 = arith.constant 0 : index
    %169 = vector.load %arg1[%c304, %c0_60] : memref<1400x128xf32, #tpu.memory_space<vmem>>, vector<1x96xf32>
    %170 = vector.broadcast %169 : vector<1x96xf32> to vector<16x96xf32>
    %171 = arith.addf %168, %170 : vector<16x96xf32>
    %172 = vector.extract_strided_slice %171 {offsets = [0, 0], sizes = [16, 32], strides = [1, 1]} : vector<16x96xf32> to vector<16x32xf32>
    %173 = vector.extract_strided_slice %171 {offsets = [0, 32], sizes = [16, 32], strides = [1, 1]} : vector<16x96xf32> to vector<16x32xf32>
    %174 = vector.extract_strided_slice %171 {offsets = [0, 64], sizes = [16, 32], strides = [1, 1]} : vector<16x96xf32> to vector<16x32xf32>
    %175 = vector.extract_strided_slice %172 {offsets = [0, 0], sizes = [16, 8], strides = [1, 1]} : vector<16x32xf32> to vector<16x8xf32>
    %176 = vector.extract_strided_slice %173 {offsets = [0, 0], sizes = [16, 8], strides = [1, 1]} : vector<16x32xf32> to vector<16x8xf32>
    %cst_61 = arith.constant dense<0.000000e+00> : vector<16x16xf32>
    %177 = tpu.matmul %175, %176, %cst_61 {dimension_numbers = #tpu.dot_dimension_numbers<[1], [1], [0], [0], [0, 0, 1, 0], [], []>} : vector<16x8xf32>, vector<16x8xf32>, vector<16x16xf32> -> vector<16x16xf32>
    %178 = vector.extract_strided_slice %172 {offsets = [0, 8], sizes = [16, 8], strides = [1, 1]} : vector<16x32xf32> to vector<16x8xf32>
    %179 = vector.extract_strided_slice %173 {offsets = [0, 8], sizes = [16, 8], strides = [1, 1]} : vector<16x32xf32> to vector<16x8xf32>
    %cst_62 = arith.constant dense<0.000000e+00> : vector<16x16xf32>
    %180 = tpu.matmul %178, %179, %cst_62 {dimension_numbers = #tpu.dot_dimension_numbers<[1], [1], [0], [0], [0, 0, 1, 0], [], []>} : vector<16x8xf32>, vector<16x8xf32>, vector<16x16xf32> -> vector<16x16xf32>
    %181 = vector.extract_strided_slice %172 {offsets = [0, 16], sizes = [16, 8], strides = [1, 1]} : vector<16x32xf32> to vector<16x8xf32>
    %182 = vector.extract_strided_slice %173 {offsets = [0, 16], sizes = [16, 8], strides = [1, 1]} : vector<16x32xf32> to vector<16x8xf32>
    %cst_63 = arith.constant dense<0.000000e+00> : vector<16x16xf32>
    %183 = tpu.matmul %181, %182, %cst_63 {dimension_numbers = #tpu.dot_dimension_numbers<[1], [1], [0], [0], [0, 0, 1, 0], [], []>} : vector<16x8xf32>, vector<16x8xf32>, vector<16x16xf32> -> vector<16x16xf32>
    %184 = vector.extract_strided_slice %172 {offsets = [0, 24], sizes = [16, 8], strides = [1, 1]} : vector<16x32xf32> to vector<16x8xf32>
    %185 = vector.extract_strided_slice %173 {offsets = [0, 24], sizes = [16, 8], strides = [1, 1]} : vector<16x32xf32> to vector<16x8xf32>
    %cst_64 = arith.constant dense<0.000000e+00> : vector<16x16xf32>
    %186 = tpu.matmul %184, %185, %cst_64 {dimension_numbers = #tpu.dot_dimension_numbers<[1], [1], [0], [0], [0, 0, 1, 0], [], []>} : vector<16x8xf32>, vector<16x8xf32>, vector<16x16xf32> -> vector<16x16xf32>
    %187 = tpu.concatenate %177, %180, %183, %186 in 1 : vector<16x16xf32>, vector<16x16xf32>, vector<16x16xf32>, vector<16x16xf32> -> vector<16x64xf32>
    %c1312_65 = arith.constant 1312 : index
    %c0_66 = arith.constant 0 : index
    %188 = vector.load %arg1[%c1312_65, %c0_66] : memref<1400x128xf32, #tpu.memory_space<vmem>>, vector<16x64xf32>
    %189 = arith.addf %187, %188 : vector<16x64xf32>
    %cst_67 = arith.constant dense<0xFF800000> : vector<16xf32>
    %190 = vector.multi_reduction <maximumf>, %189, %cst_67 [1] : vector<16x64xf32> to vector<16xf32>
    %191 = vector.shape_cast %190 : vector<16xf32> to vector<16x1xf32>
    %192 = vector.broadcast %191 : vector<16x1xf32> to vector<16x64xf32>
    %193 = arith.subf %189, %192 : vector<16x64xf32>
    %194 = math.exp %193 : vector<16x64xf32>
    %195 = vector.extract_strided_slice %194 {offsets = [0, 0], sizes = [16, 16], strides = [1, 1]} : vector<16x64xf32> to vector<16x16xf32>
    %cst_68 = arith.constant dense<0.000000e+00> : vector<16xf32>
    %196 = vector.multi_reduction <add>, %195, %cst_68 [1] : vector<16x16xf32> to vector<16xf32>
    %197 = vector.shape_cast %196 : vector<16xf32> to vector<16x1xf32>
    %198 = tpu.reciprocal %197 {approx = true} : vector<16x1xf32> -> vector<16x1xf32>
    %199 = vector.extract_strided_slice %174 {offsets = [0, 0], sizes = [16, 8], strides = [1, 1]} : vector<16x32xf32> to vector<16x8xf32>
    %cst_69 = arith.constant dense<0.000000e+00> : vector<16x8xf32>
    %200 = tpu.matmul %195, %199, %cst_69 {dimension_numbers = #tpu.dot_dimension_numbers<[1], [0], [0], [1], [0, 0, 1, 1], [], []>} : vector<16x16xf32>, vector<16x8xf32>, vector<16x8xf32> -> vector<16x8xf32>
    %201 = vector.broadcast %198 : vector<16x1xf32> to vector<16x8xf32>
    %202 = arith.mulf %200, %201 : vector<16x8xf32>
    %203 = vector.extract_strided_slice %194 {offsets = [0, 16], sizes = [16, 16], strides = [1, 1]} : vector<16x64xf32> to vector<16x16xf32>
    %cst_70 = arith.constant dense<0.000000e+00> : vector<16xf32>
    %204 = vector.multi_reduction <add>, %203, %cst_70 [1] : vector<16x16xf32> to vector<16xf32>
    %205 = vector.shape_cast %204 : vector<16xf32> to vector<16x1xf32>
    %206 = tpu.reciprocal %205 {approx = true} : vector<16x1xf32> -> vector<16x1xf32>
    %207 = vector.extract_strided_slice %174 {offsets = [0, 8], sizes = [16, 8], strides = [1, 1]} : vector<16x32xf32> to vector<16x8xf32>
    %cst_71 = arith.constant dense<0.000000e+00> : vector<16x8xf32>
    %208 = tpu.matmul %203, %207, %cst_71 {dimension_numbers = #tpu.dot_dimension_numbers<[1], [0], [0], [1], [0, 0, 1, 1], [], []>} : vector<16x16xf32>, vector<16x8xf32>, vector<16x8xf32> -> vector<16x8xf32>
    %209 = vector.broadcast %206 : vector<16x1xf32> to vector<16x8xf32>
    %210 = arith.mulf %208, %209 : vector<16x8xf32>
    %211 = vector.extract_strided_slice %194 {offsets = [0, 32], sizes = [16, 16], strides = [1, 1]} : vector<16x64xf32> to vector<16x16xf32>
    %cst_72 = arith.constant dense<0.000000e+00> : vector<16xf32>
    %212 = vector.multi_reduction <add>, %211, %cst_72 [1] : vector<16x16xf32> to vector<16xf32>
    %213 = vector.shape_cast %212 : vector<16xf32> to vector<16x1xf32>
    %214 = tpu.reciprocal %213 {approx = true} : vector<16x1xf32> -> vector<16x1xf32>
    %215 = vector.extract_strided_slice %174 {offsets = [0, 16], sizes = [16, 8], strides = [1, 1]} : vector<16x32xf32> to vector<16x8xf32>
    %cst_73 = arith.constant dense<0.000000e+00> : vector<16x8xf32>
    %216 = tpu.matmul %211, %215, %cst_73 {dimension_numbers = #tpu.dot_dimension_numbers<[1], [0], [0], [1], [0, 0, 1, 1], [], []>} : vector<16x16xf32>, vector<16x8xf32>, vector<16x8xf32> -> vector<16x8xf32>
    %217 = vector.broadcast %214 : vector<16x1xf32> to vector<16x8xf32>
    %218 = arith.mulf %216, %217 : vector<16x8xf32>
    %219 = vector.extract_strided_slice %194 {offsets = [0, 48], sizes = [16, 16], strides = [1, 1]} : vector<16x64xf32> to vector<16x16xf32>
    %cst_74 = arith.constant dense<0.000000e+00> : vector<16xf32>
    %220 = vector.multi_reduction <add>, %219, %cst_74 [1] : vector<16x16xf32> to vector<16xf32>
    %221 = vector.shape_cast %220 : vector<16xf32> to vector<16x1xf32>
    %222 = tpu.reciprocal %221 {approx = true} : vector<16x1xf32> -> vector<16x1xf32>
    %223 = vector.extract_strided_slice %174 {offsets = [0, 24], sizes = [16, 8], strides = [1, 1]} : vector<16x32xf32> to vector<16x8xf32>
    %cst_75 = arith.constant dense<0.000000e+00> : vector<16x8xf32>
    %224 = tpu.matmul %219, %223, %cst_75 {dimension_numbers = #tpu.dot_dimension_numbers<[1], [0], [0], [1], [0, 0, 1, 1], [], []>} : vector<16x16xf32>, vector<16x8xf32>, vector<16x8xf32> -> vector<16x8xf32>
    %225 = vector.broadcast %222 : vector<16x1xf32> to vector<16x8xf32>
    %226 = arith.mulf %224, %225 : vector<16x8xf32>
    %227 = tpu.concatenate %202, %210, %218, %226 in 1 : vector<16x8xf32>, vector<16x8xf32>, vector<16x8xf32>, vector<16x8xf32> -> vector<16x32xf32>
    %c312 = arith.constant 312 : index
    %c0_76 = arith.constant 0 : index
    %228 = vector.load %arg1[%c312, %c0_76] : memref<1400x128xf32, #tpu.memory_space<vmem>>, vector<32x32xf32>
    %cst_77 = arith.constant dense<0.000000e+00> : vector<16x32xf32>
    %229 = tpu.matmul %227, %228, %cst_77 {dimension_numbers = #tpu.dot_dimension_numbers<[1], [0], [0], [1], [0, 0, 1, 1], [], []>} : vector<16x32xf32>, vector<32x32xf32>, vector<16x32xf32> -> vector<16x32xf32>
    %c344 = arith.constant 344 : index
    %c0_78 = arith.constant 0 : index
    %230 = vector.load %arg1[%c344, %c0_78] : memref<1400x128xf32, #tpu.memory_space<vmem>>, vector<1x32xf32>
    %231 = vector.broadcast %230 : vector<1x32xf32> to vector<16x32xf32>
    %232 = arith.addf %229, %231 : vector<16x32xf32>
    %233 = arith.addf %141, %232 : vector<16x32xf32>
    %cst_79 = arith.constant dense<0.000000e+00> : vector<16xf32>
    %234 = vector.multi_reduction <add>, %233, %cst_79 [1] : vector<16x32xf32> to vector<16xf32>
    %235 = vector.shape_cast %234 : vector<16xf32> to vector<16x1xf32>
    %cst_80 = arith.constant 3.200000e+01 : f32
    %236 = vector.broadcast %cst_80 : f32 to vector<16x1xf32>
    %237 = arith.divf %235, %236 : vector<16x1xf32>
    %238 = vector.broadcast %237 : vector<16x1xf32> to vector<16x32xf32>
    %239 = arith.subf %233, %238 : vector<16x32xf32>
    %240 = arith.mulf %239, %239 : vector<16x32xf32>
    %cst_81 = arith.constant dense<0.000000e+00> : vector<16xf32>
    %241 = vector.multi_reduction <add>, %240, %cst_81 [1] : vector<16x32xf32> to vector<16xf32>
    %242 = vector.shape_cast %241 : vector<16xf32> to vector<16x1xf32>
    %cst_82 = arith.constant 0.0322580636 : f32
    %243 = vector.broadcast %cst_82 : f32 to vector<16x1xf32>
    %244 = arith.mulf %242, %243 : vector<16x1xf32>
    %245 = math.sqrt %244 : vector<16x1xf32>
    %cst_83 = arith.constant 9.99999997E-7 : f32
    %246 = vector.broadcast %cst_83 : f32 to vector<16x1xf32>
    %247 = arith.addf %245, %246 : vector<16x1xf32>
    %248 = tpu.reciprocal %247 {approx = true} : vector<16x1xf32> -> vector<16x1xf32>
    %c352 = arith.constant 352 : index
    %c0_84 = arith.constant 0 : index
    %249 = vector.load %arg1[%c352, %c0_84] : memref<1400x128xf32, #tpu.memory_space<vmem>>, vector<1x32xf32>
    %250 = vector.broadcast %237 : vector<16x1xf32> to vector<16x32xf32>
    %251 = arith.subf %233, %250 : vector<16x32xf32>
    %252 = vector.broadcast %249 : vector<1x32xf32> to vector<16x32xf32>
    %253 = arith.mulf %252, %251 : vector<16x32xf32>
    %254 = vector.broadcast %248 : vector<16x1xf32> to vector<16x32xf32>
    %255 = arith.mulf %253, %254 : vector<16x32xf32>
    %c360 = arith.constant 360 : index
    %c0_85 = arith.constant 0 : index
    %256 = vector.load %arg1[%c360, %c0_85] : memref<1400x128xf32, #tpu.memory_space<vmem>>, vector<1x32xf32>
    %257 = vector.broadcast %256 : vector<1x32xf32> to vector<16x32xf32>
    %258 = arith.addf %255, %257 : vector<16x32xf32>
    %c368 = arith.constant 368 : index
    %c0_86 = arith.constant 0 : index
    %259 = vector.load %arg1[%c368, %c0_86] : memref<1400x128xf32, #tpu.memory_space<vmem>>, vector<32x64xf32>
    %cst_87 = arith.constant dense<0.000000e+00> : vector<16x64xf32>
    %260 = tpu.matmul %258, %259, %cst_87 {dimension_numbers = #tpu.dot_dimension_numbers<[1], [0], [0], [1], [0, 0, 1, 1], [], []>} : vector<16x32xf32>, vector<32x64xf32>, vector<16x64xf32> -> vector<16x64xf32>
    %c400 = arith.constant 400 : index
    %c0_88 = arith.constant 0 : index
    %261 = vector.load %arg1[%c400, %c0_88] : memref<1400x128xf32, #tpu.memory_space<vmem>>, vector<1x64xf32>
    %262 = vector.broadcast %261 : vector<1x64xf32> to vector<16x64xf32>
    %263 = arith.addf %260, %262 : vector<16x64xf32>
    %cst_89 = arith.constant 0.000000e+00 : f32
    %264 = vector.broadcast %cst_89 : f32 to vector<16x64xf32>
    %265 = arith.maximumf %263, %264 : vector<16x64xf32>
    %c408 = arith.constant 408 : index
    %c0_90 = arith.constant 0 : index
    %266 = vector.load %arg1[%c408, %c0_90] : memref<1400x128xf32, #tpu.memory_space<vmem>>, vector<64x32xf32>
    %cst_91 = arith.constant dense<0.000000e+00> : vector<16x32xf32>
    %267 = tpu.matmul %265, %266, %cst_91 {dimension_numbers = #tpu.dot_dimension_numbers<[1], [0], [0], [1], [0, 0, 1, 1], [], []>} : vector<16x64xf32>, vector<64x32xf32>, vector<16x32xf32> -> vector<16x32xf32>
    %c472 = arith.constant 472 : index
    %c0_92 = arith.constant 0 : index
    %268 = vector.load %arg1[%c472, %c0_92] : memref<1400x128xf32, #tpu.memory_space<vmem>>, vector<1x32xf32>
    %269 = vector.broadcast %268 : vector<1x32xf32> to vector<16x32xf32>
    %270 = arith.addf %267, %269 : vector<16x32xf32>
    %271 = arith.addf %233, %270 : vector<16x32xf32>
    %cst_93 = arith.constant dense<0.000000e+00> : vector<16xf32>
    %272 = vector.multi_reduction <add>, %271, %cst_93 [1] : vector<16x32xf32> to vector<16xf32>
    %273 = vector.shape_cast %272 : vector<16xf32> to vector<16x1xf32>
    %cst_94 = arith.constant 3.200000e+01 : f32
    %274 = vector.broadcast %cst_94 : f32 to vector<16x1xf32>
    %275 = arith.divf %273, %274 : vector<16x1xf32>
    %276 = vector.broadcast %275 : vector<16x1xf32> to vector<16x32xf32>
    %277 = arith.subf %271, %276 : vector<16x32xf32>
    %278 = arith.mulf %277, %277 : vector<16x32xf32>
    %cst_95 = arith.constant dense<0.000000e+00> : vector<16xf32>
    %279 = vector.multi_reduction <add>, %278, %cst_95 [1] : vector<16x32xf32> to vector<16xf32>
    %280 = vector.shape_cast %279 : vector<16xf32> to vector<16x1xf32>
    %cst_96 = arith.constant 0.0322580636 : f32
    %281 = vector.broadcast %cst_96 : f32 to vector<16x1xf32>
    %282 = arith.mulf %280, %281 : vector<16x1xf32>
    %283 = math.sqrt %282 : vector<16x1xf32>
    %cst_97 = arith.constant 9.99999997E-7 : f32
    %284 = vector.broadcast %cst_97 : f32 to vector<16x1xf32>
    %285 = arith.addf %283, %284 : vector<16x1xf32>
    %286 = tpu.reciprocal %285 {approx = true} : vector<16x1xf32> -> vector<16x1xf32>
    %c480 = arith.constant 480 : index
    %c0_98 = arith.constant 0 : index
    %287 = vector.load %arg1[%c480, %c0_98] : memref<1400x128xf32, #tpu.memory_space<vmem>>, vector<1x32xf32>
    %288 = vector.broadcast %275 : vector<16x1xf32> to vector<16x32xf32>
    %289 = arith.subf %271, %288 : vector<16x32xf32>
    %290 = vector.broadcast %287 : vector<1x32xf32> to vector<16x32xf32>
    %291 = arith.mulf %290, %289 : vector<16x32xf32>
    %292 = vector.broadcast %286 : vector<16x1xf32> to vector<16x32xf32>
    %293 = arith.mulf %291, %292 : vector<16x32xf32>
    %c488 = arith.constant 488 : index
    %c0_99 = arith.constant 0 : index
    %294 = vector.load %arg1[%c488, %c0_99] : memref<1400x128xf32, #tpu.memory_space<vmem>>, vector<1x32xf32>
    %295 = vector.broadcast %294 : vector<1x32xf32> to vector<16x32xf32>
    %296 = arith.addf %293, %295 : vector<16x32xf32>
    %c16_100 = arith.constant 16 : index
    %c0_101 = arith.constant 0 : index
    %297 = vector.load %arg1[%c16_100, %c0_101] : memref<1400x128xf32, #tpu.memory_space<vmem>>, vector<3x32xf32>
    %cst_102 = arith.constant dense<0.000000e+00> : vector<18x32xf32>
    %298 = tpu.matmul %1, %297, %cst_102 {dimension_numbers = #tpu.dot_dimension_numbers<[1], [0], [0], [1], [0, 0, 1, 1], [], []>} : vector<18x3xf32>, vector<3x32xf32>, vector<18x32xf32> -> vector<18x32xf32>
    %c24 = arith.constant 24 : index
    %c0_103 = arith.constant 0 : index
    %299 = vector.load %arg1[%c24, %c0_103] : memref<1400x128xf32, #tpu.memory_space<vmem>>, vector<1x32xf32>
    %300 = vector.broadcast %299 : vector<1x32xf32> to vector<18x32xf32>
    %301 = arith.addf %298, %300 : vector<18x32xf32>
    %c1288 = arith.constant 1288 : index
    %c0_104 = arith.constant 0 : index
    %302 = vector.load %arg1[%c1288, %c0_104] : memref<1400x128xf32, #tpu.memory_space<vmem>>, vector<18x32xf32>
    %303 = arith.addf %301, %302 : vector<18x32xf32>
    %cst_105 = arith.constant dense<0.000000e+00> : vector<18xf32>
    %304 = vector.multi_reduction <add>, %303, %cst_105 [1] : vector<18x32xf32> to vector<18xf32>
    %305 = vector.shape_cast %304 : vector<18xf32> to vector<18x1xf32>
    %cst_106 = arith.constant 3.200000e+01 : f32
    %306 = vector.broadcast %cst_106 : f32 to vector<18x1xf32>
    %307 = arith.divf %305, %306 : vector<18x1xf32>
    %308 = vector.broadcast %307 : vector<18x1xf32> to vector<18x32xf32>
    %309 = arith.subf %303, %308 : vector<18x32xf32>
    %310 = arith.mulf %309, %309 : vector<18x32xf32>
    %cst_107 = arith.constant dense<0.000000e+00> : vector<18xf32>
    %311 = vector.multi_reduction <add>, %310, %cst_107 [1] : vector<18x32xf32> to vector<18xf32>
    %312 = vector.shape_cast %311 : vector<18xf32> to vector<18x1xf32>
    %cst_108 = arith.constant 0.0322580636 : f32
    %313 = vector.broadcast %cst_108 : f32 to vector<18x1xf32>
    %314 = arith.mulf %312, %313 : vector<18x1xf32>
    %315 = math.sqrt %314 : vector<18x1xf32>
    %cst_109 = arith.constant 9.99999997E-7 : f32
    %316 = vector.broadcast %cst_109 : f32 to vector<18x1xf32>
    %317 = arith.addf %315, %316 : vector<18x1xf32>
    %318 = tpu.reciprocal %317 {approx = true} : vector<18x1xf32> -> vector<18x1xf32>
    %c496 = arith.constant 496 : index
    %c0_110 = arith.constant 0 : index
    %319 = vector.load %arg1[%c496, %c0_110] : memref<1400x128xf32, #tpu.memory_space<vmem>>, vector<1x32xf32>
    %320 = vector.broadcast %307 : vector<18x1xf32> to vector<18x32xf32>
    %321 = arith.subf %303, %320 : vector<18x32xf32>
    %322 = vector.broadcast %319 : vector<1x32xf32> to vector<18x32xf32>
    %323 = arith.mulf %322, %321 : vector<18x32xf32>
    %324 = vector.broadcast %318 : vector<18x1xf32> to vector<18x32xf32>
    %325 = arith.mulf %323, %324 : vector<18x32xf32>
    %c504 = arith.constant 504 : index
    %c0_111 = arith.constant 0 : index
    %326 = vector.load %arg1[%c504, %c0_111] : memref<1400x128xf32, #tpu.memory_space<vmem>>, vector<1x32xf32>
    %327 = vector.broadcast %326 : vector<1x32xf32> to vector<18x32xf32>
    %328 = arith.addf %325, %327 : vector<18x32xf32>
    %c512 = arith.constant 512 : index
    %c0_112 = arith.constant 0 : index
    %329 = vector.load %arg1[%c512, %c0_112] : memref<1400x128xf32, #tpu.memory_space<vmem>>, vector<32x96xf32>
    %cst_113 = arith.constant dense<0.000000e+00> : vector<18x96xf32>
    %330 = tpu.matmul %328, %329, %cst_113 {dimension_numbers = #tpu.dot_dimension_numbers<[1], [0], [0], [1], [0, 0, 1, 1], [], []>} : vector<18x32xf32>, vector<32x96xf32>, vector<18x96xf32> -> vector<18x96xf32>
    %c544 = arith.constant 544 : index
    %c0_114 = arith.constant 0 : index
    %331 = vector.load %arg1[%c544, %c0_114] : memref<1400x128xf32, #tpu.memory_space<vmem>>, vector<1x96xf32>
    %332 = vector.broadcast %331 : vector<1x96xf32> to vector<18x96xf32>
    %333 = arith.addf %330, %332 : vector<18x96xf32>
    %334 = vector.extract_strided_slice %333 {offsets = [0, 0], sizes = [18, 32], strides = [1, 1]} : vector<18x96xf32> to vector<18x32xf32>
    %335 = vector.extract_strided_slice %333 {offsets = [0, 32], sizes = [18, 32], strides = [1, 1]} : vector<18x96xf32> to vector<18x32xf32>
    %336 = vector.extract_strided_slice %333 {offsets = [0, 64], sizes = [18, 32], strides = [1, 1]} : vector<18x96xf32> to vector<18x32xf32>
    %337 = vector.extract_strided_slice %334 {offsets = [0, 0], sizes = [18, 8], strides = [1, 1]} : vector<18x32xf32> to vector<18x8xf32>
    %338 = vector.extract_strided_slice %335 {offsets = [0, 0], sizes = [18, 8], strides = [1, 1]} : vector<18x32xf32> to vector<18x8xf32>
    %cst_115 = arith.constant dense<0.000000e+00> : vector<18x18xf32>
    %339 = tpu.matmul %337, %338, %cst_115 {dimension_numbers = #tpu.dot_dimension_numbers<[1], [1], [0], [0], [0, 0, 1, 0], [], []>} : vector<18x8xf32>, vector<18x8xf32>, vector<18x18xf32> -> vector<18x18xf32>
    %340 = vector.extract_strided_slice %334 {offsets = [0, 8], sizes = [18, 8], strides = [1, 1]} : vector<18x32xf32> to vector<18x8xf32>
    %341 = vector.extract_strided_slice %335 {offsets = [0, 8], sizes = [18, 8], strides = [1, 1]} : vector<18x32xf32> to vector<18x8xf32>
    %cst_116 = arith.constant dense<0.000000e+00> : vector<18x18xf32>
    %342 = tpu.matmul %340, %341, %cst_116 {dimension_numbers = #tpu.dot_dimension_numbers<[1], [1], [0], [0], [0, 0, 1, 0], [], []>} : vector<18x8xf32>, vector<18x8xf32>, vector<18x18xf32> -> vector<18x18xf32>
    %343 = vector.extract_strided_slice %334 {offsets = [0, 16], sizes = [18, 8], strides = [1, 1]} : vector<18x32xf32> to vector<18x8xf32>
    %344 = vector.extract_strided_slice %335 {offsets = [0, 16], sizes = [18, 8], strides = [1, 1]} : vector<18x32xf32> to vector<18x8xf32>
    %cst_117 = arith.constant dense<0.000000e+00> : vector<18x18xf32>
    %345 = tpu.matmul %343, %344, %cst_117 {dimension_numbers = #tpu.dot_dimension_numbers<[1], [1], [0], [0], [0, 0, 1, 0], [], []>} : vector<18x8xf32>, vector<18x8xf32>, vector<18x18xf32> -> vector<18x18xf32>
    %346 = vector.extract_strided_slice %334 {offsets = [0, 24], sizes = [18, 8], strides = [1, 1]} : vector<18x32xf32> to vector<18x8xf32>
    %347 = vector.extract_strided_slice %335 {offsets = [0, 24], sizes = [18, 8], strides = [1, 1]} : vector<18x32xf32> to vector<18x8xf32>
    %cst_118 = arith.constant dense<0.000000e+00> : vector<18x18xf32>
    %348 = tpu.matmul %346, %347, %cst_118 {dimension_numbers = #tpu.dot_dimension_numbers<[1], [1], [0], [0], [0, 0, 1, 0], [], []>} : vector<18x8xf32>, vector<18x8xf32>, vector<18x18xf32> -> vector<18x18xf32>
    %349 = tpu.concatenate %339, %342, %345, %348 in 1 : vector<18x18xf32>, vector<18x18xf32>, vector<18x18xf32>, vector<18x18xf32> -> vector<18x72xf32>
    %c1328 = arith.constant 1328 : index
    %c0_119 = arith.constant 0 : index
    %350 = vector.load %arg1[%c1328, %c0_119] : memref<1400x128xf32, #tpu.memory_space<vmem>>, vector<18x72xf32>
    %351 = arith.addf %349, %350 : vector<18x72xf32>
    %cst_120 = arith.constant dense<0xFF800000> : vector<18xf32>
    %352 = vector.multi_reduction <maximumf>, %351, %cst_120 [1] : vector<18x72xf32> to vector<18xf32>
    %353 = vector.shape_cast %352 : vector<18xf32> to vector<18x1xf32>
    %354 = vector.broadcast %353 : vector<18x1xf32> to vector<18x72xf32>
    %355 = arith.subf %351, %354 : vector<18x72xf32>
    %356 = math.exp %355 : vector<18x72xf32>
    %357 = vector.extract_strided_slice %356 {offsets = [0, 0], sizes = [18, 18], strides = [1, 1]} : vector<18x72xf32> to vector<18x18xf32>
    %cst_121 = arith.constant dense<0.000000e+00> : vector<18xf32>
    %358 = vector.multi_reduction <add>, %357, %cst_121 [1] : vector<18x18xf32> to vector<18xf32>
    %359 = vector.shape_cast %358 : vector<18xf32> to vector<18x1xf32>
    %360 = tpu.reciprocal %359 {approx = true} : vector<18x1xf32> -> vector<18x1xf32>
    %361 = vector.extract_strided_slice %336 {offsets = [0, 0], sizes = [18, 8], strides = [1, 1]} : vector<18x32xf32> to vector<18x8xf32>
    %cst_122 = arith.constant dense<0.000000e+00> : vector<18x8xf32>
    %362 = tpu.matmul %357, %361, %cst_122 {dimension_numbers = #tpu.dot_dimension_numbers<[1], [0], [0], [1], [0, 0, 1, 1], [], []>} : vector<18x18xf32>, vector<18x8xf32>, vector<18x8xf32> -> vector<18x8xf32>
    %363 = vector.broadcast %360 : vector<18x1xf32> to vector<18x8xf32>
    %364 = arith.mulf %362, %363 : vector<18x8xf32>
    %365 = vector.extract_strided_slice %356 {offsets = [0, 18], sizes = [18, 18], strides = [1, 1]} : vector<18x72xf32> to vector<18x18xf32>
    %cst_123 = arith.constant dense<0.000000e+00> : vector<18xf32>
    %366 = vector.multi_reduction <add>, %365, %cst_123 [1] : vector<18x18xf32> to vector<18xf32>
    %367 = vector.shape_cast %366 : vector<18xf32> to vector<18x1xf32>
    %368 = tpu.reciprocal %367 {approx = true} : vector<18x1xf32> -> vector<18x1xf32>
    %369 = vector.extract_strided_slice %336 {offsets = [0, 8], sizes = [18, 8], strides = [1, 1]} : vector<18x32xf32> to vector<18x8xf32>
    %cst_124 = arith.constant dense<0.000000e+00> : vector<18x8xf32>
    %370 = tpu.matmul %365, %369, %cst_124 {dimension_numbers = #tpu.dot_dimension_numbers<[1], [0], [0], [1], [0, 0, 1, 1], [], []>} : vector<18x18xf32>, vector<18x8xf32>, vector<18x8xf32> -> vector<18x8xf32>
    %371 = vector.broadcast %368 : vector<18x1xf32> to vector<18x8xf32>
    %372 = arith.mulf %370, %371 : vector<18x8xf32>
    %373 = vector.extract_strided_slice %356 {offsets = [0, 36], sizes = [18, 18], strides = [1, 1]} : vector<18x72xf32> to vector<18x18xf32>
    %cst_125 = arith.constant dense<0.000000e+00> : vector<18xf32>
    %374 = vector.multi_reduction <add>, %373, %cst_125 [1] : vector<18x18xf32> to vector<18xf32>
    %375 = vector.shape_cast %374 : vector<18xf32> to vector<18x1xf32>
    %376 = tpu.reciprocal %375 {approx = true} : vector<18x1xf32> -> vector<18x1xf32>
    %377 = vector.extract_strided_slice %336 {offsets = [0, 16], sizes = [18, 8], strides = [1, 1]} : vector<18x32xf32> to vector<18x8xf32>
    %cst_126 = arith.constant dense<0.000000e+00> : vector<18x8xf32>
    %378 = tpu.matmul %373, %377, %cst_126 {dimension_numbers = #tpu.dot_dimension_numbers<[1], [0], [0], [1], [0, 0, 1, 1], [], []>} : vector<18x18xf32>, vector<18x8xf32>, vector<18x8xf32> -> vector<18x8xf32>
    %379 = vector.broadcast %376 : vector<18x1xf32> to vector<18x8xf32>
    %380 = arith.mulf %378, %379 : vector<18x8xf32>
    %381 = vector.extract_strided_slice %356 {offsets = [0, 54], sizes = [18, 18], strides = [1, 1]} : vector<18x72xf32> to vector<18x18xf32>
    %cst_127 = arith.constant dense<0.000000e+00> : vector<18xf32>
    %382 = vector.multi_reduction <add>, %381, %cst_127 [1] : vector<18x18xf32> to vector<18xf32>
    %383 = vector.shape_cast %382 : vector<18xf32> to vector<18x1xf32>
    %384 = tpu.reciprocal %383 {approx = true} : vector<18x1xf32> -> vector<18x1xf32>
    %385 = vector.extract_strided_slice %336 {offsets = [0, 24], sizes = [18, 8], strides = [1, 1]} : vector<18x32xf32> to vector<18x8xf32>
    %cst_128 = arith.constant dense<0.000000e+00> : vector<18x8xf32>
    %386 = tpu.matmul %381, %385, %cst_128 {dimension_numbers = #tpu.dot_dimension_numbers<[1], [0], [0], [1], [0, 0, 1, 1], [], []>} : vector<18x18xf32>, vector<18x8xf32>, vector<18x8xf32> -> vector<18x8xf32>
    %387 = vector.broadcast %384 : vector<18x1xf32> to vector<18x8xf32>
    %388 = arith.mulf %386, %387 : vector<18x8xf32>
    %389 = tpu.concatenate %364, %372, %380, %388 in 1 : vector<18x8xf32>, vector<18x8xf32>, vector<18x8xf32>, vector<18x8xf32> -> vector<18x32xf32>
    %c552 = arith.constant 552 : index
    %c0_129 = arith.constant 0 : index
    %390 = vector.load %arg1[%c552, %c0_129] : memref<1400x128xf32, #tpu.memory_space<vmem>>, vector<32x32xf32>
    %cst_130 = arith.constant dense<0.000000e+00> : vector<18x32xf32>
    %391 = tpu.matmul %389, %390, %cst_130 {dimension_numbers = #tpu.dot_dimension_numbers<[1], [0], [0], [1], [0, 0, 1, 1], [], []>} : vector<18x32xf32>, vector<32x32xf32>, vector<18x32xf32> -> vector<18x32xf32>
    %c584 = arith.constant 584 : index
    %c0_131 = arith.constant 0 : index
    %392 = vector.load %arg1[%c584, %c0_131] : memref<1400x128xf32, #tpu.memory_space<vmem>>, vector<1x32xf32>
    %393 = vector.broadcast %392 : vector<1x32xf32> to vector<18x32xf32>
    %394 = arith.addf %391, %393 : vector<18x32xf32>
    %395 = arith.addf %303, %394 : vector<18x32xf32>
    %cst_132 = arith.constant dense<0.000000e+00> : vector<18xf32>
    %396 = vector.multi_reduction <add>, %395, %cst_132 [1] : vector<18x32xf32> to vector<18xf32>
    %397 = vector.shape_cast %396 : vector<18xf32> to vector<18x1xf32>
    %cst_133 = arith.constant 3.200000e+01 : f32
    %398 = vector.broadcast %cst_133 : f32 to vector<18x1xf32>
    %399 = arith.divf %397, %398 : vector<18x1xf32>
    %400 = vector.broadcast %399 : vector<18x1xf32> to vector<18x32xf32>
    %401 = arith.subf %395, %400 : vector<18x32xf32>
    %402 = arith.mulf %401, %401 : vector<18x32xf32>
    %cst_134 = arith.constant dense<0.000000e+00> : vector<18xf32>
    %403 = vector.multi_reduction <add>, %402, %cst_134 [1] : vector<18x32xf32> to vector<18xf32>
    %404 = vector.shape_cast %403 : vector<18xf32> to vector<18x1xf32>
    %cst_135 = arith.constant 0.0322580636 : f32
    %405 = vector.broadcast %cst_135 : f32 to vector<18x1xf32>
    %406 = arith.mulf %404, %405 : vector<18x1xf32>
    %407 = math.sqrt %406 : vector<18x1xf32>
    %cst_136 = arith.constant 9.99999997E-7 : f32
    %408 = vector.broadcast %cst_136 : f32 to vector<18x1xf32>
    %409 = arith.addf %407, %408 : vector<18x1xf32>
    %410 = tpu.reciprocal %409 {approx = true} : vector<18x1xf32> -> vector<18x1xf32>
    %c592 = arith.constant 592 : index
    %c0_137 = arith.constant 0 : index
    %411 = vector.load %arg1[%c592, %c0_137] : memref<1400x128xf32, #tpu.memory_space<vmem>>, vector<1x32xf32>
    %412 = vector.broadcast %399 : vector<18x1xf32> to vector<18x32xf32>
    %413 = arith.subf %395, %412 : vector<18x32xf32>
    %414 = vector.broadcast %411 : vector<1x32xf32> to vector<18x32xf32>
    %415 = arith.mulf %414, %413 : vector<18x32xf32>
    %416 = vector.broadcast %410 : vector<18x1xf32> to vector<18x32xf32>
    %417 = arith.mulf %415, %416 : vector<18x32xf32>
    %c600 = arith.constant 600 : index
    %c0_138 = arith.constant 0 : index
    %418 = vector.load %arg1[%c600, %c0_138] : memref<1400x128xf32, #tpu.memory_space<vmem>>, vector<1x32xf32>
    %419 = vector.broadcast %418 : vector<1x32xf32> to vector<18x32xf32>
    %420 = arith.addf %417, %419 : vector<18x32xf32>
    %c608 = arith.constant 608 : index
    %c0_139 = arith.constant 0 : index
    %421 = vector.load %arg1[%c608, %c0_139] : memref<1400x128xf32, #tpu.memory_space<vmem>>, vector<32x32xf32>
    %cst_140 = arith.constant dense<0.000000e+00> : vector<18x32xf32>
    %422 = tpu.matmul %420, %421, %cst_140 {dimension_numbers = #tpu.dot_dimension_numbers<[1], [0], [0], [1], [0, 0, 1, 1], [], []>} : vector<18x32xf32>, vector<32x32xf32>, vector<18x32xf32> -> vector<18x32xf32>
    %c640 = arith.constant 640 : index
    %c0_141 = arith.constant 0 : index
    %423 = vector.load %arg1[%c640, %c0_141] : memref<1400x128xf32, #tpu.memory_space<vmem>>, vector<1x32xf32>
    %424 = vector.broadcast %423 : vector<1x32xf32> to vector<18x32xf32>
    %425 = arith.addf %422, %424 : vector<18x32xf32>
    %c648 = arith.constant 648 : index
    %c0_142 = arith.constant 0 : index
    %426 = vector.load %arg1[%c648, %c0_142] : memref<1400x128xf32, #tpu.memory_space<vmem>>, vector<32x64xf32>
    %cst_143 = arith.constant dense<0.000000e+00> : vector<16x64xf32>
    %427 = tpu.matmul %296, %426, %cst_143 {dimension_numbers = #tpu.dot_dimension_numbers<[1], [0], [0], [1], [0, 0, 1, 1], [], []>} : vector<16x32xf32>, vector<32x64xf32>, vector<16x64xf32> -> vector<16x64xf32>
    %c680 = arith.constant 680 : index
    %c0_144 = arith.constant 0 : index
    %428 = vector.load %arg1[%c680, %c0_144] : memref<1400x128xf32, #tpu.memory_space<vmem>>, vector<1x64xf32>
    %429 = vector.broadcast %428 : vector<1x64xf32> to vector<16x64xf32>
    %430 = arith.addf %427, %429 : vector<16x64xf32>
    %431 = vector.extract_strided_slice %430 {offsets = [0, 0], sizes = [16, 32], strides = [1, 1]} : vector<16x64xf32> to vector<16x32xf32>
    %432 = vector.extract_strided_slice %430 {offsets = [0, 32], sizes = [16, 32], strides = [1, 1]} : vector<16x64xf32> to vector<16x32xf32>
    %433 = vector.extract_strided_slice %425 {offsets = [0, 0], sizes = [18, 8], strides = [1, 1]} : vector<18x32xf32> to vector<18x8xf32>
    %434 = vector.extract_strided_slice %431 {offsets = [0, 0], sizes = [16, 8], strides = [1, 1]} : vector<16x32xf32> to vector<16x8xf32>
    %cst_145 = arith.constant dense<0.000000e+00> : vector<18x16xf32>
    %435 = tpu.matmul %433, %434, %cst_145 {dimension_numbers = #tpu.dot_dimension_numbers<[1], [1], [0], [0], [0, 0, 1, 0], [], []>} : vector<18x8xf32>, vector<16x8xf32>, vector<18x16xf32> -> vector<18x16xf32>
    %436 = vector.extract_strided_slice %425 {offsets = [0, 8], sizes = [18, 8], strides = [1, 1]} : vector<18x32xf32> to vector<18x8xf32>
    %437 = vector.extract_strided_slice %431 {offsets = [0, 8], sizes = [16, 8], strides = [1, 1]} : vector<16x32xf32> to vector<16x8xf32>
    %cst_146 = arith.constant dense<0.000000e+00> : vector<18x16xf32>
    %438 = tpu.matmul %436, %437, %cst_146 {dimension_numbers = #tpu.dot_dimension_numbers<[1], [1], [0], [0], [0, 0, 1, 0], [], []>} : vector<18x8xf32>, vector<16x8xf32>, vector<18x16xf32> -> vector<18x16xf32>
    %439 = vector.extract_strided_slice %425 {offsets = [0, 16], sizes = [18, 8], strides = [1, 1]} : vector<18x32xf32> to vector<18x8xf32>
    %440 = vector.extract_strided_slice %431 {offsets = [0, 16], sizes = [16, 8], strides = [1, 1]} : vector<16x32xf32> to vector<16x8xf32>
    %cst_147 = arith.constant dense<0.000000e+00> : vector<18x16xf32>
    %441 = tpu.matmul %439, %440, %cst_147 {dimension_numbers = #tpu.dot_dimension_numbers<[1], [1], [0], [0], [0, 0, 1, 0], [], []>} : vector<18x8xf32>, vector<16x8xf32>, vector<18x16xf32> -> vector<18x16xf32>
    %442 = vector.extract_strided_slice %425 {offsets = [0, 24], sizes = [18, 8], strides = [1, 1]} : vector<18x32xf32> to vector<18x8xf32>
    %443 = vector.extract_strided_slice %431 {offsets = [0, 24], sizes = [16, 8], strides = [1, 1]} : vector<16x32xf32> to vector<16x8xf32>
    %cst_148 = arith.constant dense<0.000000e+00> : vector<18x16xf32>
    %444 = tpu.matmul %442, %443, %cst_148 {dimension_numbers = #tpu.dot_dimension_numbers<[1], [1], [0], [0], [0, 0, 1, 0], [], []>} : vector<18x8xf32>, vector<16x8xf32>, vector<18x16xf32> -> vector<18x16xf32>
    %445 = tpu.concatenate %435, %438, %441, %444 in 1 : vector<18x16xf32>, vector<18x16xf32>, vector<18x16xf32>, vector<18x16xf32> -> vector<18x64xf32>
    %c1352 = arith.constant 1352 : index
    %c0_149 = arith.constant 0 : index
    %446 = vector.load %arg1[%c1352, %c0_149] : memref<1400x128xf32, #tpu.memory_space<vmem>>, vector<18x64xf32>
    %447 = arith.addf %445, %446 : vector<18x64xf32>
    %cst_150 = arith.constant dense<0xFF800000> : vector<18xf32>
    %448 = vector.multi_reduction <maximumf>, %447, %cst_150 [1] : vector<18x64xf32> to vector<18xf32>
    %449 = vector.shape_cast %448 : vector<18xf32> to vector<18x1xf32>
    %450 = vector.broadcast %449 : vector<18x1xf32> to vector<18x64xf32>
    %451 = arith.subf %447, %450 : vector<18x64xf32>
    %452 = math.exp %451 : vector<18x64xf32>
    %453 = vector.extract_strided_slice %452 {offsets = [0, 0], sizes = [18, 16], strides = [1, 1]} : vector<18x64xf32> to vector<18x16xf32>
    %cst_151 = arith.constant dense<0.000000e+00> : vector<18xf32>
    %454 = vector.multi_reduction <add>, %453, %cst_151 [1] : vector<18x16xf32> to vector<18xf32>
    %455 = vector.shape_cast %454 : vector<18xf32> to vector<18x1xf32>
    %456 = tpu.reciprocal %455 {approx = true} : vector<18x1xf32> -> vector<18x1xf32>
    %457 = vector.extract_strided_slice %432 {offsets = [0, 0], sizes = [16, 8], strides = [1, 1]} : vector<16x32xf32> to vector<16x8xf32>
    %cst_152 = arith.constant dense<0.000000e+00> : vector<18x8xf32>
    %458 = tpu.matmul %453, %457, %cst_152 {dimension_numbers = #tpu.dot_dimension_numbers<[1], [0], [0], [1], [0, 0, 1, 1], [], []>} : vector<18x16xf32>, vector<16x8xf32>, vector<18x8xf32> -> vector<18x8xf32>
    %459 = vector.broadcast %456 : vector<18x1xf32> to vector<18x8xf32>
    %460 = arith.mulf %458, %459 : vector<18x8xf32>
    %461 = vector.extract_strided_slice %452 {offsets = [0, 16], sizes = [18, 16], strides = [1, 1]} : vector<18x64xf32> to vector<18x16xf32>
    %cst_153 = arith.constant dense<0.000000e+00> : vector<18xf32>
    %462 = vector.multi_reduction <add>, %461, %cst_153 [1] : vector<18x16xf32> to vector<18xf32>
    %463 = vector.shape_cast %462 : vector<18xf32> to vector<18x1xf32>
    %464 = tpu.reciprocal %463 {approx = true} : vector<18x1xf32> -> vector<18x1xf32>
    %465 = vector.extract_strided_slice %432 {offsets = [0, 8], sizes = [16, 8], strides = [1, 1]} : vector<16x32xf32> to vector<16x8xf32>
    %cst_154 = arith.constant dense<0.000000e+00> : vector<18x8xf32>
    %466 = tpu.matmul %461, %465, %cst_154 {dimension_numbers = #tpu.dot_dimension_numbers<[1], [0], [0], [1], [0, 0, 1, 1], [], []>} : vector<18x16xf32>, vector<16x8xf32>, vector<18x8xf32> -> vector<18x8xf32>
    %467 = vector.broadcast %464 : vector<18x1xf32> to vector<18x8xf32>
    %468 = arith.mulf %466, %467 : vector<18x8xf32>
    %469 = vector.extract_strided_slice %452 {offsets = [0, 32], sizes = [18, 16], strides = [1, 1]} : vector<18x64xf32> to vector<18x16xf32>
    %cst_155 = arith.constant dense<0.000000e+00> : vector<18xf32>
    %470 = vector.multi_reduction <add>, %469, %cst_155 [1] : vector<18x16xf32> to vector<18xf32>
    %471 = vector.shape_cast %470 : vector<18xf32> to vector<18x1xf32>
    %472 = tpu.reciprocal %471 {approx = true} : vector<18x1xf32> -> vector<18x1xf32>
    %473 = vector.extract_strided_slice %432 {offsets = [0, 16], sizes = [16, 8], strides = [1, 1]} : vector<16x32xf32> to vector<16x8xf32>
    %cst_156 = arith.constant dense<0.000000e+00> : vector<18x8xf32>
    %474 = tpu.matmul %469, %473, %cst_156 {dimension_numbers = #tpu.dot_dimension_numbers<[1], [0], [0], [1], [0, 0, 1, 1], [], []>} : vector<18x16xf32>, vector<16x8xf32>, vector<18x8xf32> -> vector<18x8xf32>
    %475 = vector.broadcast %472 : vector<18x1xf32> to vector<18x8xf32>
    %476 = arith.mulf %474, %475 : vector<18x8xf32>
    %477 = vector.extract_strided_slice %452 {offsets = [0, 48], sizes = [18, 16], strides = [1, 1]} : vector<18x64xf32> to vector<18x16xf32>
    %cst_157 = arith.constant dense<0.000000e+00> : vector<18xf32>
    %478 = vector.multi_reduction <add>, %477, %cst_157 [1] : vector<18x16xf32> to vector<18xf32>
    %479 = vector.shape_cast %478 : vector<18xf32> to vector<18x1xf32>
    %480 = tpu.reciprocal %479 {approx = true} : vector<18x1xf32> -> vector<18x1xf32>
    %481 = vector.extract_strided_slice %432 {offsets = [0, 24], sizes = [16, 8], strides = [1, 1]} : vector<16x32xf32> to vector<16x8xf32>
    %cst_158 = arith.constant dense<0.000000e+00> : vector<18x8xf32>
    %482 = tpu.matmul %477, %481, %cst_158 {dimension_numbers = #tpu.dot_dimension_numbers<[1], [0], [0], [1], [0, 0, 1, 1], [], []>} : vector<18x16xf32>, vector<16x8xf32>, vector<18x8xf32> -> vector<18x8xf32>
    %483 = vector.broadcast %480 : vector<18x1xf32> to vector<18x8xf32>
    %484 = arith.mulf %482, %483 : vector<18x8xf32>
    %485 = tpu.concatenate %460, %468, %476, %484 in 1 : vector<18x8xf32>, vector<18x8xf32>, vector<18x8xf32>, vector<18x8xf32> -> vector<18x32xf32>
    %c688 = arith.constant 688 : index
    %c0_159 = arith.constant 0 : index
    %486 = vector.load %arg1[%c688, %c0_159] : memref<1400x128xf32, #tpu.memory_space<vmem>>, vector<32x32xf32>
    %cst_160 = arith.constant dense<0.000000e+00> : vector<18x32xf32>
    %487 = tpu.matmul %485, %486, %cst_160 {dimension_numbers = #tpu.dot_dimension_numbers<[1], [0], [0], [1], [0, 0, 1, 1], [], []>} : vector<18x32xf32>, vector<32x32xf32>, vector<18x32xf32> -> vector<18x32xf32>
    %c720 = arith.constant 720 : index
    %c0_161 = arith.constant 0 : index
    %488 = vector.load %arg1[%c720, %c0_161] : memref<1400x128xf32, #tpu.memory_space<vmem>>, vector<1x32xf32>
    %489 = vector.broadcast %488 : vector<1x32xf32> to vector<18x32xf32>
    %490 = arith.addf %487, %489 : vector<18x32xf32>
    %491 = arith.addf %395, %490 : vector<18x32xf32>
    %cst_162 = arith.constant dense<0.000000e+00> : vector<18xf32>
    %492 = vector.multi_reduction <add>, %491, %cst_162 [1] : vector<18x32xf32> to vector<18xf32>
    %493 = vector.shape_cast %492 : vector<18xf32> to vector<18x1xf32>
    %cst_163 = arith.constant 3.200000e+01 : f32
    %494 = vector.broadcast %cst_163 : f32 to vector<18x1xf32>
    %495 = arith.divf %493, %494 : vector<18x1xf32>
    %496 = vector.broadcast %495 : vector<18x1xf32> to vector<18x32xf32>
    %497 = arith.subf %491, %496 : vector<18x32xf32>
    %498 = arith.mulf %497, %497 : vector<18x32xf32>
    %cst_164 = arith.constant dense<0.000000e+00> : vector<18xf32>
    %499 = vector.multi_reduction <add>, %498, %cst_164 [1] : vector<18x32xf32> to vector<18xf32>
    %500 = vector.shape_cast %499 : vector<18xf32> to vector<18x1xf32>
    %cst_165 = arith.constant 0.0322580636 : f32
    %501 = vector.broadcast %cst_165 : f32 to vector<18x1xf32>
    %502 = arith.mulf %500, %501 : vector<18x1xf32>
    %503 = math.sqrt %502 : vector<18x1xf32>
    %cst_166 = arith.constant 9.99999997E-7 : f32
    %504 = vector.broadcast %cst_166 : f32 to vector<18x1xf32>
    %505 = arith.addf %503, %504 : vector<18x1xf32>
    %506 = tpu.reciprocal %505 {approx = true} : vector<18x1xf32> -> vector<18x1xf32>
    %c728 = arith.constant 728 : index
    %c0_167 = arith.constant 0 : index
    %507 = vector.load %arg1[%c728, %c0_167] : memref<1400x128xf32, #tpu.memory_space<vmem>>, vector<1x32xf32>
    %508 = vector.broadcast %495 : vector<18x1xf32> to vector<18x32xf32>
    %509 = arith.subf %491, %508 : vector<18x32xf32>
    %510 = vector.broadcast %507 : vector<1x32xf32> to vector<18x32xf32>
    %511 = arith.mulf %510, %509 : vector<18x32xf32>
    %512 = vector.broadcast %506 : vector<18x1xf32> to vector<18x32xf32>
    %513 = arith.mulf %511, %512 : vector<18x32xf32>
    %c736 = arith.constant 736 : index
    %c0_168 = arith.constant 0 : index
    %514 = vector.load %arg1[%c736, %c0_168] : memref<1400x128xf32, #tpu.memory_space<vmem>>, vector<1x32xf32>
    %515 = vector.broadcast %514 : vector<1x32xf32> to vector<18x32xf32>
    %516 = arith.addf %513, %515 : vector<18x32xf32>
    %c744 = arith.constant 744 : index
    %c0_169 = arith.constant 0 : index
    %517 = vector.load %arg1[%c744, %c0_169] : memref<1400x128xf32, #tpu.memory_space<vmem>>, vector<32x64xf32>
    %cst_170 = arith.constant dense<0.000000e+00> : vector<18x64xf32>
    %518 = tpu.matmul %516, %517, %cst_170 {dimension_numbers = #tpu.dot_dimension_numbers<[1], [0], [0], [1], [0, 0, 1, 1], [], []>} : vector<18x32xf32>, vector<32x64xf32>, vector<18x64xf32> -> vector<18x64xf32>
    %c776 = arith.constant 776 : index
    %c0_171 = arith.constant 0 : index
    %519 = vector.load %arg1[%c776, %c0_171] : memref<1400x128xf32, #tpu.memory_space<vmem>>, vector<1x64xf32>
    %520 = vector.broadcast %519 : vector<1x64xf32> to vector<18x64xf32>
    %521 = arith.addf %518, %520 : vector<18x64xf32>
    %cst_172 = arith.constant 0.000000e+00 : f32
    %522 = vector.broadcast %cst_172 : f32 to vector<18x64xf32>
    %523 = arith.maximumf %521, %522 : vector<18x64xf32>
    %c784 = arith.constant 784 : index
    %c0_173 = arith.constant 0 : index
    %524 = vector.load %arg1[%c784, %c0_173] : memref<1400x128xf32, #tpu.memory_space<vmem>>, vector<64x32xf32>
    %cst_174 = arith.constant dense<0.000000e+00> : vector<18x32xf32>
    %525 = tpu.matmul %523, %524, %cst_174 {dimension_numbers = #tpu.dot_dimension_numbers<[1], [0], [0], [1], [0, 0, 1, 1], [], []>} : vector<18x64xf32>, vector<64x32xf32>, vector<18x32xf32> -> vector<18x32xf32>
    %c848 = arith.constant 848 : index
    %c0_175 = arith.constant 0 : index
    %526 = vector.load %arg1[%c848, %c0_175] : memref<1400x128xf32, #tpu.memory_space<vmem>>, vector<1x32xf32>
    %527 = vector.broadcast %526 : vector<1x32xf32> to vector<18x32xf32>
    %528 = arith.addf %525, %527 : vector<18x32xf32>
    %529 = arith.addf %491, %528 : vector<18x32xf32>
    %cst_176 = arith.constant dense<0.000000e+00> : vector<18xf32>
    %530 = vector.multi_reduction <add>, %529, %cst_176 [1] : vector<18x32xf32> to vector<18xf32>
    %531 = vector.shape_cast %530 : vector<18xf32> to vector<18x1xf32>
    %cst_177 = arith.constant 3.200000e+01 : f32
    %532 = vector.broadcast %cst_177 : f32 to vector<18x1xf32>
    %533 = arith.divf %531, %532 : vector<18x1xf32>
    %534 = vector.broadcast %533 : vector<18x1xf32> to vector<18x32xf32>
    %535 = arith.subf %529, %534 : vector<18x32xf32>
    %536 = arith.mulf %535, %535 : vector<18x32xf32>
    %cst_178 = arith.constant dense<0.000000e+00> : vector<18xf32>
    %537 = vector.multi_reduction <add>, %536, %cst_178 [1] : vector<18x32xf32> to vector<18xf32>
    %538 = vector.shape_cast %537 : vector<18xf32> to vector<18x1xf32>
    %cst_179 = arith.constant 0.0322580636 : f32
    %539 = vector.broadcast %cst_179 : f32 to vector<18x1xf32>
    %540 = arith.mulf %538, %539 : vector<18x1xf32>
    %541 = math.sqrt %540 : vector<18x1xf32>
    %cst_180 = arith.constant 9.99999997E-7 : f32
    %542 = vector.broadcast %cst_180 : f32 to vector<18x1xf32>
    %543 = arith.addf %541, %542 : vector<18x1xf32>
    %544 = tpu.reciprocal %543 {approx = true} : vector<18x1xf32> -> vector<18x1xf32>
    %c856 = arith.constant 856 : index
    %c0_181 = arith.constant 0 : index
    %545 = vector.load %arg1[%c856, %c0_181] : memref<1400x128xf32, #tpu.memory_space<vmem>>, vector<1x32xf32>
    %546 = vector.broadcast %533 : vector<18x1xf32> to vector<18x32xf32>
    %547 = arith.subf %529, %546 : vector<18x32xf32>
    %548 = vector.broadcast %545 : vector<1x32xf32> to vector<18x32xf32>
    %549 = arith.mulf %548, %547 : vector<18x32xf32>
    %550 = vector.broadcast %544 : vector<18x1xf32> to vector<18x32xf32>
    %551 = arith.mulf %549, %550 : vector<18x32xf32>
    %c864 = arith.constant 864 : index
    %c0_182 = arith.constant 0 : index
    %552 = vector.load %arg1[%c864, %c0_182] : memref<1400x128xf32, #tpu.memory_space<vmem>>, vector<1x32xf32>
    %553 = vector.broadcast %552 : vector<1x32xf32> to vector<18x32xf32>
    %554 = arith.addf %551, %553 : vector<18x32xf32>
    %c872 = arith.constant 872 : index
    %c0_183 = arith.constant 0 : index
    %555 = vector.load %arg1[%c872, %c0_183] : memref<1400x128xf32, #tpu.memory_space<vmem>>, vector<32x96xf32>
    %cst_184 = arith.constant dense<0.000000e+00> : vector<18x96xf32>
    %556 = tpu.matmul %554, %555, %cst_184 {dimension_numbers = #tpu.dot_dimension_numbers<[1], [0], [0], [1], [0, 0, 1, 1], [], []>} : vector<18x32xf32>, vector<32x96xf32>, vector<18x96xf32> -> vector<18x96xf32>
    %c904 = arith.constant 904 : index
    %c0_185 = arith.constant 0 : index
    %557 = vector.load %arg1[%c904, %c0_185] : memref<1400x128xf32, #tpu.memory_space<vmem>>, vector<1x96xf32>
    %558 = vector.broadcast %557 : vector<1x96xf32> to vector<18x96xf32>
    %559 = arith.addf %556, %558 : vector<18x96xf32>
    %560 = vector.extract_strided_slice %559 {offsets = [0, 0], sizes = [18, 32], strides = [1, 1]} : vector<18x96xf32> to vector<18x32xf32>
    %561 = vector.extract_strided_slice %559 {offsets = [0, 32], sizes = [18, 32], strides = [1, 1]} : vector<18x96xf32> to vector<18x32xf32>
    %562 = vector.extract_strided_slice %559 {offsets = [0, 64], sizes = [18, 32], strides = [1, 1]} : vector<18x96xf32> to vector<18x32xf32>
    %563 = vector.extract_strided_slice %560 {offsets = [0, 0], sizes = [18, 8], strides = [1, 1]} : vector<18x32xf32> to vector<18x8xf32>
    %564 = vector.extract_strided_slice %561 {offsets = [0, 0], sizes = [18, 8], strides = [1, 1]} : vector<18x32xf32> to vector<18x8xf32>
    %cst_186 = arith.constant dense<0.000000e+00> : vector<18x18xf32>
    %565 = tpu.matmul %563, %564, %cst_186 {dimension_numbers = #tpu.dot_dimension_numbers<[1], [1], [0], [0], [0, 0, 1, 0], [], []>} : vector<18x8xf32>, vector<18x8xf32>, vector<18x18xf32> -> vector<18x18xf32>
    %566 = vector.extract_strided_slice %560 {offsets = [0, 8], sizes = [18, 8], strides = [1, 1]} : vector<18x32xf32> to vector<18x8xf32>
    %567 = vector.extract_strided_slice %561 {offsets = [0, 8], sizes = [18, 8], strides = [1, 1]} : vector<18x32xf32> to vector<18x8xf32>
    %cst_187 = arith.constant dense<0.000000e+00> : vector<18x18xf32>
    %568 = tpu.matmul %566, %567, %cst_187 {dimension_numbers = #tpu.dot_dimension_numbers<[1], [1], [0], [0], [0, 0, 1, 0], [], []>} : vector<18x8xf32>, vector<18x8xf32>, vector<18x18xf32> -> vector<18x18xf32>
    %569 = vector.extract_strided_slice %560 {offsets = [0, 16], sizes = [18, 8], strides = [1, 1]} : vector<18x32xf32> to vector<18x8xf32>
    %570 = vector.extract_strided_slice %561 {offsets = [0, 16], sizes = [18, 8], strides = [1, 1]} : vector<18x32xf32> to vector<18x8xf32>
    %cst_188 = arith.constant dense<0.000000e+00> : vector<18x18xf32>
    %571 = tpu.matmul %569, %570, %cst_188 {dimension_numbers = #tpu.dot_dimension_numbers<[1], [1], [0], [0], [0, 0, 1, 0], [], []>} : vector<18x8xf32>, vector<18x8xf32>, vector<18x18xf32> -> vector<18x18xf32>
    %572 = vector.extract_strided_slice %560 {offsets = [0, 24], sizes = [18, 8], strides = [1, 1]} : vector<18x32xf32> to vector<18x8xf32>
    %573 = vector.extract_strided_slice %561 {offsets = [0, 24], sizes = [18, 8], strides = [1, 1]} : vector<18x32xf32> to vector<18x8xf32>
    %cst_189 = arith.constant dense<0.000000e+00> : vector<18x18xf32>
    %574 = tpu.matmul %572, %573, %cst_189 {dimension_numbers = #tpu.dot_dimension_numbers<[1], [1], [0], [0], [0, 0, 1, 0], [], []>} : vector<18x8xf32>, vector<18x8xf32>, vector<18x18xf32> -> vector<18x18xf32>
    %575 = tpu.concatenate %565, %568, %571, %574 in 1 : vector<18x18xf32>, vector<18x18xf32>, vector<18x18xf32>, vector<18x18xf32> -> vector<18x72xf32>
    %c1328_190 = arith.constant 1328 : index
    %c0_191 = arith.constant 0 : index
    %576 = vector.load %arg1[%c1328_190, %c0_191] : memref<1400x128xf32, #tpu.memory_space<vmem>>, vector<18x72xf32>
    %577 = arith.addf %575, %576 : vector<18x72xf32>
    %cst_192 = arith.constant dense<0xFF800000> : vector<18xf32>
    %578 = vector.multi_reduction <maximumf>, %577, %cst_192 [1] : vector<18x72xf32> to vector<18xf32>
    %579 = vector.shape_cast %578 : vector<18xf32> to vector<18x1xf32>
    %580 = vector.broadcast %579 : vector<18x1xf32> to vector<18x72xf32>
    %581 = arith.subf %577, %580 : vector<18x72xf32>
    %582 = math.exp %581 : vector<18x72xf32>
    %583 = vector.extract_strided_slice %582 {offsets = [0, 0], sizes = [18, 18], strides = [1, 1]} : vector<18x72xf32> to vector<18x18xf32>
    %cst_193 = arith.constant dense<0.000000e+00> : vector<18xf32>
    %584 = vector.multi_reduction <add>, %583, %cst_193 [1] : vector<18x18xf32> to vector<18xf32>
    %585 = vector.shape_cast %584 : vector<18xf32> to vector<18x1xf32>
    %586 = tpu.reciprocal %585 {approx = true} : vector<18x1xf32> -> vector<18x1xf32>
    %587 = vector.extract_strided_slice %562 {offsets = [0, 0], sizes = [18, 8], strides = [1, 1]} : vector<18x32xf32> to vector<18x8xf32>
    %cst_194 = arith.constant dense<0.000000e+00> : vector<18x8xf32>
    %588 = tpu.matmul %583, %587, %cst_194 {dimension_numbers = #tpu.dot_dimension_numbers<[1], [0], [0], [1], [0, 0, 1, 1], [], []>} : vector<18x18xf32>, vector<18x8xf32>, vector<18x8xf32> -> vector<18x8xf32>
    %589 = vector.broadcast %586 : vector<18x1xf32> to vector<18x8xf32>
    %590 = arith.mulf %588, %589 : vector<18x8xf32>
    %591 = vector.extract_strided_slice %582 {offsets = [0, 18], sizes = [18, 18], strides = [1, 1]} : vector<18x72xf32> to vector<18x18xf32>
    %cst_195 = arith.constant dense<0.000000e+00> : vector<18xf32>
    %592 = vector.multi_reduction <add>, %591, %cst_195 [1] : vector<18x18xf32> to vector<18xf32>
    %593 = vector.shape_cast %592 : vector<18xf32> to vector<18x1xf32>
    %594 = tpu.reciprocal %593 {approx = true} : vector<18x1xf32> -> vector<18x1xf32>
    %595 = vector.extract_strided_slice %562 {offsets = [0, 8], sizes = [18, 8], strides = [1, 1]} : vector<18x32xf32> to vector<18x8xf32>
    %cst_196 = arith.constant dense<0.000000e+00> : vector<18x8xf32>
    %596 = tpu.matmul %591, %595, %cst_196 {dimension_numbers = #tpu.dot_dimension_numbers<[1], [0], [0], [1], [0, 0, 1, 1], [], []>} : vector<18x18xf32>, vector<18x8xf32>, vector<18x8xf32> -> vector<18x8xf32>
    %597 = vector.broadcast %594 : vector<18x1xf32> to vector<18x8xf32>
    %598 = arith.mulf %596, %597 : vector<18x8xf32>
    %599 = vector.extract_strided_slice %582 {offsets = [0, 36], sizes = [18, 18], strides = [1, 1]} : vector<18x72xf32> to vector<18x18xf32>
    %cst_197 = arith.constant dense<0.000000e+00> : vector<18xf32>
    %600 = vector.multi_reduction <add>, %599, %cst_197 [1] : vector<18x18xf32> to vector<18xf32>
    %601 = vector.shape_cast %600 : vector<18xf32> to vector<18x1xf32>
    %602 = tpu.reciprocal %601 {approx = true} : vector<18x1xf32> -> vector<18x1xf32>
    %603 = vector.extract_strided_slice %562 {offsets = [0, 16], sizes = [18, 8], strides = [1, 1]} : vector<18x32xf32> to vector<18x8xf32>
    %cst_198 = arith.constant dense<0.000000e+00> : vector<18x8xf32>
    %604 = tpu.matmul %599, %603, %cst_198 {dimension_numbers = #tpu.dot_dimension_numbers<[1], [0], [0], [1], [0, 0, 1, 1], [], []>} : vector<18x18xf32>, vector<18x8xf32>, vector<18x8xf32> -> vector<18x8xf32>
    %605 = vector.broadcast %602 : vector<18x1xf32> to vector<18x8xf32>
    %606 = arith.mulf %604, %605 : vector<18x8xf32>
    %607 = vector.extract_strided_slice %582 {offsets = [0, 54], sizes = [18, 18], strides = [1, 1]} : vector<18x72xf32> to vector<18x18xf32>
    %cst_199 = arith.constant dense<0.000000e+00> : vector<18xf32>
    %608 = vector.multi_reduction <add>, %607, %cst_199 [1] : vector<18x18xf32> to vector<18xf32>
    %609 = vector.shape_cast %608 : vector<18xf32> to vector<18x1xf32>
    %610 = tpu.reciprocal %609 {approx = true} : vector<18x1xf32> -> vector<18x1xf32>
    %611 = vector.extract_strided_slice %562 {offsets = [0, 24], sizes = [18, 8], strides = [1, 1]} : vector<18x32xf32> to vector<18x8xf32>
    %cst_200 = arith.constant dense<0.000000e+00> : vector<18x8xf32>
    %612 = tpu.matmul %607, %611, %cst_200 {dimension_numbers = #tpu.dot_dimension_numbers<[1], [0], [0], [1], [0, 0, 1, 1], [], []>} : vector<18x18xf32>, vector<18x8xf32>, vector<18x8xf32> -> vector<18x8xf32>
    %613 = vector.broadcast %610 : vector<18x1xf32> to vector<18x8xf32>
    %614 = arith.mulf %612, %613 : vector<18x8xf32>
    %615 = tpu.concatenate %590, %598, %606, %614 in 1 : vector<18x8xf32>, vector<18x8xf32>, vector<18x8xf32>, vector<18x8xf32> -> vector<18x32xf32>
    %c912 = arith.constant 912 : index
    %c0_201 = arith.constant 0 : index
    %616 = vector.load %arg1[%c912, %c0_201] : memref<1400x128xf32, #tpu.memory_space<vmem>>, vector<32x32xf32>
    %cst_202 = arith.constant dense<0.000000e+00> : vector<18x32xf32>
    %617 = tpu.matmul %615, %616, %cst_202 {dimension_numbers = #tpu.dot_dimension_numbers<[1], [0], [0], [1], [0, 0, 1, 1], [], []>} : vector<18x32xf32>, vector<32x32xf32>, vector<18x32xf32> -> vector<18x32xf32>
    %c944 = arith.constant 944 : index
    %c0_203 = arith.constant 0 : index
    %618 = vector.load %arg1[%c944, %c0_203] : memref<1400x128xf32, #tpu.memory_space<vmem>>, vector<1x32xf32>
    %619 = vector.broadcast %618 : vector<1x32xf32> to vector<18x32xf32>
    %620 = arith.addf %617, %619 : vector<18x32xf32>
    %621 = arith.addf %529, %620 : vector<18x32xf32>
    %cst_204 = arith.constant dense<0.000000e+00> : vector<18xf32>
    %622 = vector.multi_reduction <add>, %621, %cst_204 [1] : vector<18x32xf32> to vector<18xf32>
    %623 = vector.shape_cast %622 : vector<18xf32> to vector<18x1xf32>
    %cst_205 = arith.constant 3.200000e+01 : f32
    %624 = vector.broadcast %cst_205 : f32 to vector<18x1xf32>
    %625 = arith.divf %623, %624 : vector<18x1xf32>
    %626 = vector.broadcast %625 : vector<18x1xf32> to vector<18x32xf32>
    %627 = arith.subf %621, %626 : vector<18x32xf32>
    %628 = arith.mulf %627, %627 : vector<18x32xf32>
    %cst_206 = arith.constant dense<0.000000e+00> : vector<18xf32>
    %629 = vector.multi_reduction <add>, %628, %cst_206 [1] : vector<18x32xf32> to vector<18xf32>
    %630 = vector.shape_cast %629 : vector<18xf32> to vector<18x1xf32>
    %cst_207 = arith.constant 0.0322580636 : f32
    %631 = vector.broadcast %cst_207 : f32 to vector<18x1xf32>
    %632 = arith.mulf %630, %631 : vector<18x1xf32>
    %633 = math.sqrt %632 : vector<18x1xf32>
    %cst_208 = arith.constant 9.99999997E-7 : f32
    %634 = vector.broadcast %cst_208 : f32 to vector<18x1xf32>
    %635 = arith.addf %633, %634 : vector<18x1xf32>
    %636 = tpu.reciprocal %635 {approx = true} : vector<18x1xf32> -> vector<18x1xf32>
    %c952 = arith.constant 952 : index
    %c0_209 = arith.constant 0 : index
    %637 = vector.load %arg1[%c952, %c0_209] : memref<1400x128xf32, #tpu.memory_space<vmem>>, vector<1x32xf32>
    %638 = vector.broadcast %625 : vector<18x1xf32> to vector<18x32xf32>
    %639 = arith.subf %621, %638 : vector<18x32xf32>
    %640 = vector.broadcast %637 : vector<1x32xf32> to vector<18x32xf32>
    %641 = arith.mulf %640, %639 : vector<18x32xf32>
    %642 = vector.broadcast %636 : vector<18x1xf32> to vector<18x32xf32>
    %643 = arith.mulf %641, %642 : vector<18x32xf32>
    %c960 = arith.constant 960 : index
    %c0_210 = arith.constant 0 : index
    %644 = vector.load %arg1[%c960, %c0_210] : memref<1400x128xf32, #tpu.memory_space<vmem>>, vector<1x32xf32>
    %645 = vector.broadcast %644 : vector<1x32xf32> to vector<18x32xf32>
    %646 = arith.addf %643, %645 : vector<18x32xf32>
    %c968 = arith.constant 968 : index
    %c0_211 = arith.constant 0 : index
    %647 = vector.load %arg1[%c968, %c0_211] : memref<1400x128xf32, #tpu.memory_space<vmem>>, vector<32x32xf32>
    %cst_212 = arith.constant dense<0.000000e+00> : vector<18x32xf32>
    %648 = tpu.matmul %646, %647, %cst_212 {dimension_numbers = #tpu.dot_dimension_numbers<[1], [0], [0], [1], [0, 0, 1, 1], [], []>} : vector<18x32xf32>, vector<32x32xf32>, vector<18x32xf32> -> vector<18x32xf32>
    %c1000 = arith.constant 1000 : index
    %c0_213 = arith.constant 0 : index
    %649 = vector.load %arg1[%c1000, %c0_213] : memref<1400x128xf32, #tpu.memory_space<vmem>>, vector<1x32xf32>
    %650 = vector.broadcast %649 : vector<1x32xf32> to vector<18x32xf32>
    %651 = arith.addf %648, %650 : vector<18x32xf32>
    %c1008 = arith.constant 1008 : index
    %c0_214 = arith.constant 0 : index
    %652 = vector.load %arg1[%c1008, %c0_214] : memref<1400x128xf32, #tpu.memory_space<vmem>>, vector<32x64xf32>
    %cst_215 = arith.constant dense<0.000000e+00> : vector<16x64xf32>
    %653 = tpu.matmul %296, %652, %cst_215 {dimension_numbers = #tpu.dot_dimension_numbers<[1], [0], [0], [1], [0, 0, 1, 1], [], []>} : vector<16x32xf32>, vector<32x64xf32>, vector<16x64xf32> -> vector<16x64xf32>
    %c1040 = arith.constant 1040 : index
    %c0_216 = arith.constant 0 : index
    %654 = vector.load %arg1[%c1040, %c0_216] : memref<1400x128xf32, #tpu.memory_space<vmem>>, vector<1x64xf32>
    %655 = vector.broadcast %654 : vector<1x64xf32> to vector<16x64xf32>
    %656 = arith.addf %653, %655 : vector<16x64xf32>
    %657 = vector.extract_strided_slice %656 {offsets = [0, 0], sizes = [16, 32], strides = [1, 1]} : vector<16x64xf32> to vector<16x32xf32>
    %658 = vector.extract_strided_slice %656 {offsets = [0, 32], sizes = [16, 32], strides = [1, 1]} : vector<16x64xf32> to vector<16x32xf32>
    %659 = vector.extract_strided_slice %651 {offsets = [0, 0], sizes = [18, 8], strides = [1, 1]} : vector<18x32xf32> to vector<18x8xf32>
    %660 = vector.extract_strided_slice %657 {offsets = [0, 0], sizes = [16, 8], strides = [1, 1]} : vector<16x32xf32> to vector<16x8xf32>
    %cst_217 = arith.constant dense<0.000000e+00> : vector<18x16xf32>
    %661 = tpu.matmul %659, %660, %cst_217 {dimension_numbers = #tpu.dot_dimension_numbers<[1], [1], [0], [0], [0, 0, 1, 0], [], []>} : vector<18x8xf32>, vector<16x8xf32>, vector<18x16xf32> -> vector<18x16xf32>
    %662 = vector.extract_strided_slice %651 {offsets = [0, 8], sizes = [18, 8], strides = [1, 1]} : vector<18x32xf32> to vector<18x8xf32>
    %663 = vector.extract_strided_slice %657 {offsets = [0, 8], sizes = [16, 8], strides = [1, 1]} : vector<16x32xf32> to vector<16x8xf32>
    %cst_218 = arith.constant dense<0.000000e+00> : vector<18x16xf32>
    %664 = tpu.matmul %662, %663, %cst_218 {dimension_numbers = #tpu.dot_dimension_numbers<[1], [1], [0], [0], [0, 0, 1, 0], [], []>} : vector<18x8xf32>, vector<16x8xf32>, vector<18x16xf32> -> vector<18x16xf32>
    %665 = vector.extract_strided_slice %651 {offsets = [0, 16], sizes = [18, 8], strides = [1, 1]} : vector<18x32xf32> to vector<18x8xf32>
    %666 = vector.extract_strided_slice %657 {offsets = [0, 16], sizes = [16, 8], strides = [1, 1]} : vector<16x32xf32> to vector<16x8xf32>
    %cst_219 = arith.constant dense<0.000000e+00> : vector<18x16xf32>
    %667 = tpu.matmul %665, %666, %cst_219 {dimension_numbers = #tpu.dot_dimension_numbers<[1], [1], [0], [0], [0, 0, 1, 0], [], []>} : vector<18x8xf32>, vector<16x8xf32>, vector<18x16xf32> -> vector<18x16xf32>
    %668 = vector.extract_strided_slice %651 {offsets = [0, 24], sizes = [18, 8], strides = [1, 1]} : vector<18x32xf32> to vector<18x8xf32>
    %669 = vector.extract_strided_slice %657 {offsets = [0, 24], sizes = [16, 8], strides = [1, 1]} : vector<16x32xf32> to vector<16x8xf32>
    %cst_220 = arith.constant dense<0.000000e+00> : vector<18x16xf32>
    %670 = tpu.matmul %668, %669, %cst_220 {dimension_numbers = #tpu.dot_dimension_numbers<[1], [1], [0], [0], [0, 0, 1, 0], [], []>} : vector<18x8xf32>, vector<16x8xf32>, vector<18x16xf32> -> vector<18x16xf32>
    %671 = tpu.concatenate %661, %664, %667, %670 in 1 : vector<18x16xf32>, vector<18x16xf32>, vector<18x16xf32>, vector<18x16xf32> -> vector<18x64xf32>
    %c1352_221 = arith.constant 1352 : index
    %c0_222 = arith.constant 0 : index
    %672 = vector.load %arg1[%c1352_221, %c0_222] : memref<1400x128xf32, #tpu.memory_space<vmem>>, vector<18x64xf32>
    %673 = arith.addf %671, %672 : vector<18x64xf32>
    %cst_223 = arith.constant dense<0xFF800000> : vector<18xf32>
    %674 = vector.multi_reduction <maximumf>, %673, %cst_223 [1] : vector<18x64xf32> to vector<18xf32>
    %675 = vector.shape_cast %674 : vector<18xf32> to vector<18x1xf32>
    %676 = vector.broadcast %675 : vector<18x1xf32> to vector<18x64xf32>
    %677 = arith.subf %673, %676 : vector<18x64xf32>
    %678 = math.exp %677 : vector<18x64xf32>
    %679 = vector.extract_strided_slice %678 {offsets = [0, 0], sizes = [18, 16], strides = [1, 1]} : vector<18x64xf32> to vector<18x16xf32>
    %cst_224 = arith.constant dense<0.000000e+00> : vector<18xf32>
    %680 = vector.multi_reduction <add>, %679, %cst_224 [1] : vector<18x16xf32> to vector<18xf32>
    %681 = vector.shape_cast %680 : vector<18xf32> to vector<18x1xf32>
    %682 = tpu.reciprocal %681 {approx = true} : vector<18x1xf32> -> vector<18x1xf32>
    %683 = vector.extract_strided_slice %658 {offsets = [0, 0], sizes = [16, 8], strides = [1, 1]} : vector<16x32xf32> to vector<16x8xf32>
    %cst_225 = arith.constant dense<0.000000e+00> : vector<18x8xf32>
    %684 = tpu.matmul %679, %683, %cst_225 {dimension_numbers = #tpu.dot_dimension_numbers<[1], [0], [0], [1], [0, 0, 1, 1], [], []>} : vector<18x16xf32>, vector<16x8xf32>, vector<18x8xf32> -> vector<18x8xf32>
    %685 = vector.broadcast %682 : vector<18x1xf32> to vector<18x8xf32>
    %686 = arith.mulf %684, %685 : vector<18x8xf32>
    %687 = vector.extract_strided_slice %678 {offsets = [0, 16], sizes = [18, 16], strides = [1, 1]} : vector<18x64xf32> to vector<18x16xf32>
    %cst_226 = arith.constant dense<0.000000e+00> : vector<18xf32>
    %688 = vector.multi_reduction <add>, %687, %cst_226 [1] : vector<18x16xf32> to vector<18xf32>
    %689 = vector.shape_cast %688 : vector<18xf32> to vector<18x1xf32>
    %690 = tpu.reciprocal %689 {approx = true} : vector<18x1xf32> -> vector<18x1xf32>
    %691 = vector.extract_strided_slice %658 {offsets = [0, 8], sizes = [16, 8], strides = [1, 1]} : vector<16x32xf32> to vector<16x8xf32>
    %cst_227 = arith.constant dense<0.000000e+00> : vector<18x8xf32>
    %692 = tpu.matmul %687, %691, %cst_227 {dimension_numbers = #tpu.dot_dimension_numbers<[1], [0], [0], [1], [0, 0, 1, 1], [], []>} : vector<18x16xf32>, vector<16x8xf32>, vector<18x8xf32> -> vector<18x8xf32>
    %693 = vector.broadcast %690 : vector<18x1xf32> to vector<18x8xf32>
    %694 = arith.mulf %692, %693 : vector<18x8xf32>
    %695 = vector.extract_strided_slice %678 {offsets = [0, 32], sizes = [18, 16], strides = [1, 1]} : vector<18x64xf32> to vector<18x16xf32>
    %cst_228 = arith.constant dense<0.000000e+00> : vector<18xf32>
    %696 = vector.multi_reduction <add>, %695, %cst_228 [1] : vector<18x16xf32> to vector<18xf32>
    %697 = vector.shape_cast %696 : vector<18xf32> to vector<18x1xf32>
    %698 = tpu.reciprocal %697 {approx = true} : vector<18x1xf32> -> vector<18x1xf32>
    %699 = vector.extract_strided_slice %658 {offsets = [0, 16], sizes = [16, 8], strides = [1, 1]} : vector<16x32xf32> to vector<16x8xf32>
    %cst_229 = arith.constant dense<0.000000e+00> : vector<18x8xf32>
    %700 = tpu.matmul %695, %699, %cst_229 {dimension_numbers = #tpu.dot_dimension_numbers<[1], [0], [0], [1], [0, 0, 1, 1], [], []>} : vector<18x16xf32>, vector<16x8xf32>, vector<18x8xf32> -> vector<18x8xf32>
    %701 = vector.broadcast %698 : vector<18x1xf32> to vector<18x8xf32>
    %702 = arith.mulf %700, %701 : vector<18x8xf32>
    %703 = vector.extract_strided_slice %678 {offsets = [0, 48], sizes = [18, 16], strides = [1, 1]} : vector<18x64xf32> to vector<18x16xf32>
    %cst_230 = arith.constant dense<0.000000e+00> : vector<18xf32>
    %704 = vector.multi_reduction <add>, %703, %cst_230 [1] : vector<18x16xf32> to vector<18xf32>
    %705 = vector.shape_cast %704 : vector<18xf32> to vector<18x1xf32>
    %706 = tpu.reciprocal %705 {approx = true} : vector<18x1xf32> -> vector<18x1xf32>
    %707 = vector.extract_strided_slice %658 {offsets = [0, 24], sizes = [16, 8], strides = [1, 1]} : vector<16x32xf32> to vector<16x8xf32>
    %cst_231 = arith.constant dense<0.000000e+00> : vector<18x8xf32>
    %708 = tpu.matmul %703, %707, %cst_231 {dimension_numbers = #tpu.dot_dimension_numbers<[1], [0], [0], [1], [0, 0, 1, 1], [], []>} : vector<18x16xf32>, vector<16x8xf32>, vector<18x8xf32> -> vector<18x8xf32>
    %709 = vector.broadcast %706 : vector<18x1xf32> to vector<18x8xf32>
    %710 = arith.mulf %708, %709 : vector<18x8xf32>
    %711 = tpu.concatenate %686, %694, %702, %710 in 1 : vector<18x8xf32>, vector<18x8xf32>, vector<18x8xf32>, vector<18x8xf32> -> vector<18x32xf32>
    %c1048 = arith.constant 1048 : index
    %c0_232 = arith.constant 0 : index
    %712 = vector.load %arg1[%c1048, %c0_232] : memref<1400x128xf32, #tpu.memory_space<vmem>>, vector<32x32xf32>
    %cst_233 = arith.constant dense<0.000000e+00> : vector<18x32xf32>
    %713 = tpu.matmul %711, %712, %cst_233 {dimension_numbers = #tpu.dot_dimension_numbers<[1], [0], [0], [1], [0, 0, 1, 1], [], []>} : vector<18x32xf32>, vector<32x32xf32>, vector<18x32xf32> -> vector<18x32xf32>
    %c1080 = arith.constant 1080 : index
    %c0_234 = arith.constant 0 : index
    %714 = vector.load %arg1[%c1080, %c0_234] : memref<1400x128xf32, #tpu.memory_space<vmem>>, vector<1x32xf32>
    %715 = vector.broadcast %714 : vector<1x32xf32> to vector<18x32xf32>
    %716 = arith.addf %713, %715 : vector<18x32xf32>
    %717 = arith.addf %621, %716 : vector<18x32xf32>
    %cst_235 = arith.constant dense<0.000000e+00> : vector<18xf32>
    %718 = vector.multi_reduction <add>, %717, %cst_235 [1] : vector<18x32xf32> to vector<18xf32>
    %719 = vector.shape_cast %718 : vector<18xf32> to vector<18x1xf32>
    %cst_236 = arith.constant 3.200000e+01 : f32
    %720 = vector.broadcast %cst_236 : f32 to vector<18x1xf32>
    %721 = arith.divf %719, %720 : vector<18x1xf32>
    %722 = vector.broadcast %721 : vector<18x1xf32> to vector<18x32xf32>
    %723 = arith.subf %717, %722 : vector<18x32xf32>
    %724 = arith.mulf %723, %723 : vector<18x32xf32>
    %cst_237 = arith.constant dense<0.000000e+00> : vector<18xf32>
    %725 = vector.multi_reduction <add>, %724, %cst_237 [1] : vector<18x32xf32> to vector<18xf32>
    %726 = vector.shape_cast %725 : vector<18xf32> to vector<18x1xf32>
    %cst_238 = arith.constant 0.0322580636 : f32
    %727 = vector.broadcast %cst_238 : f32 to vector<18x1xf32>
    %728 = arith.mulf %726, %727 : vector<18x1xf32>
    %729 = math.sqrt %728 : vector<18x1xf32>
    %cst_239 = arith.constant 9.99999997E-7 : f32
    %730 = vector.broadcast %cst_239 : f32 to vector<18x1xf32>
    %731 = arith.addf %729, %730 : vector<18x1xf32>
    %732 = tpu.reciprocal %731 {approx = true} : vector<18x1xf32> -> vector<18x1xf32>
    %c1088 = arith.constant 1088 : index
    %c0_240 = arith.constant 0 : index
    %733 = vector.load %arg1[%c1088, %c0_240] : memref<1400x128xf32, #tpu.memory_space<vmem>>, vector<1x32xf32>
    %734 = vector.broadcast %721 : vector<18x1xf32> to vector<18x32xf32>
    %735 = arith.subf %717, %734 : vector<18x32xf32>
    %736 = vector.broadcast %733 : vector<1x32xf32> to vector<18x32xf32>
    %737 = arith.mulf %736, %735 : vector<18x32xf32>
    %738 = vector.broadcast %732 : vector<18x1xf32> to vector<18x32xf32>
    %739 = arith.mulf %737, %738 : vector<18x32xf32>
    %c1096 = arith.constant 1096 : index
    %c0_241 = arith.constant 0 : index
    %740 = vector.load %arg1[%c1096, %c0_241] : memref<1400x128xf32, #tpu.memory_space<vmem>>, vector<1x32xf32>
    %741 = vector.broadcast %740 : vector<1x32xf32> to vector<18x32xf32>
    %742 = arith.addf %739, %741 : vector<18x32xf32>
    %c1104 = arith.constant 1104 : index
    %c0_242 = arith.constant 0 : index
    %743 = vector.load %arg1[%c1104, %c0_242] : memref<1400x128xf32, #tpu.memory_space<vmem>>, vector<32x64xf32>
    %cst_243 = arith.constant dense<0.000000e+00> : vector<18x64xf32>
    %744 = tpu.matmul %742, %743, %cst_243 {dimension_numbers = #tpu.dot_dimension_numbers<[1], [0], [0], [1], [0, 0, 1, 1], [], []>} : vector<18x32xf32>, vector<32x64xf32>, vector<18x64xf32> -> vector<18x64xf32>
    %c1136 = arith.constant 1136 : index
    %c0_244 = arith.constant 0 : index
    %745 = vector.load %arg1[%c1136, %c0_244] : memref<1400x128xf32, #tpu.memory_space<vmem>>, vector<1x64xf32>
    %746 = vector.broadcast %745 : vector<1x64xf32> to vector<18x64xf32>
    %747 = arith.addf %744, %746 : vector<18x64xf32>
    %cst_245 = arith.constant 0.000000e+00 : f32
    %748 = vector.broadcast %cst_245 : f32 to vector<18x64xf32>
    %749 = arith.maximumf %747, %748 : vector<18x64xf32>
    %c1144 = arith.constant 1144 : index
    %c0_246 = arith.constant 0 : index
    %750 = vector.load %arg1[%c1144, %c0_246] : memref<1400x128xf32, #tpu.memory_space<vmem>>, vector<64x32xf32>
    %cst_247 = arith.constant dense<0.000000e+00> : vector<18x32xf32>
    %751 = tpu.matmul %749, %750, %cst_247 {dimension_numbers = #tpu.dot_dimension_numbers<[1], [0], [0], [1], [0, 0, 1, 1], [], []>} : vector<18x64xf32>, vector<64x32xf32>, vector<18x32xf32> -> vector<18x32xf32>
    %c1208 = arith.constant 1208 : index
    %c0_248 = arith.constant 0 : index
    %752 = vector.load %arg1[%c1208, %c0_248] : memref<1400x128xf32, #tpu.memory_space<vmem>>, vector<1x32xf32>
    %753 = vector.broadcast %752 : vector<1x32xf32> to vector<18x32xf32>
    %754 = arith.addf %751, %753 : vector<18x32xf32>
    %755 = arith.addf %717, %754 : vector<18x32xf32>
    %cst_249 = arith.constant dense<0.000000e+00> : vector<18xf32>
    %756 = vector.multi_reduction <add>, %755, %cst_249 [1] : vector<18x32xf32> to vector<18xf32>
    %757 = vector.shape_cast %756 : vector<18xf32> to vector<18x1xf32>
    %cst_250 = arith.constant 3.200000e+01 : f32
    %758 = vector.broadcast %cst_250 : f32 to vector<18x1xf32>
    %759 = arith.divf %757, %758 : vector<18x1xf32>
    %760 = vector.broadcast %759 : vector<18x1xf32> to vector<18x32xf32>
    %761 = arith.subf %755, %760 : vector<18x32xf32>
    %762 = arith.mulf %761, %761 : vector<18x32xf32>
    %cst_251 = arith.constant dense<0.000000e+00> : vector<18xf32>
    %763 = vector.multi_reduction <add>, %762, %cst_251 [1] : vector<18x32xf32> to vector<18xf32>
    %764 = vector.shape_cast %763 : vector<18xf32> to vector<18x1xf32>
    %cst_252 = arith.constant 0.0322580636 : f32
    %765 = vector.broadcast %cst_252 : f32 to vector<18x1xf32>
    %766 = arith.mulf %764, %765 : vector<18x1xf32>
    %767 = math.sqrt %766 : vector<18x1xf32>
    %cst_253 = arith.constant 9.99999997E-7 : f32
    %768 = vector.broadcast %cst_253 : f32 to vector<18x1xf32>
    %769 = arith.addf %767, %768 : vector<18x1xf32>
    %770 = tpu.reciprocal %769 {approx = true} : vector<18x1xf32> -> vector<18x1xf32>
    %c1216 = arith.constant 1216 : index
    %c0_254 = arith.constant 0 : index
    %771 = vector.load %arg1[%c1216, %c0_254] : memref<1400x128xf32, #tpu.memory_space<vmem>>, vector<1x32xf32>
    %772 = vector.broadcast %759 : vector<18x1xf32> to vector<18x32xf32>
    %773 = arith.subf %755, %772 : vector<18x32xf32>
    %774 = vector.broadcast %771 : vector<1x32xf32> to vector<18x32xf32>
    %775 = arith.mulf %774, %773 : vector<18x32xf32>
    %776 = vector.broadcast %770 : vector<18x1xf32> to vector<18x32xf32>
    %777 = arith.mulf %775, %776 : vector<18x32xf32>
    %c1224 = arith.constant 1224 : index
    %c0_255 = arith.constant 0 : index
    %778 = vector.load %arg1[%c1224, %c0_255] : memref<1400x128xf32, #tpu.memory_space<vmem>>, vector<1x32xf32>
    %779 = vector.broadcast %778 : vector<1x32xf32> to vector<18x32xf32>
    %780 = arith.addf %777, %779 : vector<18x32xf32>
    %c1232 = arith.constant 1232 : index
    %c0_256 = arith.constant 0 : index
    %781 = vector.load %arg1[%c1232, %c0_256] : memref<1400x128xf32, #tpu.memory_space<vmem>>, vector<32x3xf32>
    %cst_257 = arith.constant dense<0.000000e+00> : vector<18x3xf32>
    %782 = tpu.matmul %780, %781, %cst_257 {dimension_numbers = #tpu.dot_dimension_numbers<[1], [0], [0], [1], [0, 0, 1, 1], [], []>} : vector<18x32xf32>, vector<32x3xf32>, vector<18x3xf32> -> vector<18x3xf32>
    %c1264 = arith.constant 1264 : index
    %c0_258 = arith.constant 0 : index
    %783 = vector.load %arg1[%c1264, %c0_258] : memref<1400x128xf32, #tpu.memory_space<vmem>>, vector<1x3xf32>
    %784 = vector.broadcast %783 : vector<1x3xf32> to vector<18x3xf32>
    %785 = arith.addf %782, %784 : vector<18x3xf32>
    %786 = vector.extract_strided_slice %785 {offsets = [0, 0], sizes = [18, 2], strides = [1, 1]} : vector<18x3xf32> to vector<18x2xf32>
    %787 = vector.broadcast %4 : vector<1x2xf32> to vector<18x2xf32>
    %788 = arith.mulf %786, %787 : vector<18x2xf32>
    %789 = vector.broadcast %3 : vector<1x2xf32> to vector<18x2xf32>
    %790 = arith.addf %788, %789 : vector<18x2xf32>
    %c1376 = arith.constant 1376 : index
    %c0_259 = arith.constant 0 : index
    %791 = vector.load %arg1[%c1376, %c0_259] : memref<1400x128xf32, #tpu.memory_space<vmem>>, vector<18x18xf32>
    %cst_260 = arith.constant dense<0.000000e+00> : vector<18x2xf32>
    %792 = tpu.matmul %791, %790, %cst_260 {dimension_numbers = #tpu.dot_dimension_numbers<[1], [0], [0], [1], [0, 0, 1, 1], [], []>} : vector<18x18xf32>, vector<18x2xf32>, vector<18x2xf32> -> vector<18x2xf32>
    %793 = arith.addf %792, %2 : vector<18x2xf32>
    %cst_261 = arith.constant 0.000000e+00 : f32
    %794 = vector.broadcast %cst_261 : f32 to vector<18x123xf32>
    %795 = tpu.concatenate %793, %785, %794 in 1 : vector<18x2xf32>, vector<18x3xf32>, vector<18x123xf32> -> vector<18x128xf32>
    %c0_262 = arith.constant 0 : index
    %c0_263 = arith.constant 0 : index
    %796 = vector.load %arg2[%c0_262, %c0_263] : memref<18x128xf32, #tpu.memory_space<vmem>>, vector<18x128xf32>
    tpu.vector_store %arg2[%c0_262, %c0_263], %795 {strides = array<i32>} : memref<18x128xf32, #tpu.memory_space<vmem>>, vector<18x128xf32>,
    return
  }
}

</mosaic_0001>

<bundles_post_ra>
// kernel: forward.1
= control target key start
LH: loop header
LB: loop body
LE: loop exit
PB: predicated region body
PF: predicated region fallthrough
CT: control target
= control target key end

     0   :  { %7 = vsyncpa [#allocation3], 0  ;;  %s11040_s9 = smov [#allocation2]   ;;  %s12941_s0 = inlined_call_operand.vmem [shape: f32[72,128], index: 0, kind: input, shape index: {}]   ;;  %s12942_s1 = inlined_call_operand.hbm [shape: f32[1400,128], index: 1, kind: input, shape index: {}]   ;;  %s12943_s2 = inlined_call_operand.vmem [shape: f32[18,128], index: 2, kind: output, shape index: {}]  }
   0x1   :  { %s15_s10 = sshll.u32 %s11040_s9, 4  ;;  %s16_s10 = int_to_ptr.vmem [resolvable:$true] %s15_s10 }
   0x2   :  { %s11026_s11 = scalar_lea.vmem %s16_s10, 22400  ;;  %p11031_p1 = scmp.lt.s32.totalorder %s16_s10, %s16_s10 }
   0x3   :  { %p11027_p0 = scmp.ne.s32.totalorder %s16_s10, %s11026_s11  ;;  %p11032_p2 = scmp.lt.s32.totalorder %s11026_s11, %s11026_s11 }
   0x5   :  { %p11033_p3 = por %p11032_p2, %p11031_p1 }
   0x7   :  { %p11034_p4 = pnand %p11033_p3, %p11027_p0 }
   0x9   :  { %11037 = shalt.err (!%p11034_p4)
}
   0xa   :  { %s11041_s12 = smov 128   ;;  %s11042_s13 = smov 8  }
   0xb   :  { %21 = dma.hbm_to_vmem [thread:$0]  %s12942_s1, 22400, %s16_s10, [#allocation3], %s11041_s12, %s11041_s12, %s11042_s13  }
   0xc   :  { %11038 = dma.done.wait [#allocation3], 22400  }
   0xd   :  { %11039 = vsyncadd [#allocation3], 4294944896  ;;  %vm12946_vm0 = vcmask 1041408   ;;  %vm12944_vm1 = vcmask 15360   ;;  %v35_v0 = vld [vmem:[#allocation2] sm:$0x3] }
   0xe   :  { %v25_v1 = vld [vmem:[%s12941_s0] sm:$0xff]  ;;  %v26_v2 = vld [vmem:[%s12941_s0 + $0x8] sm:$0xff]  ;;  %9748 = vmatprep.subr.msk.mxu0 %vm12946_vm0, %v35_v0  ;;  %v127_v6 = vld [vmem:[#allocation2 + $0x4f8] sm:$0xff]  ;;  %vm131_vm2 = vcmask 261120   ;;  %vm283_vm7 = vcmask 64512   ;;  %s11043_s1 = smov 88  }
   0xf   :  { %9750 = vmatprep.mubr.msk.f32.mxu0 %vm12944_vm1, %v25_v1  ;;  %9749 = vmatpush3.msk.msra.mxu0 %vm12946_vm0, %v35_v0  ;;  %v9015_v4 = vld [vmem:[#allocation2 + $0x8] ss:$0 sm:$0xff]  ;;  %v128_v9 = vld [vmem:[#allocation2 + $0x500] sm:$0xff]  ;;  %v188_v26 = vld [vmem:[#allocation2 + $0x38] sm:$0xff]  ;;  %s11044_s20 = smov 96   ;;  %s11045_s21 = smov 120  }
  0x10   :  { %9751 = vmatmul.mubr.msk.f32.vlgmr.msra.gmra.mxu0 %vm12944_vm1, %v26_v2  ;;  %v190_v24 = vld [vmem:[#allocation2 + $0x48] sm:$0xff]  ;;  %v189_v25 = vld [vmem:[#allocation2 + $0x40] sm:$0xff]  ;;  %v187_v27 = vld [vmem:[#allocation2 + $0x30] sm:$0xff]  ;;  %s11046_s22 = smov 80   ;;  %s11047_s23 = smov 112   ;;  %vm664_vm8 = vcmask 130048  }
  0x11   :  { %9753 = vmatprep.subr.mxu1 %v190_v24  ;;  %v9019_v44 = vld [vmem:[#allocation2 + $0x20] ss:$0 sm:$0xff]  ;;  %v9020_v47 = vld [vmem:[#allocation2 + $0x28] ss:$0 sm:$0xff]  ;;  %v9021_v54 = vld [vmem:[#allocation2 + $0x50] ss:$0 sm:$0xff] }
  0x12   :  { %9754 = vmatpush3.msra.mxu1 %v190_v24  ;;  %s11048_s24 = smov 72   ;;  %s11049_s25 = smov 104   ;;  %vm669_vm9 = vcmask 392192   ;;  %v11174_v24 = vld [vmem:[#allocation2 + $0x528] sm:$0xff]  ;;  %vm676_vm10 = vcmask 523264   ;;  %vm1117_vm11 = vcmask 195584  }
  0x13   :  { %9755 = vmatprep.subr.mxu1 %v189_v25  ;;  %s11050_s26 = smov 16   ;;  %s11051_s27 = smov 32  }
  0x14   :  { %9756 = vmatpush3.msra.mxu1 %v189_v25  ;;  %s11052_s28 = smov 48   ;;  %s11053_s29 = smov 64  }
  0x15   :  { %9757 = vmatprep.subr.mxu1 %v188_v26  ;;  %s11054_s30 = smov 56   ;;  %s11055_s3 = smov 40  }
  0x16   :  { %9758 = vmatpush3.msra.mxu1 %v188_v26  ;;  %s11056_s4 = smov 24   ;;  %s11059_s11 = smov 18  }
  0x17   :  { %9759 = vmatprep.subr.mxu1 %v187_v27  ;;  %s11060_s12 = smov 54   ;;  %s11061_s14 = smov 36  }
  0x18   :  { %9760 = vmatpush3.msra.mxu1 %v187_v27  ;;  %s11062_s15 = smov 110   ;;  %s11063_s16 = smov 92  }
  0x19   :  { %s11064_s17 = smov 74  }
  0xd0   :  { %v9752_v3 = vpop.f32.mrf.mxu0 }
  0xd1   :  { %v124_v7 = vadd.f32 %v9752_v3, %v9015_v4 }
  0xd2   :  { %v118_v5 = vpop.f32.mrf.mxu0 }
  0xd3   :  { %v119_v8 = vadd.f32 %v9015_v4, %v118_v5  ;;  %v11097_v11 = vadd.f32 %v128_v9, %v124_v7 }
  0xd5   :  { %v11095_v10 = vadd.f32 %v127_v6, %v119_v8  ;;  %v135_v13 = vsel %vm131_vm2, %v11097_v11, 0.0 }
  0xd7   :  { %v132_v12 = vsel %vm131_vm2, %v11095_v10, 0.0 }
  0xd8   :  { %133 = vadd.xlane.f32.xlu0 %v132_v12 }
  0xdc   :  { %136 = vadd.xlane.f32.xlu0 %v135_v13 }
 0x161   :  { %v134_v14 = vpop.xlane.xlu0 %133 }
 0x162   :  { %v139_v15 = vmul.f32 0.03125, %v134_v14 }
 0x164   :  { %v141_v16 = vsub.f32 %v11095_v10, %v139_v15 }
 0x165   :  { %v137_v17 = vpop.xlane.xlu0 %136 }
 0x166   :  { %v140_v18 = vmul.f32 0.03125, %v137_v17  ;;  %v143_v19 = vmul.f32 %v141_v16, %v141_v16  ;;  %v176_v45 = vmul.f32 %v9019_v44, %v141_v16 }
 0x168   :  { %v142_v20 = vsub.f32 %v11097_v11, %v140_v18  ;;  %v145_v21 = vsel %vm131_vm2, %v143_v19, 0.0 }
 0x169   :  { %146 = vadd.xlane.f32.xlu1 %v145_v21 }
 0x16a   :  { %v144_v22 = vmul.f32 %v142_v20, %v142_v20  ;;  %v177_v49 = vmul.f32 %v9019_v44, %v142_v20 }
 0x16c   :  { %v148_v23 = vsel %vm131_vm2, %v144_v22, 0.0 }
 0x16d   :  { %149 = vadd.xlane.f32.xlu1 %v148_v23 }
 0x1f2   :  { %v147_v28 = vpop.xlane.xlu1 %146 }
 0x1f3   :  { %v151_v29 = vmul.f32 0.032258064, %v147_v28 }
 0x1f5   :  { %10728 = vrsqrt.f32 %v151_v29  ;;  %vm155_vm3 = vcmp.eq.f32.partialorder %v151_v29, inf  ;;  %v158_v34 = vand.u32 2147483648, %v151_v29  ;;  %vm157_vm4 = vcmp.eq.f32.partialorder %v151_v29, 0.0 }
 0x1f6   :  { %v150_v30 = vpop.xlane.xlu1 %149 }
 0x1f7   :  { %v152_v31 = vmul.f32 0.032258064, %v150_v30 }
 0x1f9   :  { %10730 = vrsqrt.f32 %v152_v31  ;;  %vm162_vm5 = vcmp.eq.f32.partialorder %v152_v31, inf  ;;  %v165_v40 = vand.u32 2147483648, %v152_v31  ;;  %vm164_vm6 = vcmp.eq.f32.partialorder %v152_v31, 0.0 }
 0x202   :  { %v10729_v32 = vpop.eup %10728 }
 0x203   :  { %v154_v33 = vmul.f32 %v10729_v32, %v151_v29 }
 0x205   :  { %v156_v35 = vsel %vm155_vm3, %v151_v29, %v154_v33  ;;  %v11179_v29 = vld [vmem:[#allocation2 + $0x520] sm:$0xff] }
 0x206   :  { %v10731_v36 = vpop.eup %10730  ;;  %v159_v37 = vsel %vm157_vm4, %v158_v34, %v156_v35 }
 0x207   :  { %v161_v38 = vmul.f32 %v10731_v36, %v152_v31  ;;  %v167_v39 = vadd.f32 1e-06, %v159_v37 }
 0x209   :  { %v163_v41 = vsel %vm162_vm5, %v152_v31, %v161_v38  ;;  %10732 = vrcp.f32 %v167_v39 }
 0x20a   :  { %v166_v42 = vsel %vm164_vm6, %v165_v40, %v163_v41 }
 0x20b   :  { %v168_v43 = vadd.f32 1e-06, %v166_v42 }
 0x20d   :  { %10734 = vrcp.f32 %v168_v43 }
 0x216   :  { %v10733_v46 = vpop.eup %10732 }
 0x217   :  { %v178_v48 = vmul.f32 %v10733_v46, %v176_v45 }
 0x219   :  { %v185_v50 = vadd.f32 %v9020_v47, %v178_v48 }
 0x21a   :  { %v10735_v51 = vpop.eup %10734 }
 0x21b   :  { %v179_v52 = vmul.f32 %v10735_v51, %v177_v49  ;;  %9761 = vmatprep.mubr.msk.f32.mxu1 %vm131_vm2, %v185_v50 }
 0x21d   :  { %v186_v53 = vadd.f32 %v9020_v47, %v179_v52 }
 0x21f   :  { %9762 = vmatmul.mubr.msk.f32.vlgmr.msra.gmra.mxu1 %vm131_vm2, %v186_v53 }
 0x2df   :  { %v9763_v55 = vpop.f32.mrf.mxu1 }
 0x2e0   :  { %v11109_v56 = vadd.f32 %v9763_v55, %v9021_v54 }
 0x2e1   :  { %v268_v57 = vpop.f32.mrf.mxu1 }
 0x2e2   :  { %v11111_v58 = vadd.f32 %v9021_v54, %v268_v57  ;;  %373 = vrot.lane.b32.xlu1 %v11109_v56, %s11043_s1  ;;  %281 = vrot.lane.b32.xlu0 %v11109_v56, %s11044_s20 }
 0x2e4   :  { %9768 = vmatprep.mubr.msk.f32.mxu0 %vm283_vm7, %v11111_v58 }
 0x2e6   :  { %369 = vrot.lane.b32.xlu1 %v11109_v56, %s11045_s21  ;;  %464 = vrot.lane.b32.xlu0 %v11109_v56, %s11046_s22 }
 0x2ea   :  { %460 = vrot.lane.b32.xlu1 %v11109_v56, %s11047_s23  ;;  %555 = vrot.lane.b32.xlu0 %v11109_v56, %s11048_s24 }
 0x2ee   :  { %462 = vrot.lane.b32.xlu0 %v11111_v58, %s11046_s22  ;;  %279 = vrot.lane.b32.xlu1 %v11111_v58, %s11044_s20 }
 0x2f2   :  { %458 = vrot.lane.b32.xlu0 %v11111_v58, %s11047_s23  ;;  %371 = vrot.lane.b32.xlu1 %v11111_v58, %s11043_s1 }
 0x2f6   :  { %549 = vrot.lane.b32.xlu0 %v11111_v58, %s11049_s25  ;;  %367 = vrot.lane.b32.xlu1 %v11111_v58, %s11045_s21 }
 0x2fa   :  { %553 = vrot.lane.b32.xlu1 %v11111_v58, %s11048_s24 }
 0x2fe   :  { %551 = vrot.lane.b32.xlu1 %v11109_v56, %s11049_s25 }
 0x354   :  { %v374_v59 = vpop.permute.xlu1 %373  ;;  %v282_v60 = vpop.permute.xlu0 %281 }
 0x355   :  { %9764 = vmatprep.subr.msk.mxu0 %vm283_vm7, %v282_v60  ;;  %9771 = vmatprep.subr.msk.mxu1 %vm283_vm7, %v374_v59 }
 0x356   :  { %9765 = vmatpush3.xpose.msk.msra.mxu0 %vm283_vm7, %v282_v60  ;;  %9772 = vmatpush3.xpose.msk.msra.mxu1 %vm283_vm7, %v374_v59 }
 0x358   :  { %v370_v61 = vpop.permute.xlu1 %369  ;;  %v465_v62 = vpop.permute.xlu0 %464 }
 0x35c   :  { %v461_v63 = vpop.permute.xlu1 %460  ;;  %v556_v0 = vpop.permute.xlu0 %555 }
 0x360   :  { %v463_v1 = vpop.permute.xlu0 %462  ;;  %v280_v2 = vpop.permute.xlu1 %279 }
 0x361   :  { %9766 = vmatprep.subr.msk.mxu0 %vm283_vm7, %v280_v2 }
 0x362   :  { %9767 = vmatpush3.xpose.msk.msra.mxu0 %vm283_vm7, %v280_v2 }
 0x363   :  { %9778 = vmatprep.subr.msk.mxu0 %vm283_vm7, %v465_v62 }
 0x364   :  { %v459_v3 = vpop.permute.xlu0 %458  ;;  %v372_v4 = vpop.permute.xlu1 %371 }
 0x365   :  { %9769 = vmatmul.mubr.msk.f32.vlgmr.msra.gmra.mxu0 %vm283_vm7, %v11109_v56  ;;  %9773 = vmatprep.subr.msk.mxu1 %vm283_vm7, %v372_v4 }
 0x366   :  { %9774 = vmatpush3.xpose.msk.msra.mxu1 %vm283_vm7, %v372_v4  ;;  %9779 = vmatpush3.xpose.msk.msra.mxu0 %vm283_vm7, %v465_v62 }
 0x367   :  { %9782 = vmatprep.mubr.msk.f32.mxu0 %vm283_vm7, %v459_v3  ;;  %9780 = vmatprep.subr.msk.mxu0 %vm283_vm7, %v463_v1 }
 0x368   :  { %9785 = vmatprep.subr.msk.mxu1 %vm283_vm7, %v556_v0  ;;  %v368_v5 = vpop.permute.xlu1 %367  ;;  %v550_v6 = vpop.permute.xlu0 %549 }
 0x369   :  { %9775 = vmatprep.mubr.msk.f32.mxu1 %vm283_vm7, %v368_v5 }
 0x36a   :  { %9776 = vmatmul.mubr.msk.f32.vlgmr.msra.gmra.mxu1 %vm283_vm7, %v370_v61  ;;  %9781 = vmatpush3.xpose.msk.msra.mxu0 %vm283_vm7, %v463_v1 }
 0x36b   :  { %9786 = vmatpush3.xpose.msk.msra.mxu1 %vm283_vm7, %v556_v0  ;;  %9789 = vmatprep.mubr.msk.f32.mxu1 %vm283_vm7, %v550_v6 }
 0x36c   :  { %v554_v7 = vpop.permute.xlu1 %553 }
 0x36d   :  { %9783 = vmatmul.mubr.msk.f32.vlgmr.msra.gmra.mxu0 %vm283_vm7, %v461_v63  ;;  %9787 = vmatprep.subr.msk.mxu1 %vm283_vm7, %v554_v7 }
 0x36f   :  { %9788 = vmatpush3.xpose.msk.msra.mxu1 %vm283_vm7, %v554_v7 }
 0x370   :  { %v552_v8 = vpop.permute.xlu1 %551 }
 0x372   :  { %9790 = vmatmul.mubr.msk.f32.vlgmr.msra.gmra.mxu1 %vm283_vm7, %v552_v8  ;;  %v1123_v8 = vld [vmem:[#allocation2 + $0x70] sm:$0xff] }
 0x373   :  { %9820 = vmatprep.subr.mxu1 %v1123_v8 }
 0x374   :  { %9821 = vmatpush3.msra.mxu1 %v1123_v8  ;;  %v1269_v8 = vld [vmem:[#allocation2 + $0xa8] sm:$0xff] }
 0x425   :  { %v9770_v9 = vpop.f32.mrf.mxu0 }
 0x427   :  { %v358_v13 = vpop.f32.mrf.mxu0 }
 0x42a   :  { %v9777_v12 = vpop.f32.mrf.mxu1 }
 0x42b   :  { %644 = vrot.lane.b32.xlu1 %v9777_v12, %s11050_s26 }
 0x42c   :  { %v449_v14 = vpop.f32.mrf.mxu1 }
 0x42d   :  { %642 = vrot.lane.b32.xlu0 %v449_v14, %s11050_s26  ;;  %v9784_v15 = vpop.f32.mrf.mxu0 }
 0x42f   :  { %652 = vrot.lane.b32.xlu1 %v9784_v15, %s11051_s27  ;;  %v540_v16 = vpop.f32.mrf.mxu0  ;;  %v1121_v15 = vld [vmem:[#allocation2 + $0x60] sm:$0xff] }
 0x431   :  { %650 = vrot.lane.b32.xlu0 %v540_v16, %s11051_s27 }
 0x432   :  { %v9791_v17 = vpop.f32.mrf.mxu1 }
 0x433   :  { %660 = vrot.lane.b32.xlu1 %v9791_v17, %s11052_s28 }
 0x434   :  { %v631_v18 = vpop.f32.mrf.mxu1 }
 0x435   :  { %658 = vrot.lane.b32.xlu0 %v631_v18, %s11052_s28 }
 0x49d   :  { %v645_v19 = vpop.permute.xlu1 %644 }
 0x49e   :  { %v666_v23 = vsel %vm664_vm8, %v9770_v9, %v645_v19  ;;  %v1122_v9 = vld [vmem:[#allocation2 + $0x68] sm:$0xff]  ;;  %v1120_v19 = vld [vmem:[#allocation2 + $0x58] sm:$0xff] }
 0x49f   :  { %v643_v20 = vpop.permute.xlu0 %642  ;;  %9822 = vmatprep.subr.mxu1 %v1122_v9 }
 0x4a0   :  { %v665_v27 = vsel %vm664_vm8, %v358_v13, %v643_v20  ;;  %9823 = vmatpush3.msra.mxu1 %v1122_v9  ;;  %v1268_v9 = vld [vmem:[#allocation2 + $0xa0] sm:$0xff] }
 0x4a1   :  { %v653_v21 = vpop.permute.xlu1 %652  ;;  %9824 = vmatprep.subr.mxu1 %v1121_v15 }
 0x4a2   :  { %v668_v25 = vsel %vm131_vm2, %v666_v23, %v653_v21  ;;  %9825 = vmatpush3.msra.mxu1 %v1121_v15  ;;  %v1364_v15 = vld [vmem:[#allocation2 + $0xe8] sm:$0xff] }
 0x4a3   :  { %v651_v22 = vpop.permute.xlu0 %650  ;;  %9826 = vmatprep.subr.mxu1 %v1120_v19 }
 0x4a4   :  { %v667_v30 = vsel %vm131_vm2, %v665_v27, %v651_v22  ;;  %9827 = vmatpush3.msra.mxu1 %v1120_v19 }
 0x4a5   :  { %v661_v26 = vpop.permute.xlu1 %660 }
 0x4a6   :  { %v671_v28 = vsel %vm669_vm9, %v668_v25, %v661_v26 }
 0x4a7   :  { %v659_v31 = vpop.permute.xlu0 %658  ;;  %v675_v32 = vadd.f32 %v11174_v24, %v671_v28 }
 0x4a8   :  { %v670_v33 = vsel %vm669_vm9, %v667_v30, %v659_v31 }
 0x4a9   :  { %v680_v34 = vsel %vm676_vm10, %v675_v32, -inf  ;;  %v674_v35 = vadd.f32 %v11179_v29, %v670_v33 }
 0x4aa   :  { %681 = vmax.xlane.f32.xlu1 %v680_v34 }
 0x4ab   :  { %v677_v36 = vsel %vm676_vm10, %v674_v35, -inf }
 0x4ac   :  { %678 = vmax.xlane.f32.xlu0 %v677_v36 }
 0x4bb   :  { %697 = vrot.lane.b32.xlu1 %v11111_v58, %s11053_s29 }
 0x4bf   :  { %800 = vrot.lane.b32.xlu1 %v11111_v58, %s11054_s30 }
 0x4c2   :  { %699 = vrot.lane.b32.xlu0 %v11109_v56, %s11053_s29 }
 0x4c3   :  { %901 = vrot.lane.b32.xlu1 %v11111_v58, %s11052_s28 }
 0x4c6   :  { %802 = vrot.lane.b32.xlu0 %v11109_v56, %s11054_s30 }
 0x4c7   :  { %1002 = vrot.lane.b32.xlu1 %v11111_v58, %s11055_s3 }
 0x4ca   :  { %903 = vrot.lane.b32.xlu0 %v11109_v56, %s11052_s28 }
 0x4ce   :  { %1004 = vrot.lane.b32.xlu0 %v11109_v56, %s11055_s3 }
 0x533   :  { %v682_v37 = vpop.xlane.xlu1 %681 }
 0x534   :  { %v684_v38 = vsub.f32 %v675_v32, %v682_v37 }
 0x535   :  { %v679_v39 = vpop.xlane.xlu0 %678 }
 0x536   :  { %v687_v40 = vmul.f32 1.442695, %v684_v38  ;;  %v683_v41 = vsub.f32 %v674_v35, %v679_v39 }
 0x537   :  { %v698_v44 = vpop.permute.xlu1 %697 }
 0x538   :  { %10736 = vpow2.f32 %v687_v40  ;;  %v685_v42 = vmul.f32 1.442695, %v683_v41 }
 0x539   :  { %v700_v43 = vpop.permute.xlu0 %699 }
 0x53a   :  { %10738 = vpow2.f32 %v685_v42  ;;  %9792 = vmatprep.subr.mxu0 %v700_v43 }
 0x53b   :  { %9793 = vmatpush3.msra.mxu0 %v700_v43  ;;  %v801_v48 = vpop.permute.xlu1 %800 }
 0x53c   :  { %9794 = vmatprep.subr.mxu0 %v698_v44 }
 0x53d   :  { %9795 = vmatpush3.msra.mxu0 %v698_v44  ;;  %v803_v45 = vpop.permute.xlu0 %802 }
 0x53e   :  { %9799 = vmatprep.subr.mxu0 %v803_v45 }
 0x53f   :  { %v902_v50 = vpop.permute.xlu1 %901 }
 0x541   :  { %v904_v49 = vpop.permute.xlu0 %903 }
 0x543   :  { %v1003_v51 = vpop.permute.xlu1 %1002 }
 0x545   :  { %v10737_v46 = vpop.eup %10736  ;;  %v1005_v52 = vpop.permute.xlu0 %1004 }
 0x546   :  { %788 = vrot.lane.b32.xlu1 %v10737_v46, %s11047_s23  ;;  %v692_v63 = vsel %vm664_vm8, %v10737_v46, 0.0 }
 0x547   :  { %v10739_v47 = vpop.eup %10738 }
 0x548   :  { %786 = vrot.lane.b32.xlu0 %v10739_v47, %s11047_s23  ;;  %9796 = vmatprep.mubr.msk.f32.mxu0 %vm664_vm8, %v10739_v47  ;;  %v689_v2 = vsel %vm664_vm8, %v10739_v47, 0.0 }
 0x549   :  { %9797 = vmatmul.mubr.msk.f32.vlgmr.msra.gmra.mxu0 %vm664_vm8, %v10737_v46 }
 0x54a   :  { %9800 = vmatpush3.msra.mxu0 %v803_v45  ;;  %889 = vrot.lane.b32.xlu1 %v10737_v46, %s11044_s20 }
 0x54b   :  { %9801 = vmatprep.subr.mxu0 %v801_v48 }
 0x54c   :  { %9802 = vmatpush3.msra.mxu0 %v801_v48  ;;  %887 = vrot.lane.b32.xlu0 %v10739_v47, %s11044_s20 }
 0x54d   :  { %9806 = vmatprep.subr.mxu0 %v904_v49 }
 0x54e   :  { %990 = vrot.lane.b32.xlu1 %v10737_v46, %s11046_s22 }
 0x550   :  { %988 = vrot.lane.b32.xlu0 %v10739_v47, %s11046_s22 }
 0x5b8   :  { %v789_v53 = vpop.permute.xlu1 %788 }
 0x5b9   :  { %v795_v54 = vsel %vm664_vm8, %v789_v53, 0.0 }
 0x5ba   :  { %796 = vadd.xlane.f32.xlu1 %v795_v54  ;;  %v787_v55 = vpop.permute.xlu0 %786 }
 0x5bb   :  { %9803 = vmatprep.mubr.msk.f32.mxu0 %vm664_vm8, %v787_v55  ;;  %v792_v61 = vsel %vm664_vm8, %v787_v55, 0.0  ;;  %v9048_v55 = vld [vmem:[#allocation2 + $0x78] ss:$0 sm:$0xff] }
 0x5bc   :  { %v890_v56 = vpop.permute.xlu1 %889  ;;  %9804 = vmatmul.mubr.msk.f32.vlgmr.msra.gmra.mxu0 %vm664_vm8, %v789_v53 }
 0x5bd   :  { %9807 = vmatpush3.msra.mxu0 %v904_v49  ;;  %v896_v57 = vsel %vm664_vm8, %v890_v56, 0.0 }
 0x5be   :  { %9808 = vmatprep.subr.mxu0 %v902_v50  ;;  %897 = vadd.xlane.f32.xlu0 %v896_v57  ;;  %v888_v58 = vpop.permute.xlu0 %887 }
 0x5bf   :  { %9809 = vmatpush3.msra.mxu0 %v902_v50  ;;  %9810 = vmatprep.mubr.msk.f32.mxu0 %vm664_vm8, %v888_v58  ;;  %v893_v0 = vsel %vm664_vm8, %v888_v58, 0.0 }
 0x5c0   :  { %9813 = vmatprep.subr.mxu0 %v1005_v52  ;;  %v991_v59 = vpop.permute.xlu1 %990  ;;  %9811 = vmatmul.mubr.msk.f32.vlgmr.msra.gmra.mxu0 %vm664_vm8, %v890_v56 }
 0x5c1   :  { %9814 = vmatpush3.msra.mxu0 %v1005_v52  ;;  %v997_v60 = vsel %vm664_vm8, %v991_v59, 0.0 }
 0x5c2   :  { %9815 = vmatprep.subr.mxu0 %v1003_v51  ;;  %998 = vadd.xlane.f32.xlu1 %v997_v60  ;;  %v989_v62 = vpop.permute.xlu0 %988 }
 0x5c3   :  { %793 = vadd.xlane.f32.xlu0 %v792_v61  ;;  %9816 = vmatpush3.msra.mxu0 %v1003_v51  ;;  %v994_v1 = vsel %vm664_vm8, %v989_v62, 0.0 }
 0x5c4   :  { %9817 = vmatprep.mubr.msk.f32.mxu0 %vm664_vm8, %v989_v62  ;;  %9831 = vmatprep.subr.mxu0 %v1269_v8 }
 0x5c5   :  { %9818 = vmatmul.mubr.msk.f32.vlgmr.msra.gmra.mxu0 %vm664_vm8, %v991_v59 }
 0x5c6   :  { %693 = vadd.xlane.f32.xlu1 %v692_v63  ;;  %9832 = vmatpush3.msra.mxu0 %v1269_v8 }
 0x5c7   :  { %894 = vadd.xlane.f32.xlu0 %v893_v0  ;;  %9833 = vmatprep.subr.mxu0 %v1268_v9 }
 0x5c8   :  { %9834 = vmatpush3.msra.mxu0 %v1268_v9 }
 0x5cb   :  { %995 = vadd.xlane.f32.xlu0 %v994_v1 }
 0x5cf   :  { %690 = vadd.xlane.f32.xlu0 %v689_v2 }
 0x609   :  { %v9798_v7 = vpop.f32.mrf.mxu0 }
 0x60b   :  { %v775_v14 = vpop.f32.mrf.mxu0 }
 0x643   :  { %v797_v5 = vpop.xlane.xlu1 %796 }
 0x644   :  { %10740 = vrcp.f32 %v797_v5 }
 0x647   :  { %v898_v3 = vpop.xlane.xlu0 %897 }
 0x64b   :  { %v999_v13 = vpop.xlane.xlu1 %998 }
 0x64c   :  { %v794_v4 = vpop.xlane.xlu0 %793 }
 0x64d   :  { %10742 = vrcp.f32 %v794_v4 }
 0x64e   :  { %10744 = vrcp.f32 %v898_v3 }
 0x64f   :  { %v694_v38 = vpop.xlane.xlu1 %693 }
 0x650   :  { %v895_v6 = vpop.xlane.xlu0 %894 }
 0x651   :  { %10746 = vrcp.f32 %v895_v6  ;;  %v10741_v16 = vpop.eup %10740 }
 0x654   :  { %v996_v12 = vpop.xlane.xlu0 %995 }
 0x655   :  { %10748 = vrcp.f32 %v996_v12  ;;  %v1267_v12 = vld [vmem:[#allocation2 + $0x98] sm:$0xff] }
 0x656   :  { %10750 = vrcp.f32 %v999_v13  ;;  %9835 = vmatprep.subr.mxu0 %v1267_v12  ;;  %v1266_v13 = vld [vmem:[#allocation2 + $0x90] sm:$0xff] }
 0x657   :  { %9836 = vmatpush3.msra.mxu0 %v1267_v12  ;;  %v1511_v12 = vld [vmem:[#allocation2 + $0x128] sm:$0xff] }
 0x658   :  { %v691_v37 = vpop.xlane.xlu0 %690  ;;  %9837 = vmatprep.subr.mxu0 %v1266_v13 }
 0x659   :  { %10752 = vrcp.f32 %v691_v37  ;;  %9838 = vmatpush3.msra.mxu0 %v1266_v13  ;;  %v1510_v13 = vld [vmem:[#allocation2 + $0x120] sm:$0xff] }
 0x65a   :  { %v10743_v20 = vpop.eup %10742  ;;  %10754 = vrcp.f32 %v694_v38  ;;  %9861 = vmatprep.subr.mxu0 %v1511_v12 }
 0x65b   :  { %v10745_v23 = vpop.eup %10744 }
 0x65e   :  { %v10747_v28 = vpop.eup %10746 }
 0x662   :  { %v10749_v32 = vpop.eup %10748 }
 0x663   :  { %v10751_v34 = vpop.eup %10750 }
 0x666   :  { %v10753_v40 = vpop.eup %10752 }
 0x667   :  { %v10755_v43 = vpop.eup %10754  ;;  %v784_v44 = vmul.f32 %v10753_v40, %v775_v14  ;;  %v1365_v14 = vld [vmem:[#allocation2 + $0xf0] sm:$0xff] }
 0x668   :  { %v785_v47 = vmul.f32 %v10755_v43, %v9798_v7  ;;  %9842 = vmatprep.subr.mxu1 %v1365_v14 }
 0x67c   :  { %v9805_v17 = vpop.f32.mrf.mxu0 }
 0x67d   :  { %v886_v18 = vmul.f32 %v10741_v16, %v9805_v17  ;;  %v1363_v16 = vld [vmem:[#allocation2 + $0xe0] sm:$0xff]  ;;  %v1362_v17 = vld [vmem:[#allocation2 + $0xd8] sm:$0xff] }
 0x67e   :  { %v876_v21 = vpop.f32.mrf.mxu0 }
 0x67f   :  { %1093 = vrot.lane.b32.xlu1 %v886_v18, %s11042_s13  ;;  %v885_v22 = vmul.f32 %v10743_v20, %v876_v21 }
 0x680   :  { %v9812_v25 = vpop.f32.mrf.mxu0 }
 0x681   :  { %v987_v26 = vmul.f32 %v10745_v23, %v9812_v25  ;;  %1091 = vrot.lane.b32.xlu0 %v885_v22, %s11042_s13 }
 0x682   :  { %v977_v27 = vpop.f32.mrf.mxu0 }
 0x683   :  { %1101 = vrot.lane.b32.xlu1 %v987_v26, %s11050_s26  ;;  %v986_v30 = vmul.f32 %v10747_v28, %v977_v27 }
 0x685   :  { %v9819_v31 = vpop.f32.mrf.mxu0 }
 0x686   :  { %v1088_v36 = vmul.f32 %v10751_v34, %v9819_v31 }
 0x687   :  { %v1078_v33 = vpop.f32.mrf.mxu0  ;;  %1099 = vrot.lane.b32.xlu1 %v986_v30, %s11050_s26 }
 0x688   :  { %v1087_v35 = vmul.f32 %v10749_v32, %v1078_v33 }
 0x68a   :  { %1107 = vrot.lane.b32.xlu0 %v1087_v35, %s11056_s4 }
 0x68b   :  { %1109 = vrot.lane.b32.xlu1 %v1088_v36, %s11056_s4  ;;  %v9051_v36 = vld [vmem:[#allocation2 + $0x80] ss:$0 sm:$0xff] }
 0x6f1   :  { %v1094_v39 = vpop.permute.xlu1 %1093 }
 0x6f2   :  { %v1114_v49 = vsel %vm283_vm7, %v785_v47, %v1094_v39  ;;  %v9052_v39 = vld [vmem:[#allocation2 + $0x88] ss:$0 sm:$0xff] }
 0x6f3   :  { %v1092_v42 = vpop.permute.xlu0 %1091  ;;  %v1360_v47 = vld [vmem:[#allocation2 + $0xc8] sm:$0xff] }
 0x6f4   :  { %v1113_v45 = vsel %vm283_vm7, %v784_v44, %v1092_v42 }
 0x6f5   :  { %v1102_v41 = vpop.permute.xlu1 %1101 }
 0x6f6   :  { %v1116_v51 = vsel %vm664_vm8, %v1114_v49, %v1102_v41  ;;  %v1358_v49 = vld [vmem:[#allocation2 + $0xb8] sm:$0xff] }
 0x6f9   :  { %v1100_v46 = vpop.permute.xlu1 %1099 }
 0x6fa   :  { %v1115_v48 = vsel %vm664_vm8, %v1113_v45, %v1100_v46  ;;  %v1361_v46 = vld [vmem:[#allocation2 + $0xd0] sm:$0xff] }
 0x6fc   :  { %v1108_v50 = vpop.permute.xlu0 %1107 }
 0x6fd   :  { %v1118_v52 = vsel %vm1117_vm11, %v1115_v48, %v1108_v50  ;;  %v1110_v53 = vpop.permute.xlu1 %1109  ;;  %v1359_v48 = vld [vmem:[#allocation2 + $0xc0] sm:$0xff]  ;;  %v9053_v50 = vld [vmem:[#allocation2 + $0xb0] ss:$0 sm:$0xff] }
 0x6fe   :  { %v1119_v54 = vsel %vm1117_vm11, %v1116_v51, %v1110_v53  ;;  %9828 = vmatprep.mubr.msk.f32.mxu1 %vm131_vm2, %v1118_v52 }
 0x6ff   :  { %9829 = vmatmul.mubr.msk.f32.vlgmr.msra.gmra.mxu1 %vm131_vm2, %v1119_v54 }
 0x700   :  { %9843 = vmatpush3.msra.mxu1 %v1365_v14  ;;  %v1509_v14 = vld [vmem:[#allocation2 + $0x118] sm:$0xff] }
 0x701   :  { %9844 = vmatprep.subr.mxu1 %v1364_v15 }
 0x702   :  { %9845 = vmatpush3.msra.mxu1 %v1364_v15  ;;  %v1508_v15 = vld [vmem:[#allocation2 + $0x110] sm:$0xff] }
 0x703   :  { %9846 = vmatprep.subr.mxu1 %v1363_v16 }
 0x704   :  { %9847 = vmatpush3.msra.mxu1 %v1363_v16 }
 0x705   :  { %9848 = vmatprep.subr.mxu1 %v1362_v17 }
 0x706   :  { %9849 = vmatpush3.msra.mxu1 %v1362_v17 }
 0x707   :  { %9850 = vmatprep.subr.mxu1 %v1361_v46 }
 0x708   :  { %9851 = vmatpush3.msra.mxu1 %v1361_v46 }
 0x709   :  { %9852 = vmatprep.subr.mxu1 %v1360_v47 }
 0x70a   :  { %9853 = vmatpush3.msra.mxu1 %v1360_v47 }
 0x70b   :  { %9854 = vmatprep.subr.mxu1 %v1359_v48 }
 0x70c   :  { %9855 = vmatpush3.msra.mxu1 %v1359_v48 }
 0x70d   :  { %9856 = vmatprep.subr.mxu1 %v1358_v49 }
 0x70e   :  { %9857 = vmatpush3.msra.mxu1 %v1358_v49 }
 0x7bf   :  { %v9830_v56 = vpop.f32.mrf.mxu1 }
 0x7c0   :  { %v1207_v57 = vadd.f32 %v9830_v56, %v9048_v55 }
 0x7c1   :  { %v1201_v58 = vpop.f32.mrf.mxu1 }
 0x7c2   :  { %v11240_v59 = vadd.f32 %v1207_v57, %v11097_v11  ;;  %v1202_v60 = vadd.f32 %v9048_v55, %v1201_v58  ;;  %v9056_v57 = vld [vmem:[#allocation2 + $0xf8] ss:$0 sm:$0xff] }
 0x7c4   :  { %v11243_v61 = vadd.f32 %v1202_v60, %v11095_v10  ;;  %v1215_v62 = vsel %vm131_vm2, %v11240_v59, 0.0 }
 0x7c5   :  { %1216 = vadd.xlane.f32.xlu1 %v1215_v62 }
 0x7c6   :  { %v1212_v63 = vsel %vm131_vm2, %v11243_v61, 0.0 }
 0x7c7   :  { %1213 = vadd.xlane.f32.xlu0 %v1212_v63 }
 0x84e   :  { %v1217_v0 = vpop.xlane.xlu1 %1216 }
 0x84f   :  { %v1219_v1 = vmul.f32 0.03125, %v1217_v0 }
 0x850   :  { %v1214_v2 = vpop.xlane.xlu0 %1213 }
 0x851   :  { %v1218_v3 = vmul.f32 0.03125, %v1214_v2  ;;  %v1221_v4 = vsub.f32 %v11240_v59, %v1219_v1 }
 0x853   :  { %v1220_v11 = vsub.f32 %v11243_v61, %v1218_v3  ;;  %v1223_v6 = vmul.f32 %v1221_v4, %v1221_v4  ;;  %v1256_v41 = vmul.f32 %v9051_v36, %v1221_v4 }
 0x855   :  { %v1222_v5 = vmul.f32 %v1220_v11, %v1220_v11  ;;  %v1227_v7 = vsel %vm131_vm2, %v1223_v6, 0.0  ;;  %v1255_v37 = vmul.f32 %v9051_v36, %v1220_v11 }
 0x857   :  { %v1224_v10 = vsel %vm131_vm2, %v1222_v5, 0.0 }
 0x858   :  { %1225 = vadd.xlane.f32.xlu0 %v1224_v10 }
 0x85c   :  { %1228 = vadd.xlane.f32.xlu0 %v1227_v7 }
 0x8e1   :  { %v1226_v18 = vpop.xlane.xlu0 %1225 }
 0x8e2   :  { %v1230_v19 = vmul.f32 0.032258064, %v1226_v18 }
 0x8e4   :  { %10756 = vrsqrt.f32 %v1230_v19  ;;  %vm1234_vm12 = vcmp.eq.f32.partialorder %v1230_v19, inf  ;;  %v1237_v25 = vand.u32 2147483648, %v1230_v19  ;;  %vm1236_vm13 = vcmp.eq.f32.partialorder %v1230_v19, 0.0 }
 0x8e5   :  { %v1229_v20 = vpop.xlane.xlu0 %1228 }
 0x8e6   :  { %v1231_v21 = vmul.f32 0.032258064, %v1229_v20 }
 0x8e8   :  { %10758 = vrsqrt.f32 %v1231_v21  ;;  %vm1241_vm14 = vcmp.eq.f32.partialorder %v1231_v21, inf  ;;  %v1244_v32 = vand.u32 2147483648, %v1231_v21  ;;  %vm1243_vm15 = vcmp.eq.f32.partialorder %v1231_v21, 0.0 }
 0x8f1   :  { %v10757_v22 = vpop.eup %10756 }
 0x8f2   :  { %v1233_v23 = vmul.f32 %v10757_v22, %v1230_v19 }
 0x8f4   :  { %v1235_v26 = vsel %vm1234_vm12, %v1230_v19, %v1233_v23 }
 0x8f5   :  { %v10759_v27 = vpop.eup %10758  ;;  %v1238_v28 = vsel %vm1236_vm13, %v1237_v25, %v1235_v26 }
 0x8f6   :  { %v1246_v30 = vadd.f32 1e-06, %v1238_v28  ;;  %v1240_v31 = vmul.f32 %v10759_v27, %v1231_v21 }
 0x8f8   :  { %10760 = vrcp.f32 %v1246_v30  ;;  %v1242_v33 = vsel %vm1241_vm14, %v1231_v21, %v1240_v31 }
 0x8f9   :  { %v1245_v34 = vsel %vm1243_vm15, %v1244_v32, %v1242_v33 }
 0x8fa   :  { %v1247_v35 = vadd.f32 1e-06, %v1245_v34  ;;  %v9059_v34 = vld [vmem:[#allocation2 + $0x100] ss:$0 sm:$0xff] }
 0x8fc   :  { %10762 = vrcp.f32 %v1247_v35 }
 0x905   :  { %v10761_v38 = vpop.eup %10760 }
 0x906   :  { %v1257_v40 = vmul.f32 %v10761_v38, %v1255_v37 }
 0x908   :  { %v1264_v42 = vadd.f32 %v9052_v39, %v1257_v40 }
 0x909   :  { %v10763_v43 = vpop.eup %10762 }
 0x90a   :  { %v1258_v44 = vmul.f32 %v10763_v43, %v1256_v41  ;;  %9839 = vmatprep.mubr.msk.f32.mxu0 %vm131_vm2, %v1264_v42  ;;  %v9060_v41 = vld [vmem:[#allocation2 + $0x108] ss:$0 sm:$0xff] }
 0x90c   :  { %v1265_v45 = vadd.f32 %v9052_v39, %v1258_v44  ;;  %v9061_v44 = vld [vmem:[#allocation2 + $0x130] ss:$0 sm:$0xff] }
 0x90e   :  { %9840 = vmatmul.mubr.msk.f32.vlgmr.msra.gmra.mxu0 %vm131_vm2, %v1265_v45 }
 0x90f   :  { %9862 = vmatpush3.msra.mxu0 %v1511_v12 }
 0x910   :  { %9863 = vmatprep.subr.mxu0 %v1510_v13 }
 0x911   :  { %9864 = vmatpush3.msra.mxu0 %v1510_v13 }
 0x912   :  { %9865 = vmatprep.subr.mxu0 %v1509_v14 }
 0x913   :  { %9866 = vmatpush3.msra.mxu0 %v1509_v14 }
 0x914   :  { %9867 = vmatprep.subr.mxu0 %v1508_v15 }
 0x915   :  { %9868 = vmatpush3.msra.mxu0 %v1508_v15 }
 0x9ce   :  { %v9841_v51 = vpop.f32.mrf.mxu0 }
 0x9cf   :  { %v1353_v52 = vadd.f32 %v9841_v51, %v9053_v50 }
 0x9d0   :  { %v1347_v53 = vpop.f32.mrf.mxu0 }
 0x9d1   :  { %v1348_v54 = vadd.f32 %v9053_v50, %v1347_v53  ;;  %v1357_v56 = vmax.f32 %v1353_v52, 0.0 }
 0x9d3   :  { %v1356_v55 = vmax.f32 %v1348_v54, 0.0 }
 0x9d5   :  { %9858 = vmatprep.mubr.msk.f32.mxu1 %vm676_vm10, %v1356_v55 }
 0x9d6   :  { %9859 = vmatmul.mubr.msk.f32.vlgmr.msra.gmra.mxu1 %vm676_vm10, %v1357_v56 }
 0xa96   :  { %v9860_v58 = vpop.f32.mrf.mxu1 }
 0xa97   :  { %v1449_v60 = vadd.f32 %v9860_v58, %v9056_v57 }
 0xa98   :  { %v1443_v62 = vpop.f32.mrf.mxu1 }
 0xa99   :  { %v11258_v63 = vadd.f32 %v1449_v60, %v11240_v59  ;;  %v1444_v0 = vadd.f32 %v9056_v57, %v1443_v62 }
 0xa9b   :  { %v11261_v1 = vadd.f32 %v1444_v0, %v11243_v61  ;;  %v1457_v2 = vsel %vm131_vm2, %v11258_v63, 0.0 }
 0xa9c   :  { %1458 = vadd.xlane.f32.xlu1 %v1457_v2 }
 0xa9d   :  { %v1454_v3 = vsel %vm131_vm2, %v11261_v1, 0.0 }
 0xa9e   :  { %1455 = vadd.xlane.f32.xlu0 %v1454_v3 }
 0xb25   :  { %v1459_v4 = vpop.xlane.xlu1 %1458 }
 0xb26   :  { %v1461_v11 = vmul.f32 0.03125, %v1459_v4 }
 0xb27   :  { %v1456_v5 = vpop.xlane.xlu0 %1455 }
 0xb28   :  { %v1463_v10 = vsub.f32 %v11258_v63, %v1461_v11  ;;  %v1460_v6 = vmul.f32 0.03125, %v1456_v5 }
 0xb2a   :  { %v1462_v59 = vsub.f32 %v11261_v1, %v1460_v6  ;;  %v1465_v7 = vmul.f32 %v1463_v10, %v1463_v10  ;;  %v1498_v36 = vmul.f32 %v9059_v34, %v1463_v10 }
 0xb2c   :  { %v1469_v61 = vsel %vm131_vm2, %v1465_v7, 0.0  ;;  %v1464_v8 = vmul.f32 %v1462_v59, %v1462_v59  ;;  %v1497_v37 = vmul.f32 %v9059_v34, %v1462_v59 }
 0xb2d   :  { %1470 = vadd.xlane.f32.xlu1 %v1469_v61 }
 0xb2e   :  { %v1466_v9 = vsel %vm131_vm2, %v1464_v8, 0.0 }
 0xb2f   :  { %1467 = vadd.xlane.f32.xlu0 %v1466_v9 }
 0xbb6   :  { %v1471_v16 = vpop.xlane.xlu1 %1470 }
 0xbb7   :  { %v1473_v17 = vmul.f32 0.032258064, %v1471_v16 }
 0xbb8   :  { %v1468_v18 = vpop.xlane.xlu0 %1467 }
 0xbb9   :  { %10764 = vrsqrt.f32 %v1473_v17  ;;  %v1472_v19 = vmul.f32 0.032258064, %v1468_v18  ;;  %vm1483_vm3 = vcmp.eq.f32.partialorder %v1473_v17, inf  ;;  %v1486_v22 = vand.u32 2147483648, %v1473_v17 }
 0xbba   :  { %vm1485_vm4 = vcmp.eq.f32.partialorder %v1473_v17, 0.0 }
 0xbbb   :  { %10766 = vrsqrt.f32 %v1472_v19  ;;  %vm1476_vm5 = vcmp.eq.f32.partialorder %v1472_v19, inf  ;;  %v1479_v30 = vand.u32 2147483648, %v1472_v19  ;;  %vm1478_vm6 = vcmp.eq.f32.partialorder %v1472_v19, 0.0 }
 0xbc6   :  { %v10765_v20 = vpop.eup %10764 }
 0xbc7   :  { %v1482_v21 = vmul.f32 %v10765_v20, %v1473_v17 }
 0xbc8   :  { %v10767_v23 = vpop.eup %10766 }
 0xbc9   :  { %v1484_v25 = vsel %vm1483_vm3, %v1473_v17, %v1482_v21  ;;  %v1475_v27 = vmul.f32 %v10767_v23, %v1472_v19  ;;  %vm2838_vm3 = vcmask 1042432  }
 0xbca   :  { %v1487_v26 = vsel %vm1485_vm4, %v1486_v22, %v1484_v25  ;;  %vm11058_vm4 = vmmov 0  }
 0xbcb   :  { %v1489_v28 = vadd.f32 1e-06, %v1487_v26  ;;  %v1477_v31 = vsel %vm1476_vm5, %v1472_v19, %v1475_v27  ;;  %vm2828_vm5 = vcmask 23552  }
 0xbcc   :  { %v1480_v32 = vsel %vm1478_vm6, %v1479_v30, %v1477_v31  ;;  %vm2934_vm6 = vcmask 254976  }
 0xbcd   :  { %10768 = vrcp.f32 %v1489_v28  ;;  %v1488_v33 = vadd.f32 1e-06, %v1480_v32 }
 0xbcf   :  { %10770 = vrcp.f32 %v1488_v33 }
 0xbda   :  { %v10769_v35 = vpop.eup %10768 }
 0xbdb   :  { %v1500_v39 = vmul.f32 %v10769_v35, %v1498_v36 }
 0xbdc   :  { %v10771_v38 = vpop.eup %10770 }
 0xbdd   :  { %v1499_v40 = vmul.f32 %v10771_v38, %v1497_v37  ;;  %v1507_v43 = vadd.f32 %v9060_v41, %v1500_v39 }
 0xbdf   :  { %v1506_v42 = vadd.f32 %v9060_v41, %v1499_v40 }
 0xbe1   :  { %9869 = vmatprep.mubr.msk.f32.mxu0 %vm131_vm2, %v1506_v42 }
 0xbe2   :  { %9870 = vmatmul.mubr.msk.f32.vlgmr.msra.gmra.mxu0 %vm131_vm2, %v1507_v43 }
 0xca2   :  { %v9871_v45 = vpop.f32.mrf.mxu0 }
 0xca3   :  { %v11273_v46 = vadd.f32 %v9871_v45, %v9061_v44 }
 0xca4   :  { %v1589_v47 = vpop.f32.mrf.mxu0 }
 0xca5   :  { %v11275_v48 = vadd.f32 %v9061_v44, %v1589_v47  ;;  %1693 = vrot.lane.b32.xlu1 %v11273_v46, %s11043_s1  ;;  %1602 = vrot.lane.b32.xlu0 %v11273_v46, %s11044_s20 }
 0xca7   :  { %9876 = vmatprep.mubr.msk.f32.mxu0 %vm283_vm7, %v11275_v48 }
 0xca9   :  { %1689 = vrot.lane.b32.xlu1 %v11273_v46, %s11045_s21  ;;  %1784 = vrot.lane.b32.xlu0 %v11273_v46, %s11046_s22 }
 0xcad   :  { %1780 = vrot.lane.b32.xlu1 %v11273_v46, %s11047_s23  ;;  %1875 = vrot.lane.b32.xlu0 %v11273_v46, %s11048_s24 }
 0xcb1   :  { %1782 = vrot.lane.b32.xlu0 %v11275_v48, %s11046_s22  ;;  %1600 = vrot.lane.b32.xlu1 %v11275_v48, %s11044_s20 }
 0xcb5   :  { %1778 = vrot.lane.b32.xlu0 %v11275_v48, %s11047_s23  ;;  %1691 = vrot.lane.b32.xlu1 %v11275_v48, %s11043_s1 }
 0xcb9   :  { %1869 = vrot.lane.b32.xlu0 %v11275_v48, %s11049_s25  ;;  %1687 = vrot.lane.b32.xlu1 %v11275_v48, %s11045_s21 }
 0xcbd   :  { %1873 = vrot.lane.b32.xlu1 %v11275_v48, %s11048_s24 }
 0xcc1   :  { %1871 = vrot.lane.b32.xlu1 %v11273_v46, %s11049_s25 }
 0xd17   :  { %v1694_v49 = vpop.permute.xlu1 %1693  ;;  %v1603_v50 = vpop.permute.xlu0 %1602 }
 0xd18   :  { %9872 = vmatprep.subr.msk.mxu0 %vm283_vm7, %v1603_v50  ;;  %9879 = vmatprep.subr.msk.mxu1 %vm283_vm7, %v1694_v49 }
 0xd19   :  { %9873 = vmatpush3.xpose.msk.msra.mxu0 %vm283_vm7, %v1603_v50  ;;  %9880 = vmatpush3.xpose.msk.msra.mxu1 %vm283_vm7, %v1694_v49 }
 0xd1b   :  { %v1690_v51 = vpop.permute.xlu1 %1689  ;;  %v1785_v52 = vpop.permute.xlu0 %1784 }
 0xd1f   :  { %v1781_v53 = vpop.permute.xlu1 %1780  ;;  %v1876_v54 = vpop.permute.xlu0 %1875 }
 0xd23   :  { %v1783_v55 = vpop.permute.xlu0 %1782  ;;  %v1601_v56 = vpop.permute.xlu1 %1600 }
 0xd24   :  { %9874 = vmatprep.subr.msk.mxu0 %vm283_vm7, %v1601_v56 }
 0xd25   :  { %9875 = vmatpush3.xpose.msk.msra.mxu0 %vm283_vm7, %v1601_v56 }
 0xd26   :  { %9886 = vmatprep.subr.msk.mxu0 %vm283_vm7, %v1785_v52 }
 0xd27   :  { %v1779_v57 = vpop.permute.xlu0 %1778  ;;  %v1692_v58 = vpop.permute.xlu1 %1691 }
 0xd28   :  { %9877 = vmatmul.mubr.msk.f32.vlgmr.msra.gmra.mxu0 %vm283_vm7, %v11273_v46  ;;  %9881 = vmatprep.subr.msk.mxu1 %vm283_vm7, %v1692_v58 }
 0xd29   :  { %9882 = vmatpush3.xpose.msk.msra.mxu1 %vm283_vm7, %v1692_v58  ;;  %9887 = vmatpush3.xpose.msk.msra.mxu0 %vm283_vm7, %v1785_v52 }
 0xd2a   :  { %9890 = vmatprep.mubr.msk.f32.mxu0 %vm283_vm7, %v1779_v57  ;;  %9888 = vmatprep.subr.msk.mxu0 %vm283_vm7, %v1783_v55 }
 0xd2b   :  { %9893 = vmatprep.subr.msk.mxu1 %vm283_vm7, %v1876_v54  ;;  %v1688_v60 = vpop.permute.xlu1 %1687  ;;  %v1870_v62 = vpop.permute.xlu0 %1869 }
 0xd2c   :  { %9883 = vmatprep.mubr.msk.f32.mxu1 %vm283_vm7, %v1688_v60 }
 0xd2d   :  { %9884 = vmatmul.mubr.msk.f32.vlgmr.msra.gmra.mxu1 %vm283_vm7, %v1690_v51  ;;  %9889 = vmatpush3.xpose.msk.msra.mxu0 %vm283_vm7, %v1783_v55 }
 0xd2e   :  { %9894 = vmatpush3.xpose.msk.msra.mxu1 %vm283_vm7, %v1876_v54  ;;  %9897 = vmatprep.mubr.msk.f32.mxu1 %vm283_vm7, %v1870_v62 }
 0xd2f   :  { %v1874_v0 = vpop.permute.xlu1 %1873 }
 0xd30   :  { %9891 = vmatmul.mubr.msk.f32.vlgmr.msra.gmra.mxu0 %vm283_vm7, %v1781_v53  ;;  %9895 = vmatprep.subr.msk.mxu1 %vm283_vm7, %v1874_v0 }
 0xd32   :  { %9896 = vmatpush3.xpose.msk.msra.mxu1 %vm283_vm7, %v1874_v0  ;;  %v2437_v0 = vld [vmem:[#allocation2 + $0x150] sm:$0xff] }
 0xd33   :  { %v1872_v2 = vpop.permute.xlu1 %1871 }
 0xd35   :  { %9898 = vmatmul.mubr.msk.f32.vlgmr.msra.gmra.mxu1 %vm283_vm7, %v1872_v2 }
 0xde8   :  { %v9878_v3 = vpop.f32.mrf.mxu0 }
 0xdea   :  { %v1678_v11 = vpop.f32.mrf.mxu0 }
 0xded   :  { %v9885_v4 = vpop.f32.mrf.mxu1 }
 0xdee   :  { %1964 = vrot.lane.b32.xlu1 %v9885_v4, %s11050_s26 }
 0xdef   :  { %v1769_v5 = vpop.f32.mrf.mxu1 }
 0xdf0   :  { %1962 = vrot.lane.b32.xlu0 %v1769_v5, %s11050_s26  ;;  %v9892_v10 = vpop.f32.mrf.mxu0 }
 0xdf2   :  { %1972 = vrot.lane.b32.xlu1 %v9892_v10, %s11051_s27  ;;  %v1860_v6 = vpop.f32.mrf.mxu0 }
 0xdf4   :  { %1970 = vrot.lane.b32.xlu0 %v1860_v6, %s11051_s27  ;;  %v2434_v6 = vld [vmem:[#allocation2 + $0x138] sm:$0xff] }
 0xdf5   :  { %v9899_v59 = vpop.f32.mrf.mxu1 }
 0xdf6   :  { %1980 = vrot.lane.b32.xlu1 %v9899_v59, %s11052_s28 }
 0xdf7   :  { %v1951_v7 = vpop.f32.mrf.mxu1 }
 0xdf8   :  { %1978 = vrot.lane.b32.xlu0 %v1951_v7, %s11052_s28 }
 0xe60   :  { %v1965_v61 = vpop.permute.xlu1 %1964 }
 0xe61   :  { %v1985_v13 = vsel %vm664_vm8, %v9878_v3, %v1965_v61  ;;  %v2436_v3 = vld [vmem:[#allocation2 + $0x148] sm:$0xff] }
 0xe62   :  { %v1963_v8 = vpop.permute.xlu0 %1962 }
 0xe63   :  { %v1984_v16 = vsel %vm664_vm8, %v1678_v11, %v1963_v8  ;;  %v2435_v11 = vld [vmem:[#allocation2 + $0x140] sm:$0xff] }
 0xe64   :  { %v1973_v9 = vpop.permute.xlu1 %1972 }
 0xe65   :  { %v1987_v14 = vsel %vm131_vm2, %v1985_v13, %v1973_v9 }
 0xe66   :  { %v1971_v12 = vpop.permute.xlu0 %1970 }
 0xe67   :  { %v1986_v18 = vsel %vm131_vm2, %v1984_v16, %v1971_v12 }
 0xe68   :  { %v1981_v15 = vpop.permute.xlu1 %1980 }
 0xe69   :  { %v1989_v17 = vsel %vm669_vm9, %v1987_v14, %v1981_v15 }
 0xe6a   :  { %v1979_v19 = vpop.permute.xlu0 %1978  ;;  %v1991_v20 = vadd.f32 %v1989_v17, %v11174_v24 }
 0xe6b   :  { %v1988_v21 = vsel %vm669_vm9, %v1986_v18, %v1979_v19 }
 0xe6c   :  { %v1995_v22 = vsel %vm676_vm10, %v1991_v20, -inf  ;;  %v1990_v23 = vadd.f32 %v1988_v21, %v11179_v29 }
 0xe6d   :  { %1996 = vmax.xlane.f32.xlu1 %v1995_v22 }
 0xe6e   :  { %v1992_v25 = vsel %vm676_vm10, %v1990_v23, -inf }
 0xe6f   :  { %1993 = vmax.xlane.f32.xlu0 %v1992_v25 }
 0xe7e   :  { %2012 = vrot.lane.b32.xlu1 %v11275_v48, %s11053_s29 }
 0xe82   :  { %2115 = vrot.lane.b32.xlu1 %v11275_v48, %s11054_s30 }
 0xe85   :  { %2014 = vrot.lane.b32.xlu0 %v11273_v46, %s11053_s29 }
 0xe86   :  { %2218 = vrot.lane.b32.xlu1 %v11273_v46, %s11052_s28 }
 0xe89   :  { %2117 = vrot.lane.b32.xlu0 %v11273_v46, %s11054_s30 }
 0xe8a   :  { %2319 = vrot.lane.b32.xlu1 %v11273_v46, %s11055_s3 }
 0xe8d   :  { %2216 = vrot.lane.b32.xlu0 %v11275_v48, %s11052_s28 }
 0xe91   :  { %2317 = vrot.lane.b32.xlu0 %v11275_v48, %s11055_s3 }
 0xef6   :  { %v1997_v24 = vpop.xlane.xlu1 %1996 }
 0xef7   :  { %v1999_v29 = vsub.f32 %v1991_v20, %v1997_v24 }
 0xef8   :  { %v1994_v26 = vpop.xlane.xlu0 %1993 }
 0xef9   :  { %v2002_v27 = vmul.f32 1.442695, %v1999_v29  ;;  %v1998_v28 = vsub.f32 %v1990_v23, %v1994_v26 }
 0xefa   :  { %v2013_v30 = vpop.permute.xlu1 %2012 }
 0xefb   :  { %10772 = vpow2.f32 %v2002_v27  ;;  %v2000_v31 = vmul.f32 1.442695, %v1998_v28 }
 0xefc   :  { %v2015_v32 = vpop.permute.xlu0 %2014 }
 0xefd   :  { %10774 = vpow2.f32 %v2000_v31  ;;  %9900 = vmatprep.subr.mxu0 %v2015_v32 }
 0xefe   :  { %v2116_v33 = vpop.permute.xlu1 %2115  ;;  %9901 = vmatpush3.msra.mxu0 %v2015_v32 }
 0xeff   :  { %9902 = vmatprep.subr.mxu0 %v2013_v30 }
 0xf00   :  { %9903 = vmatpush3.msra.mxu0 %v2013_v30  ;;  %v2118_v34 = vpop.permute.xlu0 %2117 }
 0xf01   :  { %9907 = vmatprep.subr.mxu0 %v2118_v34 }
 0xf02   :  { %v2219_v35 = vpop.permute.xlu1 %2218 }
 0xf03   :  { %9914 = vmatprep.subr.mxu1 %v2219_v35 }
 0xf04   :  { %9915 = vmatpush3.msra.mxu1 %v2219_v35  ;;  %v2217_v36 = vpop.permute.xlu0 %2216 }
 0xf05   :  { %9916 = vmatprep.subr.mxu1 %v2217_v36 }
 0xf06   :  { %9917 = vmatpush3.msra.mxu1 %v2217_v36  ;;  %v2320_v39 = vpop.permute.xlu1 %2319 }
 0xf07   :  { %9928 = vmatprep.subr.mxu1 %v2437_v0 }
 0xf08   :  { %v10773_v37 = vpop.eup %10772  ;;  %v2318_v40 = vpop.permute.xlu0 %2317 }
 0xf09   :  { %2204 = vrot.lane.b32.xlu1 %v10773_v37, %s11044_s20  ;;  %2103 = vrot.lane.b32.xlu0 %v10773_v37, %s11047_s23  ;;  %v2007_v52 = vsel %vm664_vm8, %v10773_v37, 0.0 }
 0xf0a   :  { %v10775_v38 = vpop.eup %10774 }
 0xf0b   :  { %9904 = vmatprep.mubr.msk.f32.mxu0 %vm664_vm8, %v10775_v38  ;;  %v2004_v54 = vsel %vm664_vm8, %v10775_v38, 0.0 }
 0xf0c   :  { %9905 = vmatmul.mubr.msk.f32.vlgmr.msra.gmra.mxu0 %vm664_vm8, %v10773_v37 }
 0xf0d   :  { %9908 = vmatpush3.msra.mxu0 %v2118_v34  ;;  %2202 = vrot.lane.b32.xlu1 %v10775_v38, %s11044_s20 }
 0xf0e   :  { %2101 = vrot.lane.b32.xlu0 %v10775_v38, %s11047_s23  ;;  %9909 = vmatprep.subr.mxu0 %v2116_v33 }
 0xf0f   :  { %9910 = vmatpush3.msra.mxu0 %v2116_v33 }
 0xf10   :  { %9921 = vmatprep.subr.mxu0 %v2320_v39 }
 0xf11   :  { %2305 = vrot.lane.b32.xlu1 %v10773_v37, %s11046_s22 }
 0xf12   :  { %2303 = vrot.lane.b32.xlu0 %v10775_v38, %s11046_s22 }
 0xf7b   :  { %v2205_v41 = vpop.permute.xlu1 %2204  ;;  %v2104_v42 = vpop.permute.xlu0 %2103 }
 0xf7c   :  { %v2211_v43 = vsel %vm664_vm8, %v2205_v41, 0.0  ;;  %v2110_v44 = vsel %vm664_vm8, %v2104_v42, 0.0 }
 0xf7d   :  { %2212 = vadd.xlane.f32.xlu0 %v2211_v43  ;;  %2111 = vadd.xlane.f32.xlu1 %v2110_v44 }
 0xf7f   :  { %v2203_v45 = vpop.permute.xlu1 %2202 }
 0xf80   :  { %v2102_v46 = vpop.permute.xlu0 %2101  ;;  %9918 = vmatprep.mubr.msk.f32.mxu1 %vm664_vm8, %v2203_v45  ;;  %v2208_v51 = vsel %vm664_vm8, %v2203_v45, 0.0 }
 0xf81   :  { %9911 = vmatprep.mubr.msk.f32.mxu0 %vm664_vm8, %v2102_v46  ;;  %9919 = vmatmul.mubr.msk.f32.vlgmr.msra.gmra.mxu1 %vm664_vm8, %v2205_v41  ;;  %v2107_v47 = vsel %vm664_vm8, %v2102_v46, 0.0  ;;  %v9088_v41 = vld [vmem:[#allocation2 + $0x158] ss:$0 sm:$0xff] }
 0xf82   :  { %9912 = vmatmul.mubr.msk.f32.vlgmr.msra.gmra.mxu0 %vm664_vm8, %v2104_v42  ;;  %2108 = vadd.xlane.f32.xlu0 %v2107_v47 }
 0xf83   :  { %9922 = vmatpush3.msra.mxu0 %v2320_v39  ;;  %v2306_v48 = vpop.permute.xlu1 %2305  ;;  %9929 = vmatpush3.msra.mxu1 %v2437_v0  ;;  %v2580_v0 = vld [vmem:[#allocation2 + $0x170] sm:$0xff] }
 0xf84   :  { %9923 = vmatprep.subr.mxu0 %v2318_v40  ;;  %v2304_v49 = vpop.permute.xlu0 %2303  ;;  %v2312_v50 = vsel %vm664_vm8, %v2306_v48, 0.0  ;;  %9930 = vmatprep.subr.mxu1 %v2436_v3 }
 0xf85   :  { %9924 = vmatpush3.msra.mxu0 %v2318_v40  ;;  %9925 = vmatprep.mubr.msk.f32.mxu0 %vm664_vm8, %v2304_v49  ;;  %v2309_v53 = vsel %vm664_vm8, %v2304_v49, 0.0 }
 0xf86   :  { %2313 = vadd.xlane.f32.xlu1 %v2312_v50  ;;  %2209 = vadd.xlane.f32.xlu0 %v2208_v51 }
 0xf87   :  { %9926 = vmatmul.mubr.msk.f32.vlgmr.msra.gmra.mxu0 %vm664_vm8, %v2306_v48  ;;  %9931 = vmatpush3.msra.mxu1 %v2436_v3  ;;  %v2679_v3 = vld [vmem:[#allocation2 + $0x1d0] sm:$0xff] }
 0xf88   :  { %9932 = vmatprep.subr.mxu1 %v2435_v11 }
 0xf89   :  { %9933 = vmatpush3.msra.mxu1 %v2435_v11  ;;  %v2677_v11 = vld [vmem:[#allocation2 + $0x1c0] sm:$0xff] }
 0xf8a   :  { %2008 = vadd.xlane.f32.xlu1 %v2007_v52  ;;  %2310 = vadd.xlane.f32.xlu0 %v2309_v53 }
 0xf8b   :  { %9934 = vmatprep.subr.mxu1 %v2434_v6 }
 0xf8c   :  { %9935 = vmatpush3.msra.mxu1 %v2434_v6 }
 0xf8d   :  { %9950 = vmatprep.subr.mxu1 %v2679_v3 }
 0xf8e   :  { %2005 = vadd.xlane.f32.xlu0 %v2004_v54 }
 0xfcc   :  { %v9906_v62 = vpop.f32.mrf.mxu0 }
 0xfce   :  { %v2090_v4 = vpop.f32.mrf.mxu0 }
0x1006   :  { %v2213_v55 = vpop.xlane.xlu0 %2212  ;;  %v2112_v57 = vpop.xlane.xlu1 %2111 }
0x1007   :  { %10776 = vrcp.f32 %v2112_v57 }
0x100b   :  { %v2109_v56 = vpop.xlane.xlu0 %2108 }
0x100c   :  { %10778 = vrcp.f32 %v2109_v56 }
0x100d   :  { %10780 = vrcp.f32 %v2213_v55 }
0x100f   :  { %v2210_v58 = vpop.xlane.xlu0 %2209  ;;  %v2314_v2 = vpop.xlane.xlu1 %2313 }
0x1013   :  { %v2311_v60 = vpop.xlane.xlu0 %2310  ;;  %v2009_v25 = vpop.xlane.xlu1 %2008 }
0x1014   :  { %10782 = vrcp.f32 %v2311_v60  ;;  %v10777_v5 = vpop.eup %10776  ;;  %v2582_v60 = vld [vmem:[#allocation2 + $0x180] sm:$0xff] }
0x1015   :  { %10784 = vrcp.f32 %v2210_v58  ;;  %v2583_v58 = vld [vmem:[#allocation2 + $0x188] sm:$0xff] }
0x1016   :  { %10786 = vrcp.f32 %v2314_v2  ;;  %9939 = vmatprep.subr.mxu0 %v2583_v58  ;;  %v11057_v2 = vmov 0.0  }
0x1017   :  { %v2006_v23 = vpop.xlane.xlu0 %2005  ;;  %9940 = vmatpush3.msra.mxu0 %v2583_v58 }
0x1018   :  { %10788 = vrcp.f32 %v2006_v23  ;;  %9941 = vmatprep.subr.mxu0 %v2582_v60 }
0x1019   :  { %v10779_v7 = vpop.eup %10778  ;;  %10790 = vrcp.f32 %v2009_v25  ;;  %9942 = vmatpush3.msra.mxu0 %v2582_v60  ;;  %v9092_v25 = vld [vmem:[#allocation2 + $0x168] ss:$0 sm:$0xff]  ;;  %v2924_v60 = vld [vmem:[#allocation2 + $0x518] sm:$0x3] }
0x101a   :  { %v10781_v12 = vpop.eup %10780 }
0x1021   :  { %v10783_v16 = vpop.eup %10782 }
0x1022   :  { %v10785_v18 = vpop.eup %10784 }
0x1023   :  { %v10787_v21 = vpop.eup %10786 }
0x1025   :  { %v10789_v29 = vpop.eup %10788 }
0x1026   :  { %v10791_v28 = vpop.eup %10790  ;;  %v2099_v30 = vmul.f32 %v10789_v29, %v2090_v4  ;;  %v2678_v4 = vld [vmem:[#allocation2 + $0x1c8] sm:$0xff] }
0x1027   :  { %v2100_v33 = vmul.f32 %v10791_v28, %v9906_v62  ;;  %v2581_v62 = vld [vmem:[#allocation2 + $0x178] sm:$0xff] }
0x1028   :  { %9943 = vmatprep.subr.mxu0 %v2581_v62 }
0x1029   :  { %9944 = vmatpush3.msra.mxu0 %v2581_v62 }
0x102a   :  { %9945 = vmatprep.subr.mxu0 %v2580_v0 }
0x102b   :  { %9946 = vmatpush3.msra.mxu0 %v2580_v0 }
0x102c   :  { %9969 = vmatprep.subr.mxu0 %v11057_v2 }
0x1041   :  { %v9920_v61 = vpop.f32.mrf.mxu1 }
0x1042   :  { %v9913_v10 = vpop.f32.mrf.mxu0  ;;  %v2302_v13 = vmul.f32 %v10781_v12, %v9920_v61 }
0x1043   :  { %v2201_v59 = vmul.f32 %v10777_v5, %v9913_v10  ;;  %v2292_v15 = vpop.f32.mrf.mxu1  ;;  %v2676_v5 = vld [vmem:[#allocation2 + $0x1b8] sm:$0xff] }
0x1044   :  { %v2191_v8 = vpop.f32.mrf.mxu0  ;;  %v2301_v20 = vmul.f32 %v10785_v18, %v2292_v15 }
0x1045   :  { %v2200_v9 = vmul.f32 %v10779_v7, %v2191_v8  ;;  %2408 = vrot.lane.b32.xlu1 %v2201_v59, %s11042_s13 }
0x1047   :  { %v9927_v14 = vpop.f32.mrf.mxu0  ;;  %2406 = vrot.lane.b32.xlu0 %v2200_v9, %s11042_s13 }
0x1048   :  { %v2403_v22 = vmul.f32 %v10787_v21, %v9927_v14  ;;  %v9091_v21 = vld [vmem:[#allocation2 + $0x160] ss:$0 sm:$0xff] }
0x1049   :  { %v2393_v17 = vpop.f32.mrf.mxu0  ;;  %2416 = vrot.lane.b32.xlu1 %v2302_v13, %s11050_s26 }
0x104a   :  { %v2402_v19 = vmul.f32 %v10783_v16, %v2393_v17 }
0x104c   :  { %2422 = vrot.lane.b32.xlu0 %v2402_v19, %s11056_s4 }
0x104d   :  { %2414 = vrot.lane.b32.xlu1 %v2301_v20, %s11050_s26 }
0x1051   :  { %2424 = vrot.lane.b32.xlu1 %v2403_v22, %s11056_s4 }
0x10b7   :  { %v2409_v24 = vpop.permute.xlu1 %2408 }
0x10b8   :  { %v2429_v37 = vsel %vm283_vm7, %v2100_v33, %v2409_v24  ;;  %v28_v33 = vld [vmem:[%s12941_s0 + $0x18] sm:$0xff] }
0x10b9   :  { %v2407_v26 = vpop.permute.xlu0 %2406 }
0x10ba   :  { %v2428_v31 = vsel %vm283_vm7, %v2099_v30, %v2407_v26 }
0x10bb   :  { %v2417_v27 = vpop.permute.xlu1 %2416 }
0x10bc   :  { %v2431_v38 = vsel %vm664_vm8, %v2429_v37, %v2417_v27  ;;  %v2673_v37 = vld [vmem:[#allocation2 + $0x1a0] sm:$0xff] }
0x10be   :  { %v2423_v34 = vpop.permute.xlu0 %2422 }
0x10bf   :  { %v2415_v32 = vpop.permute.xlu1 %2414 }
0x10c0   :  { %v2430_v35 = vsel %vm664_vm8, %v2428_v31, %v2415_v32  ;;  %v2822_v31 = vld [vmem:[#allocation2 + $0x10] sm:$0x7] }
0x10c1   :  { %v2432_v36 = vsel %vm1117_vm11, %v2430_v35, %v2423_v34  ;;  %v27_v32 = vld [vmem:[%s12941_s0 + $0x10] sm:$0xff]  ;;  %v29_v34 = vld [vmem:[%s12941_s0 + $0x20] sm:$0x3] }
0x10c2   :  { %9936 = vmatprep.mubr.msk.f32.mxu1 %vm131_vm2, %v2432_v36  ;;  %v2675_v35 = vld [vmem:[#allocation2 + $0x1b0] sm:$0xff]  ;;  %v2674_v36 = vld [vmem:[#allocation2 + $0x1a8] sm:$0xff] }
0x10c3   :  { %v2425_v39 = vpop.permute.xlu1 %2424 }
0x10c4   :  { %v2433_v40 = vsel %vm1117_vm11, %v2431_v38, %v2425_v39  ;;  %v2672_v38 = vld [vmem:[#allocation2 + $0x198] sm:$0xff]  ;;  %v9093_v39 = vld [vmem:[#allocation2 + $0x190] ss:$0 sm:$0xff] }
0x10c5   :  { %9937 = vmatmul.mubr.msk.f32.vlgmr.msra.gmra.mxu1 %vm131_vm2, %v2433_v40 }
0x10c6   :  { %9951 = vmatpush3.msra.mxu1 %v2679_v3 }
0x10c7   :  { %9952 = vmatprep.subr.mxu1 %v2678_v4 }
0x10c8   :  { %9953 = vmatpush3.msra.mxu1 %v2678_v4 }
0x10c9   :  { %9954 = vmatprep.subr.mxu1 %v2677_v11 }
0x10ca   :  { %9955 = vmatpush3.msra.mxu1 %v2677_v11 }
0x10cb   :  { %9956 = vmatprep.subr.mxu1 %v2676_v5 }
0x10cc   :  { %9957 = vmatpush3.msra.mxu1 %v2676_v5 }
0x10cd   :  { %9958 = vmatprep.subr.mxu1 %v2675_v35 }
0x10ce   :  { %9959 = vmatpush3.msra.mxu1 %v2675_v35 }
0x10cf   :  { %9960 = vmatprep.subr.mxu1 %v2674_v36 }
0x10d0   :  { %9961 = vmatpush3.msra.mxu1 %v2674_v36 }
0x10d1   :  { %9962 = vmatprep.subr.mxu1 %v2673_v37 }
0x10d2   :  { %9963 = vmatpush3.msra.mxu1 %v2673_v37 }
0x10d3   :  { %9964 = vmatprep.subr.mxu1 %v2672_v38 }
0x10d4   :  { %9965 = vmatpush3.msra.mxu1 %v2672_v38 }
0x10d5   :  { %9997 = vmatprep.subr.mxu1 %v11057_v2 }
0x1185   :  { %v9938_v42 = vpop.f32.mrf.mxu1 }
0x1186   :  { %v2521_v43 = vadd.f32 %v9938_v42, %v9088_v41 }
0x1187   :  { %v2515_v44 = vpop.f32.mrf.mxu1 }
0x1188   :  { %v11400_v45 = vadd.f32 %v2521_v43, %v11258_v63  ;;  %v2516_v46 = vadd.f32 %v9088_v41, %v2515_v44  ;;  %v9101_v43 = vld [vmem:[#allocation2 + $0x18] ss:$0 sm:$0xff] }
0x118a   :  { %v11403_v47 = vadd.f32 %v2516_v46, %v11261_v1  ;;  %v2529_v48 = vsel %vm131_vm2, %v11400_v45, 0.0 }
0x118b   :  { %2530 = vadd.xlane.f32.xlu1 %v2529_v48  ;;  %v2922_v48 = vld [vmem:[#allocation2 + $0x508] sm:$0xff] }
0x118c   :  { %v2526_v49 = vsel %vm131_vm2, %v11403_v47, 0.0 }
0x118d   :  { %2527 = vadd.xlane.f32.xlu0 %v2526_v49 }
0x1214   :  { %v2531_v50 = vpop.xlane.xlu1 %2530 }
0x1215   :  { %v2533_v51 = vmul.f32 0.03125, %v2531_v50 }
0x1216   :  { %v2528_v52 = vpop.xlane.xlu0 %2527 }
0x1217   :  { %v2532_v53 = vmul.f32 0.03125, %v2528_v52  ;;  %v11410_v54 = vsub.f32 %v11400_v45, %v2533_v51 }
0x1219   :  { %v2534_v63 = vsub.f32 %v11403_v47, %v2532_v53  ;;  %v2537_v56 = vmul.f32 %v11410_v54, %v11410_v54  ;;  %v2570_v29 = vmul.f32 %v9091_v21, %v11410_v54 }
0x121b   :  { %v2536_v55 = vmul.f32 %v2534_v63, %v2534_v63  ;;  %v2541_v57 = vsel %vm131_vm2, %v2537_v56, 0.0  ;;  %v2569_v22 = vmul.f32 %v9091_v21, %v2534_v63  ;;  %v2923_v63 = vld [vmem:[#allocation2 + $0x510] sm:$0xff]  ;;  %v3006_v21 = vld [vmem:[#allocation2 + $0x208] sm:$0xff] }
0x121d   :  { %v2538_v1 = vsel %vm131_vm2, %v2536_v55, 0.0 }
0x121e   :  { %2539 = vadd.xlane.f32.xlu0 %v2538_v1 }
0x1222   :  { %2542 = vadd.xlane.f32.xlu0 %v2541_v57 }
0x12a7   :  { %v2540_v10 = vpop.xlane.xlu0 %2539 }
0x12a8   :  { %v2544_v6 = vmul.f32 0.032258064, %v2540_v10 }
0x12aa   :  { %10792 = vrsqrt.f32 %v2544_v6  ;;  %vm2548_vm12 = vcmp.eq.f32.partialorder %v2544_v6, inf  ;;  %v2551_v9 = vand.u32 2147483648, %v2544_v6  ;;  %vm2550_vm13 = vcmp.eq.f32.partialorder %v2544_v6, 0.0 }
0x12ab   :  { %v2543_v59 = vpop.xlane.xlu0 %2542 }
0x12ac   :  { %v2545_v7 = vmul.f32 0.032258064, %v2543_v59 }
0x12ae   :  { %10794 = vrsqrt.f32 %v2545_v7  ;;  %vm2555_vm14 = vcmp.eq.f32.partialorder %v2545_v7, inf  ;;  %v2558_v17 = vand.u32 2147483648, %v2545_v7  ;;  %vm2557_vm15 = vcmp.eq.f32.partialorder %v2545_v7, 0.0 }
0x12b7   :  { %v10793_v61 = vpop.eup %10792 }
0x12b8   :  { %v2547_v8 = vmul.f32 %v10793_v61, %v2544_v6 }
0x12ba   :  { %v2549_v12 = vsel %vm2548_vm12, %v2544_v6, %v2547_v8 }
0x12bb   :  { %v10795_v13 = vpop.eup %10794  ;;  %v2552_v14 = vsel %vm2550_vm13, %v2551_v9, %v2549_v12 }
0x12bc   :  { %v2560_v15 = vadd.f32 1e-06, %v2552_v14  ;;  %v2554_v16 = vmul.f32 %v10795_v13, %v2545_v7 }
0x12be   :  { %10796 = vrcp.f32 %v2560_v15  ;;  %v2556_v18 = vsel %vm2555_vm14, %v2545_v7, %v2554_v16 }
0x12bf   :  { %v2559_v19 = vsel %vm2557_vm15, %v2558_v17, %v2556_v18 }
0x12c0   :  { %v2561_v20 = vadd.f32 1e-06, %v2559_v19  ;;  %v3008_v19 = vld [vmem:[#allocation2 + $0x218] sm:$0xff] }
0x12c2   :  { %10798 = vrcp.f32 %v2561_v20  ;;  %v3007_v20 = vld [vmem:[#allocation2 + $0x210] sm:$0xff] }
0x12cb   :  { %v10797_v23 = vpop.eup %10796 }
0x12cc   :  { %v2571_v24 = vmul.f32 %v10797_v23, %v2569_v22  ;;  %v3005_v22 = vld [vmem:[#allocation2 + $0x200] sm:$0xff] }
0x12ce   :  { %v2578_v26 = vadd.f32 %v9092_v25, %v2571_v24 }
0x12cf   :  { %v10799_v27 = vpop.eup %10798 }
0x12d0   :  { %v2572_v28 = vmul.f32 %v10799_v27, %v2570_v29  ;;  %9947 = vmatprep.mubr.msk.f32.mxu0 %vm131_vm2, %v2578_v26 }
0x12d2   :  { %v2579_v30 = vadd.f32 %v9092_v25, %v2572_v28 }
0x12d4   :  { %9948 = vmatmul.mubr.msk.f32.vlgmr.msra.gmra.mxu0 %vm131_vm2, %v2579_v30 }
0x12d5   :  { %9970 = vmatpush3.msk.msra.mxu0 %vm2838_vm3, %v2822_v31  ;;  %9971 = vmatprep.mubr.msk.f32.mxu0 %vm11058_vm4, %v11057_v2 }
0x12d6   :  { %9980 = vmatprep.subr.mxu0 %v11057_v2 }
0x12d8   :  { %9972 = vmatmul.mubr.msk.f32.vlgmr.msra.gmra.mxu0 %vm2828_vm5, %v27_v32 }
0x12d9   :  { %9974 = vmatprep.mubr.msk.f32.mxu0 %vm11058_vm4, %v11057_v2  ;;  %9981 = vmatpush3.msra.mxu0 %v3008_v19 }
0x12da   :  { %9982 = vmatprep.subr.mxu0 %v11057_v2 }
0x12db   :  { %9983 = vmatpush3.msra.mxu0 %v3007_v20 }
0x12dc   :  { %9975 = vmatmul.mubr.msk.f32.gmra.mxu0 %vm2828_vm5, %v28_v33  ;;  %9984 = vmatprep.subr.mxu0 %v11057_v2 }
0x12dd   :  { %9977 = vmatprep.mubr.msk.f32.mxu0 %vm11058_vm4, %v11057_v2  ;;  %9985 = vmatpush3.msra.mxu0 %v3006_v21 }
0x12de   :  { %9986 = vmatprep.subr.mxu0 %v11057_v2 }
0x12df   :  { %9987 = vmatpush3.msra.mxu0 %v3005_v22 }
0x12e0   :  { %9978 = vmatmul.mubr.msk.f32.gmra.mxu0 %vm2828_vm5, %v29_v34  ;;  %10012 = vmatprep.subr.mxu0 %v11057_v2 }
0x12e1   :  { %9988 = vmatprep.mubr.msk.f32.mxu0 %vm11058_vm4, %v11057_v2 }
0x1394   :  { %v9949_v40 = vpop.f32.mrf.mxu0 }
0x1395   :  { %v2667_v41 = vadd.f32 %v9949_v40, %v9093_v39 }
0x1396   :  { %v2661_v42 = vpop.f32.mrf.mxu0 }
0x1397   :  { %v2662_v44 = vadd.f32 %v9093_v39, %v2661_v42  ;;  %v2671_v51 = vmax.f32 %v2667_v41, 0.0 }
0x1398   :  { %v2908_v46 = vpop.f32.mrf.mxu0 }
0x1399   :  { %v2670_v49 = vmax.f32 %v2662_v44, 0.0  ;;  %v2909_v50 = vadd.f32 %v9101_v43, %v2908_v46 }
0x139a   :  { %v9973_v52 = vpop.f32.mrf.mxu0 }
0x139b   :  { %v11440_v53 = vadd.f32 %v2922_v48, %v2909_v50  ;;  %9966 = vmatprep.mubr.msk.f32.mxu1 %vm676_vm10, %v2670_v49  ;;  %v9106_v49 = vld [vmem:[#allocation2 + $0x1f0] ss:$0 sm:$0xff]  ;;  %v9107_v52 = vld [vmem:[#allocation2 + $0x1f8] ss:$0 sm:$0xff] }
0x139c   :  { %9967 = vmatmul.mubr.msk.f32.vlgmr.msra.gmra.mxu1 %vm676_vm10, %v2671_v51  ;;  %v2913_v54 = vpop.f32.mrf.mxu0 }
0x139d   :  { %v2914_v55 = vadd.f32 %v9101_v43, %v2913_v54  ;;  %v2928_v1 = vsel %vm131_vm2, %v11440_v53, 0.0  ;;  %10003 = vmatprep.mubr.msk.f32.mxu1 %vm11058_vm4, %v11057_v2 }
0x139e   :  { %2929 = vadd.xlane.f32.xlu0 %v2928_v1  ;;  %v9976_v56 = vpop.f32.mrf.mxu0 }
0x139f   :  { %v11448_v57 = vadd.f32 %v2923_v63, %v2914_v55 }
0x13a0   :  { %v2918_v58 = vpop.f32.mrf.mxu0 }
0x13a1   :  { %v2919_v62 = vadd.f32 %v9101_v43, %v2918_v58  ;;  %v2931_v0 = vsel %vm131_vm2, %v11448_v57, 0.0 }
0x13a2   :  { %2932 = vadd.xlane.f32.xlu1 %v2931_v0  ;;  %v9979_v3 = vpop.f32.mrf.mxu0 }
0x13a3   :  { %v11452_v4 = vadd.f32 %v2924_v60, %v2919_v62 }
0x13a5   :  { %v2935_v11 = vsel %vm2934_vm6, %v11452_v4, 0.0 }
0x13a6   :  { %2936 = vadd.xlane.f32.xlu0 %v2935_v11  ;;  %v9108_v11 = vld [vmem:[#allocation2 + $0x220] ss:$0 sm:$0xff] }
0x1427   :  { %v2930_v5 = vpop.xlane.xlu0 %2929 }
0x1428   :  { %v2938_v10 = vmul.f32 0.03125, %v2930_v5 }
0x142a   :  { %v11457_v6 = vsub.f32 %v11440_v53, %v2938_v10 }
0x142b   :  { %v2933_v59 = vpop.xlane.xlu1 %2932 }
0x142c   :  { %v2939_v7 = vmul.f32 0.03125, %v2933_v59  ;;  %v2944_v61 = vmul.f32 %v11457_v6, %v11457_v6  ;;  %v2991_v50 = vmul.f32 %v9106_v49, %v11457_v6 }
0x142e   :  { %v11462_v8 = vsub.f32 %v11448_v57, %v2939_v7  ;;  %v2947_v9 = vsel %vm131_vm2, %v2944_v61, 0.0 }
0x142f   :  { %2948 = vadd.xlane.f32.xlu1 %v2947_v9  ;;  %v2937_v12 = vpop.xlane.xlu0 %2936 }
0x1430   :  { %v2940_v13 = vmul.f32 0.03125, %v2937_v12  ;;  %v2945_v14 = vmul.f32 %v11462_v8, %v11462_v8  ;;  %v2992_v63 = vmul.f32 %v9106_v49, %v11462_v8 }
0x1432   :  { %v11468_v15 = vsub.f32 %v11452_v4, %v2940_v13  ;;  %v2950_v16 = vsel %vm131_vm2, %v2945_v14, 0.0 }
0x1433   :  { %2951 = vadd.xlane.f32.xlu0 %v2950_v16 }
0x1434   :  { %v2946_v17 = vmul.f32 %v11468_v15, %v11468_v15  ;;  %v2993_v58 = vmul.f32 %v9106_v49, %v11468_v15 }
0x1436   :  { %v2953_v18 = vsel %vm2934_vm6, %v2946_v17, 0.0 }
0x1437   :  { %2954 = vadd.xlane.f32.xlu1 %v2953_v18 }
0x14b8   :  { %v2949_v23 = vpop.xlane.xlu1 %2948 }
0x14b9   :  { %v2956_v25 = vmul.f32 0.032258064, %v2949_v23 }
0x14bb   :  { %10800 = vrsqrt.f32 %v2956_v25  ;;  %vm2961_vm12 = vcmp.eq.f32.partialorder %v2956_v25, inf  ;;  %v2964_v31 = vand.u32 2147483648, %v2956_v25  ;;  %vm2963_vm13 = vcmp.eq.f32.partialorder %v2956_v25, 0.0 }
0x14bc   :  { %v2952_v24 = vpop.xlane.xlu0 %2951 }
0x14bd   :  { %v2957_v29 = vmul.f32 0.032258064, %v2952_v24 }
0x14bf   :  { %10802 = vrsqrt.f32 %v2957_v29  ;;  %vm2968_vm14 = vcmp.eq.f32.partialorder %v2957_v29, inf  ;;  %v2971_v37 = vand.u32 2147483648, %v2957_v29  ;;  %vm2970_vm15 = vcmp.eq.f32.partialorder %v2957_v29, 0.0 }
0x14c0   :  { %v2955_v26 = vpop.xlane.xlu1 %2954 }
0x14c1   :  { %v2958_v27 = vmul.f32 0.032258064, %v2955_v26 }
0x14c3   :  { %10804 = vrsqrt.f32 %v2958_v27  ;;  %vm2975_vm3 = vcmp.eq.f32.partialorder %v2958_v27, inf  ;;  %v2978_v43 = vand.u32 2147483648, %v2958_v27  ;;  %vm2977_vm5 = vcmp.eq.f32.partialorder %v2958_v27, 0.0 }
0x14c8   :  { %v10801_v28 = vpop.eup %10800 }
0x14c9   :  { %v2960_v30 = vmul.f32 %v10801_v28, %v2956_v25 }
0x14cb   :  { %v2962_v32 = vsel %vm2961_vm12, %v2956_v25, %v2960_v30  ;;  %vm3552_vm12 = vcmask 146432  }
0x14cc   :  { %v10803_v33 = vpop.eup %10802  ;;  %v2965_v34 = vsel %vm2963_vm13, %v2964_v31, %v2962_v32  ;;  %vm3556_vm13 = vcmask 293888  }
0x14cd   :  { %v2980_v35 = vadd.f32 1e-06, %v2965_v34  ;;  %v2967_v36 = vmul.f32 %v10803_v33, %v2957_v29  ;;  %v11601_v34 = vpop.f32.mrf.mxu1 }
0x14cf   :  { %10806 = vrcp.f32 %v2980_v35  ;;  %v2969_v38 = vsel %vm2968_vm14, %v2957_v29, %v2967_v36  ;;  %v11603_v35 = vpop.f32.mrf.mxu1  ;;  %vm12949_vm14 = vcmask 441344  }
0x14d0   :  { %v10805_v39 = vpop.eup %10804  ;;  %v2972_v40 = vsel %vm2970_vm15, %v2971_v37, %v2969_v38  ;;  %vm12948_vm15 = vcmask 588800  }
0x14d1   :  { %v2981_v41 = vadd.f32 1e-06, %v2972_v40  ;;  %v2974_v42 = vmul.f32 %v10805_v39, %v2958_v27 }
0x14d3   :  { %10808 = vrcp.f32 %v2981_v41  ;;  %v2976_v44 = vsel %vm2975_vm3, %v2958_v27, %v2974_v42  ;;  %vm12947_vm3 = vcmask 582656  }
0x14d4   :  { %v2979_v46 = vsel %vm2977_vm5, %v2978_v43, %v2976_v44  ;;  %vm12945_vm5 = vcmask 140288  }
0x14d5   :  { %v2982_v48 = vadd.f32 1e-06, %v2979_v46 }
0x14d7   :  { %10810 = vrcp.f32 %v2982_v48 }
0x14dc   :  { %v10807_v51 = vpop.eup %10806 }
0x14dd   :  { %v2994_v54 = vmul.f32 %v10807_v51, %v2991_v50 }
0x14df   :  { %v3002_v55 = vadd.f32 %v9107_v52, %v2994_v54 }
0x14e0   :  { %v10809_v1 = vpop.eup %10808 }
0x14e1   :  { %9989 = vmatmul.mubr.msk.f32.vlgmr.msra.gmra.mxu0 %vm131_vm2, %v3002_v55  ;;  %v2995_v56 = vmul.f32 %v10809_v1, %v2992_v63 }
0x14e2   :  { %9991 = vmatprep.mubr.msk.f32.mxu0 %vm11058_vm4, %v11057_v2 }
0x14e3   :  { %v3003_v60 = vadd.f32 %v9107_v52, %v2995_v56 }
0x14e4   :  { %v10811_v62 = vpop.eup %10810 }
0x14e5   :  { %9992 = vmatmul.mubr.msk.f32.gmra.mxu0 %vm131_vm2, %v3003_v60  ;;  %v2996_v0 = vmul.f32 %v10811_v62, %v2993_v58 }
0x14e6   :  { %9994 = vmatprep.mubr.msk.f32.mxu0 %vm11058_vm4, %v11057_v2 }
0x14e7   :  { %v3004_v3 = vadd.f32 %v9107_v52, %v2996_v0 }
0x14e9   :  { %9995 = vmatmul.mubr.msk.f32.gmra.mxu0 %vm131_vm2, %v3004_v3 }
0x14ea   :  { %10018 = vmatprep.mubr.msk.f32.mxu0 %vm11058_vm4, %v11057_v2 }
0x15a1   :  { %v3089_v5 = vpop.f32.mrf.mxu0 }
0x15a2   :  { %v11490_v10 = vadd.f32 %v9108_v11, %v3089_v5 }
0x15a3   :  { %v9990_v6 = vpop.f32.mrf.mxu0 }
0x15a4   :  { %3106 = vrot.lane.b32.xlu0 %v11490_v10, %s11044_s20 }
0x15a5   :  { %v3094_v59 = vpop.f32.mrf.mxu0 }
0x15a6   :  { %v11494_v7 = vadd.f32 %v9108_v11, %v3094_v59 }
0x15a7   :  { %v9993_v61 = vpop.f32.mrf.mxu0 }
0x15a8   :  { %3108 = vrot.lane.b32.xlu1 %v11494_v7, %s11044_s20  ;;  %v3564_v61 = vld [vmem:[#allocation2 + $0x530] sm:$0xff] }
0x15a9   :  { %v3099_v8 = vpop.f32.mrf.mxu0 }
0x15aa   :  { %v11498_v9 = vadd.f32 %v9108_v11, %v3099_v8 }
0x15ab   :  { %v9996_v12 = vpop.f32.mrf.mxu0 }
0x15ac   :  { %3212 = vrot.lane.b32.xlu1 %v11494_v7, %s11043_s1  ;;  %3110 = vrot.lane.b32.xlu0 %v11498_v9, %s11044_s20 }
0x15b0   :  { %3214 = vrot.lane.b32.xlu1 %v11498_v9, %s11043_s1  ;;  %3204 = vrot.lane.b32.xlu0 %v11490_v10, %s11045_s21 }
0x15b4   :  { %3210 = vrot.lane.b32.xlu1 %v11490_v10, %s11043_s1  ;;  %3316 = vrot.lane.b32.xlu0 %v11494_v7, %s11046_s22 }
0x15b8   :  { %3206 = vrot.lane.b32.xlu1 %v11494_v7, %s11045_s21  ;;  %3422 = vrot.lane.b32.xlu0 %v11498_v9, %s11048_s24 }
0x15bc   :  { %3318 = vrot.lane.b32.xlu1 %v11498_v9, %s11046_s22  ;;  %3418 = vrot.lane.b32.xlu0 %v11490_v10, %s11048_s24 }
0x15c0   :  { %3420 = vrot.lane.b32.xlu1 %v11494_v7, %s11048_s24  ;;  %3208 = vrot.lane.b32.xlu0 %v11498_v9, %s11045_s21 }
0x15c4   :  { %3314 = vrot.lane.b32.xlu1 %v11490_v10, %s11046_s22  ;;  %3412 = vrot.lane.b32.xlu0 %v11490_v10, %s11049_s25 }
0x15c8   :  { %3308 = vrot.lane.b32.xlu1 %v11490_v10, %s11047_s23  ;;  %3414 = vrot.lane.b32.xlu0 %v11494_v7, %s11049_s25 }
0x15cc   :  { %3310 = vrot.lane.b32.xlu1 %v11494_v7, %s11047_s23  ;;  %3416 = vrot.lane.b32.xlu0 %v11498_v9, %s11049_s25 }
0x15d0   :  { %3312 = vrot.lane.b32.xlu1 %v11498_v9, %s11047_s23 }
0x1616   :  { %v3107_v13 = vpop.permute.xlu0 %3106 }
0x161a   :  { %v3109_v14 = vpop.permute.xlu1 %3108 }
0x161e   :  { %v3213_v15 = vpop.permute.xlu1 %3212  ;;  %v3111_v16 = vpop.permute.xlu0 %3110 }
0x161f   :  { %9998 = vmatpush3.xpose.msk.msra.mxu1 %vm283_vm7, %v3111_v16 }
0x1620   :  { %9999 = vmatprep.subr.mxu1 %v11057_v2 }
0x1622   :  { %v3215_v17 = vpop.permute.xlu1 %3214  ;;  %v3205_v18 = vpop.permute.xlu0 %3204 }
0x1623   :  { %10000 = vmatpush3.xpose.msk.msra.mxu1 %vm283_vm7, %v3109_v14  ;;  %10013 = vmatpush3.xpose.msk.msra.mxu0 %vm283_vm7, %v3215_v17  ;;  %v3565_v17 = vld [vmem:[#allocation2 + $0x538] sm:$0xff] }
0x1624   :  { %10014 = vmatprep.subr.mxu0 %v11057_v2  ;;  %10001 = vmatprep.subr.mxu1 %v11057_v2 }
0x1626   :  { %v3211_v19 = vpop.permute.xlu1 %3210  ;;  %v3317_v20 = vpop.permute.xlu0 %3316 }
0x1627   :  { %10002 = vmatpush3.xpose.msk.msra.mxu1 %vm283_vm7, %v3107_v13  ;;  %10015 = vmatpush3.xpose.msk.msra.mxu0 %vm283_vm7, %v3213_v15 }
0x1628   :  { %10016 = vmatprep.subr.mxu0 %v11057_v2  ;;  %10027 = vmatprep.subr.mxu1 %v11057_v2 }
0x162a   :  { %v3207_v21 = vpop.permute.xlu1 %3206  ;;  %v3423_v22 = vpop.permute.xlu0 %3422  ;;  %10004 = vmatmul.mubr.msk.f32.vlgmr.msra.gmra.mxu1 %vm283_vm7, %v11490_v10 }
0x162b   :  { %10017 = vmatpush3.xpose.msk.msra.mxu0 %vm283_vm7, %v3211_v19  ;;  %10006 = vmatprep.mubr.msk.f32.mxu1 %vm11058_vm4, %v11057_v2 }
0x162c   :  { %10042 = vmatprep.subr.mxu0 %v11057_v2 }
0x162e   :  { %v3319_v23 = vpop.permute.xlu1 %3318  ;;  %10019 = vmatmul.mubr.msk.f32.vlgmr.msra.gmra.mxu0 %vm283_vm7, %v3205_v18  ;;  %v3419_v25 = vpop.permute.xlu0 %3418  ;;  %10007 = vmatmul.mubr.msk.f32.gmra.mxu1 %vm283_vm7, %v11494_v7 }
0x162f   :  { %10028 = vmatpush3.xpose.msk.msra.mxu1 %vm283_vm7, %v3319_v23  ;;  %10043 = vmatpush3.xpose.msk.msra.mxu0 %vm283_vm7, %v3423_v22 }
0x1630   :  { %10009 = vmatprep.mubr.msk.f32.mxu1 %vm11058_vm4, %v11057_v2  ;;  %10021 = vmatprep.mubr.msk.f32.mxu0 %vm11058_vm4, %v11057_v2 }
0x1631   :  { %10044 = vmatprep.subr.mxu0 %v11057_v2  ;;  %10029 = vmatprep.subr.mxu1 %v11057_v2 }
0x1632   :  { %v3421_v24 = vpop.permute.xlu1 %3420  ;;  %10022 = vmatmul.mubr.msk.f32.gmra.mxu0 %vm283_vm7, %v3207_v21  ;;  %v3209_v29 = vpop.permute.xlu0 %3208  ;;  %10010 = vmatmul.mubr.msk.f32.gmra.mxu1 %vm283_vm7, %v11498_v9 }
0x1633   :  { %10030 = vmatpush3.xpose.msk.msra.mxu1 %vm283_vm7, %v3317_v20  ;;  %10045 = vmatpush3.xpose.msk.msra.mxu0 %vm283_vm7, %v3421_v24 }
0x1634   :  { %10024 = vmatprep.mubr.msk.f32.mxu0 %vm11058_vm4, %v11057_v2  ;;  %10046 = vmatprep.subr.mxu0 %v11057_v2 }
0x1635   :  { %10031 = vmatprep.subr.mxu1 %v11057_v2  ;;  %10033 = vmatprep.mubr.msk.f32.mxu1 %vm11058_vm4, %v11057_v2 }
0x1636   :  { %v3315_v26 = vpop.permute.xlu1 %3314  ;;  %10025 = vmatmul.mubr.msk.f32.gmra.mxu0 %vm283_vm7, %v3209_v29  ;;  %v3413_v27 = vpop.permute.xlu0 %3412  ;;  %v3566_v29 = vld [vmem:[#allocation2 + $0x540] sm:$0x3] }
0x1637   :  { %10032 = vmatpush3.xpose.msk.msra.mxu1 %vm283_vm7, %v3315_v26  ;;  %10047 = vmatpush3.xpose.msk.msra.mxu0 %vm283_vm7, %v3419_v25 }
0x1638   :  { %10048 = vmatprep.mubr.msk.f32.mxu0 %vm11058_vm4, %v11057_v2  ;;  %10072 = vmatprep.subr.mxu0 %v11057_v2 }
0x1639   :  { %10057 = vmatprep.subr.mxu1 %v11057_v2 }
0x163a   :  { %v3309_v28 = vpop.permute.xlu1 %3308  ;;  %10049 = vmatmul.mubr.msk.f32.vlgmr.msra.gmra.mxu0 %vm283_vm7, %v3413_v27  ;;  %v3415_v30 = vpop.permute.xlu0 %3414 }
0x163b   :  { %10034 = vmatmul.mubr.msk.f32.vlgmr.msra.gmra.mxu1 %vm283_vm7, %v3309_v28  ;;  %10051 = vmatprep.mubr.msk.f32.mxu0 %vm11058_vm4, %v11057_v2 }
0x163c   :  { %10036 = vmatprep.mubr.msk.f32.mxu1 %vm11058_vm4, %v11057_v2 }
0x163e   :  { %v3311_v31 = vpop.permute.xlu1 %3310  ;;  %10052 = vmatmul.mubr.msk.f32.gmra.mxu0 %vm283_vm7, %v3415_v30  ;;  %v3417_v32 = vpop.permute.xlu0 %3416 }
0x163f   :  { %10037 = vmatmul.mubr.msk.f32.gmra.mxu1 %vm283_vm7, %v3311_v31  ;;  %10054 = vmatprep.mubr.msk.f32.mxu0 %vm11058_vm4, %v11057_v2 }
0x1640   :  { %10039 = vmatprep.mubr.msk.f32.mxu1 %vm11058_vm4, %v11057_v2 }
0x1642   :  { %v3313_v33 = vpop.permute.xlu1 %3312  ;;  %10055 = vmatmul.mubr.msk.f32.gmra.mxu0 %vm283_vm7, %v3417_v32 }
0x1643   :  { %10040 = vmatmul.mubr.msk.f32.gmra.mxu1 %vm283_vm7, %v3313_v33  ;;  %10078 = vmatprep.mubr.msk.f32.mxu0 %vm11058_vm4, %v11057_v2 }
0x1644   :  { %10063 = vmatprep.mubr.msk.f32.mxu1 %vm11058_vm4, %v11057_v2 }
0x16ea   :  { %v3190_v36 = vpop.f32.mrf.mxu1 }
0x16ec   :  { %v10005_v37 = vpop.f32.mrf.mxu1 }
0x16ee   :  { %v3195_v38 = vpop.f32.mrf.mxu1  ;;  %v3294_v39 = vpop.f32.mrf.mxu0 }
0x16ef   :  { %3519 = vrot.lane.b32.xlu1 %v3294_v39, %s11059_s11 }
0x16f0   :  { %v10008_v40 = vpop.f32.mrf.mxu1  ;;  %v10020_v41 = vpop.f32.mrf.mxu0 }
0x16f2   :  { %v3200_v42 = vpop.f32.mrf.mxu1  ;;  %v3299_v43 = vpop.f32.mrf.mxu0 }
0x16f3   :  { %3521 = vrot.lane.b32.xlu0 %v3299_v43, %s11059_s11 }
0x16f4   :  { %v10011_v44 = vpop.f32.mrf.mxu1  ;;  %v10023_v46 = vpop.f32.mrf.mxu0 }
0x16f6   :  { %v3304_v48 = vpop.f32.mrf.mxu0 }
0x16f8   :  { %v10026_v49 = vpop.f32.mrf.mxu0 }
0x16fa   :  { %v3502_v50 = vpop.f32.mrf.mxu0 }
0x16fb   :  { %3543 = vrot.lane.b32.xlu1 %v3502_v50, %s11060_s12  ;;  %v3398_v51 = vpop.f32.mrf.mxu1 }
0x16fc   :  { %v10050_v52 = vpop.f32.mrf.mxu0  ;;  %3531 = vrot.lane.b32.xlu0 %v3398_v51, %s11061_s14 }
0x16fd   :  { %v10035_v54 = vpop.f32.mrf.mxu1 }
0x16fe   :  { %v3507_v63 = vpop.f32.mrf.mxu0 }
0x16ff   :  { %v3403_v55 = vpop.f32.mrf.mxu1 }
0x1700   :  { %v10053_v1 = vpop.f32.mrf.mxu0  ;;  %3545 = vrot.lane.b32.xlu0 %v3507_v63, %s11060_s12  ;;  %3533 = vrot.lane.b32.xlu1 %v3403_v55, %s11061_s14 }
0x1701   :  { %v10038_v56 = vpop.f32.mrf.mxu1 }
0x1702   :  { %v3512_v58 = vpop.f32.mrf.mxu0 }
0x1703   :  { %v3408_v60 = vpop.f32.mrf.mxu1 }
0x1704   :  { %v10056_v62 = vpop.f32.mrf.mxu0  ;;  %3523 = vrot.lane.b32.xlu1 %v3304_v48, %s11059_s11  ;;  %3535 = vrot.lane.b32.xlu0 %v3408_v60, %s11061_s14 }
0x1705   :  { %v10041_v0 = vpop.f32.mrf.mxu1 }
0x1708   :  { %3547 = vrot.lane.b32.xlu1 %v3512_v58, %s11060_s12 }
0x1761   :  { %v3520_v3 = vpop.permute.xlu1 %3519 }
0x1762   :  { %v3553_v6 = vsel %vm3552_vm12, %v3190_v36, %v3520_v3 }
0x1765   :  { %v3522_v11 = vpop.permute.xlu0 %3521 }
0x1766   :  { %v3554_v14 = vsel %vm3552_vm12, %v3195_v38, %v3522_v11 }
0x176d   :  { %v3544_v5 = vpop.permute.xlu1 %3543 }
0x176e   :  { %v3532_v59 = vpop.permute.xlu0 %3531 }
0x176f   :  { %v3557_v8 = vsel %vm3556_vm13, %v3553_v6, %v3532_v59 }
0x1770   :  { %v3561_v12 = vsel %vm12949_vm14, %v3557_v8, %v3544_v5 }
0x1771   :  { %v3567_v13 = vadd.f32 %v3564_v61, %v3561_v12 }
0x1772   :  { %v3546_v15 = vpop.permute.xlu0 %3545  ;;  %v3534_v16 = vpop.permute.xlu1 %3533 }
0x1773   :  { %v3558_v18 = vsel %vm3556_vm13, %v3554_v14, %v3534_v16  ;;  %v3571_v19 = vsel %vm12948_vm15, %v3567_v13, -inf }
0x1774   :  { %v3562_v20 = vsel %vm12949_vm14, %v3558_v18, %v3546_v15  ;;  %3572 = vmax.xlane.f32.xlu0 %v3571_v19 }
0x1775   :  { %v3568_v21 = vadd.f32 %v3565_v17, %v3562_v20 }
0x1776   :  { %v3524_v22 = vpop.permute.xlu1 %3523  ;;  %v3536_v25 = vpop.permute.xlu0 %3535 }
0x1777   :  { %v3555_v23 = vsel %vm3552_vm12, %v3200_v42, %v3524_v22  ;;  %v3574_v24 = vsel %vm12948_vm15, %v3568_v21, -inf }
0x1778   :  { %3575 = vmax.xlane.f32.xlu1 %v3574_v24  ;;  %v3559_v26 = vsel %vm3556_vm13, %v3555_v23, %v3536_v25 }
0x177a   :  { %v3548_v27 = vpop.permute.xlu1 %3547 }
0x177b   :  { %v3563_v28 = vsel %vm12949_vm14, %v3559_v26, %v3548_v27 }
0x177c   :  { %v3569_v30 = vadd.f32 %v3566_v29, %v3563_v28 }
0x177e   :  { %v3578_v31 = vsel %vm12947_vm3, %v3569_v30, -inf }
0x177f   :  { %3579 = vmax.xlane.f32.xlu0 %v3578_v31 }
0x1789   :  { %3730 = vrot.lane.b32.xlu1 %v11498_v9, %s11054_s30 }
0x178d   :  { %3605 = vrot.lane.b32.xlu1 %v11494_v7, %s11053_s29 }
0x1791   :  { %3603 = vrot.lane.b32.xlu1 %v11490_v10, %s11053_s29 }
0x1795   :  { %3850 = vrot.lane.b32.xlu1 %v11498_v9, %s11052_s28  ;;  %3607 = vrot.lane.b32.xlu0 %v11498_v9, %s11053_s29 }
0x1799   :  { %3968 = vrot.lane.b32.xlu1 %v11494_v7, %s11055_s3  ;;  %3728 = vrot.lane.b32.xlu0 %v11494_v7, %s11054_s30 }
0x179d   :  { %3726 = vrot.lane.b32.xlu0 %v11490_v10, %s11054_s30 }
0x17a1   :  { %3970 = vrot.lane.b32.xlu0 %v11498_v9, %s11055_s3 }
0x17a5   :  { %3848 = vrot.lane.b32.xlu0 %v11494_v7, %s11052_s28 }
0x17fd   :  { %v3573_v32 = vpop.xlane.xlu0 %3572 }
0x17fe   :  { %v3581_v33 = vsub.f32 %v3567_v13, %v3573_v32  ;;  %v4113_v32 = vld [vmem:[#allocation2 + $0x240] sm:$0xff] }
0x1800   :  { %v3584_v36 = vmul.f32 1.442695, %v3581_v33 }
0x1801   :  { %v3576_v37 = vpop.xlane.xlu1 %3575 }
0x1802   :  { %10812 = vpow2.f32 %v3584_v36  ;;  %v3582_v38 = vsub.f32 %v3568_v21, %v3576_v37 }
0x1804   :  { %v3586_v39 = vmul.f32 1.442695, %v3582_v38 }
0x1805   :  { %v3731_v40 = vpop.permute.xlu1 %3730 }
0x1806   :  { %10814 = vpow2.f32 %v3586_v39  ;;  %10073 = vmatpush3.msk.msra.mxu0 %vm12946_vm0, %v3731_v40 }
0x1807   :  { %10074 = vmatprep.subr.mxu0 %v11057_v2 }
0x1808   :  { %v3580_v41 = vpop.xlane.xlu0 %3579 }
0x1809   :  { %v3583_v42 = vsub.f32 %v3569_v30, %v3580_v41  ;;  %v3606_v43 = vpop.permute.xlu1 %3605  ;;  %v4112_v41 = vld [vmem:[#allocation2 + $0x238] sm:$0xff] }
0x180b   :  { %v3588_v9 = vmul.f32 1.442695, %v3583_v42  ;;  %v4111_v42 = vld [vmem:[#allocation2 + $0x230] sm:$0xff] }
0x180c   :  { %v3608_v44 = vpop.permute.xlu0 %3607 }
0x180d   :  { %10816 = vpow2.f32 %v3588_v9  ;;  %v3604_v7 = vpop.permute.xlu1 %3603  ;;  %10058 = vmatpush3.msk.msra.mxu1 %vm12946_vm0, %v3608_v44 }
0x180e   :  { %10059 = vmatprep.subr.mxu1 %v11057_v2 }
0x180f   :  { %v11650_v46 = vpop.eup %10812  ;;  %10060 = vmatpush3.msra.mxu1 %v3606_v43 }
0x1810   :  { %3705 = vrot.lane.b32.xlu1 %v11650_v46, %s11062_s15  ;;  %10061 = vmatprep.subr.mxu1 %v11057_v2  ;;  %v3729_v48 = vpop.permute.xlu0 %3728  ;;  %v3590_v17 = vsel %vm3552_vm12, %v11650_v46, 0.0 }
0x1811   :  { %v3851_v49 = vpop.permute.xlu1 %3850  ;;  %10062 = vmatpush3.msra.mxu1 %v3604_v7  ;;  %10075 = vmatpush3.msra.mxu0 %v3729_v48  ;;  %v4110_v7 = vld [vmem:[#allocation2 + $0x228] sm:$0xff] }
0x1812   :  { %10064 = vmatmul.mubr.msk.f32.vlgmr.msra.gmra.mxu1 %vm3552_vm12, %v11650_v46  ;;  %10087 = vmatprep.subr.mxu1 %v11057_v2 }
0x1813   :  { %v11658_v50 = vpop.eup %10814  ;;  %10088 = vmatpush3.msk.msra.mxu1 %vm12946_vm0, %v3851_v49  ;;  %10076 = vmatprep.subr.mxu0 %v11057_v2 }
0x1814   :  { %3707 = vrot.lane.b32.xlu0 %v11658_v50, %s11062_s15  ;;  %3825 = vrot.lane.b32.xlu1 %v11650_v46, %s11063_s16  ;;  %v3727_v51 = vpop.permute.xlu0 %3726  ;;  %v3593_v20 = vsel %vm3552_vm12, %v11658_v50, 0.0 }
0x1815   :  { %10066 = vmatprep.mubr.msk.f32.mxu1 %vm11058_vm4, %v11057_v2  ;;  %10077 = vmatpush3.msra.mxu0 %v3727_v51 }
0x1816   :  { %10067 = vmatmul.mubr.msk.f32.gmra.mxu1 %vm3552_vm12, %v11658_v50  ;;  %10089 = vmatprep.subr.mxu1 %v11057_v2 }
0x1817   :  { %10069 = vmatprep.mubr.msk.f32.mxu1 %vm11058_vm4, %v11057_v2  ;;  %10102 = vmatprep.subr.mxu0 %v11057_v2 }
0x1818   :  { %3846 = vrot.lane.b32.xlu0 %v11490_v10, %s11052_s28  ;;  %v3971_v52 = vpop.permute.xlu0 %3970 }
0x181a   :  { %v11676_v54 = vpop.eup %10816 }
0x181b   :  { %3709 = vrot.lane.b32.xlu1 %v11676_v54, %s11062_s15  ;;  %10070 = vmatmul.mubr.msk.f32.gmra.mxu1 %vm3552_vm12, %v11676_v54  ;;  %v3597_v19 = vsel %vm12945_vm5, %v11676_v54, 0.0 }
0x181c   :  { %3966 = vrot.lane.b32.xlu0 %v11490_v10, %s11055_s3  ;;  %v3849_v63 = vpop.permute.xlu0 %3848  ;;  %10093 = vmatprep.mubr.msk.f32.mxu1 %vm11058_vm4, %v11057_v2  ;;  %v3969_v10 = vpop.permute.xlu1 %3968 }
0x181d   :  { %10090 = vmatpush3.msra.mxu1 %v3849_v63 }
0x181e   :  { %10091 = vmatprep.subr.mxu1 %v11057_v2 }
0x181f   :  { %3945 = vrot.lane.b32.xlu1 %v11650_v46, %s11064_s17 }
0x1820   :  { %3827 = vrot.lane.b32.xlu0 %v11658_v50, %s11063_s16 }
0x1823   :  { %3947 = vrot.lane.b32.xlu1 %v11658_v50, %s11064_s17 }
0x1824   :  { %3829 = vrot.lane.b32.xlu0 %v11676_v54, %s11063_s16 }
0x1827   :  { %3949 = vrot.lane.b32.xlu1 %v11676_v54, %s11064_s17 }
0x1882   :  { %v3706_v55 = vpop.permute.xlu1 %3705 }
0x1883   :  { %10079 = vmatmul.mubr.msk.f32.vlgmr.msra.gmra.mxu0 %vm3552_vm12, %v3706_v55  ;;  %v3714_v1 = vsel %vm3552_vm12, %v3706_v55, 0.0 }
0x1884   :  { %10103 = vmatpush3.msk.msra.mxu0 %vm12946_vm0, %v3971_v52  ;;  %3715 = vadd.xlane.f32.xlu0 %v3714_v1 }
0x1885   :  { %10104 = vmatprep.subr.mxu0 %v11057_v2  ;;  %10081 = vmatprep.mubr.msk.f32.mxu0 %vm11058_vm4, %v11057_v2 }
0x1886   :  { %10105 = vmatpush3.msra.mxu0 %v3969_v10  ;;  %v3826_v56 = vpop.permute.xlu1 %3825  ;;  %v3708_v58 = vpop.permute.xlu0 %3707 }
0x1887   :  { %10082 = vmatmul.mubr.msk.f32.gmra.mxu0 %vm3552_vm12, %v3708_v58  ;;  %v3834_v60 = vsel %vm3552_vm12, %v3826_v56, 0.0  ;;  %10106 = vmatprep.subr.mxu0 %v11057_v2  ;;  %v3717_v12 = vsel %vm3552_vm12, %v3708_v58, 0.0 }
0x1888   :  { %3835 = vadd.xlane.f32.xlu1 %v3834_v60  ;;  %10084 = vmatprep.mubr.msk.f32.mxu0 %vm11058_vm4, %v11057_v2 }
0x188a   :  { %v3847_v62 = vpop.permute.xlu0 %3846 }
0x188b   :  { %10092 = vmatpush3.msra.mxu1 %v3847_v62 }
0x188c   :  { %10094 = vmatmul.mubr.msk.f32.vlgmr.msra.gmra.mxu1 %vm3552_vm12, %v3826_v56  ;;  %10117 = vmatprep.subr.mxu1 %v11057_v2 }
0x188d   :  { %v3710_v0 = vpop.permute.xlu1 %3709  ;;  %10096 = vmatprep.mubr.msk.f32.mxu1 %vm11058_vm4, %v11057_v2  ;;  %10118 = vmatpush3.msra.mxu1 %v4113_v32 }
0x188e   :  { %10085 = vmatmul.mubr.msk.f32.gmra.mxu0 %vm3552_vm12, %v3710_v0  ;;  %v3967_v3 = vpop.permute.xlu0 %3966  ;;  %v3720_v16 = vsel %vm12945_vm5, %v3710_v0, 0.0  ;;  %10119 = vmatprep.subr.mxu1 %v11057_v2 }
0x188f   :  { %10107 = vmatpush3.msra.mxu0 %v3967_v3  ;;  %10108 = vmatprep.mubr.msk.f32.mxu0 %vm11058_vm4, %v11057_v2 }
0x1890   :  { %10134 = vmatprep.subr.mxu0 %v11057_v2  ;;  %10120 = vmatpush3.msra.mxu1 %v4112_v41 }
0x1891   :  { %v3946_v11 = vpop.permute.xlu1 %3945  ;;  %10121 = vmatprep.subr.mxu1 %v11057_v2 }
0x1892   :  { %10109 = vmatmul.mubr.msk.f32.vlgmr.msra.gmra.mxu0 %vm3552_vm12, %v3946_v11  ;;  %v3828_v5 = vpop.permute.xlu0 %3827  ;;  %v3954_v6 = vsel %vm3552_vm12, %v3946_v11, 0.0  ;;  %10122 = vmatpush3.msra.mxu1 %v4111_v42 }
0x1893   :  { %3955 = vadd.xlane.f32.xlu0 %v3954_v6  ;;  %10097 = vmatmul.mubr.msk.f32.gmra.mxu1 %vm3552_vm12, %v3828_v5  ;;  %v3837_v14 = vsel %vm3552_vm12, %v3828_v5, 0.0 }
0x1894   :  { %10111 = vmatprep.mubr.msk.f32.mxu0 %vm11058_vm4, %v11057_v2  ;;  %10099 = vmatprep.mubr.msk.f32.mxu1 %vm11058_vm4, %v11057_v2 }
0x1895   :  { %v3948_v59 = vpop.permute.xlu1 %3947  ;;  %10123 = vmatprep.subr.mxu1 %v11057_v2 }
0x1896   :  { %10112 = vmatmul.mubr.msk.f32.gmra.mxu0 %vm3552_vm12, %v3948_v59  ;;  %v3830_v61 = vpop.permute.xlu0 %3829  ;;  %v3957_v8 = vsel %vm3552_vm12, %v3948_v59, 0.0  ;;  %10124 = vmatpush3.msra.mxu1 %v4110_v7 }
0x1897   :  { %3958 = vadd.xlane.f32.xlu1 %v3957_v8  ;;  %3718 = vadd.xlane.f32.xlu0 %v3717_v12  ;;  %v3840_v15 = vsel %vm12945_vm5, %v3830_v61, 0.0 }
0x1898   :  { %10100 = vmatmul.mubr.msk.f32.gmra.mxu1 %vm3552_vm12, %v3830_v61  ;;  %10114 = vmatprep.mubr.msk.f32.mxu0 %vm11058_vm4, %v11057_v2 }
0x1899   :  { %v3950_v13 = vpop.permute.xlu1 %3949  ;;  %10125 = vmatprep.mubr.msk.f32.mxu1 %vm11058_vm4, %v11057_v2 }
0x189a   :  { %10115 = vmatmul.mubr.msk.f32.gmra.mxu0 %vm3552_vm12, %v3950_v13  ;;  %v3960_v18 = vsel %vm12945_vm5, %v3950_v13, 0.0 }
0x189b   :  { %3838 = vadd.xlane.f32.xlu0 %v3837_v14  ;;  %3841 = vadd.xlane.f32.xlu1 %v3840_v15 }
0x189c   :  { %10142 = vmatprep.mubr.msk.f32.mxu0 %vm11058_vm4, %v11057_v2 }
0x189f   :  { %3721 = vadd.xlane.f32.xlu0 %v3720_v16  ;;  %3591 = vadd.xlane.f32.xlu1 %v3590_v17 }
0x18a3   :  { %3961 = vadd.xlane.f32.xlu0 %v3960_v18  ;;  %3598 = vadd.xlane.f32.xlu1 %v3597_v19 }
0x18a7   :  { %3594 = vadd.xlane.f32.xlu0 %v3593_v20  ;;  %v9096_v20 = vld [vmem:[#allocation2 + $0x1d8] ss:$0 sm:$0xff] }
0x18d2   :  { %v11744_v21 = vpop.f32.mrf.mxu1 }
0x18d4   :  { %v10065_v22 = vpop.f32.mrf.mxu1 }
0x18d5   :  { %v2763_v22 = vadd.f32 %v11601_v34, %v9096_v20 }
0x18d6   :  { %v11746_v23 = vpop.f32.mrf.mxu1 }
0x18d8   :  { %v10068_v25 = vpop.f32.mrf.mxu1 }
0x18d9   :  { %v2767_v25 = vadd.f32 %v2763_v22, %v11400_v45 }
0x18db   :  { %v11748_v24 = vpop.f32.mrf.mxu1 }
0x18dd   :  { %v10071_v29 = vpop.f32.mrf.mxu1 }
0x18de   :  { %v2758_v29 = vadd.f32 %v9096_v20, %v11603_v35  ;;  %v4385_v20 = vld [vmem:[#allocation2 + $0x288] sm:$0xff] }
0x190d   :  { %v3716_v26 = vpop.xlane.xlu0 %3715 }
0x190e   :  { %10818 = vrcp.f32 %v3716_v26  ;;  %v2771_v26 = vsel %vm131_vm2, %v2767_v25, 0.0 }
0x1911   :  { %v3836_v30 = vpop.xlane.xlu1 %3835 }
0x1912   :  { %10820 = vrcp.f32 %v3836_v30 }
0x191b   :  { %v10819_v33 = vpop.eup %10818 }
0x191c   :  { %v3956_v27 = vpop.xlane.xlu0 %3955 }
0x191f   :  { %v10821_v46 = vpop.eup %10820 }
0x1920   :  { %v3719_v28 = vpop.xlane.xlu0 %3718  ;;  %v3959_v40 = vpop.xlane.xlu1 %3958 }
0x1921   :  { %10822 = vrcp.f32 %v3719_v28 }
0x1924   :  { %v3839_v31 = vpop.xlane.xlu0 %3838  ;;  %v3842_v48 = vpop.xlane.xlu1 %3841 }
0x1925   :  { %10824 = vrcp.f32 %v3839_v31 }
0x1926   :  { %10826 = vrcp.f32 %v3956_v27  ;;  %v2766_v27 = vadd.f32 %v2758_v29, %v11403_v47 }
0x1928   :  { %v3722_v37 = vpop.xlane.xlu0 %3721  ;;  %v2768_v28 = vsel %vm131_vm2, %v2766_v27, 0.0  ;;  %v3592_v30 = vpop.xlane.xlu1 %3591 }
0x1929   :  { %10828 = vrcp.f32 %v3722_v37 }
0x192a   :  { %10830 = vrcp.f32 %v3959_v40 }
0x192c   :  { %v3962_v44 = vpop.xlane.xlu0 %3961  ;;  %v3599_v32 = vpop.xlane.xlu1 %3598 }
0x192d   :  { %10832 = vrcp.f32 %v3962_v44 }
0x192e   :  { %10834 = vrcp.f32 %v3842_v48  ;;  %v10823_v54 = vpop.eup %10822 }
0x192f   :  { %10836 = vrcp.f32 %v3592_v30 }
0x1930   :  { %v3595_v31 = vpop.xlane.xlu0 %3594 }
0x1931   :  { %10838 = vrcp.f32 %v3595_v31 }
0x1932   :  { %v10825_v1 = vpop.eup %10824  ;;  %10840 = vrcp.f32 %v3599_v32 }
0x1933   :  { %v10827_v58 = vpop.eup %10826 }
0x1936   :  { %v10829_v5 = vpop.eup %10828 }
0x1937   :  { %v10831_v6 = vpop.eup %10830 }
0x193a   :  { %v10833_v13 = vpop.eup %10832 }
0x193b   :  { %v10835_v17 = vpop.eup %10834 }
0x193c   :  { %v10837_v34 = vpop.eup %10836 }
0x193d   :  { %v3702_v35 = vmul.f32 %v10837_v34, %v11744_v21 }
0x193e   :  { %v10839_v37 = vpop.eup %10838 }
0x193f   :  { %v3703_v41 = vmul.f32 %v10839_v37, %v11746_v23 }
0x1943   :  { %v3808_v36 = vpop.f32.mrf.mxu0 }
0x1944   :  { %v3822_v38 = vmul.f32 %v10819_v33, %v3808_v36 }
0x1945   :  { %v10080_v39 = vpop.f32.mrf.mxu0 }
0x1946   :  { %4068 = vrot.lane.b32.xlu0 %v3822_v38, %s11042_s13 }
0x1947   :  { %v3813_v43 = vpop.f32.mrf.mxu0 }
0x1948   :  { %v3823_v10 = vmul.f32 %v10823_v54, %v3813_v43  ;;  %v10841_v43 = vpop.eup %10840 }
0x1949   :  { %v10083_v9 = vpop.f32.mrf.mxu0  ;;  %v3704_v48 = vmul.f32 %v10841_v43, %v11748_v24 }
0x194c   :  { %v3928_v49 = vpop.f32.mrf.mxu1 }
0x194d   :  { %v3942_v50 = vmul.f32 %v10821_v46, %v3928_v49 }
0x194e   :  { %v3818_v51 = vpop.f32.mrf.mxu0  ;;  %v10095_v52 = vpop.f32.mrf.mxu1 }
0x194f   :  { %4080 = vrot.lane.b32.xlu1 %v3942_v50, %s11050_s26  ;;  %v3824_v59 = vmul.f32 %v10829_v5, %v3818_v51 }
0x1950   :  { %v10086_v63 = vpop.f32.mrf.mxu0 }
0x1951   :  { %v9152_v63 = vld [vmem:[#allocation2 + $0x248] ss:$0 sm:$0xff] }
0x1952   :  { %v4048_v55 = vpop.f32.mrf.mxu0 }
0x1953   :  { %4070 = vrot.lane.b32.xlu1 %v3823_v10, %s11042_s13  ;;  %v3933_v56 = vpop.f32.mrf.mxu1  ;;  %v4062_v0 = vmul.f32 %v10827_v58, %v4048_v55 }
0x1954   :  { %v3943_v60 = vmul.f32 %v10825_v1, %v3933_v56  ;;  %v10110_v62 = vpop.f32.mrf.mxu0 }
0x1955   :  { %v10098_v3 = vpop.f32.mrf.mxu1 }
0x1956   :  { %v4053_v11 = vpop.f32.mrf.mxu0  ;;  %4082 = vrot.lane.b32.xlu0 %v3943_v60, %s11050_s26 }
0x1957   :  { %4092 = vrot.lane.b32.xlu1 %v4062_v0, %s11056_s4  ;;  %v4063_v12 = vmul.f32 %v10831_v6, %v4053_v11 }
0x1958   :  { %v3938_v61 = vpop.f32.mrf.mxu1  ;;  %v10113_v8 = vpop.f32.mrf.mxu0 }
0x1959   :  { %v3944_v19 = vmul.f32 %v10835_v17, %v3938_v61 }
0x195a   :  { %v10101_v14 = vpop.f32.mrf.mxu1  ;;  %v4058_v15 = vpop.f32.mrf.mxu0  ;;  %4072 = vrot.lane.b32.xlu0 %v3824_v59, %s11042_s13 }
0x195b   :  { %v4064_v16 = vmul.f32 %v10833_v13, %v4058_v15  ;;  %4094 = vrot.lane.b32.xlu1 %v4063_v12, %s11056_s4 }
0x195c   :  { %v10116_v18 = vpop.f32.mrf.mxu0 }
0x195d   :  { %v4388_v18 = vld [vmem:[#allocation2 + $0x2a0] sm:$0xff] }
0x195e   :  { %4096 = vrot.lane.b32.xlu0 %v4064_v16, %s11056_s4  ;;  %10151 = vmatprep.subr.mxu1 %v4388_v18 }
0x195f   :  { %4084 = vrot.lane.b32.xlu1 %v3944_v19, %s11050_s26  ;;  %v4387_v19 = vld [vmem:[#allocation2 + $0x298] sm:$0xff] }
0x197d   :  { %2772 = vadd.xlane.f32.xlu0 %v2771_v26 }
0x1983   :  { %2769 = vadd.xlane.f32.xlu1 %v2768_v28 }
0x19b8   :  { %v4069_v36 = vpop.permute.xlu0 %4068 }
0x19b9   :  { %v4101_v38 = vsel %vm283_vm7, %v3702_v35, %v4069_v36 }
0x19c1   :  { %v4081_v33 = vpop.permute.xlu1 %4080 }
0x19c2   :  { %v4104_v47 = vsel %vm664_vm8, %v4101_v38, %v4081_v33 }
0x19c5   :  { %v4071_v45 = vpop.permute.xlu1 %4070 }
0x19c6   :  { %v4102_v9 = vsel %vm283_vm7, %v3703_v41, %v4071_v45 }
0x19c8   :  { %v4083_v39 = vpop.permute.xlu0 %4082 }
0x19c9   :  { %v4093_v40 = vpop.permute.xlu1 %4092  ;;  %v4105_v21 = vsel %vm664_vm8, %v4102_v9, %v4083_v39 }
0x19ca   :  { %v4107_v42 = vsel %vm1117_vm11, %v4104_v47, %v4093_v40 }
0x19cb   :  { %10126 = vmatmul.mubr.msk.f32.vlgmr.msra.gmra.mxu1 %vm131_vm2, %v4107_v42 }
0x19cc   :  { %v4073_v44 = vpop.permute.xlu0 %4072  ;;  %10128 = vmatprep.mubr.msk.f32.mxu1 %vm11058_vm4, %v11057_v2  ;;  %10152 = vmatpush3.msra.mxu1 %v4388_v18 }
0x19cd   :  { %v4095_v7 = vpop.permute.xlu1 %4094  ;;  %v4103_v23 = vsel %vm283_vm7, %v3704_v48, %v4073_v44  ;;  %10153 = vmatprep.subr.mxu1 %v4387_v19 }
0x19ce   :  { %v4108_v46 = vsel %vm1117_vm11, %v4105_v21, %v4095_v7  ;;  %10154 = vmatpush3.msra.mxu1 %v4387_v19 }
0x19cf   :  { %10129 = vmatmul.mubr.msk.f32.gmra.mxu1 %vm131_vm2, %v4108_v46 }
0x19d0   :  { %10131 = vmatprep.mubr.msk.f32.mxu1 %vm11058_vm4, %v11057_v2  ;;  %v4097_v50 = vpop.permute.xlu0 %4096 }
0x19d1   :  { %v4085_v49 = vpop.permute.xlu1 %4084 }
0x19d2   :  { %v4106_v51 = vsel %vm664_vm8, %v4103_v23, %v4085_v49 }
0x19d3   :  { %v4109_v52 = vsel %vm1117_vm11, %v4106_v51, %v4097_v50  ;;  %v9099_v51 = vld [vmem:[#allocation2 + $0x1e0] ss:$0 sm:$0xff] }
0x19d4   :  { %10132 = vmatmul.mubr.msk.f32.gmra.mxu1 %vm131_vm2, %v4109_v52 }
0x1a06   :  { %v2773_v56 = vpop.xlane.xlu0 %2772 }
0x1a07   :  { %v2775_v11 = vmul.f32 0.03125, %v2773_v56 }
0x1a09   :  { %v11801_v8 = vsub.f32 %v2767_v25, %v2775_v11  ;;  %v4287_v11 = vld [vmem:[#allocation2 + $0x260] sm:$0xff] }
0x1a0b   :  { %v2779_v16 = vmul.f32 %v11801_v8, %v11801_v8 }
0x1a0c   :  { %v2770_v54 = vpop.xlane.xlu1 %2769 }
0x1a0d   :  { %v2774_v55 = vmul.f32 0.03125, %v2770_v54  ;;  %v2783_v17 = vsel %vm131_vm2, %v2779_v16, 0.0 }
0x1a0f   :  { %v11790_v62 = vsub.f32 %v2766_v27, %v2774_v55 }
0x1a11   :  { %v2811_v52 = vmul.f32 %v9099_v51, %v11790_v62 }
0x1a8b   :  { %v4194_v10 = vpop.f32.mrf.mxu1 }
0x1a8c   :  { %v4195_v24 = vadd.f32 %v9152_v63, %v4194_v10 }
0x1a8d   :  { %v10127_v1 = vpop.f32.mrf.mxu1 }
0x1a8e   :  { %v11788_v58 = vadd.f32 %v4195_v24, %v11440_v53  ;;  %v2778_v53 = vmul.f32 %v11790_v62, %v11790_v62  ;;  %v2812_v24 = vmul.f32 %v9099_v51, %v11801_v8  ;;  %v4288_v62 = vld [vmem:[#allocation2 + $0x268] sm:$0xff] }
0x1a8f   :  { %v4199_v60 = vpop.f32.mrf.mxu1 }
0x1a90   :  { %v4200_v0 = vadd.f32 %v9152_v63, %v4199_v60  ;;  %v4211_v3 = vsel %vm131_vm2, %v11788_v58, 0.0  ;;  %v2780_v15 = vsel %vm131_vm2, %v2778_v53, 0.0  ;;  %v4290_v60 = vld [vmem:[#allocation2 + $0x278] sm:$0xff] }
0x1a91   :  { %4212 = vadd.xlane.f32.xlu0 %v4211_v3  ;;  %v10130_v5 = vpop.f32.mrf.mxu1  ;;  %10135 = vmatpush3.msra.mxu0 %v4290_v60 }
0x1a92   :  { %v11795_v6 = vadd.f32 %v4200_v0, %v11448_v57  ;;  %v4289_v0 = vld [vmem:[#allocation2 + $0x270] sm:$0xff]  ;;  %10136 = vmatprep.subr.mxu0 %v11057_v2 }
0x1a93   :  { %10137 = vmatpush3.msra.mxu0 %v4289_v0 }
0x1a94   :  { %v4204_v59 = vpop.f32.mrf.mxu1  ;;  %v4214_v61 = vsel %vm131_vm2, %v11795_v6, 0.0  ;;  %10138 = vmatprep.subr.mxu0 %v11057_v2 }
0x1a95   :  { %v4205_v12 = vadd.f32 %v9152_v63, %v4204_v59  ;;  %4215 = vadd.xlane.f32.xlu0 %v4214_v61  ;;  %v9100_v63 = vld [vmem:[#allocation2 + $0x1e8] ss:$0 sm:$0xff]  ;;  %10139 = vmatpush3.msra.mxu0 %v4288_v62 }
0x1a96   :  { %v10133_v13 = vpop.f32.mrf.mxu1  ;;  %10140 = vmatprep.subr.mxu0 %v11057_v2 }
0x1a97   :  { %v11804_v14 = vadd.f32 %v4205_v12, %v11452_v4  ;;  %v4386_v4 = vld [vmem:[#allocation2 + $0x290] sm:$0xff]  ;;  %10141 = vmatpush3.msra.mxu0 %v4287_v11 }
0x1a98   :  { %10155 = vmatprep.subr.mxu1 %v4386_v4  ;;  %10162 = vmatprep.subr.mxu0 %v11057_v2 }
0x1a99   :  { %2781 = vadd.xlane.f32.xlu0 %v2780_v15  ;;  %v4217_v57 = vsel %vm2934_vm6, %v11804_v14, 0.0  ;;  %10156 = vmatpush3.msra.mxu1 %v4386_v4 }
0x1a9a   :  { %4218 = vadd.xlane.f32.xlu1 %v4217_v57  ;;  %10157 = vmatprep.subr.mxu1 %v4385_v20 }
0x1a9b   :  { %10158 = vmatpush3.msra.mxu1 %v4385_v20 }
0x1a9c   :  { %10175 = vmatprep.subr.mxu1 %v11057_v2 }
0x1a9e   :  { %2784 = vadd.xlane.f32.xlu1 %v2783_v17 }
0x1b1a   :  { %v4213_v22 = vpop.xlane.xlu0 %4212 }
0x1b1b   :  { %v4220_v25 = vmul.f32 0.03125, %v4213_v22 }
0x1b1d   :  { %v11814_v29 = vsub.f32 %v11788_v58, %v4220_v25 }
0x1b1e   :  { %v4216_v26 = vpop.xlane.xlu0 %4215 }
0x1b1f   :  { %v4221_v27 = vmul.f32 0.03125, %v4216_v26  ;;  %v4226_v28 = vmul.f32 %v11814_v29, %v11814_v29 }
0x1b21   :  { %v11819_v30 = vsub.f32 %v11795_v6, %v4221_v27  ;;  %v4229_v31 = vsel %vm131_vm2, %v4226_v28, 0.0 }
0x1b22   :  { %4230 = vadd.xlane.f32.xlu0 %v4229_v31  ;;  %v2782_v32 = vpop.xlane.xlu0 %2781 }
0x1b23   :  { %v2786_v33 = vmul.f32 0.032258064, %v2782_v32  ;;  %v4219_v34 = vpop.xlane.xlu1 %4218  ;;  %v4227_v36 = vmul.f32 %v11819_v30, %v11819_v30 }
0x1b24   :  { %v4222_v45 = vmul.f32 0.03125, %v4219_v34 }
0x1b25   :  { %10842 = vrsqrt.f32 %v2786_v33  ;;  %v4232_v37 = vsel %vm131_vm2, %v4227_v36, 0.0  ;;  %vm2790_vm1 = vcmp.eq.f32.partialorder %v2786_v33, inf  ;;  %v2793_v43 = vand.u32 2147483648, %v2786_v33  ;;  %v9156_v36 = vld [vmem:[#allocation2 + $0x250] ss:$0 sm:$0xff] }
0x1b26   :  { %v11825_v35 = vsub.f32 %v11804_v14, %v4222_v45  ;;  %4233 = vadd.xlane.f32.xlu1 %v4232_v37  ;;  %vm2792_vm5 = vcmp.eq.f32.partialorder %v2786_v33, 0.0  ;;  %v4273_v45 = vmul.f32 %v9156_v36, %v11814_v29 }
0x1b27   :  { %v2785_v38 = vpop.xlane.xlu1 %2784 }
0x1b28   :  { %v2787_v39 = vmul.f32 0.032258064, %v2785_v38  ;;  %v4228_v47 = vmul.f32 %v11825_v35, %v11825_v35  ;;  %v9157_v38 = vld [vmem:[#allocation2 + $0x258] ss:$0 sm:$0xff] }
0x1b2a   :  { %10844 = vrsqrt.f32 %v2787_v39  ;;  %v4235_v40 = vsel %vm2934_vm6, %v4228_v47, 0.0  ;;  %vm2797_vm0 = vcmp.eq.f32.partialorder %v2787_v39, inf  ;;  %v2800_v48 = vand.u32 2147483648, %v2787_v39 }
0x1b2b   :  { %4236 = vadd.xlane.f32.xlu0 %v4235_v40  ;;  %vm2799_vm3 = vcmp.eq.f32.partialorder %v2787_v39, 0.0  ;;  %v4274_v40 = vmul.f32 %v9156_v36, %v11819_v30  ;;  %v9162_v30 = vld [vmem:[#allocation2 + $0x2a8] ss:$0 sm:$0xff] }
0x1b32   :  { %v10843_v41 = vpop.eup %10842 }
0x1b33   :  { %v2789_v42 = vmul.f32 %v10843_v41, %v2786_v33 }
0x1b35   :  { %v2791_v9 = vsel %vm2790_vm1, %v2786_v33, %v2789_v42 }
0x1b36   :  { %v2794_v44 = vsel %vm2792_vm5, %v2793_v43, %v2791_v9  ;;  %v4275_v9 = vmul.f32 %v9156_v36, %v11825_v35 }
0x1b37   :  { %v10845_v21 = vpop.eup %10844  ;;  %v2802_v7 = vadd.f32 1e-06, %v2794_v44 }
0x1b38   :  { %v2796_v46 = vmul.f32 %v10845_v21, %v2787_v39 }
0x1b39   :  { %10846 = vrcp.f32 %v2802_v7 }
0x1b3a   :  { %v2798_v23 = vsel %vm2797_vm0, %v2787_v39, %v2796_v46 }
0x1b3b   :  { %v2801_v49 = vsel %vm2799_vm3, %v2800_v48, %v2798_v23 }
0x1b3c   :  { %v2803_v50 = vadd.f32 1e-06, %v2801_v49 }
0x1b3e   :  { %10848 = vrcp.f32 %v2803_v50  ;;  %v9158_v50 = vld [vmem:[#allocation2 + $0x280] ss:$0 sm:$0xff] }
0x1b46   :  { %v10847_v54 = vpop.eup %10846 }
0x1b47   :  { %v2813_v10 = vmul.f32 %v10847_v54, %v2811_v52 }
0x1b49   :  { %v11832_v55 = vadd.f32 %v9100_v63, %v2813_v10 }
0x1b4b   :  { %v10849_v1 = vpop.eup %10848  ;;  %10159 = vmatprep.mubr.msk.f32.mxu1 %vm131_vm2, %v11832_v55 }
0x1b4c   :  { %v2814_v56 = vmul.f32 %v10849_v1, %v2812_v24 }
0x1b4e   :  { %v11837_v3 = vadd.f32 %v9100_v63, %v2814_v56 }
0x1b50   :  { %10160 = vmatmul.mubr.msk.f32.vlgmr.msra.gmra.mxu1 %vm131_vm2, %v11837_v3 }
0x1b51   :  { %10179 = vmatprep.mubr.msk.f32.mxu1 %vm11058_vm4, %v11057_v2 }
0x1bab   :  { %v4231_v5 = vpop.xlane.xlu0 %4230 }
0x1bac   :  { %v4238_v59 = vmul.f32 0.032258064, %v4231_v5 }
0x1bae   :  { %10850 = vrsqrt.f32 %v4238_v59  ;;  %vm4243_vm0 = vcmp.eq.f32.partialorder %v4238_v59, inf  ;;  %v4246_v57 = vand.u32 2147483648, %v4238_v59  ;;  %vm4245_vm1 = vcmp.eq.f32.partialorder %v4238_v59, 0.0 }
0x1baf   :  { %v4234_v61 = vpop.xlane.xlu1 %4233 }
0x1bb0   :  { %v4239_v53 = vmul.f32 0.032258064, %v4234_v61 }
0x1bb2   :  { %10852 = vrsqrt.f32 %v4239_v53  ;;  %vm4250_vm3 = vcmp.eq.f32.partialorder %v4239_v53, inf  ;;  %v4253_v20 = vand.u32 2147483648, %v4239_v53  ;;  %vm4252_vm5 = vcmp.eq.f32.partialorder %v4239_v53, 0.0 }
0x1bb4   :  { %v4237_v8 = vpop.xlane.xlu0 %4236 }
0x1bb5   :  { %v4240_v12 = vmul.f32 0.032258064, %v4237_v8 }
0x1bb7   :  { %10854 = vrsqrt.f32 %v4240_v12  ;;  %vm4257_vm15 = vcmp.eq.f32.partialorder %v4240_v12, inf  ;;  %v4260_v31 = vand.u32 2147483648, %v4240_v12  ;;  %vm4259_vm14 = vcmp.eq.f32.partialorder %v4240_v12, 0.0 }
0x1bbb   :  { %v10851_v13 = vpop.eup %10850 }
0x1bbc   :  { %v4242_v15 = vmul.f32 %v10851_v13, %v4238_v59 }
0x1bbe   :  { %v4244_v16 = vsel %vm4243_vm0, %v4238_v59, %v4242_v15 }
0x1bbf   :  { %v4247_v17 = vsel %vm4245_vm1, %v4246_v57, %v4244_v16  ;;  %v10853_v18 = vpop.eup %10852 }
0x1bc0   :  { %v4262_v19 = vadd.f32 1e-06, %v4247_v17  ;;  %v4249_v4 = vmul.f32 %v10853_v18, %v4239_v53 }
0x1bc2   :  { %10856 = vrcp.f32 %v4262_v19  ;;  %v4251_v22 = vsel %vm4250_vm3, %v4239_v53, %v4249_v4 }
0x1bc3   :  { %v4254_v25 = vsel %vm4252_vm5, %v4253_v20, %v4251_v22 }
0x1bc4   :  { %v10855_v26 = vpop.eup %10854  ;;  %v4263_v27 = vadd.f32 1e-06, %v4254_v25 }
0x1bc5   :  { %v4256_v28 = vmul.f32 %v10855_v26, %v4240_v12 }
0x1bc6   :  { %10858 = vrcp.f32 %v4263_v27 }
0x1bc7   :  { %v4258_v32 = vsel %vm4257_vm15, %v4240_v12, %v4256_v28  ;;  %vm12950_vm15 = vcmask 123904  }
0x1bc8   :  { %v4261_v33 = vsel %vm4259_vm14, %v4260_v31, %v4258_v32  ;;  %vm12951_vm14 = vcmask 517120  }
0x1bc9   :  { %v4264_v34 = vadd.f32 1e-06, %v4261_v33 }
0x1bcb   :  { %10860 = vrcp.f32 %v4264_v34 }
0x1bcf   :  { %v10857_v37 = vpop.eup %10856 }
0x1bd0   :  { %v4276_v39 = vmul.f32 %v10857_v37, %v4273_v45 }
0x1bd2   :  { %v4284_v47 = vadd.f32 %v9157_v38, %v4276_v39 }
0x1bd3   :  { %v10859_v41 = vpop.eup %10858 }
0x1bd4   :  { %10143 = vmatmul.mubr.msk.f32.vlgmr.msra.gmra.mxu0 %vm131_vm2, %v4284_v47  ;;  %v4277_v42 = vmul.f32 %v10859_v41, %v4274_v40 }
0x1bd5   :  { %10145 = vmatprep.mubr.msk.f32.mxu0 %vm11058_vm4, %v11057_v2 }
0x1bd6   :  { %v4285_v43 = vadd.f32 %v9157_v38, %v4277_v42 }
0x1bd8   :  { %v10861_v44 = vpop.eup %10860  ;;  %10146 = vmatmul.mubr.msk.f32.gmra.mxu0 %vm131_vm2, %v4285_v43 }
0x1bd9   :  { %10148 = vmatprep.mubr.msk.f32.mxu0 %vm11058_vm4, %v11057_v2  ;;  %v4278_v29 = vmul.f32 %v10861_v44, %v4275_v9 }
0x1bdb   :  { %v4286_v21 = vadd.f32 %v9157_v38, %v4278_v29 }
0x1bdd   :  { %10149 = vmatmul.mubr.msk.f32.gmra.mxu0 %vm131_vm2, %v4286_v21 }
0x1bde   :  { %10166 = vmatprep.mubr.msk.f32.mxu0 %vm11058_vm4, %v11057_v2 }
0x1c10   :  { %v10161_v7 = vpop.f32.mrf.mxu1 }
0x1c11   :  { %v11859_v46 = vadd.f32 %v10161_v7, %v9162_v30  ;;  %v4915_v7 = vld [vmem:[#allocation2 + $0x548] sm:$0xff] }
0x1c12   :  { %v4466_v48 = vpop.f32.mrf.mxu1 }
0x1c13   :  { %v11861_v23 = vadd.f32 %v9162_v30, %v4466_v48  ;;  %4578 = vrot.lane.b32.xlu1 %v11859_v46, %s11045_s21  ;;  %10163 = vmatpush3.xpose.msk.msra.mxu0 %vm283_vm7, %v11859_v46 }
0x1c14   :  { %10164 = vmatprep.subr.mxu0 %v11057_v2 }
0x1c15   :  { %4576 = vrot.lane.b32.xlu0 %v11861_v23, %s11045_s21 }
0x1c17   :  { %4678 = vrot.lane.b32.xlu1 %v11859_v46, %s11047_s23  ;;  %10165 = vmatpush3.xpose.msk.msra.mxu0 %vm283_vm7, %v11861_v23 }
0x1c18   :  { %10188 = vmatprep.subr.mxu0 %v11057_v2 }
0x1c19   :  { %4778 = vrot.lane.b32.xlu0 %v11859_v46, %s11049_s25 }
0x1c1b   :  { %4776 = vrot.lane.b32.xlu1 %v11861_v23, %s11049_s25 }
0x1c1d   :  { %4676 = vrot.lane.b32.xlu0 %v11861_v23, %s11047_s23 }
0x1c85   :  { %v4579_v35 = vpop.permute.xlu1 %4578 }
0x1c86   :  { %10176 = vmatpush3.xpose.msk.msra.mxu1 %vm283_vm7, %v4579_v35 }
0x1c87   :  { %10177 = vmatprep.subr.mxu1 %v11057_v2  ;;  %v4577_v49 = vpop.permute.xlu0 %4576 }
0x1c89   :  { %v4679_v10 = vpop.permute.xlu1 %4678 }
0x1c8a   :  { %10178 = vmatpush3.xpose.msk.msra.mxu1 %vm283_vm7, %v4577_v49 }
0x1c8b   :  { %10201 = vmatprep.subr.mxu1 %v11057_v2  ;;  %v4779_v63 = vpop.permute.xlu0 %4778 }
0x1c8d   :  { %v4777_v5 = vpop.permute.xlu1 %4776 }
0x1c8f   :  { %v4677_v60 = vpop.permute.xlu0 %4676 }
0x1c94   :  { %v4371_v51 = vpop.f32.mrf.mxu0 }
0x1c95   :  { %v4372_v52 = vadd.f32 %v9158_v50, %v4371_v51 }
0x1c96   :  { %v10144_v54 = vpop.f32.mrf.mxu0 }
0x1c97   :  { %4570 = vrot.lane.b32.xlu1 %v4372_v52, %s11045_s21  ;;  %4670 = vrot.lane.b32.xlu0 %v4372_v52, %s11047_s23 }
0x1c98   :  { %10167 = vmatmul.mubr.msk.f32.vlgmr.msra.gmra.mxu0 %vm283_vm7, %v4372_v52  ;;  %v4376_v24 = vpop.f32.mrf.mxu0 }
0x1c99   :  { %10189 = vmatpush3.xpose.msk.msra.mxu0 %vm283_vm7, %v4679_v10  ;;  %10169 = vmatprep.mubr.msk.f32.mxu0 %vm11058_vm4, %v11057_v2  ;;  %v4377_v1 = vadd.f32 %v9158_v50, %v4376_v24 }
0x1c9a   :  { %10190 = vmatprep.subr.mxu0 %v11057_v2  ;;  %v10147_v56 = vpop.f32.mrf.mxu0 }
0x1c9b   :  { %4672 = vrot.lane.b32.xlu0 %v4377_v1, %s11047_s23  ;;  %4572 = vrot.lane.b32.xlu1 %v4377_v1, %s11045_s21 }
0x1c9c   :  { %10170 = vmatmul.mubr.msk.f32.gmra.mxu0 %vm283_vm7, %v4377_v1 }
0x1c9d   :  { %10191 = vmatpush3.xpose.msk.msra.mxu0 %vm283_vm7, %v4677_v60  ;;  %v4381_v0 = vpop.f32.mrf.mxu0  ;;  %10172 = vmatprep.mubr.msk.f32.mxu0 %vm11058_vm4, %v11057_v2 }
0x1c9e   :  { %v4382_v62 = vadd.f32 %v9158_v50, %v4381_v0  ;;  %10214 = vmatprep.subr.mxu0 %v11057_v2 }
0x1c9f   :  { %v10150_v11 = vpop.f32.mrf.mxu0 }
0x1ca0   :  { %4674 = vrot.lane.b32.xlu0 %v4382_v62, %s11047_s23  ;;  %4574 = vrot.lane.b32.xlu1 %v4382_v62, %s11045_s21 }
0x1ca1   :  { %10173 = vmatmul.mubr.msk.f32.gmra.mxu0 %vm283_vm7, %v4382_v62 }
0x1ca2   :  { %10192 = vmatprep.mubr.msk.f32.mxu0 %vm11058_vm4, %v11057_v2 }
0x1ca4   :  { %4770 = vrot.lane.b32.xlu1 %v4372_v52, %s11049_s25  ;;  %v4916_v52 = vld [vmem:[#allocation2 + $0x550] sm:$0xff] }
0x1ca8   :  { %4772 = vrot.lane.b32.xlu1 %v4377_v1, %s11049_s25 }
0x1cac   :  { %4774 = vrot.lane.b32.xlu1 %v4382_v62, %s11049_s25 }
0x1d09   :  { %v4671_v59 = vpop.permute.xlu0 %4670  ;;  %v4571_v61 = vpop.permute.xlu1 %4570 }
0x1d0a   :  { %10180 = vmatmul.mubr.msk.f32.vlgmr.msra.gmra.mxu1 %vm283_vm7, %v4571_v61  ;;  %10193 = vmatmul.mubr.msk.f32.vlgmr.msra.gmra.mxu0 %vm283_vm7, %v4671_v59 }
0x1d0b   :  { %10202 = vmatpush3.xpose.msk.msra.mxu1 %vm283_vm7, %v4779_v63  ;;  %10182 = vmatprep.mubr.msk.f32.mxu1 %vm11058_vm4, %v11057_v2 }
0x1d0c   :  { %10195 = vmatprep.mubr.msk.f32.mxu0 %vm11058_vm4, %v11057_v2  ;;  %10203 = vmatprep.subr.mxu1 %v11057_v2 }
0x1d0d   :  { %v4673_v53 = vpop.permute.xlu0 %4672  ;;  %v4573_v8 = vpop.permute.xlu1 %4572 }
0x1d0e   :  { %10183 = vmatmul.mubr.msk.f32.gmra.mxu1 %vm283_vm7, %v4573_v8  ;;  %10196 = vmatmul.mubr.msk.f32.gmra.mxu0 %vm283_vm7, %v4673_v53 }
0x1d0f   :  { %10204 = vmatpush3.xpose.msk.msra.mxu1 %vm283_vm7, %v4777_v5  ;;  %10185 = vmatprep.mubr.msk.f32.mxu1 %vm11058_vm4, %v11057_v2  ;;  %v4917_v5 = vld [vmem:[#allocation2 + $0x558] sm:$0x3] }
0x1d10   :  { %10198 = vmatprep.mubr.msk.f32.mxu0 %vm11058_vm4, %v11057_v2  ;;  %10227 = vmatprep.subr.mxu1 %v11057_v2 }
0x1d12   :  { %v4675_v12 = vpop.permute.xlu0 %4674  ;;  %v4575_v13 = vpop.permute.xlu1 %4574 }
0x1d13   :  { %10186 = vmatmul.mubr.msk.f32.gmra.mxu1 %vm283_vm7, %v4575_v13  ;;  %10199 = vmatmul.mubr.msk.f32.gmra.mxu0 %vm283_vm7, %v4675_v12 }
0x1d14   :  { %10205 = vmatprep.mubr.msk.f32.mxu1 %vm11058_vm4, %v11057_v2  ;;  %10218 = vmatprep.mubr.msk.f32.mxu0 %vm11058_vm4, %v11057_v2 }
0x1d16   :  { %v4771_v15 = vpop.permute.xlu1 %4770 }
0x1d17   :  { %10206 = vmatmul.mubr.msk.f32.vlgmr.msra.gmra.mxu1 %vm283_vm7, %v4771_v15 }
0x1d18   :  { %10208 = vmatprep.mubr.msk.f32.mxu1 %vm11058_vm4, %v11057_v2 }
0x1d1a   :  { %v4773_v57 = vpop.permute.xlu1 %4772 }
0x1d1b   :  { %10209 = vmatmul.mubr.msk.f32.gmra.mxu1 %vm283_vm7, %v4773_v57 }
0x1d1c   :  { %10211 = vmatprep.mubr.msk.f32.mxu1 %vm11058_vm4, %v11057_v2 }
0x1d1e   :  { %v4775_v16 = vpop.permute.xlu1 %4774 }
0x1d1f   :  { %10212 = vmatmul.mubr.msk.f32.gmra.mxu1 %vm283_vm7, %v4775_v16 }
0x1d20   :  { %10231 = vmatprep.mubr.msk.f32.mxu1 %vm11058_vm4, %v11057_v2 }
0x1d58   :  { %v4556_v17 = vpop.f32.mrf.mxu0 }
0x1d5a   :  { %v10168_v18 = vpop.f32.mrf.mxu0 }
0x1d5c   :  { %v4561_v19 = vpop.f32.mrf.mxu0 }
0x1d5e   :  { %v10171_v4 = vpop.f32.mrf.mxu0 }
0x1d61   :  { %v4566_v20 = vpop.f32.mrf.mxu0 }
0x1d63   :  { %v10174_v22 = vpop.f32.mrf.mxu0 }
0x1dca   :  { %v4656_v25 = vpop.f32.mrf.mxu1  ;;  %v4756_v26 = vpop.f32.mrf.mxu0 }
0x1dcb   :  { %4885 = vrot.lane.b32.xlu1 %v4756_v26, %s11051_s27  ;;  %4873 = vrot.lane.b32.xlu0 %v4656_v25, %s11050_s26 }
0x1dcc   :  { %v10181_v27 = vpop.f32.mrf.mxu1  ;;  %v10194_v28 = vpop.f32.mrf.mxu0 }
0x1dce   :  { %v4661_v31 = vpop.f32.mrf.mxu1  ;;  %v4761_v32 = vpop.f32.mrf.mxu0 }
0x1dcf   :  { %4887 = vrot.lane.b32.xlu0 %v4761_v32, %s11051_s27  ;;  %4875 = vrot.lane.b32.xlu1 %v4661_v31, %s11050_s26 }
0x1dd0   :  { %v10184_v33 = vpop.f32.mrf.mxu1  ;;  %v10197_v34 = vpop.f32.mrf.mxu0 }
0x1dd3   :  { %v4666_v36 = vpop.f32.mrf.mxu1  ;;  %v4766_v45 = vpop.f32.mrf.mxu0 }
0x1dd5   :  { %v10187_v37 = vpop.f32.mrf.mxu1  ;;  %v10200_v38 = vpop.f32.mrf.mxu0 }
0x1dd7   :  { %v4856_v39 = vpop.f32.mrf.mxu1 }
0x1dd8   :  { %4897 = vrot.lane.b32.xlu0 %v4856_v39, %s11052_s28 }
0x1dd9   :  { %v10207_v47 = vpop.f32.mrf.mxu1 }
0x1ddb   :  { %v4861_v40 = vpop.f32.mrf.mxu1 }
0x1ddc   :  { %4877 = vrot.lane.b32.xlu0 %v4666_v36, %s11050_s26  ;;  %4899 = vrot.lane.b32.xlu1 %v4861_v40, %s11052_s28 }
0x1ddd   :  { %v10210_v41 = vpop.f32.mrf.mxu1 }
0x1ddf   :  { %v4866_v42 = vpop.f32.mrf.mxu1 }
0x1de0   :  { %4889 = vrot.lane.b32.xlu1 %v4766_v45, %s11051_s27  ;;  %4901 = vrot.lane.b32.xlu0 %v4866_v42, %s11052_s28 }
0x1de1   :  { %v10213_v43 = vpop.f32.mrf.mxu1 }
0x1e3d   :  { %v4874_v9 = vpop.permute.xlu0 %4873  ;;  %v4886_v44 = vpop.permute.xlu1 %4885 }
0x1e3e   :  { %v4906_v21 = vsel %vm664_vm8, %v4556_v17, %v4874_v9 }
0x1e3f   :  { %v4909_v48 = vsel %vm131_vm2, %v4906_v21, %v4886_v44 }
0x1e41   :  { %v4888_v29 = vpop.permute.xlu0 %4887  ;;  %v4876_v30 = vpop.permute.xlu1 %4875 }
0x1e42   :  { %v4907_v49 = vsel %vm664_vm8, %v4561_v19, %v4876_v30 }
0x1e43   :  { %v4910_v63 = vsel %vm131_vm2, %v4907_v49, %v4888_v29 }
0x1e4a   :  { %v4898_v35 = vpop.permute.xlu0 %4897 }
0x1e4b   :  { %v4912_v50 = vsel %vm669_vm9, %v4909_v48, %v4898_v35 }
0x1e4c   :  { %v4918_v51 = vadd.f32 %v4915_v7, %v4912_v50 }
0x1e4e   :  { %v4878_v54 = vpop.permute.xlu0 %4877  ;;  %v4900_v10 = vpop.permute.xlu1 %4899  ;;  %v4921_v24 = vsel %vm676_vm10, %v4918_v51, -inf }
0x1e4f   :  { %v4913_v1 = vsel %vm669_vm9, %v4910_v63, %v4900_v10  ;;  %4922 = vmax.xlane.f32.xlu1 %v4921_v24  ;;  %v4908_v60 = vsel %vm664_vm8, %v4566_v20, %v4878_v54 }
0x1e50   :  { %v4919_v56 = vadd.f32 %v4916_v52, %v4913_v1 }
0x1e52   :  { %v4902_v0 = vpop.permute.xlu0 %4901  ;;  %v4890_v62 = vpop.permute.xlu1 %4889  ;;  %v4924_v11 = vsel %vm676_vm10, %v4919_v56, -inf }
0x1e53   :  { %v4911_v59 = vsel %vm131_vm2, %v4908_v60, %v4890_v62  ;;  %4925 = vmax.xlane.f32.xlu0 %v4924_v11  ;;  %v5447_v11 = vld [vmem:[#allocation2 + $0x2c8] sm:$0xff] }
0x1e54   :  { %v4914_v61 = vsel %vm669_vm9, %v4911_v59, %v4902_v0 }
0x1e55   :  { %v4920_v53 = vadd.f32 %v4917_v5, %v4914_v61 }
0x1e57   :  { %v4928_v8 = vsel %vm12951_vm14, %v4920_v53, -inf }
0x1e58   :  { %4929 = vmax.xlane.f32.xlu0 %v4928_v8 }
0x1e60   :  { %5074 = vrot.lane.b32.xlu1 %v11859_v46, %s11043_s1 }
0x1e64   :  { %4953 = vrot.lane.b32.xlu1 %v11861_v23, %s11044_s20 }
0x1e68   :  { %5072 = vrot.lane.b32.xlu1 %v11861_v23, %s11043_s1 }
0x1e6c   :  { %5190 = vrot.lane.b32.xlu1 %v11859_v46, %s11046_s22 }
0x1e6e   :  { %4955 = vrot.lane.b32.xlu0 %v11859_v46, %s11044_s20 }
0x1e72   :  { %5306 = vrot.lane.b32.xlu0 %v11859_v46, %s11048_s24 }
0x1ed8   :  { %v4923_v12 = vpop.xlane.xlu1 %4922 }
0x1ed9   :  { %v4931_v13 = vsub.f32 %v4918_v51, %v4923_v12 }
0x1edb   :  { %v4934_v15 = vmul.f32 1.442695, %v4931_v13 }
0x1edc   :  { %v4926_v57 = vpop.xlane.xlu0 %4925  ;;  %v5075_v16 = vpop.permute.xlu1 %5074 }
0x1edd   :  { %10862 = vpow2.f32 %v4934_v15  ;;  %v4932_v17 = vsub.f32 %v4919_v56, %v4926_v57  ;;  %10228 = vmatpush3.msra.mxu1 %v5075_v16 }
0x1ede   :  { %10229 = vmatprep.subr.mxu1 %v11057_v2 }
0x1edf   :  { %v4936_v18 = vmul.f32 1.442695, %v4932_v17 }
0x1ee0   :  { %v4954_v19 = vpop.permute.xlu1 %4953 }
0x1ee1   :  { %10864 = vpow2.f32 %v4936_v18  ;;  %v4930_v4 = vpop.xlane.xlu0 %4929  ;;  %v5446_v18 = vld [vmem:[#allocation2 + $0x2c0] sm:$0xff] }
0x1ee2   :  { %v4933_v20 = vsub.f32 %v4920_v53, %v4930_v4 }
0x1ee4   :  { %v4938_v22 = vmul.f32 1.442695, %v4933_v20  ;;  %v5073_v25 = vpop.permute.xlu1 %5072 }
0x1ee5   :  { %v4956_v26 = vpop.permute.xlu0 %4955  ;;  %10230 = vmatpush3.msra.mxu1 %v5073_v25 }
0x1ee6   :  { %10866 = vpow2.f32 %v4938_v22  ;;  %10215 = vmatpush3.msra.mxu0 %v4956_v26  ;;  %10253 = vmatprep.subr.mxu1 %v11057_v2  ;;  %v5444_v26 = vld [vmem:[#allocation2 + $0x2b0] sm:$0xff] }
0x1ee7   :  { %10216 = vmatprep.subr.mxu0 %v11057_v2 }
0x1ee8   :  { %10217 = vmatpush3.msra.mxu0 %v4954_v19  ;;  %v5191_v27 = vpop.permute.xlu1 %5190  ;;  %v5445_v19 = vld [vmem:[#allocation2 + $0x2b8] sm:$0xff] }
0x1ee9   :  { %10240 = vmatprep.subr.mxu0 %v11057_v2  ;;  %v5307_v32 = vpop.permute.xlu0 %5306 }
0x1eea   :  { %v11975_v46 = vpop.eup %10862 }
0x1eeb   :  { %5051 = vrot.lane.b32.xlu0 %v11975_v46, %s11047_s23  ;;  %10219 = vmatmul.mubr.msk.f32.vlgmr.msra.gmra.mxu0 %vm664_vm8, %v11975_v46  ;;  %v4940_v49 = vsel %vm664_vm8, %v11975_v46, 0.0 }
0x1eec   :  { %10241 = vmatpush3.msra.mxu0 %v5191_v27  ;;  %10221 = vmatprep.mubr.msk.f32.mxu0 %vm11058_vm4, %v11057_v2 }
0x1eed   :  { %10242 = vmatprep.subr.mxu0 %v11057_v2 }
0x1eee   :  { %v11984_v28 = vpop.eup %10864 }
0x1eef   :  { %5053 = vrot.lane.b32.xlu1 %v11984_v28, %s11047_s23  ;;  %5167 = vrot.lane.b32.xlu0 %v11975_v46, %s11044_s20  ;;  %v4943_v35 = vsel %vm664_vm8, %v11984_v28, 0.0 }
0x1ef0   :  { %10222 = vmatmul.mubr.msk.f32.gmra.mxu0 %vm664_vm8, %v11984_v28 }
0x1ef1   :  { %10224 = vmatprep.mubr.msk.f32.mxu0 %vm11058_vm4, %v11057_v2 }
0x1ef3   :  { %v11994_v31 = vpop.eup %10866  ;;  %5188 = vrot.lane.b32.xlu1 %v11861_v23, %s11046_s22 }
0x1ef4   :  { %5055 = vrot.lane.b32.xlu0 %v11994_v31, %s11047_s23  ;;  %10225 = vmatmul.mubr.msk.f32.gmra.mxu0 %vm664_vm8, %v11994_v31  ;;  %v4947_v50 = vsel %vm12950_vm15, %v11994_v31, 0.0 }
0x1ef5   :  { %10244 = vmatprep.mubr.msk.f32.mxu0 %vm11058_vm4, %v11057_v2 }
0x1ef7   :  { %5304 = vrot.lane.b32.xlu1 %v11861_v23, %s11048_s24 }
0x1ef8   :  { %5283 = vrot.lane.b32.xlu0 %v11975_v46, %s11046_s22 }
0x1efb   :  { %5169 = vrot.lane.b32.xlu1 %v11984_v28, %s11044_s20 }
0x1efc   :  { %5285 = vrot.lane.b32.xlu0 %v11984_v28, %s11046_s22 }
0x1eff   :  { %5171 = vrot.lane.b32.xlu1 %v11994_v31, %s11044_s20 }
0x1f00   :  { %5287 = vrot.lane.b32.xlu0 %v11994_v31, %s11046_s22 }
0x1f5d   :  { %v5052_v33 = vpop.permute.xlu0 %5051 }
0x1f5e   :  { %10232 = vmatmul.mubr.msk.f32.vlgmr.msra.gmra.mxu1 %vm664_vm8, %v5052_v33  ;;  %v5060_v23 = vsel %vm664_vm8, %v5052_v33, 0.0 }
0x1f5f   :  { %10254 = vmatpush3.msra.mxu1 %v5307_v32  ;;  %5061 = vadd.xlane.f32.xlu1 %v5060_v23 }
0x1f60   :  { %10234 = vmatprep.mubr.msk.f32.mxu1 %vm11058_vm4, %v11057_v2  ;;  %10255 = vmatprep.subr.mxu1 %v11057_v2 }
0x1f61   :  { %v5168_v34 = vpop.permute.xlu0 %5167  ;;  %v5054_v36 = vpop.permute.xlu1 %5053 }
0x1f62   :  { %10235 = vmatmul.mubr.msk.f32.gmra.mxu1 %vm664_vm8, %v5054_v36  ;;  %v5176_v45 = vsel %vm664_vm8, %v5168_v34, 0.0  ;;  %v5063_v9 = vsel %vm664_vm8, %v5054_v36, 0.0 }
0x1f63   :  { %5177 = vadd.xlane.f32.xlu0 %v5176_v45  ;;  %10237 = vmatprep.mubr.msk.f32.mxu1 %vm11058_vm4, %v11057_v2 }
0x1f65   :  { %v5189_v37 = vpop.permute.xlu1 %5188 }
0x1f66   :  { %v5056_v38 = vpop.permute.xlu0 %5055  ;;  %10243 = vmatpush3.msra.mxu0 %v5189_v37 }
0x1f67   :  { %10238 = vmatmul.mubr.msk.f32.gmra.mxu1 %vm664_vm8, %v5056_v38  ;;  %10245 = vmatmul.mubr.msk.f32.vlgmr.msra.gmra.mxu0 %vm664_vm8, %v5168_v34  ;;  %v5066_v21 = vsel %vm12950_vm15, %v5056_v38, 0.0 }
0x1f68   :  { %10257 = vmatprep.mubr.msk.f32.mxu1 %vm11058_vm4, %v11057_v2  ;;  %10247 = vmatprep.mubr.msk.f32.mxu0 %vm11058_vm4, %v11057_v2 }
0x1f69   :  { %v5305_v39 = vpop.permute.xlu1 %5304  ;;  %10266 = vmatprep.subr.mxu0 %v11057_v2 }
0x1f6a   :  { %v5284_v47 = vpop.permute.xlu0 %5283  ;;  %10256 = vmatpush3.msra.mxu1 %v5305_v39  ;;  %10267 = vmatpush3.msra.mxu0 %v5447_v11 }
0x1f6b   :  { %10258 = vmatmul.mubr.msk.f32.vlgmr.msra.gmra.mxu1 %vm664_vm8, %v5284_v47  ;;  %v5292_v40 = vsel %vm664_vm8, %v5284_v47, 0.0  ;;  %10283 = vmatprep.subr.mxu1 %v11057_v2 }
0x1f6c   :  { %5293 = vadd.xlane.f32.xlu0 %v5292_v40  ;;  %10260 = vmatprep.mubr.msk.f32.mxu1 %vm11058_vm4, %v11057_v2 }
0x1f6d   :  { %v5170_v41 = vpop.permute.xlu1 %5169  ;;  %10268 = vmatprep.subr.mxu0 %v11057_v2 }
0x1f6e   :  { %v5286_v42 = vpop.permute.xlu0 %5285  ;;  %10248 = vmatmul.mubr.msk.f32.gmra.mxu0 %vm664_vm8, %v5170_v41  ;;  %v5179_v43 = vsel %vm664_vm8, %v5170_v41, 0.0 }
0x1f6f   :  { %10261 = vmatmul.mubr.msk.f32.gmra.mxu1 %vm664_vm8, %v5286_v42  ;;  %5180 = vadd.xlane.f32.xlu1 %v5179_v43  ;;  %v5295_v30 = vsel %vm664_vm8, %v5286_v42, 0.0 }
0x1f70   :  { %5064 = vadd.xlane.f32.xlu0 %v5063_v9  ;;  %10250 = vmatprep.mubr.msk.f32.mxu0 %vm11058_vm4, %v11057_v2 }
0x1f71   :  { %v5172_v44 = vpop.permute.xlu1 %5171  ;;  %10263 = vmatprep.mubr.msk.f32.mxu1 %vm11058_vm4, %v11057_v2  ;;  %10269 = vmatpush3.msra.mxu0 %v5446_v18 }
0x1f72   :  { %v5288_v29 = vpop.permute.xlu0 %5287  ;;  %10251 = vmatmul.mubr.msk.f32.gmra.mxu0 %vm664_vm8, %v5172_v44  ;;  %v5182_v48 = vsel %vm12950_vm15, %v5172_v44, 0.0  ;;  %10270 = vmatprep.subr.mxu0 %v11057_v2 }
0x1f73   :  { %10264 = vmatmul.mubr.msk.f32.gmra.mxu1 %vm664_vm8, %v5288_v29  ;;  %5067 = vadd.xlane.f32.xlu1 %v5066_v21  ;;  %v5298_v7 = vsel %vm12950_vm15, %v5288_v29, 0.0 }
0x1f74   :  { %5296 = vadd.xlane.f32.xlu0 %v5295_v30  ;;  %10274 = vmatprep.mubr.msk.f32.mxu0 %vm11058_vm4, %v11057_v2 }
0x1f75   :  { %10291 = vmatprep.mubr.msk.f32.mxu1 %vm11058_vm4, %v11057_v2  ;;  %10271 = vmatpush3.msra.mxu0 %v5445_v19 }
0x1f76   :  { %10272 = vmatprep.subr.mxu0 %v11057_v2 }
0x1f77   :  { %5299 = vadd.xlane.f32.xlu1 %v5298_v7  ;;  %10273 = vmatpush3.msra.mxu0 %v5444_v26 }
0x1f78   :  { %5183 = vadd.xlane.f32.xlu0 %v5182_v48  ;;  %10300 = vmatprep.subr.mxu0 %v11057_v2 }
0x1f7b   :  { %4944 = vadd.xlane.f32.xlu1 %v4943_v35 }
0x1f7c   :  { %4941 = vadd.xlane.f32.xlu0 %v4940_v49 }
0x1f80   :  { %4948 = vadd.xlane.f32.xlu0 %v4947_v50 }
0x1fab   :  { %v12061_v51 = vpop.f32.mrf.mxu0 }
0x1fad   :  { %v10220_v52 = vpop.f32.mrf.mxu0 }
0x1fb0   :  { %v12063_v54 = vpop.f32.mrf.mxu0 }
0x1fb2   :  { %v10223_v63 = vpop.f32.mrf.mxu0 }
0x1fb4   :  { %v12065_v10 = vpop.f32.mrf.mxu0 }
0x1fb6   :  { %v10226_v24 = vpop.f32.mrf.mxu0 }
0x1fe8   :  { %v5062_v60 = vpop.xlane.xlu1 %5061 }
0x1fe9   :  { %10868 = vrcp.f32 %v5062_v60 }
0x1fec   :  { %v5178_v1 = vpop.xlane.xlu0 %5177 }
0x1ff5   :  { %v5294_v56 = vpop.xlane.xlu0 %5293 }
0x1ff6   :  { %v10869_v5 = vpop.eup %10868 }
0x1ff8   :  { %v5181_v59 = vpop.xlane.xlu1 %5180 }
0x1ff9   :  { %v5065_v0 = vpop.xlane.xlu0 %5064 }
0x1ffa   :  { %10870 = vrcp.f32 %v5065_v0 }
0x1ffb   :  { %10872 = vrcp.f32 %v5178_v1 }
0x1ffc   :  { %10874 = vrcp.f32 %v5181_v59  ;;  %v5068_v16 = vpop.xlane.xlu1 %5067 }
0x1ffd   :  { %v5297_v62 = vpop.xlane.xlu0 %5296 }
0x1ffe   :  { %10876 = vrcp.f32 %v5297_v62 }
0x1fff   :  { %10878 = vrcp.f32 %v5294_v56 }
0x2000   :  { %v5300_v28 = vpop.xlane.xlu1 %5299 }
0x2001   :  { %v5184_v13 = vpop.xlane.xlu0 %5183 }
0x2002   :  { %10880 = vrcp.f32 %v5184_v13 }
0x2003   :  { %10882 = vrcp.f32 %v5068_v16 }
0x2004   :  { %10884 = vrcp.f32 %v5300_v28  ;;  %v4945_v49 = vpop.xlane.xlu1 %4944 }
0x2005   :  { %v4942_v35 = vpop.xlane.xlu0 %4941 }
0x2006   :  { %10886 = vrcp.f32 %v4942_v35  ;;  %v5621_v35 = vld [vmem:[#allocation2 + $0x2e8] sm:$0xff] }
0x2007   :  { %v10871_v12 = vpop.eup %10870  ;;  %10888 = vrcp.f32 %v4945_v49  ;;  %v5729_v49 = vld [vmem:[#allocation2 + $0x348] sm:$0xff] }
0x2008   :  { %v10873_v4 = vpop.eup %10872 }
0x2009   :  { %v10875_v33 = vpop.eup %10874  ;;  %v4949_v50 = vpop.xlane.xlu0 %4948 }
0x200a   :  { %10890 = vrcp.f32 %v4949_v50  ;;  %v5728_v50 = vld [vmem:[#allocation2 + $0x340] sm:$0xff] }
0x200b   :  { %v10877_v34 = vpop.eup %10876 }
0x200c   :  { %v10879_v39 = vpop.eup %10878 }
0x200f   :  { %v10881_v40 = vpop.eup %10880 }
0x2010   :  { %v10883_v21 = vpop.eup %10882 }
0x2011   :  { %v10885_v7 = vpop.eup %10884 }
0x2013   :  { %v10887_v24 = vpop.eup %10886 }
0x2014   :  { %v10889_v1 = vpop.eup %10888  ;;  %v5048_v60 = vmul.f32 %v10887_v24, %v12061_v51  ;;  %v5725_v24 = vld [vmem:[#allocation2 + $0x328] sm:$0xff] }
0x2015   :  { %v5049_v11 = vmul.f32 %v10889_v1, %v12063_v54 }
0x201e   :  { %v5150_v61 = vpop.f32.mrf.mxu1 }
0x201f   :  { %v5164_v53 = vmul.f32 %v10869_v5, %v5150_v61  ;;  %v10891_v5 = vpop.eup %10890 }
0x2020   :  { %v10233_v8 = vpop.f32.mrf.mxu1  ;;  %v5050_v51 = vmul.f32 %v10891_v5, %v12065_v10  ;;  %v9197_v10 = vld [vmem:[#allocation2 + $0x2d0] ss:$0 sm:$0xff] }
0x2021   :  { %5402 = vrot.lane.b32.xlu1 %v5164_v53, %s11042_s13 }
0x2022   :  { %v5155_v15 = vpop.f32.mrf.mxu1 }
0x2023   :  { %v5165_v57 = vmul.f32 %v10871_v12, %v5155_v15 }
0x2024   :  { %v10236_v17 = vpop.f32.mrf.mxu1 }
0x2025   :  { %5404 = vrot.lane.b32.xlu1 %v5165_v57, %s11042_s13 }
0x2027   :  { %v5160_v20 = vpop.f32.mrf.mxu1  ;;  %v5266_v22 = vpop.f32.mrf.mxu0 }
0x2028   :  { %v5280_v25 = vmul.f32 %v10873_v4, %v5266_v22  ;;  %v5166_v30 = vmul.f32 %v10883_v21, %v5160_v20 }
0x2029   :  { %v10239_v46 = vpop.f32.mrf.mxu1  ;;  %v10246_v27 = vpop.f32.mrf.mxu0 }
0x202a   :  { %5414 = vrot.lane.b32.xlu0 %v5280_v25, %s11050_s26 }
0x202b   :  { %v5382_v31 = vpop.f32.mrf.mxu1 }
0x202c   :  { %v5396_v42 = vmul.f32 %v10879_v39, %v5382_v31 }
0x202d   :  { %v10259_v32 = vpop.f32.mrf.mxu1 }
0x202e   :  { %v5271_v23 = vpop.f32.mrf.mxu0 }
0x202f   :  { %v5281_v36 = vmul.f32 %v10875_v33, %v5271_v23  ;;  %v5387_v45 = vpop.f32.mrf.mxu1 }
0x2030   :  { %v5397_v37 = vmul.f32 %v10877_v34, %v5387_v45  ;;  %v10249_v38 = vpop.f32.mrf.mxu0 }
0x2031   :  { %v10262_v47 = vpop.f32.mrf.mxu1  ;;  %5416 = vrot.lane.b32.xlu1 %v5281_v36, %s11050_s26 }
0x2032   :  { %v5276_v41 = vpop.f32.mrf.mxu0  ;;  %5428 = vrot.lane.b32.xlu0 %v5397_v37, %s11056_s4 }
0x2033   :  { %v5282_v43 = vmul.f32 %v10881_v40, %v5276_v41  ;;  %v5392_v9 = vpop.f32.mrf.mxu1 }
0x2034   :  { %v10252_v44 = vpop.f32.mrf.mxu0  ;;  %v5398_v48 = vmul.f32 %v10885_v7, %v5392_v9  ;;  %v5623_v7 = vld [vmem:[#allocation2 + $0x2f8] sm:$0xff] }
0x2035   :  { %v10265_v29 = vpop.f32.mrf.mxu1  ;;  %5426 = vrot.lane.b32.xlu1 %v5396_v42, %s11056_s4 }
0x2036   :  { %5418 = vrot.lane.b32.xlu0 %v5282_v43, %s11050_s26 }
0x2039   :  { %5406 = vrot.lane.b32.xlu1 %v5166_v30, %s11042_s13  ;;  %v5624_v30 = vld [vmem:[#allocation2 + $0x300] sm:$0xff] }
0x203a   :  { %10284 = vmatpush3.msra.mxu1 %v5624_v30 }
0x203b   :  { %10285 = vmatprep.subr.mxu1 %v11057_v2 }
0x203c   :  { %10286 = vmatpush3.msra.mxu1 %v5623_v7 }
0x203d   :  { %5430 = vrot.lane.b32.xlu1 %v5398_v48, %s11056_s4  ;;  %v5622_v48 = vld [vmem:[#allocation2 + $0x2f0] sm:$0xff]  ;;  %10287 = vmatprep.subr.mxu1 %v11057_v2 }
0x203e   :  { %10288 = vmatpush3.msra.mxu1 %v5622_v48 }
0x203f   :  { %10289 = vmatprep.subr.mxu1 %v11057_v2 }
0x2040   :  { %10290 = vmatpush3.msra.mxu1 %v5621_v35 }
0x2041   :  { %10325 = vmatprep.subr.mxu1 %v11057_v2 }
0x2093   :  { %v5403_v52 = vpop.permute.xlu1 %5402 }
0x2094   :  { %v5435_v62 = vsel %vm283_vm7, %v5048_v60, %v5403_v52  ;;  %v5727_v52 = vld [vmem:[#allocation2 + $0x338] sm:$0xff] }
0x2097   :  { %v5405_v63 = vpop.permute.xlu1 %5404 }
0x2098   :  { %v5436_v53 = vsel %vm283_vm7, %v5049_v11, %v5405_v63  ;;  %v5726_v63 = vld [vmem:[#allocation2 + $0x330] sm:$0xff] }
0x209c   :  { %v5415_v0 = vpop.permute.xlu0 %5414 }
0x209d   :  { %v5438_v59 = vsel %vm664_vm8, %v5435_v62, %v5415_v0 }
0x20a3   :  { %v5417_v56 = vpop.permute.xlu1 %5416 }
0x20a4   :  { %v5429_v8 = vpop.permute.xlu0 %5428  ;;  %v5439_v13 = vsel %vm664_vm8, %v5436_v53, %v5417_v56 }
0x20a5   :  { %v5442_v54 = vsel %vm1117_vm11, %v5439_v13, %v5429_v8 }
0x20a7   :  { %v5427_v61 = vpop.permute.xlu1 %5426 }
0x20a8   :  { %v5441_v12 = vsel %vm1117_vm11, %v5438_v59, %v5427_v61  ;;  %v5419_v16 = vpop.permute.xlu0 %5418 }
0x20a9   :  { %10275 = vmatmul.mubr.msk.f32.vlgmr.msra.gmra.mxu0 %vm131_vm2, %v5441_v12 }
0x20aa   :  { %10277 = vmatprep.mubr.msk.f32.mxu0 %vm11058_vm4, %v11057_v2  ;;  %10301 = vmatpush3.msra.mxu0 %v5729_v49 }
0x20ab   :  { %v5407_v15 = vpop.permute.xlu1 %5406  ;;  %10302 = vmatprep.subr.mxu0 %v11057_v2 }
0x20ac   :  { %v5437_v57 = vsel %vm283_vm7, %v5050_v51, %v5407_v15  ;;  %10303 = vmatpush3.msra.mxu0 %v5728_v50  ;;  %v9207_v50 = vld [vmem:[#allocation2 + $0x350] ss:$0 sm:$0xff] }
0x20ad   :  { %10278 = vmatmul.mubr.msk.f32.gmra.mxu0 %vm131_vm2, %v5442_v54  ;;  %v5440_v17 = vsel %vm664_vm8, %v5437_v57, %v5419_v16  ;;  %10304 = vmatprep.subr.mxu0 %v11057_v2 }
0x20ae   :  { %10280 = vmatprep.mubr.msk.f32.mxu0 %vm11058_vm4, %v11057_v2  ;;  %10305 = vmatpush3.msra.mxu0 %v5727_v52 }
0x20af   :  { %v5431_v18 = vpop.permute.xlu1 %5430  ;;  %10306 = vmatprep.subr.mxu0 %v11057_v2 }
0x20b0   :  { %v5443_v19 = vsel %vm1117_vm11, %v5440_v17, %v5431_v18  ;;  %10307 = vmatpush3.msra.mxu0 %v5726_v63 }
0x20b1   :  { %10281 = vmatmul.mubr.msk.f32.gmra.mxu0 %vm131_vm2, %v5443_v19  ;;  %10308 = vmatprep.subr.mxu0 %v11057_v2 }
0x20b2   :  { %10316 = vmatprep.mubr.msk.f32.mxu0 %vm11058_vm4, %v11057_v2  ;;  %10309 = vmatpush3.msra.mxu0 %v5725_v24 }
0x20b3   :  { %10310 = vmatprep.subr.mxu0 %v11057_v2 }
0x2169   :  { %v5528_v4 = vpop.f32.mrf.mxu0 }
0x216a   :  { %v5529_v20 = vadd.f32 %v9197_v10, %v5528_v4 }
0x216b   :  { %v10276_v22 = vpop.f32.mrf.mxu0 }
0x216c   :  { %v12102_v25 = vadd.f32 %v5529_v20, %v11788_v58  ;;  %v9201_v22 = vld [vmem:[#allocation2 + $0x2d8] ss:$0 sm:$0xff] }
0x216d   :  { %v5533_v26 = vpop.f32.mrf.mxu0 }
0x216e   :  { %v5534_v46 = vadd.f32 %v9197_v10, %v5533_v26  ;;  %v5545_v27 = vsel %vm131_vm2, %v12102_v25, 0.0 }
0x216f   :  { %5546 = vadd.xlane.f32.xlu0 %v5545_v27  ;;  %v10279_v28 = vpop.f32.mrf.mxu0  ;;  %v9202_v27 = vld [vmem:[#allocation2 + $0x2e0] ss:$0 sm:$0xff] }
0x2170   :  { %v12107_v31 = vadd.f32 %v5534_v46, %v11795_v6 }
0x2171   :  { %v5538_v32 = vpop.f32.mrf.mxu0 }
0x2172   :  { %v5539_v33 = vadd.f32 %v9197_v10, %v5538_v32  ;;  %v5548_v23 = vsel %vm131_vm2, %v12107_v31, 0.0 }
0x2173   :  { %5549 = vadd.xlane.f32.xlu1 %v5548_v23  ;;  %v10282_v34 = vpop.f32.mrf.mxu0 }
0x2174   :  { %v12112_v58 = vadd.f32 %v5539_v33, %v11804_v14 }
0x2176   :  { %v5551_v36 = vsel %vm2934_vm6, %v12112_v58, 0.0 }
0x2177   :  { %5552 = vadd.xlane.f32.xlu0 %v5551_v36 }
0x21f8   :  { %v5547_v45 = vpop.xlane.xlu0 %5546 }
0x21f9   :  { %v5554_v37 = vmul.f32 0.03125, %v5547_v45 }
0x21fb   :  { %v12117_v38 = vsub.f32 %v12102_v25, %v5554_v37 }
0x21fc   :  { %v5550_v6 = vpop.xlane.xlu1 %5549 }
0x21fd   :  { %v5555_v39 = vmul.f32 0.03125, %v5550_v6  ;;  %v5560_v47 = vmul.f32 %v12117_v38, %v12117_v38  ;;  %v5607_v26 = vmul.f32 %v9201_v22, %v12117_v38 }
0x21ff   :  { %v12122_v40 = vsub.f32 %v12107_v31, %v5555_v39  ;;  %v5563_v14 = vsel %vm131_vm2, %v5560_v47, 0.0  ;;  %v5724_v39 = vld [vmem:[#allocation2 + $0x320] sm:$0xff]  ;;  %v5723_v47 = vld [vmem:[#allocation2 + $0x318] sm:$0xff] }
0x2200   :  { %5564 = vadd.xlane.f32.xlu0 %v5563_v14  ;;  %v5553_v41 = vpop.xlane.xlu0 %5552  ;;  %10311 = vmatpush3.msra.mxu0 %v5724_v39  ;;  %v9203_v14 = vld [vmem:[#allocation2 + $0x308] ss:$0 sm:$0xff] }
0x2201   :  { %v5556_v42 = vmul.f32 0.03125, %v5553_v41  ;;  %v5561_v43 = vmul.f32 %v12122_v40, %v12122_v40  ;;  %v5608_v32 = vmul.f32 %v9201_v22, %v12122_v40  ;;  %10312 = vmatprep.subr.mxu0 %v11057_v2  ;;  %v5722_v40 = vld [vmem:[#allocation2 + $0x310] sm:$0xff] }
0x2202   :  { %10313 = vmatpush3.msra.mxu0 %v5723_v47 }
0x2203   :  { %v12128_v9 = vsub.f32 %v12112_v58, %v5556_v42  ;;  %v5566_v44 = vsel %vm131_vm2, %v5561_v43, 0.0  ;;  %10314 = vmatprep.subr.mxu0 %v11057_v2 }
0x2204   :  { %5567 = vadd.xlane.f32.xlu0 %v5566_v44  ;;  %10315 = vmatpush3.msra.mxu0 %v5722_v40 }
0x2205   :  { %v5562_v29 = vmul.f32 %v12128_v9, %v12128_v9  ;;  %v5609_v36 = vmul.f32 %v9201_v22, %v12128_v9  ;;  %10342 = vmatprep.subr.mxu0 %v11057_v2  ;;  %v5906_v22 = vld [vmem:[#allocation2 + $0x380] sm:$0xff] }
0x2207   :  { %v5569_v21 = vsel %vm2934_vm6, %v5562_v29, 0.0 }
0x2208   :  { %5570 = vadd.xlane.f32.xlu1 %v5569_v21 }
0x2289   :  { %v5565_v1 = vpop.xlane.xlu0 %5564 }
0x228a   :  { %v5572_v56 = vmul.f32 0.032258064, %v5565_v1 }
0x228c   :  { %10892 = vrsqrt.f32 %v5572_v56  ;;  %vm5577_vm0 = vcmp.eq.f32.partialorder %v5572_v56, inf  ;;  %v5580_v61 = vand.u32 2147483648, %v5572_v56  ;;  %vm5579_vm1 = vcmp.eq.f32.partialorder %v5572_v56, 0.0 }
0x228d   :  { %v5568_v60 = vpop.xlane.xlu0 %5567 }
0x228e   :  { %v5573_v0 = vmul.f32 0.032258064, %v5568_v60 }
0x2290   :  { %10894 = vrsqrt.f32 %v5573_v0  ;;  %vm5584_vm3 = vcmp.eq.f32.partialorder %v5573_v0, inf  ;;  %v5587_v15 = vand.u32 2147483648, %v5573_v0  ;;  %vm5586_vm5 = vcmp.eq.f32.partialorder %v5573_v0, 0.0 }
0x2291   :  { %v5571_v62 = vpop.xlane.xlu1 %5570 }
0x2292   :  { %v5574_v11 = vmul.f32 0.032258064, %v5571_v62 }
0x2294   :  { %10896 = vrsqrt.f32 %v5574_v11  ;;  %vm5591_vm15 = vcmp.eq.f32.partialorder %v5574_v11, inf  ;;  %v5594_v19 = vand.u32 2147483648, %v5574_v11  ;;  %vm5593_vm14 = vcmp.eq.f32.partialorder %v5574_v11, 0.0 }
0x2299   :  { %v10893_v5 = vpop.eup %10892 }
0x229a   :  { %v5576_v59 = vmul.f32 %v10893_v5, %v5572_v56 }
0x229c   :  { %v5578_v53 = vsel %vm5577_vm0, %v5572_v56, %v5576_v59 }
0x229d   :  { %v10895_v8 = vpop.eup %10894  ;;  %v5581_v12 = vsel %vm5579_vm1, %v5580_v61, %v5578_v53 }
0x229e   :  { %v5596_v13 = vadd.f32 1e-06, %v5581_v12  ;;  %v5583_v51 = vmul.f32 %v10895_v8, %v5573_v0 }
0x22a0   :  { %10898 = vrcp.f32 %v5596_v13  ;;  %v5585_v54 = vsel %vm5584_vm3, %v5573_v0, %v5583_v51 }
0x22a1   :  { %v10897_v57 = vpop.eup %10896  ;;  %v5588_v16 = vsel %vm5586_vm5, %v5587_v15, %v5585_v54 }
0x22a2   :  { %v5597_v17 = vadd.f32 1e-06, %v5588_v16  ;;  %v5590_v18 = vmul.f32 %v10897_v57, %v5574_v11 }
0x22a4   :  { %10900 = vrcp.f32 %v5597_v17  ;;  %v5592_v10 = vsel %vm5591_vm15, %v5574_v11, %v5590_v18 }
0x22a5   :  { %v5595_v4 = vsel %vm5593_vm14, %v5594_v19, %v5592_v10 }
0x22a6   :  { %v5598_v20 = vadd.f32 1e-06, %v5595_v4 }
0x22a8   :  { %10902 = vrcp.f32 %v5598_v20 }
0x22ad   :  { %v10899_v46 = vpop.eup %10898 }
0x22ae   :  { %v5610_v28 = vmul.f32 %v10899_v46, %v5607_v26  ;;  %v5905_v26 = vld [vmem:[#allocation2 + $0x378] sm:$0xff]  ;;  %v5904_v46 = vld [vmem:[#allocation2 + $0x370] sm:$0xff] }
0x22b0   :  { %v5618_v33 = vadd.f32 %v9202_v27, %v5610_v28 }
0x22b1   :  { %v10901_v23 = vpop.eup %10900 }
0x22b2   :  { %10292 = vmatmul.mubr.msk.f32.vlgmr.msra.gmra.mxu1 %vm131_vm2, %v5618_v33  ;;  %v5611_v34 = vmul.f32 %v10901_v23, %v5608_v32 }
0x22b3   :  { %10294 = vmatprep.mubr.msk.f32.mxu1 %vm11058_vm4, %v11057_v2  ;;  %10326 = vmatpush3.msra.mxu1 %v5906_v22 }
0x22b4   :  { %v5619_v45 = vadd.f32 %v9202_v27, %v5611_v34  ;;  %10327 = vmatprep.subr.mxu1 %v11057_v2 }
0x22b5   :  { %v10903_v37 = vpop.eup %10902  ;;  %10328 = vmatpush3.msra.mxu1 %v5905_v26 }
0x22b6   :  { %10295 = vmatmul.mubr.msk.f32.gmra.mxu1 %vm131_vm2, %v5619_v45  ;;  %v5612_v38 = vmul.f32 %v10903_v37, %v5609_v36  ;;  %10329 = vmatprep.subr.mxu1 %v11057_v2 }
0x22b7   :  { %10297 = vmatprep.mubr.msk.f32.mxu1 %vm11058_vm4, %v11057_v2  ;;  %10330 = vmatpush3.msra.mxu1 %v5904_v46 }
0x22b8   :  { %v5620_v6 = vadd.f32 %v9202_v27, %v5612_v38  ;;  %v5903_v27 = vld [vmem:[#allocation2 + $0x368] sm:$0xff]  ;;  %10331 = vmatprep.subr.mxu1 %v11057_v2 }
0x22b9   :  { %10332 = vmatpush3.msra.mxu1 %v5903_v27 }
0x22ba   :  { %10298 = vmatmul.mubr.msk.f32.gmra.mxu1 %vm131_vm2, %v5620_v6  ;;  %10357 = vmatprep.subr.mxu1 %v11057_v2 }
0x22bb   :  { %10333 = vmatprep.mubr.msk.f32.mxu1 %vm11058_vm4, %v11057_v2 }
0x2372   :  { %v5705_v41 = vpop.f32.mrf.mxu1 }
0x2373   :  { %v5706_v42 = vadd.f32 %v9203_v14, %v5705_v41 }
0x2374   :  { %v10293_v43 = vpop.f32.mrf.mxu1 }
0x2375   :  { %v5719_v9 = vmax.f32 %v5706_v42, 0.0 }
0x2376   :  { %v5710_v44 = vpop.f32.mrf.mxu1 }
0x2377   :  { %v5711_v29 = vadd.f32 %v9203_v14, %v5710_v44  ;;  %10317 = vmatmul.mubr.msk.f32.vlgmr.msra.gmra.mxu0 %vm676_vm10, %v5719_v9 }
0x2378   :  { %v10296_v21 = vpop.f32.mrf.mxu1  ;;  %10319 = vmatprep.mubr.msk.f32.mxu0 %vm11058_vm4, %v11057_v2 }
0x2379   :  { %v5720_v30 = vmax.f32 %v5711_v29, 0.0 }
0x237a   :  { %v5715_v7 = vpop.f32.mrf.mxu1 }
0x237b   :  { %v5716_v48 = vadd.f32 %v9203_v14, %v5715_v7  ;;  %10320 = vmatmul.mubr.msk.f32.gmra.mxu0 %vm676_vm10, %v5720_v30 }
0x237c   :  { %v10299_v35 = vpop.f32.mrf.mxu1  ;;  %10322 = vmatprep.mubr.msk.f32.mxu0 %vm11058_vm4, %v11057_v2 }
0x237d   :  { %v5721_v49 = vmax.f32 %v5716_v48, 0.0  ;;  %v9211_v35 = vld [vmem:[#allocation2 + $0x358] ss:$0 sm:$0xff] }
0x237f   :  { %10323 = vmatmul.mubr.msk.f32.gmra.mxu0 %vm676_vm10, %v5721_v49 }
0x2380   :  { %10348 = vmatprep.mubr.msk.f32.mxu0 %vm11058_vm4, %v11057_v2 }
0x2437   :  { %v5810_v52 = vpop.f32.mrf.mxu0 }
0x2438   :  { %v5811_v63 = vadd.f32 %v9207_v50, %v5810_v52  ;;  %v9212_v52 = vld [vmem:[#allocation2 + $0x360] ss:$0 sm:$0xff] }
0x2439   :  { %v10318_v24 = vpop.f32.mrf.mxu0 }
0x243a   :  { %v12168_v1 = vadd.f32 %v5811_v63, %v12102_v25 }
0x243b   :  { %v5815_v56 = vpop.f32.mrf.mxu0 }
0x243c   :  { %v5816_v60 = vadd.f32 %v9207_v50, %v5815_v56  ;;  %v5827_v0 = vsel %vm131_vm2, %v12168_v1, 0.0 }
0x243d   :  { %5828 = vadd.xlane.f32.xlu0 %v5827_v0  ;;  %v10321_v62 = vpop.f32.mrf.mxu0 }
0x243e   :  { %v12173_v11 = vadd.f32 %v5816_v60, %v12107_v31 }
0x243f   :  { %v5820_v5 = vpop.f32.mrf.mxu0 }
0x2440   :  { %v5821_v59 = vadd.f32 %v9207_v50, %v5820_v5  ;;  %v5830_v61 = vsel %vm131_vm2, %v12173_v11, 0.0 }
0x2441   :  { %5831 = vadd.xlane.f32.xlu1 %v5830_v61  ;;  %v10324_v53 = vpop.f32.mrf.mxu0 }
0x2442   :  { %v12178_v25 = vadd.f32 %v5821_v59, %v12112_v58 }
0x2444   :  { %v5833_v8 = vsel %vm2934_vm6, %v12178_v25, 0.0 }
0x2445   :  { %5834 = vadd.xlane.f32.xlu0 %v5833_v8  ;;  %v9213_v8 = vld [vmem:[#allocation2 + $0x388] ss:$0 sm:$0xff] }
0x24c6   :  { %v5829_v12 = vpop.xlane.xlu0 %5828 }
0x24c7   :  { %v5836_v13 = vmul.f32 0.03125, %v5829_v12 }
0x24c9   :  { %v12183_v51 = vsub.f32 %v12168_v1, %v5836_v13 }
0x24ca   :  { %v5832_v31 = vpop.xlane.xlu1 %5831 }
0x24cb   :  { %v5837_v15 = vmul.f32 0.03125, %v5832_v31  ;;  %v5842_v54 = vmul.f32 %v12183_v51, %v12183_v51  ;;  %v5889_v49 = vmul.f32 %v9211_v35, %v12183_v51 }
0x24cd   :  { %v12188_v57 = vsub.f32 %v12173_v11, %v5837_v15  ;;  %v5845_v58 = vsel %vm131_vm2, %v5842_v54, 0.0 }
0x24ce   :  { %5846 = vadd.xlane.f32.xlu1 %v5845_v58  ;;  %v5835_v16 = vpop.xlane.xlu0 %5834 }
0x24cf   :  { %v5838_v17 = vmul.f32 0.03125, %v5835_v16  ;;  %v5843_v18 = vmul.f32 %v12188_v57, %v12188_v57  ;;  %v5890_v24 = vmul.f32 %v9211_v35, %v12188_v57 }
0x24d1   :  { %v12194_v19 = vsub.f32 %v12178_v25, %v5838_v17  ;;  %v5848_v10 = vsel %vm131_vm2, %v5843_v18, 0.0 }
0x24d2   :  { %5849 = vadd.xlane.f32.xlu0 %v5848_v10 }
0x24d3   :  { %v5844_v4 = vmul.f32 %v12194_v19, %v12194_v19  ;;  %v5891_v62 = vmul.f32 %v9211_v35, %v12194_v19 }
0x24d5   :  { %v5851_v20 = vsel %vm2934_vm6, %v5844_v4, 0.0 }
0x24d6   :  { %5852 = vadd.xlane.f32.xlu1 %v5851_v20 }
0x2557   :  { %v5847_v28 = vpop.xlane.xlu1 %5846 }
0x2558   :  { %v5854_v32 = vmul.f32 0.032258064, %v5847_v28 }
0x255a   :  { %10904 = vrsqrt.f32 %v5854_v32  ;;  %vm5859_vm14 = vcmp.eq.f32.partialorder %v5854_v32, inf  ;;  %v5862_v38 = vand.u32 2147483648, %v5854_v32  ;;  %vm5861_vm15 = vcmp.eq.f32.partialorder %v5854_v32, 0.0 }
0x255b   :  { %v5850_v33 = vpop.xlane.xlu0 %5849 }
0x255c   :  { %v5855_v23 = vmul.f32 0.032258064, %v5850_v33 }
0x255e   :  { %10906 = vrsqrt.f32 %v5855_v23  ;;  %vm5866_vm0 = vcmp.eq.f32.partialorder %v5855_v23, inf  ;;  %v5869_v41 = vand.u32 2147483648, %v5855_v23  ;;  %vm5868_vm1 = vcmp.eq.f32.partialorder %v5855_v23, 0.0 }
0x255f   :  { %v5853_v34 = vpop.xlane.xlu1 %5852 }
0x2560   :  { %v5856_v36 = vmul.f32 0.032258064, %v5853_v34 }
0x2562   :  { %10908 = vrsqrt.f32 %v5856_v36  ;;  %vm5873_vm3 = vcmp.eq.f32.partialorder %v5856_v36, inf  ;;  %v5876_v21 = vand.u32 2147483648, %v5856_v36  ;;  %vm5875_vm5 = vcmp.eq.f32.partialorder %v5856_v36, 0.0 }
0x2567   :  { %v10905_v45 = vpop.eup %10904 }
0x2568   :  { %v5858_v37 = vmul.f32 %v10905_v45, %v5854_v32 }
0x256a   :  { %v5860_v6 = vsel %vm5859_vm14, %v5854_v32, %v5858_v37  ;;  %vm12952_vm14 = vcmask 441344  }
0x256b   :  { %v10907_v39 = vpop.eup %10906  ;;  %v5863_v47 = vsel %vm5861_vm15, %v5862_v38, %v5860_v6  ;;  %vm12953_vm15 = vcmask 588800  }
0x256c   :  { %v5878_v40 = vadd.f32 1e-06, %v5863_v47  ;;  %v5865_v14 = vmul.f32 %v10907_v39, %v5855_v23 }
0x256e   :  { %10910 = vrcp.f32 %v5878_v40  ;;  %v5867_v42 = vsel %vm5866_vm0, %v5855_v23, %v5865_v14  ;;  %vm12954_vm0 = vmmov %vm12952_vm14 }
0x256f   :  { %v10909_v43 = vpop.eup %10908  ;;  %v5870_v9 = vsel %vm5868_vm1, %v5869_v41, %v5867_v42  ;;  %vm12955_vm1 = vmmov %vm12953_vm15 }
0x2570   :  { %v5879_v44 = vadd.f32 1e-06, %v5870_v9  ;;  %v5872_v29 = vmul.f32 %v10909_v43, %v5856_v36 }
0x2572   :  { %10912 = vrcp.f32 %v5879_v44  ;;  %v5874_v30 = vsel %vm5873_vm3, %v5856_v36, %v5872_v29  ;;  %vm12956_vm3 = vmmov %vm12954_vm0 }
0x2573   :  { %v5877_v7 = vsel %vm5875_vm5, %v5876_v21, %v5874_v30  ;;  %vm12957_vm5 = vcmask 582656  }
0x2574   :  { %v5880_v48 = vadd.f32 1e-06, %v5877_v7 }
0x2576   :  { %10914 = vrcp.f32 %v5880_v48 }
0x257b   :  { %v10911_v50 = vpop.eup %10910 }
0x257c   :  { %v5892_v63 = vmul.f32 %v10911_v50, %v5889_v49 }
0x257e   :  { %v5900_v56 = vadd.f32 %v9212_v52, %v5892_v63 }
0x257f   :  { %v10913_v60 = vpop.eup %10912 }
0x2580   :  { %10334 = vmatmul.mubr.msk.f32.vlgmr.msra.gmra.mxu1 %vm131_vm2, %v5900_v56  ;;  %v5893_v0 = vmul.f32 %v10913_v60, %v5890_v24 }
0x2581   :  { %10336 = vmatprep.mubr.msk.f32.mxu1 %vm11058_vm4, %v11057_v2 }
0x2582   :  { %v5901_v5 = vadd.f32 %v9212_v52, %v5893_v0 }
0x2583   :  { %v10915_v59 = vpop.eup %10914 }
0x2584   :  { %10337 = vmatmul.mubr.msk.f32.gmra.mxu1 %vm131_vm2, %v5901_v5  ;;  %v5894_v61 = vmul.f32 %v10915_v59, %v5891_v62 }
0x2585   :  { %10339 = vmatprep.mubr.msk.f32.mxu1 %vm11058_vm4, %v11057_v2 }
0x2586   :  { %v5902_v53 = vadd.f32 %v9212_v52, %v5894_v61 }
0x2588   :  { %10340 = vmatmul.mubr.msk.f32.gmra.mxu1 %vm131_vm2, %v5902_v53 }
0x2589   :  { %10363 = vmatprep.mubr.msk.f32.mxu1 %vm11058_vm4, %v11057_v2 }
0x2640   :  { %v5987_v12 = vpop.f32.mrf.mxu1 }
0x2641   :  { %v12216_v13 = vadd.f32 %v9213_v8, %v5987_v12 }
0x2642   :  { %v10335_v51 = vpop.f32.mrf.mxu1 }
0x2643   :  { %6004 = vrot.lane.b32.xlu0 %v12216_v13, %s11044_s20 }
0x2644   :  { %v5992_v31 = vpop.f32.mrf.mxu1 }
0x2645   :  { %v12220_v15 = vadd.f32 %v9213_v8, %v5992_v31 }
0x2646   :  { %v10338_v54 = vpop.f32.mrf.mxu1 }
0x2647   :  { %6006 = vrot.lane.b32.xlu1 %v12220_v15, %s11044_s20  ;;  %v11012_v54 = vld [vmem:[#allocation2 + $0x530] sm:$0xff] }
0x2648   :  { %v5997_v57 = vpop.f32.mrf.mxu1 }
0x2649   :  { %v12224_v58 = vadd.f32 %v9213_v8, %v5997_v57 }
0x264a   :  { %v10341_v16 = vpop.f32.mrf.mxu1 }
0x264b   :  { %6110 = vrot.lane.b32.xlu1 %v12220_v15, %s11043_s1  ;;  %6008 = vrot.lane.b32.xlu0 %v12224_v58, %s11044_s20 }
0x264f   :  { %6112 = vrot.lane.b32.xlu1 %v12224_v58, %s11043_s1  ;;  %6102 = vrot.lane.b32.xlu0 %v12216_v13, %s11045_s21 }
0x2653   :  { %6108 = vrot.lane.b32.xlu1 %v12216_v13, %s11043_s1  ;;  %6214 = vrot.lane.b32.xlu0 %v12220_v15, %s11046_s22 }
0x2657   :  { %6104 = vrot.lane.b32.xlu1 %v12220_v15, %s11045_s21  ;;  %6320 = vrot.lane.b32.xlu0 %v12224_v58, %s11048_s24 }
0x265b   :  { %6216 = vrot.lane.b32.xlu1 %v12224_v58, %s11046_s22  ;;  %6316 = vrot.lane.b32.xlu0 %v12216_v13, %s11048_s24 }
0x265f   :  { %6318 = vrot.lane.b32.xlu1 %v12220_v15, %s11048_s24  ;;  %6106 = vrot.lane.b32.xlu0 %v12224_v58, %s11045_s21 }
0x2663   :  { %6212 = vrot.lane.b32.xlu1 %v12216_v13, %s11046_s22  ;;  %6310 = vrot.lane.b32.xlu0 %v12216_v13, %s11049_s25 }
0x2667   :  { %6206 = vrot.lane.b32.xlu1 %v12216_v13, %s11047_s23  ;;  %6312 = vrot.lane.b32.xlu0 %v12220_v15, %s11049_s25 }
0x266b   :  { %6208 = vrot.lane.b32.xlu1 %v12220_v15, %s11047_s23  ;;  %6314 = vrot.lane.b32.xlu0 %v12224_v58, %s11049_s25 }
0x266f   :  { %6210 = vrot.lane.b32.xlu1 %v12224_v58, %s11047_s23 }
0x26b5   :  { %v6005_v17 = vpop.permute.xlu0 %6004 }
0x26b9   :  { %v6007_v18 = vpop.permute.xlu1 %6006 }
0x26bd   :  { %v6009_v19 = vpop.permute.xlu0 %6008  ;;  %v6111_v10 = vpop.permute.xlu1 %6110 }
0x26be   :  { %10343 = vmatpush3.xpose.msk.msra.mxu0 %vm283_vm7, %v6009_v19 }
0x26bf   :  { %10344 = vmatprep.subr.mxu0 %v11057_v2 }
0x26c1   :  { %v6103_v4 = vpop.permute.xlu0 %6102  ;;  %v6113_v20 = vpop.permute.xlu1 %6112 }
0x26c2   :  { %10345 = vmatpush3.xpose.msk.msra.mxu0 %vm283_vm7, %v6007_v18  ;;  %10358 = vmatpush3.xpose.msk.msra.mxu1 %vm283_vm7, %v6113_v20  ;;  %v11013_v20 = vld [vmem:[#allocation2 + $0x538] sm:$0xff] }
0x26c3   :  { %10346 = vmatprep.subr.mxu0 %v11057_v2  ;;  %10359 = vmatprep.subr.mxu1 %v11057_v2 }
0x26c5   :  { %v6215_v22 = vpop.permute.xlu0 %6214  ;;  %v6109_v26 = vpop.permute.xlu1 %6108 }
0x26c6   :  { %10347 = vmatpush3.xpose.msk.msra.mxu0 %vm283_vm7, %v6005_v17  ;;  %10360 = vmatpush3.xpose.msk.msra.mxu1 %vm283_vm7, %v6111_v10 }
0x26c7   :  { %10361 = vmatprep.subr.mxu1 %v11057_v2  ;;  %10372 = vmatprep.subr.mxu0 %v11057_v2 }
0x26c9   :  { %v6321_v46 = vpop.permute.xlu0 %6320  ;;  %10349 = vmatmul.mubr.msk.f32.vlgmr.msra.gmra.mxu0 %vm283_vm7, %v12216_v13  ;;  %v6105_v27 = vpop.permute.xlu1 %6104 }
0x26ca   :  { %10362 = vmatpush3.xpose.msk.msra.mxu1 %vm283_vm7, %v6109_v26  ;;  %10351 = vmatprep.mubr.msk.f32.mxu0 %vm11058_vm4, %v11057_v2 }
0x26cb   :  { %10387 = vmatprep.subr.mxu1 %v11057_v2 }
0x26cd   :  { %v6317_v28 = vpop.permute.xlu0 %6316  ;;  %10352 = vmatmul.mubr.msk.f32.gmra.mxu0 %vm283_vm7, %v12220_v15  ;;  %10364 = vmatmul.mubr.msk.f32.vlgmr.msra.gmra.mxu1 %vm283_vm7, %v6103_v4  ;;  %v6217_v32 = vpop.permute.xlu1 %6216 }
0x26ce   :  { %10373 = vmatpush3.xpose.msk.msra.mxu0 %vm283_vm7, %v6217_v32  ;;  %10388 = vmatpush3.xpose.msk.msra.mxu1 %vm283_vm7, %v6321_v46 }
0x26cf   :  { %10354 = vmatprep.mubr.msk.f32.mxu0 %vm11058_vm4, %v11057_v2  ;;  %10366 = vmatprep.mubr.msk.f32.mxu1 %vm11058_vm4, %v11057_v2 }
0x26d0   :  { %10374 = vmatprep.subr.mxu0 %v11057_v2  ;;  %10389 = vmatprep.subr.mxu1 %v11057_v2 }
0x26d1   :  { %v6107_v33 = vpop.permute.xlu0 %6106  ;;  %10355 = vmatmul.mubr.msk.f32.gmra.mxu0 %vm283_vm7, %v12224_v58  ;;  %10367 = vmatmul.mubr.msk.f32.gmra.mxu1 %vm283_vm7, %v6105_v27  ;;  %v6319_v23 = vpop.permute.xlu1 %6318 }
0x26d2   :  { %10375 = vmatpush3.xpose.msk.msra.mxu0 %vm283_vm7, %v6215_v22  ;;  %10390 = vmatpush3.xpose.msk.msra.mxu1 %vm283_vm7, %v6319_v23 }
0x26d3   :  { %10369 = vmatprep.mubr.msk.f32.mxu1 %vm11058_vm4, %v11057_v2  ;;  %10376 = vmatprep.subr.mxu0 %v11057_v2 }
0x26d4   :  { %10391 = vmatprep.subr.mxu1 %v11057_v2  ;;  %10378 = vmatprep.mubr.msk.f32.mxu0 %vm11058_vm4, %v11057_v2 }
0x26d5   :  { %v6311_v34 = vpop.permute.xlu0 %6310  ;;  %10370 = vmatmul.mubr.msk.f32.gmra.mxu1 %vm283_vm7, %v6107_v33  ;;  %v6213_v36 = vpop.permute.xlu1 %6212 }
0x26d6   :  { %10377 = vmatpush3.xpose.msk.msra.mxu0 %vm283_vm7, %v6213_v36  ;;  %10392 = vmatpush3.xpose.msk.msra.mxu1 %vm283_vm7, %v6317_v28 }
0x26d7   :  { %10393 = vmatprep.mubr.msk.f32.mxu1 %vm11058_vm4, %v11057_v2  ;;  %10417 = vmatprep.subr.mxu1 %v11057_v2 }
0x26d8   :  { %10402 = vmatprep.subr.mxu0 %v11057_v2 }
0x26d9   :  { %10394 = vmatmul.mubr.msk.f32.vlgmr.msra.gmra.mxu1 %vm283_vm7, %v6311_v34  ;;  %v6207_v45 = vpop.permute.xlu1 %6206  ;;  %v6313_v37 = vpop.permute.xlu0 %6312  ;;  %v11014_v34 = vld [vmem:[#allocation2 + $0x540] sm:$0x3] }
0x26da   :  { %10379 = vmatmul.mubr.msk.f32.vlgmr.msra.gmra.mxu0 %vm283_vm7, %v6207_v45  ;;  %10396 = vmatprep.mubr.msk.f32.mxu1 %vm11058_vm4, %v11057_v2 }
0x26db   :  { %10381 = vmatprep.mubr.msk.f32.mxu0 %vm11058_vm4, %v11057_v2 }
0x26dd   :  { %10397 = vmatmul.mubr.msk.f32.gmra.mxu1 %vm283_vm7, %v6313_v37  ;;  %v6209_v38 = vpop.permute.xlu1 %6208  ;;  %v6315_v6 = vpop.permute.xlu0 %6314 }
0x26de   :  { %10382 = vmatmul.mubr.msk.f32.gmra.mxu0 %vm283_vm7, %v6209_v38  ;;  %10399 = vmatprep.mubr.msk.f32.mxu1 %vm11058_vm4, %v11057_v2 }
0x26df   :  { %10384 = vmatprep.mubr.msk.f32.mxu0 %vm11058_vm4, %v11057_v2 }
0x26e1   :  { %10400 = vmatmul.mubr.msk.f32.gmra.mxu1 %vm283_vm7, %v6315_v6  ;;  %v6211_v39 = vpop.permute.xlu1 %6210 }
0x26e2   :  { %10385 = vmatmul.mubr.msk.f32.gmra.mxu0 %vm283_vm7, %v6211_v39  ;;  %10423 = vmatprep.mubr.msk.f32.mxu1 %vm11058_vm4, %v11057_v2 }
0x26e3   :  { %10408 = vmatprep.mubr.msk.f32.mxu0 %vm11058_vm4, %v11057_v2 }
0x2789   :  { %v6088_v47 = vpop.f32.mrf.mxu0 }
0x278b   :  { %v10350_v40 = vpop.f32.mrf.mxu0 }
0x278d   :  { %v6093_v14 = vpop.f32.mrf.mxu0  ;;  %v6192_v41 = vpop.f32.mrf.mxu1 }
0x278e   :  { %6417 = vrot.lane.b32.xlu1 %v6192_v41, %s11059_s11 }
0x278f   :  { %v10353_v42 = vpop.f32.mrf.mxu0  ;;  %v10365_v43 = vpop.f32.mrf.mxu1 }
0x2791   :  { %v6098_v9 = vpop.f32.mrf.mxu0  ;;  %v6197_v44 = vpop.f32.mrf.mxu1 }
0x2792   :  { %6419 = vrot.lane.b32.xlu0 %v6197_v44, %s11059_s11 }
0x2793   :  { %v10356_v29 = vpop.f32.mrf.mxu0  ;;  %v10368_v21 = vpop.f32.mrf.mxu1 }
0x2795   :  { %v6202_v30 = vpop.f32.mrf.mxu1 }
0x2797   :  { %v10371_v7 = vpop.f32.mrf.mxu1 }
0x2799   :  { %v6400_v48 = vpop.f32.mrf.mxu1 }
0x279a   :  { %6441 = vrot.lane.b32.xlu1 %v6400_v48, %s11060_s12  ;;  %v6296_v35 = vpop.f32.mrf.mxu0 }
0x279b   :  { %v10395_v49 = vpop.f32.mrf.mxu1  ;;  %6429 = vrot.lane.b32.xlu0 %v6296_v35, %s11061_s14 }
0x279c   :  { %v10380_v50 = vpop.f32.mrf.mxu0 }
0x279d   :  { %v6405_v52 = vpop.f32.mrf.mxu1 }
0x279e   :  { %v6301_v63 = vpop.f32.mrf.mxu0 }
0x279f   :  { %v10398_v24 = vpop.f32.mrf.mxu1  ;;  %6443 = vrot.lane.b32.xlu0 %v6405_v52, %s11060_s12  ;;  %6431 = vrot.lane.b32.xlu1 %v6301_v63, %s11061_s14 }
0x27a0   :  { %v10383_v56 = vpop.f32.mrf.mxu0 }
0x27a1   :  { %v6410_v60 = vpop.f32.mrf.mxu1 }
0x27a2   :  { %v6306_v0 = vpop.f32.mrf.mxu0 }
0x27a3   :  { %v10401_v62 = vpop.f32.mrf.mxu1  ;;  %6421 = vrot.lane.b32.xlu1 %v6202_v30, %s11059_s11  ;;  %6433 = vrot.lane.b32.xlu0 %v6306_v0, %s11061_s14 }
0x27a4   :  { %v10386_v5 = vpop.f32.mrf.mxu0 }
0x27a7   :  { %6445 = vrot.lane.b32.xlu1 %v6410_v60, %s11060_s12 }
0x2800   :  { %v6418_v59 = vpop.permute.xlu1 %6417 }
0x2801   :  { %v6450_v8 = vsel %vm3552_vm12, %v6088_v47, %v6418_v59 }
0x2804   :  { %v6420_v61 = vpop.permute.xlu0 %6419 }
0x2805   :  { %v6451_v16 = vsel %vm3552_vm12, %v6093_v14, %v6420_v61 }
0x280c   :  { %v6442_v53 = vpop.permute.xlu1 %6441 }
0x280d   :  { %v6430_v12 = vpop.permute.xlu0 %6429 }
0x280e   :  { %v6453_v51 = vsel %vm3556_vm13, %v6450_v8, %v6430_v12 }
0x280f   :  { %v6456_v31 = vsel %vm12952_vm14, %v6453_v51, %v6442_v53 }
0x2810   :  { %v6459_v57 = vadd.f32 %v11012_v54, %v6456_v31 }
0x2811   :  { %v6444_v17 = vpop.permute.xlu0 %6443  ;;  %v6432_v18 = vpop.permute.xlu1 %6431 }
0x2812   :  { %v6454_v19 = vsel %vm3556_vm13, %v6451_v16, %v6432_v18  ;;  %v6462_v10 = vsel %vm12953_vm15, %v6459_v57, -inf }
0x2813   :  { %v6457_v4 = vsel %vm12954_vm0, %v6454_v19, %v6444_v17  ;;  %6463 = vmax.xlane.f32.xlu0 %v6462_v10 }
0x2814   :  { %v6460_v22 = vadd.f32 %v11013_v20, %v6457_v4 }
0x2815   :  { %v6422_v26 = vpop.permute.xlu1 %6421  ;;  %v6434_v46 = vpop.permute.xlu0 %6433 }
0x2816   :  { %v6452_v27 = vsel %vm3552_vm12, %v6098_v9, %v6422_v26  ;;  %v6465_v28 = vsel %vm12955_vm1, %v6460_v22, -inf  ;;  %vm12962_vm1 = vcmask 140288  }
0x2817   :  { %6466 = vmax.xlane.f32.xlu1 %v6465_v28  ;;  %v6455_v32 = vsel %vm3556_vm13, %v6452_v27, %v6434_v46  ;;  %vm12958_vm13 = vcmask 1041408  }
0x2818   :  { %vm12959_vm14 = vmmov %vm12958_vm13 }
0x2819   :  { %v6446_v33 = vpop.permute.xlu1 %6445  ;;  %vm12960_vm15 = vmmov %vm12958_vm13 }
0x281a   :  { %v6458_v23 = vsel %vm12956_vm3, %v6455_v32, %v6446_v33  ;;  %vm12961_vm0 = vmmov %vm12958_vm13 }
0x281b   :  { %v6461_v36 = vadd.f32 %v11014_v34, %v6458_v23  ;;  %vm12963_vm3 = vmmov %vm12962_vm1 }
0x281d   :  { %v6468_v45 = vsel %vm12957_vm5, %v6461_v36, -inf  ;;  %vm12964_vm5 = vmmov %vm12962_vm1 }
0x281e   :  { %6469 = vmax.xlane.f32.xlu0 %v6468_v45 }
0x2828   :  { %6619 = vrot.lane.b32.xlu1 %v12224_v58, %s11054_s30 }
0x282c   :  { %6494 = vrot.lane.b32.xlu1 %v12220_v15, %s11053_s29 }
0x2830   :  { %6492 = vrot.lane.b32.xlu1 %v12216_v13, %s11053_s29 }
0x2834   :  { %6739 = vrot.lane.b32.xlu1 %v12224_v58, %s11052_s28  ;;  %6496 = vrot.lane.b32.xlu0 %v12224_v58, %s11053_s29 }
0x2838   :  { %6857 = vrot.lane.b32.xlu1 %v12220_v15, %s11055_s3  ;;  %6617 = vrot.lane.b32.xlu0 %v12220_v15, %s11054_s30 }
0x283c   :  { %6615 = vrot.lane.b32.xlu0 %v12216_v13, %s11054_s30 }
0x2840   :  { %6859 = vrot.lane.b32.xlu0 %v12224_v58, %s11055_s3 }
0x2844   :  { %6737 = vrot.lane.b32.xlu0 %v12220_v15, %s11052_s28 }
0x289c   :  { %v6464_v37 = vpop.xlane.xlu0 %6463 }
0x289d   :  { %v6471_v38 = vsub.f32 %v6459_v57, %v6464_v37 }
0x289f   :  { %v6474_v6 = vmul.f32 1.442695, %v6471_v38 }
0x28a0   :  { %v6467_v39 = vpop.xlane.xlu1 %6466 }
0x28a1   :  { %10916 = vpow2.f32 %v6474_v6  ;;  %v6472_v47 = vsub.f32 %v6460_v22, %v6467_v39 }
0x28a3   :  { %v6476_v40 = vmul.f32 1.442695, %v6472_v47 }
0x28a4   :  { %v6620_v14 = vpop.permute.xlu1 %6619 }
0x28a5   :  { %10918 = vpow2.f32 %v6476_v40  ;;  %10418 = vmatpush3.msk.msra.mxu1 %vm12958_vm13, %v6620_v14  ;;  %vm12965_vm13 = vmmov %vm12962_vm1  ;;  %v7001_v40 = vld [vmem:[#allocation2 + $0x3a0] sm:$0xff]  ;;  %v7000_v14 = vld [vmem:[#allocation2 + $0x398] sm:$0xff] }
0x28a6   :  { %10419 = vmatprep.subr.mxu1 %v11057_v2 }
0x28a7   :  { %v6470_v41 = vpop.xlane.xlu0 %6469 }
0x28a8   :  { %v6473_v42 = vsub.f32 %v6461_v36, %v6470_v41  ;;  %v6495_v43 = vpop.permute.xlu1 %6494  ;;  %v7002_v36 = vld [vmem:[#allocation2 + $0x3a8] sm:$0xff] }
0x28aa   :  { %v6478_v58 = vmul.f32 1.442695, %v6473_v42 }
0x28ab   :  { %v6497_v9 = vpop.permute.xlu0 %6496 }
0x28ac   :  { %10920 = vpow2.f32 %v6478_v58  ;;  %10403 = vmatpush3.msk.msra.mxu0 %vm12959_vm14, %v6497_v9  ;;  %v6493_v15 = vpop.permute.xlu1 %6492  ;;  %v6999_v58 = vld [vmem:[#allocation2 + $0x390] sm:$0xff] }
0x28ad   :  { %10404 = vmatprep.subr.mxu0 %v11057_v2 }
0x28ae   :  { %v12372_v44 = vpop.eup %10916  ;;  %10405 = vmatpush3.msra.mxu0 %v6495_v43 }
0x28af   :  { %6594 = vrot.lane.b32.xlu1 %v12372_v44, %s11062_s15  ;;  %v6618_v29 = vpop.permute.xlu0 %6617  ;;  %10406 = vmatprep.subr.mxu0 %v11057_v2  ;;  %v6480_v17 = vsel %vm3552_vm12, %v12372_v44, 0.0 }
0x28b0   :  { %10407 = vmatpush3.msra.mxu0 %v6493_v15  ;;  %10420 = vmatpush3.msra.mxu1 %v6618_v29  ;;  %v6740_v21 = vpop.permute.xlu1 %6739 }
0x28b1   :  { %10409 = vmatmul.mubr.msk.f32.vlgmr.msra.gmra.mxu0 %vm3552_vm12, %v12372_v44  ;;  %10432 = vmatprep.subr.mxu0 %v11057_v2 }
0x28b2   :  { %v12380_v30 = vpop.eup %10918  ;;  %10433 = vmatpush3.msk.msra.mxu0 %vm12960_vm15, %v6740_v21  ;;  %10421 = vmatprep.subr.mxu1 %v11057_v2 }
0x28b3   :  { %6714 = vrot.lane.b32.xlu1 %v12372_v44, %s11063_s16  ;;  %v6616_v7 = vpop.permute.xlu0 %6615  ;;  %6596 = vrot.lane.b32.xlu0 %v12380_v30, %s11062_s15  ;;  %v6483_v10 = vsel %vm3552_vm12, %v12380_v30, 0.0 }
0x28b4   :  { %10411 = vmatprep.mubr.msk.f32.mxu0 %vm11058_vm4, %v11057_v2  ;;  %10422 = vmatpush3.msra.mxu1 %v6616_v7  ;;  %v7277_v7 = vld [vmem:[#allocation2 + $0x408] sm:$0xff] }
0x28b5   :  { %10412 = vmatmul.mubr.msk.f32.gmra.mxu0 %vm3552_vm12, %v12380_v30  ;;  %10434 = vmatprep.subr.mxu0 %v11057_v2 }
0x28b6   :  { %10414 = vmatprep.mubr.msk.f32.mxu0 %vm11058_vm4, %v11057_v2  ;;  %10447 = vmatprep.subr.mxu1 %v11057_v2 }
0x28b7   :  { %v6860_v48 = vpop.permute.xlu0 %6859  ;;  %6735 = vrot.lane.b32.xlu0 %v12216_v13, %s11052_s28 }
0x28b9   :  { %v12398_v35 = vpop.eup %10920 }
0x28ba   :  { %6598 = vrot.lane.b32.xlu1 %v12398_v35, %s11062_s15  ;;  %10415 = vmatmul.mubr.msk.f32.gmra.mxu0 %vm3552_vm12, %v12398_v35  ;;  %v6486_v19 = vsel %vm12965_vm13, %v12398_v35, 0.0  ;;  %vm12966_vm13 = vcmask 517120  }
0x28bb   :  { %v6738_v49 = vpop.permute.xlu0 %6737  ;;  %6855 = vrot.lane.b32.xlu0 %v12216_v13, %s11055_s3  ;;  %10438 = vmatprep.mubr.msk.f32.mxu0 %vm11058_vm4, %v11057_v2  ;;  %v6858_v13 = vpop.permute.xlu1 %6857 }
0x28bc   :  { %10435 = vmatpush3.msra.mxu0 %v6738_v49 }
0x28bd   :  { %10436 = vmatprep.subr.mxu0 %v11057_v2 }
0x28be   :  { %6834 = vrot.lane.b32.xlu1 %v12372_v44, %s11064_s17 }
0x28bf   :  { %6716 = vrot.lane.b32.xlu0 %v12380_v30, %s11063_s16 }
0x28c2   :  { %6836 = vrot.lane.b32.xlu1 %v12380_v30, %s11064_s17 }
0x28c3   :  { %6718 = vrot.lane.b32.xlu0 %v12398_v35, %s11063_s16 }
0x28c6   :  { %6838 = vrot.lane.b32.xlu1 %v12398_v35, %s11064_s17 }
0x2921   :  { %v6595_v50 = vpop.permute.xlu1 %6594 }
0x2922   :  { %10424 = vmatmul.mubr.msk.f32.vlgmr.msra.gmra.mxu1 %vm3552_vm12, %v6595_v50  ;;  %v6603_v52 = vsel %vm3552_vm12, %v6595_v50, 0.0 }
0x2923   :  { %10448 = vmatpush3.msk.msra.mxu1 %vm12961_vm0, %v6860_v48  ;;  %6604 = vadd.xlane.f32.xlu0 %v6603_v52 }
0x2924   :  { %10449 = vmatprep.subr.mxu1 %v11057_v2  ;;  %10426 = vmatprep.mubr.msk.f32.mxu1 %vm11058_vm4, %v11057_v2 }
0x2925   :  { %10450 = vmatpush3.msra.mxu1 %v6858_v13  ;;  %v6597_v63 = vpop.permute.xlu0 %6596  ;;  %v6715_v24 = vpop.permute.xlu1 %6714 }
0x2926   :  { %10427 = vmatmul.mubr.msk.f32.gmra.mxu1 %vm3552_vm12, %v6597_v63  ;;  %v6723_v56 = vsel %vm3552_vm12, %v6715_v24, 0.0  ;;  %10451 = vmatprep.subr.mxu1 %v11057_v2  ;;  %v6606_v12 = vsel %vm3552_vm12, %v6597_v63, 0.0 }
0x2927   :  { %6724 = vadd.xlane.f32.xlu1 %v6723_v56  ;;  %10429 = vmatprep.mubr.msk.f32.mxu1 %vm11058_vm4, %v11057_v2 }
0x2929   :  { %v6736_v60 = vpop.permute.xlu0 %6735 }
0x292a   :  { %10437 = vmatpush3.msra.mxu0 %v6736_v60 }
0x292b   :  { %10439 = vmatmul.mubr.msk.f32.vlgmr.msra.gmra.mxu0 %vm3552_vm12, %v6715_v24  ;;  %10462 = vmatprep.subr.mxu0 %v11057_v2 }
0x292c   :  { %v6599_v0 = vpop.permute.xlu1 %6598  ;;  %10441 = vmatprep.mubr.msk.f32.mxu0 %vm11058_vm4, %v11057_v2  ;;  %10463 = vmatpush3.msra.mxu0 %v7002_v36 }
0x292d   :  { %v6856_v62 = vpop.permute.xlu0 %6855  ;;  %10430 = vmatmul.mubr.msk.f32.gmra.mxu1 %vm3552_vm12, %v6599_v0  ;;  %v6609_v16 = vsel %vm12963_vm3, %v6599_v0, 0.0  ;;  %10464 = vmatprep.subr.mxu0 %v11057_v2 }
0x292e   :  { %10452 = vmatpush3.msra.mxu1 %v6856_v62  ;;  %10453 = vmatprep.mubr.msk.f32.mxu1 %vm11058_vm4, %v11057_v2 }
0x292f   :  { %10479 = vmatprep.subr.mxu1 %v11057_v2  ;;  %10465 = vmatpush3.msra.mxu0 %v7001_v40 }
0x2930   :  { %v6835_v5 = vpop.permute.xlu1 %6834  ;;  %10466 = vmatprep.subr.mxu0 %v11057_v2 }
0x2931   :  { %v6717_v59 = vpop.permute.xlu0 %6716  ;;  %10454 = vmatmul.mubr.msk.f32.vlgmr.msra.gmra.mxu1 %vm3552_vm12, %v6835_v5  ;;  %v6843_v61 = vsel %vm3552_vm12, %v6835_v5, 0.0  ;;  %10467 = vmatpush3.msra.mxu0 %v7000_v14 }
0x2932   :  { %10442 = vmatmul.mubr.msk.f32.gmra.mxu0 %vm3552_vm12, %v6717_v59  ;;  %6844 = vadd.xlane.f32.xlu0 %v6843_v61  ;;  %v6726_v54 = vsel %vm3552_vm12, %v6717_v59, 0.0 }
0x2933   :  { %10456 = vmatprep.mubr.msk.f32.mxu1 %vm11058_vm4, %v11057_v2  ;;  %10444 = vmatprep.mubr.msk.f32.mxu0 %vm11058_vm4, %v11057_v2 }
0x2934   :  { %v6837_v53 = vpop.permute.xlu1 %6836  ;;  %10468 = vmatprep.subr.mxu0 %v11057_v2 }
0x2935   :  { %v6719_v8 = vpop.permute.xlu0 %6718  ;;  %10457 = vmatmul.mubr.msk.f32.gmra.mxu1 %vm3552_vm12, %v6837_v53  ;;  %v6846_v51 = vsel %vm3552_vm12, %v6837_v53, 0.0  ;;  %10469 = vmatpush3.msra.mxu0 %v6999_v58 }
0x2936   :  { %10445 = vmatmul.mubr.msk.f32.gmra.mxu0 %vm3552_vm12, %v6719_v8  ;;  %6607 = vadd.xlane.f32.xlu0 %v6606_v12  ;;  %v6729_v57 = vsel %vm12962_vm1, %v6719_v8, 0.0 }
0x2937   :  { %6847 = vadd.xlane.f32.xlu1 %v6846_v51  ;;  %10459 = vmatprep.mubr.msk.f32.mxu1 %vm11058_vm4, %v11057_v2 }
0x2938   :  { %v6839_v31 = vpop.permute.xlu1 %6838  ;;  %10470 = vmatprep.mubr.msk.f32.mxu0 %vm11058_vm4, %v11057_v2  ;;  %10496 = vmatprep.subr.mxu0 %v7277_v7 }
0x2939   :  { %10460 = vmatmul.mubr.msk.f32.gmra.mxu1 %vm3552_vm12, %v6839_v31  ;;  %v6849_v18 = vsel %vm12964_vm5, %v6839_v31, 0.0 }
0x293a   :  { %6727 = vadd.xlane.f32.xlu0 %v6726_v54  ;;  %10487 = vmatprep.mubr.msk.f32.mxu1 %vm11058_vm4, %v11057_v2 }
0x293b   :  { %6730 = vadd.xlane.f32.xlu1 %v6729_v57 }
0x293e   :  { %6610 = vadd.xlane.f32.xlu0 %v6609_v16 }
0x293f   :  { %6481 = vadd.xlane.f32.xlu1 %v6480_v17 }
0x2942   :  { %6850 = vadd.xlane.f32.xlu0 %v6849_v18 }
0x2943   :  { %6487 = vadd.xlane.f32.xlu1 %v6486_v19 }
0x2946   :  { %6484 = vadd.xlane.f32.xlu0 %v6483_v10 }
0x2971   :  { %v12466_v4 = vpop.f32.mrf.mxu0 }
0x2973   :  { %v10410_v20 = vpop.f32.mrf.mxu0 }
0x2975   :  { %v12468_v22 = vpop.f32.mrf.mxu0 }
0x2977   :  { %v10413_v26 = vpop.f32.mrf.mxu0 }
0x297a   :  { %v12470_v46 = vpop.f32.mrf.mxu0 }
0x297c   :  { %v10416_v27 = vpop.f32.mrf.mxu0 }
0x29ac   :  { %v6605_v28 = vpop.xlane.xlu0 %6604 }
0x29ad   :  { %10922 = vrcp.f32 %v6605_v28 }
0x29b0   :  { %v6725_v23 = vpop.xlane.xlu1 %6724 }
0x29b1   :  { %10924 = vrcp.f32 %v6725_v23 }
0x29ba   :  { %v10923_v45 = vpop.eup %10922 }
0x29bb   :  { %v6845_v32 = vpop.xlane.xlu0 %6844 }
0x29be   :  { %v10925_v9 = vpop.eup %10924 }
0x29bf   :  { %v6608_v33 = vpop.xlane.xlu0 %6607 }
0x29c0   :  { %10926 = vrcp.f32 %v6608_v33  ;;  %v6848_v47 = vpop.xlane.xlu1 %6847 }
0x29c3   :  { %v6728_v34 = vpop.xlane.xlu0 %6727 }
0x29c4   :  { %10928 = vrcp.f32 %v6728_v34  ;;  %v6731_v15 = vpop.xlane.xlu1 %6730 }
0x29c5   :  { %10930 = vrcp.f32 %v6845_v32 }
0x29c7   :  { %v6611_v38 = vpop.xlane.xlu0 %6610 }
0x29c8   :  { %10932 = vrcp.f32 %v6611_v38  ;;  %v6482_v19 = vpop.xlane.xlu1 %6481 }
0x29c9   :  { %10934 = vrcp.f32 %v6848_v47 }
0x29cb   :  { %v6851_v43 = vpop.xlane.xlu0 %6850 }
0x29cc   :  { %10936 = vrcp.f32 %v6851_v43  ;;  %v6488_v20 = vpop.xlane.xlu1 %6487  ;;  %v7274_v43 = vld [vmem:[#allocation2 + $0x3f0] sm:$0xff] }
0x29cd   :  { %10938 = vrcp.f32 %v6731_v15  ;;  %v10927_v48 = vpop.eup %10926 }
0x29ce   :  { %10940 = vrcp.f32 %v6482_v19 }
0x29cf   :  { %v6485_v10 = vpop.xlane.xlu0 %6484 }
0x29d0   :  { %10942 = vrcp.f32 %v6485_v10 }
0x29d1   :  { %v10929_v50 = vpop.eup %10928  ;;  %10944 = vrcp.f32 %v6488_v20 }
0x29d2   :  { %v10931_v63 = vpop.eup %10930 }
0x29d5   :  { %v10933_v5 = vpop.eup %10932 }
0x29d6   :  { %v10935_v61 = vpop.eup %10934 }
0x29d9   :  { %v10937_v31 = vpop.eup %10936 }
0x29da   :  { %v10939_v16 = vpop.eup %10938 }
0x29db   :  { %v10941_v27 = vpop.eup %10940 }
0x29dc   :  { %v6591_v33 = vmul.f32 %v10941_v27, %v12466_v4  ;;  %v7275_v4 = vld [vmem:[#allocation2 + $0x3f8] sm:$0xff] }
0x29dd   :  { %v10943_v23 = vpop.eup %10942  ;;  %v7178_v27 = vld [vmem:[#allocation2 + $0x3d8] sm:$0xff] }
0x29de   :  { %v6592_v38 = vmul.f32 %v10943_v23, %v12468_v22  ;;  %v10945_v47 = vpop.eup %10944 }
0x29df   :  { %v6593_v58 = vmul.f32 %v10945_v47, %v12470_v46  ;;  %v9257_v46 = vld [vmem:[#allocation2 + $0x3b0] ss:$0 sm:$0xff] }
0x29e2   :  { %v6697_v37 = vpop.f32.mrf.mxu1 }
0x29e3   :  { %v6711_v6 = vmul.f32 %v10923_v45, %v6697_v37 }
0x29e4   :  { %v10425_v39 = vpop.f32.mrf.mxu1 }
0x29e5   :  { %6957 = vrot.lane.b32.xlu0 %v6711_v6, %s11042_s13  ;;  %v7276_v39 = vld [vmem:[#allocation2 + $0x400] sm:$0xff] }
0x29e6   :  { %v6702_v41 = vpop.f32.mrf.mxu1 }
0x29e7   :  { %v6712_v49 = vmul.f32 %v10927_v48, %v6702_v41 }
0x29e8   :  { %v10428_v42 = vpop.f32.mrf.mxu1 }
0x29eb   :  { %v6817_v44 = vpop.f32.mrf.mxu0 }
0x29ec   :  { %v6831_v29 = vmul.f32 %v10925_v9, %v6817_v44 }
0x29ed   :  { %v6707_v21 = vpop.f32.mrf.mxu1  ;;  %v10440_v30 = vpop.f32.mrf.mxu0 }
0x29ee   :  { %6969 = vrot.lane.b32.xlu1 %v6831_v29, %s11050_s26  ;;  %v6713_v53 = vmul.f32 %v10933_v5, %v6707_v21 }
0x29ef   :  { %v10431_v35 = vpop.f32.mrf.mxu1 }
0x29f1   :  { %v6937_v13 = vpop.f32.mrf.mxu1 }
0x29f2   :  { %v6822_v52 = vpop.f32.mrf.mxu0  ;;  %6959 = vrot.lane.b32.xlu1 %v6712_v49, %s11042_s13  ;;  %v6951_v60 = vmul.f32 %v10931_v63, %v6937_v13 }
0x29f3   :  { %v6832_v24 = vmul.f32 %v10929_v50, %v6822_v52  ;;  %v10455_v56 = vpop.f32.mrf.mxu1 }
0x29f4   :  { %v10443_v0 = vpop.f32.mrf.mxu0 }
0x29f5   :  { %v6942_v62 = vpop.f32.mrf.mxu1  ;;  %6971 = vrot.lane.b32.xlu0 %v6832_v24, %s11050_s26 }
0x29f6   :  { %v6827_v59 = vpop.f32.mrf.mxu0  ;;  %6981 = vrot.lane.b32.xlu1 %v6951_v60, %s11056_s4  ;;  %v6952_v12 = vmul.f32 %v10935_v61, %v6942_v62 }
0x29f7   :  { %v10458_v8 = vpop.f32.mrf.mxu1  ;;  %v6833_v18 = vmul.f32 %v10939_v16, %v6827_v59 }
0x29f8   :  { %v10446_v51 = vpop.f32.mrf.mxu0 }
0x29f9   :  { %v6947_v54 = vpop.f32.mrf.mxu1  ;;  %6961 = vrot.lane.b32.xlu0 %v6713_v53, %s11042_s13 }
0x29fa   :  { %v6953_v57 = vmul.f32 %v10937_v31, %v6947_v54  ;;  %6983 = vrot.lane.b32.xlu1 %v6952_v12, %s11056_s4 }
0x29fb   :  { %v10461_v17 = vpop.f32.mrf.mxu1 }
0x29fd   :  { %6985 = vrot.lane.b32.xlu0 %v6953_v57, %s11056_s4 }
0x29fe   :  { %6973 = vrot.lane.b32.xlu1 %v6833_v18, %s11050_s26  ;;  %v9267_v18 = vld [vmem:[#allocation2 + $0x410] ss:$0 sm:$0xff] }
0x2a57   :  { %v6958_v28 = vpop.permute.xlu0 %6957 }
0x2a58   :  { %v6990_v34 = vsel %vm283_vm7, %v6591_v33, %v6958_v28  ;;  %v7177_v28 = vld [vmem:[#allocation2 + $0x3d0] sm:$0xff] }
0x2a60   :  { %v6970_v26 = vpop.permute.xlu1 %6969 }
0x2a61   :  { %v6993_v45 = vsel %vm664_vm8, %v6990_v34, %v6970_v26  ;;  %v7179_v26 = vld [vmem:[#allocation2 + $0x3e0] sm:$0xff] }
0x2a62   :  { %10480 = vmatpush3.msra.mxu1 %v7179_v26 }
0x2a63   :  { %10481 = vmatprep.subr.mxu1 %v11057_v2 }
0x2a64   :  { %v6960_v32 = vpop.permute.xlu1 %6959  ;;  %10482 = vmatpush3.msra.mxu1 %v7178_v27 }
0x2a65   :  { %v6991_v40 = vsel %vm283_vm7, %v6592_v38, %v6960_v32  ;;  %10483 = vmatprep.subr.mxu1 %v11057_v2  ;;  %v7176_v32 = vld [vmem:[#allocation2 + $0x3c8] sm:$0xff] }
0x2a66   :  { %10484 = vmatpush3.msra.mxu1 %v7177_v28 }
0x2a67   :  { %v6972_v36 = vpop.permute.xlu0 %6971  ;;  %10485 = vmatprep.subr.mxu1 %v11057_v2 }
0x2a68   :  { %v6982_v37 = vpop.permute.xlu1 %6981  ;;  %v6994_v41 = vsel %vm664_vm8, %v6991_v40, %v6972_v36  ;;  %10486 = vmatpush3.msra.mxu1 %v7176_v32 }
0x2a69   :  { %v6996_v6 = vsel %vm1117_vm11, %v6993_v45, %v6982_v37  ;;  %10507 = vmatprep.subr.mxu1 %v11057_v2 }
0x2a6a   :  { %10471 = vmatmul.mubr.msk.f32.vlgmr.msra.gmra.mxu0 %vm131_vm2, %v6996_v6 }
0x2a6b   :  { %v6962_v14 = vpop.permute.xlu0 %6961  ;;  %10473 = vmatprep.mubr.msk.f32.mxu0 %vm11058_vm4, %v11057_v2  ;;  %10497 = vmatpush3.msra.mxu0 %v7277_v7 }
0x2a6c   :  { %v6984_v42 = vpop.permute.xlu1 %6983  ;;  %10498 = vmatprep.subr.mxu0 %v7276_v39  ;;  %v6992_v9 = vsel %vm283_vm7, %v6593_v58, %v6962_v14 }
0x2a6d   :  { %v6997_v22 = vsel %vm1117_vm11, %v6994_v41, %v6984_v42  ;;  %10499 = vmatpush3.msra.mxu0 %v7276_v39 }
0x2a6e   :  { %10474 = vmatmul.mubr.msk.f32.gmra.mxu0 %vm131_vm2, %v6997_v22  ;;  %10500 = vmatprep.subr.mxu0 %v7275_v4 }
0x2a6f   :  { %10476 = vmatprep.mubr.msk.f32.mxu0 %vm11058_vm4, %v11057_v2  ;;  %10501 = vmatpush3.msra.mxu0 %v7275_v4  ;;  %v6986_v44 = vpop.permute.xlu0 %6985 }
0x2a70   :  { %v6974_v15 = vpop.permute.xlu1 %6973  ;;  %10502 = vmatprep.subr.mxu0 %v7274_v43 }
0x2a71   :  { %v6995_v29 = vsel %vm664_vm8, %v6992_v9, %v6974_v15  ;;  %10503 = vmatpush3.msra.mxu0 %v7274_v43 }
0x2a72   :  { %v6998_v21 = vsel %vm1117_vm11, %v6995_v29, %v6986_v44  ;;  %10520 = vmatprep.subr.mxu0 %v11057_v2 }
0x2a73   :  { %10477 = vmatmul.mubr.msk.f32.gmra.mxu0 %vm131_vm2, %v6998_v21 }
0x2a74   :  { %10504 = vmatprep.mubr.msk.f32.mxu0 %vm131_vm2, %v11832_v55 }
0x2a77   :  { %10505 = vmatmul.mubr.msk.f32.vlgmr.msra.gmra.mxu0 %vm131_vm2, %v11837_v3 }
0x2a78   :  { %10524 = vmatprep.mubr.msk.f32.mxu0 %vm11058_vm4, %v11057_v2 }
0x2b2a   :  { %v7083_v30 = vpop.f32.mrf.mxu0 }
0x2b2b   :  { %v7084_v7 = vadd.f32 %v9257_v46, %v7083_v30 }
0x2b2c   :  { %v10472_v48 = vpop.f32.mrf.mxu0 }
0x2b2d   :  { %v12511_v35 = vadd.f32 %v7084_v7, %v12168_v1  ;;  %v9261_v48 = vld [vmem:[#allocation2 + $0x3b8] ss:$0 sm:$0xff] }
0x2b2e   :  { %v7088_v49 = vpop.f32.mrf.mxu0 }
0x2b2f   :  { %v7089_v13 = vadd.f32 %v9257_v46, %v7088_v49  ;;  %v7100_v50 = vsel %vm131_vm2, %v12511_v35, 0.0 }
0x2b30   :  { %7101 = vadd.xlane.f32.xlu1 %v7100_v50  ;;  %v10475_v55 = vpop.f32.mrf.mxu0  ;;  %v9262_v50 = vld [vmem:[#allocation2 + $0x3c0] ss:$0 sm:$0xff] }
0x2b31   :  { %v12516_v52 = vadd.f32 %v7089_v13, %v12173_v11 }
0x2b33   :  { %v7093_v3 = vpop.f32.mrf.mxu0  ;;  %v7103_v63 = vsel %vm131_vm2, %v12516_v52, 0.0 }
0x2b34   :  { %v7094_v24 = vadd.f32 %v9257_v46, %v7093_v3  ;;  %7104 = vadd.xlane.f32.xlu0 %v7103_v63 }
0x2b35   :  { %v10478_v56 = vpop.f32.mrf.mxu0 }
0x2b36   :  { %v12521_v1 = vadd.f32 %v7094_v24, %v12178_v25 }
0x2b37   :  { %v10506_v17 = vpop.f32.mrf.mxu0 }
0x2b38   :  { %v7106_v60 = vsel %vm2934_vm6, %v12521_v1, 0.0  ;;  %v12543_v19 = vadd.f32 %v10506_v17, %v9267_v18 }
0x2b39   :  { %7107 = vadd.xlane.f32.xlu0 %v7106_v60  ;;  %v7349_v10 = vpop.f32.mrf.mxu0 }
0x2b3a   :  { %v12549_v20 = vadd.f32 %v9267_v18, %v7349_v10 }
0x2bb9   :  { %v7102_v0 = vpop.xlane.xlu1 %7101 }
0x2bba   :  { %v7109_v62 = vmul.f32 0.03125, %v7102_v0 }
0x2bbc   :  { %v12526_v5 = vsub.f32 %v12511_v35, %v7109_v62 }
0x2bbd   :  { %v7105_v11 = vpop.xlane.xlu0 %7104 }
0x2bbe   :  { %v7110_v59 = vmul.f32 0.03125, %v7105_v11  ;;  %v7115_v61 = vmul.f32 %v12526_v5, %v12526_v5  ;;  %v7162_v49 = vmul.f32 %v9261_v48, %v12526_v5 }
0x2bc0   :  { %v12531_v53 = vsub.f32 %v12516_v52, %v7110_v59  ;;  %v7118_v25 = vsel %vm131_vm2, %v7115_v61, 0.0  ;;  %v9263_v59 = vld [vmem:[#allocation2 + $0x3e8] ss:$0 sm:$0xff] }
0x2bc1   :  { %7119 = vadd.xlane.f32.xlu0 %v7118_v25 }
0x2bc2   :  { %v7108_v8 = vpop.xlane.xlu0 %7107  ;;  %v7116_v12 = vmul.f32 %v12531_v53, %v12531_v53  ;;  %v7163_v3 = vmul.f32 %v9261_v48, %v12531_v53 }
0x2bc3   :  { %v7111_v51 = vmul.f32 0.03125, %v7108_v8 }
0x2bc4   :  { %v7121_v31 = vsel %vm131_vm2, %v7116_v12, 0.0 }
0x2bc5   :  { %v12538_v54 = vsub.f32 %v12521_v1, %v7111_v51  ;;  %7122 = vadd.xlane.f32.xlu1 %v7121_v31 }
0x2bc7   :  { %v7117_v57 = vmul.f32 %v12538_v54, %v12538_v54  ;;  %v7164_v0 = vmul.f32 %v9261_v48, %v12538_v54 }
0x2bc9   :  { %v7124_v16 = vsel %vm2934_vm6, %v7117_v57, 0.0 }
0x2bca   :  { %7125 = vadd.xlane.f32.xlu0 %v7124_v16 }
0x2bd6   :  { %7461 = vrot.lane.b32.xlu1 %v12543_v19, %s11045_s21 }
0x2bda   :  { %7561 = vrot.lane.b32.xlu1 %v12543_v19, %s11047_s23 }
0x2bde   :  { %7659 = vrot.lane.b32.xlu1 %v12549_v20, %s11049_s25 }
0x2be0   :  { %7459 = vrot.lane.b32.xlu0 %v12549_v20, %s11045_s21 }
0x2be4   :  { %7661 = vrot.lane.b32.xlu0 %v12543_v19, %s11049_s25 }
0x2be8   :  { %7559 = vrot.lane.b32.xlu0 %v12549_v20, %s11047_s23 }
0x2c4a   :  { %v7120_v33 = vpop.xlane.xlu0 %7119 }
0x2c4b   :  { %v7127_v23 = vmul.f32 0.032258064, %v7120_v33 }
0x2c4d   :  { %10946 = vrsqrt.f32 %v7127_v23  ;;  %vm7132_vm14 = vcmp.eq.f32.partialorder %v7127_v23, inf  ;;  %v7135_v40 = vand.u32 2147483648, %v7127_v23  ;;  %vm7134_vm15 = vcmp.eq.f32.partialorder %v7127_v23, 0.0 }
0x2c4e   :  { %v7123_v34 = vpop.xlane.xlu1 %7122 }
0x2c4f   :  { %v7128_v36 = vmul.f32 0.032258064, %v7123_v34 }
0x2c51   :  { %10948 = vrsqrt.f32 %v7128_v36  ;;  %vm7139_vm0 = vcmp.eq.f32.partialorder %v7128_v36, inf  ;;  %v7142_v43 = vand.u32 2147483648, %v7128_v36  ;;  %vm7141_vm1 = vcmp.eq.f32.partialorder %v7128_v36, 0.0 }
0x2c52   :  { %v7462_v45 = vpop.permute.xlu1 %7461 }
0x2c53   :  { %v7126_v37 = vpop.xlane.xlu0 %7125  ;;  %10521 = vmatpush3.xpose.msk.msra.mxu0 %vm283_vm7, %v7462_v45 }
0x2c54   :  { %v7129_v38 = vmul.f32 0.032258064, %v7126_v37  ;;  %10522 = vmatprep.subr.mxu0 %v11057_v2 }
0x2c56   :  { %10950 = vrsqrt.f32 %v7129_v38  ;;  %vm7146_vm3 = vcmp.eq.f32.partialorder %v7129_v38, inf  ;;  %v7149_v21 = vand.u32 2147483648, %v7129_v38  ;;  %vm7148_vm5 = vcmp.eq.f32.partialorder %v7129_v38, 0.0  ;;  %v7562_v12 = vpop.permute.xlu1 %7561 }
0x2c57   :  { %v7460_v6 = vpop.permute.xlu0 %7459 }
0x2c58   :  { %10523 = vmatpush3.xpose.msk.msra.mxu0 %vm283_vm7, %v7460_v6 }
0x2c59   :  { %10546 = vmatprep.subr.mxu0 %v11057_v2 }
0x2c5a   :  { %v10947_v39 = vpop.eup %10946  ;;  %v7660_v10 = vpop.permute.xlu1 %7659 }
0x2c5b   :  { %v7131_v47 = vmul.f32 %v10947_v39, %v7127_v23  ;;  %v7662_v25 = vpop.permute.xlu0 %7661 }
0x2c5d   :  { %v7133_v14 = vsel %vm7132_vm14, %v7127_v23, %v7131_v47 }
0x2c5e   :  { %v10949_v4 = vpop.eup %10948  ;;  %v7136_v41 = vsel %vm7134_vm15, %v7135_v40, %v7133_v14 }
0x2c5f   :  { %v7151_v42 = vadd.f32 1e-06, %v7136_v41  ;;  %v7138_v22 = vmul.f32 %v10949_v4, %v7128_v36  ;;  %v7560_v57 = vpop.permute.xlu0 %7559 }
0x2c61   :  { %10952 = vrcp.f32 %v7151_v42  ;;  %v7140_v58 = vsel %vm7139_vm0, %v7128_v36, %v7138_v22 }
0x2c62   :  { %v7143_v9 = vsel %vm7141_vm1, %v7142_v43, %v7140_v58 }
0x2c63   :  { %v10951_v15 = vpop.eup %10950  ;;  %v7152_v44 = vadd.f32 1e-06, %v7143_v9 }
0x2c64   :  { %v7145_v29 = vmul.f32 %v10951_v15, %v7129_v38 }
0x2c65   :  { %10954 = vrcp.f32 %v7152_v44 }
0x2c66   :  { %v7147_v46 = vsel %vm7146_vm3, %v7129_v38, %v7145_v29 }
0x2c67   :  { %v7150_v30 = vsel %vm7148_vm5, %v7149_v21, %v7147_v46 }
0x2c68   :  { %v7153_v7 = vadd.f32 1e-06, %v7150_v30 }
0x2c6a   :  { %10956 = vrcp.f32 %v7153_v7 }
0x2c6e   :  { %v10953_v13 = vpop.eup %10952 }
0x2c6f   :  { %v7165_v55 = vmul.f32 %v10953_v13, %v7162_v49 }
0x2c71   :  { %v7173_v63 = vadd.f32 %v9262_v50, %v7165_v55 }
0x2c72   :  { %v10955_v24 = vpop.eup %10954 }
0x2c73   :  { %10488 = vmatmul.mubr.msk.f32.vlgmr.msra.gmra.mxu1 %vm131_vm2, %v7173_v63  ;;  %v7166_v56 = vmul.f32 %v10955_v24, %v7163_v3 }
0x2c74   :  { %10508 = vmatpush3.xpose.msk.msra.mxu1 %vm283_vm7, %v12543_v19  ;;  %10490 = vmatprep.mubr.msk.f32.mxu1 %vm11058_vm4, %v11057_v2 }
0x2c75   :  { %10509 = vmatprep.subr.mxu1 %v11057_v2  ;;  %v7174_v60 = vadd.f32 %v9262_v50, %v7166_v56 }
0x2c77   :  { %v10957_v62 = vpop.eup %10956  ;;  %10491 = vmatmul.mubr.msk.f32.gmra.mxu1 %vm131_vm2, %v7174_v60 }
0x2c78   :  { %10510 = vmatpush3.xpose.msk.msra.mxu1 %vm283_vm7, %v12549_v20  ;;  %10493 = vmatprep.mubr.msk.f32.mxu1 %vm11058_vm4, %v11057_v2  ;;  %v7167_v5 = vmul.f32 %v10957_v62, %v7164_v0 }
0x2c79   :  { %10533 = vmatprep.subr.mxu1 %v11057_v2 }
0x2c7a   :  { %v7175_v11 = vadd.f32 %v9262_v50, %v7167_v5  ;;  %v11015_v5 = vld [vmem:[#allocation2 + $0x548] sm:$0xff] }
0x2c7c   :  { %10494 = vmatmul.mubr.msk.f32.gmra.mxu1 %vm131_vm2, %v7175_v11 }
0x2c7d   :  { %10511 = vmatprep.mubr.msk.f32.mxu1 %vm11058_vm4, %v11057_v2 }
0x2d33   :  { %v7260_v61 = vpop.f32.mrf.mxu1 }
0x2d34   :  { %v7261_v53 = vadd.f32 %v9263_v59, %v7260_v61 }
0x2d35   :  { %v10489_v8 = vpop.f32.mrf.mxu1 }
0x2d36   :  { %7553 = vrot.lane.b32.xlu0 %v7261_v53, %s11047_s23  ;;  %7453 = vrot.lane.b32.xlu1 %v7261_v53, %s11045_s21 }
0x2d37   :  { %10512 = vmatmul.mubr.msk.f32.vlgmr.msra.gmra.mxu1 %vm283_vm7, %v7261_v53  ;;  %v7265_v51 = vpop.f32.mrf.mxu1 }
0x2d38   :  { %10534 = vmatpush3.xpose.msk.msra.mxu1 %vm283_vm7, %v7562_v12  ;;  %v7266_v31 = vadd.f32 %v9263_v59, %v7265_v51  ;;  %10514 = vmatprep.mubr.msk.f32.mxu1 %vm11058_vm4, %v11057_v2  ;;  %v11016_v12 = vld [vmem:[#allocation2 + $0x550] sm:$0xff] }
0x2d39   :  { %v10492_v54 = vpop.f32.mrf.mxu1  ;;  %10535 = vmatprep.subr.mxu1 %v11057_v2 }
0x2d3a   :  { %7555 = vrot.lane.b32.xlu0 %v7266_v31, %s11047_s23  ;;  %7455 = vrot.lane.b32.xlu1 %v7266_v31, %s11045_s21 }
0x2d3b   :  { %10515 = vmatmul.mubr.msk.f32.gmra.mxu1 %vm283_vm7, %v7266_v31 }
0x2d3c   :  { %10536 = vmatpush3.xpose.msk.msra.mxu1 %vm283_vm7, %v7560_v57  ;;  %v7270_v16 = vpop.f32.mrf.mxu1  ;;  %10517 = vmatprep.mubr.msk.f32.mxu1 %vm11058_vm4, %v11057_v2 }
0x2d3d   :  { %v7271_v17 = vadd.f32 %v9263_v59, %v7270_v16  ;;  %10559 = vmatprep.subr.mxu1 %v11057_v2 }
0x2d3e   :  { %v10495_v18 = vpop.f32.mrf.mxu1 }
0x2d3f   :  { %7557 = vrot.lane.b32.xlu0 %v7271_v17, %s11047_s23  ;;  %7457 = vrot.lane.b32.xlu1 %v7271_v17, %s11045_s21 }
0x2d40   :  { %10518 = vmatmul.mubr.msk.f32.gmra.mxu1 %vm283_vm7, %v7271_v17 }
0x2d41   :  { %10537 = vmatprep.mubr.msk.f32.mxu1 %vm11058_vm4, %v11057_v2 }
0x2d43   :  { %7653 = vrot.lane.b32.xlu1 %v7261_v53, %s11049_s25 }
0x2d47   :  { %7655 = vrot.lane.b32.xlu1 %v7266_v31, %s11049_s25 }
0x2d4b   :  { %7657 = vrot.lane.b32.xlu1 %v7271_v17, %s11049_s25 }
0x2da8   :  { %v7554_v26 = vpop.permute.xlu0 %7553  ;;  %v7454_v27 = vpop.permute.xlu1 %7453 }
0x2da9   :  { %10525 = vmatmul.mubr.msk.f32.vlgmr.msra.gmra.mxu0 %vm283_vm7, %v7454_v27  ;;  %10538 = vmatmul.mubr.msk.f32.vlgmr.msra.gmra.mxu1 %vm283_vm7, %v7554_v26 }
0x2daa   :  { %10547 = vmatpush3.xpose.msk.msra.mxu0 %vm283_vm7, %v7662_v25  ;;  %10527 = vmatprep.mubr.msk.f32.mxu0 %vm11058_vm4, %v11057_v2 }
0x2dab   :  { %10540 = vmatprep.mubr.msk.f32.mxu1 %vm11058_vm4, %v11057_v2  ;;  %10548 = vmatprep.subr.mxu0 %v11057_v2 }
0x2dac   :  { %v7556_v28 = vpop.permute.xlu0 %7555  ;;  %v7456_v32 = vpop.permute.xlu1 %7455 }
0x2dad   :  { %10528 = vmatmul.mubr.msk.f32.gmra.mxu0 %vm283_vm7, %v7456_v32  ;;  %10541 = vmatmul.mubr.msk.f32.gmra.mxu1 %vm283_vm7, %v7556_v28 }
0x2dae   :  { %10549 = vmatpush3.xpose.msk.msra.mxu0 %vm283_vm7, %v7660_v10  ;;  %10530 = vmatprep.mubr.msk.f32.mxu0 %vm11058_vm4, %v11057_v2  ;;  %v11017_v10 = vld [vmem:[#allocation2 + $0x558] sm:$0x3] }
0x2daf   :  { %10543 = vmatprep.mubr.msk.f32.mxu1 %vm11058_vm4, %v11057_v2  ;;  %10572 = vmatprep.subr.mxu0 %v11057_v2 }
0x2db1   :  { %v7558_v33 = vpop.permute.xlu0 %7557  ;;  %v7458_v23 = vpop.permute.xlu1 %7457 }
0x2db2   :  { %10531 = vmatmul.mubr.msk.f32.gmra.mxu0 %vm283_vm7, %v7458_v23  ;;  %10544 = vmatmul.mubr.msk.f32.gmra.mxu1 %vm283_vm7, %v7558_v33 }
0x2db3   :  { %10550 = vmatprep.mubr.msk.f32.mxu0 %vm11058_vm4, %v11057_v2  ;;  %10563 = vmatprep.mubr.msk.f32.mxu1 %vm11058_vm4, %v11057_v2 }
0x2db5   :  { %v7654_v34 = vpop.permute.xlu1 %7653 }
0x2db6   :  { %10551 = vmatmul.mubr.msk.f32.vlgmr.msra.gmra.mxu0 %vm283_vm7, %v7654_v34 }
0x2db7   :  { %10553 = vmatprep.mubr.msk.f32.mxu0 %vm11058_vm4, %v11057_v2 }
0x2db9   :  { %v7656_v36 = vpop.permute.xlu1 %7655 }
0x2dba   :  { %10554 = vmatmul.mubr.msk.f32.gmra.mxu0 %vm283_vm7, %v7656_v36 }
0x2dbb   :  { %10556 = vmatprep.mubr.msk.f32.mxu0 %vm11058_vm4, %v11057_v2 }
0x2dbd   :  { %v7658_v45 = vpop.permute.xlu1 %7657 }
0x2dbe   :  { %10557 = vmatmul.mubr.msk.f32.gmra.mxu0 %vm283_vm7, %v7658_v45 }
0x2dbf   :  { %10576 = vmatprep.mubr.msk.f32.mxu0 %vm11058_vm4, %v11057_v2 }
0x2df7   :  { %v7439_v37 = vpop.f32.mrf.mxu1 }
0x2df9   :  { %v10513_v38 = vpop.f32.mrf.mxu1 }
0x2dfb   :  { %v7444_v6 = vpop.f32.mrf.mxu1 }
0x2dfd   :  { %v10516_v39 = vpop.f32.mrf.mxu1 }
0x2e00   :  { %v7449_v47 = vpop.f32.mrf.mxu1 }
0x2e02   :  { %v10519_v40 = vpop.f32.mrf.mxu1 }
0x2e69   :  { %v7539_v14 = vpop.f32.mrf.mxu0  ;;  %v7639_v4 = vpop.f32.mrf.mxu1 }
0x2e6a   :  { %7768 = vrot.lane.b32.xlu1 %v7639_v4, %s11051_s27  ;;  %7756 = vrot.lane.b32.xlu0 %v7539_v14, %s11050_s26 }
0x2e6b   :  { %v10526_v41 = vpop.f32.mrf.mxu0  ;;  %v10539_v42 = vpop.f32.mrf.mxu1 }
0x2e6d   :  { %v7544_v22 = vpop.f32.mrf.mxu0  ;;  %v7644_v43 = vpop.f32.mrf.mxu1 }
0x2e6e   :  { %7770 = vrot.lane.b32.xlu0 %v7644_v43, %s11051_s27  ;;  %7758 = vrot.lane.b32.xlu1 %v7544_v22, %s11050_s26 }
0x2e6f   :  { %v10529_v58 = vpop.f32.mrf.mxu0  ;;  %v10542_v9 = vpop.f32.mrf.mxu1 }
0x2e72   :  { %v7549_v15 = vpop.f32.mrf.mxu0  ;;  %v7649_v44 = vpop.f32.mrf.mxu1 }
0x2e74   :  { %v10532_v29 = vpop.f32.mrf.mxu0  ;;  %v10545_v21 = vpop.f32.mrf.mxu1 }
0x2e76   :  { %v7739_v46 = vpop.f32.mrf.mxu0 }
0x2e77   :  { %7780 = vrot.lane.b32.xlu0 %v7739_v46, %s11052_s28 }
0x2e78   :  { %v10552_v30 = vpop.f32.mrf.mxu0 }
0x2e7a   :  { %v7744_v7 = vpop.f32.mrf.mxu0 }
0x2e7b   :  { %7760 = vrot.lane.b32.xlu0 %v7549_v15, %s11050_s26  ;;  %7782 = vrot.lane.b32.xlu1 %v7744_v7, %s11052_s28 }
0x2e7c   :  { %v10555_v48 = vpop.f32.mrf.mxu0 }
0x2e7e   :  { %v7749_v49 = vpop.f32.mrf.mxu0 }
0x2e7f   :  { %7772 = vrot.lane.b32.xlu1 %v7649_v44, %s11051_s27  ;;  %7784 = vrot.lane.b32.xlu0 %v7749_v49, %s11052_s28 }
0x2e80   :  { %v10558_v13 = vpop.f32.mrf.mxu0 }
0x2edc   :  { %v7757_v50 = vpop.permute.xlu0 %7756  ;;  %v7769_v55 = vpop.permute.xlu1 %7768 }
0x2edd   :  { %v7789_v63 = vsel %vm664_vm8, %v7439_v37, %v7757_v50 }
0x2ede   :  { %v7792_v56 = vsel %vm131_vm2, %v7789_v63, %v7769_v55 }
0x2ee0   :  { %v7771_v3 = vpop.permute.xlu0 %7770  ;;  %v7759_v24 = vpop.permute.xlu1 %7758 }
0x2ee1   :  { %v7790_v0 = vsel %vm664_vm8, %v7444_v6, %v7759_v24 }
0x2ee2   :  { %v7793_v61 = vsel %vm131_vm2, %v7790_v0, %v7771_v3 }
0x2ee9   :  { %v7781_v60 = vpop.permute.xlu0 %7780 }
0x2eea   :  { %v7795_v62 = vsel %vm669_vm9, %v7792_v56, %v7781_v60 }
0x2eeb   :  { %v7798_v11 = vadd.f32 %v11015_v5, %v7795_v62 }
0x2eed   :  { %v7761_v59 = vpop.permute.xlu0 %7760  ;;  %v7783_v53 = vpop.permute.xlu1 %7782  ;;  %v7801_v25 = vsel %vm676_vm10, %v7798_v11, -inf }
0x2eee   :  { %v7796_v8 = vsel %vm669_vm9, %v7793_v61, %v7783_v53  ;;  %7802 = vmax.xlane.f32.xlu1 %v7801_v25  ;;  %v7791_v31 = vsel %vm664_vm8, %v7449_v47, %v7761_v59 }
0x2eef   :  { %v7799_v51 = vadd.f32 %v11016_v12, %v7796_v8 }
0x2ef1   :  { %v7785_v54 = vpop.permute.xlu0 %7784  ;;  %v7773_v57 = vpop.permute.xlu1 %7772  ;;  %v7804_v16 = vsel %vm676_vm10, %v7799_v51, -inf }
0x2ef2   :  { %v7794_v17 = vsel %vm131_vm2, %v7791_v31, %v7773_v57  ;;  %7805 = vmax.xlane.f32.xlu0 %v7804_v16 }
0x2ef3   :  { %v7797_v18 = vsel %vm669_vm9, %v7794_v17, %v7785_v54  ;;  %vm12967_vm9 = vcmask 123904   ;;  %v8325_v54 = vld [vmem:[#allocation2 + $0x430] sm:$0xff] }
0x2ef4   :  { %v7800_v26 = vadd.f32 %v11017_v10, %v7797_v18  ;;  %vm12968_vm14 = vmmov %vm12967_vm9 }
0x2ef5   :  { %vm12969_vm15 = vmmov %vm12967_vm9 }
0x2ef6   :  { %v7807_v27 = vsel %vm12966_vm13, %v7800_v26, -inf  ;;  %vm12970_vm0 = vmmov %vm12967_vm9 }
0x2ef7   :  { %7808 = vmax.xlane.f32.xlu0 %v7807_v27 }
0x2eff   :  { %7952 = vrot.lane.b32.xlu1 %v12543_v19, %s11043_s1 }
0x2f03   :  { %7831 = vrot.lane.b32.xlu1 %v12549_v20, %s11044_s20 }
0x2f07   :  { %7950 = vrot.lane.b32.xlu1 %v12549_v20, %s11043_s1 }
0x2f0b   :  { %8068 = vrot.lane.b32.xlu1 %v12543_v19, %s11046_s22 }
0x2f0d   :  { %7833 = vrot.lane.b32.xlu0 %v12543_v19, %s11044_s20 }
0x2f11   :  { %8184 = vrot.lane.b32.xlu0 %v12543_v19, %s11048_s24 }
0x2f77   :  { %v7803_v28 = vpop.xlane.xlu1 %7802 }
0x2f78   :  { %v7810_v32 = vsub.f32 %v7798_v11, %v7803_v28 }
0x2f7a   :  { %v7813_v33 = vmul.f32 1.442695, %v7810_v32 }
0x2f7b   :  { %v7806_v23 = vpop.xlane.xlu0 %7805  ;;  %v7953_v34 = vpop.permute.xlu1 %7952 }
0x2f7c   :  { %10958 = vpow2.f32 %v7813_v33  ;;  %v7811_v36 = vsub.f32 %v7799_v51, %v7806_v23  ;;  %10573 = vmatpush3.msra.mxu0 %v7953_v34  ;;  %v8324_v34 = vld [vmem:[#allocation2 + $0x428] sm:$0xff] }
0x2f7d   :  { %10574 = vmatprep.subr.mxu0 %v11057_v2 }
0x2f7e   :  { %v7815_v45 = vmul.f32 1.442695, %v7811_v36  ;;  %v8323_v36 = vld [vmem:[#allocation2 + $0x420] sm:$0xff] }
0x2f7f   :  { %v7832_v37 = vpop.permute.xlu1 %7831 }
0x2f80   :  { %10960 = vpow2.f32 %v7815_v45  ;;  %v7809_v38 = vpop.xlane.xlu0 %7808 }
0x2f81   :  { %v7812_v6 = vsub.f32 %v7800_v26, %v7809_v38 }
0x2f83   :  { %v7817_v39 = vmul.f32 1.442695, %v7812_v6  ;;  %v7951_v47 = vpop.permute.xlu1 %7950 }
0x2f84   :  { %v7834_v40 = vpop.permute.xlu0 %7833  ;;  %10575 = vmatpush3.msra.mxu0 %v7951_v47 }
0x2f85   :  { %10962 = vpow2.f32 %v7817_v39  ;;  %10560 = vmatpush3.msra.mxu1 %v7834_v40  ;;  %10598 = vmatprep.subr.mxu0 %v11057_v2  ;;  %v8322_v39 = vld [vmem:[#allocation2 + $0x418] sm:$0xff] }
0x2f86   :  { %10561 = vmatprep.subr.mxu1 %v11057_v2 }
0x2f87   :  { %10562 = vmatpush3.msra.mxu1 %v7832_v37  ;;  %v8069_v14 = vpop.permute.xlu1 %8068 }
0x2f88   :  { %10585 = vmatprep.subr.mxu1 %v11057_v2  ;;  %v8185_v42 = vpop.permute.xlu0 %8184 }
0x2f89   :  { %v12675_v19 = vpop.eup %10958 }
0x2f8a   :  { %7929 = vrot.lane.b32.xlu0 %v12675_v19, %s11047_s23  ;;  %10564 = vmatmul.mubr.msk.f32.vlgmr.msra.gmra.mxu1 %vm664_vm8, %v12675_v19  ;;  %v7819_v60 = vsel %vm664_vm8, %v12675_v19, 0.0 }
0x2f8b   :  { %10586 = vmatpush3.msra.mxu1 %v8069_v14  ;;  %10566 = vmatprep.mubr.msk.f32.mxu1 %vm11058_vm4, %v11057_v2 }
0x2f8c   :  { %10587 = vmatprep.subr.mxu1 %v11057_v2 }
0x2f8d   :  { %v12684_v4 = vpop.eup %10960 }
0x2f8e   :  { %7931 = vrot.lane.b32.xlu1 %v12684_v4, %s11047_s23  ;;  %8045 = vrot.lane.b32.xlu0 %v12675_v19, %s11044_s20  ;;  %v7822_v56 = vsel %vm664_vm8, %v12684_v4, 0.0 }
0x2f8f   :  { %10567 = vmatmul.mubr.msk.f32.gmra.mxu1 %vm664_vm8, %v12684_v4 }
0x2f90   :  { %10569 = vmatprep.mubr.msk.f32.mxu1 %vm11058_vm4, %v11057_v2 }
0x2f92   :  { %v12694_v41 = vpop.eup %10962  ;;  %8066 = vrot.lane.b32.xlu1 %v12549_v20, %s11046_s22 }
0x2f93   :  { %7933 = vrot.lane.b32.xlu0 %v12694_v41, %s11047_s23  ;;  %10570 = vmatmul.mubr.msk.f32.gmra.mxu1 %vm664_vm8, %v12694_v41  ;;  %v7825_v0 = vsel %vm12970_vm0, %v12694_v41, 0.0  ;;  %vm9003_vm0 = vcmask 39936  }
0x2f94   :  { %10589 = vmatprep.mubr.msk.f32.mxu1 %vm11058_vm4, %v11057_v2 }
0x2f96   :  { %8182 = vrot.lane.b32.xlu1 %v12549_v20, %s11048_s24 }
0x2f97   :  { %8161 = vrot.lane.b32.xlu0 %v12675_v19, %s11046_s22 }
0x2f9a   :  { %8047 = vrot.lane.b32.xlu1 %v12684_v4, %s11044_s20 }
0x2f9b   :  { %8163 = vrot.lane.b32.xlu0 %v12684_v4, %s11046_s22 }
0x2f9e   :  { %8049 = vrot.lane.b32.xlu1 %v12694_v41, %s11044_s20 }
0x2f9f   :  { %8165 = vrot.lane.b32.xlu0 %v12694_v41, %s11046_s22 }
0x2ffc   :  { %v7930_v22 = vpop.permute.xlu0 %7929 }
0x2ffd   :  { %10577 = vmatmul.mubr.msk.f32.vlgmr.msra.gmra.mxu0 %vm664_vm8, %v7930_v22  ;;  %v7938_v20 = vsel %vm664_vm8, %v7930_v22, 0.0 }
0x2ffe   :  { %10599 = vmatpush3.msra.mxu0 %v8185_v42  ;;  %7939 = vadd.xlane.f32.xlu1 %v7938_v20 }
0x2fff   :  { %10579 = vmatprep.mubr.msk.f32.mxu0 %vm11058_vm4, %v11057_v2  ;;  %10600 = vmatprep.subr.mxu0 %v11057_v2 }
0x3000   :  { %v8046_v43 = vpop.permute.xlu0 %8045  ;;  %v7932_v58 = vpop.permute.xlu1 %7931 }
0x3001   :  { %10580 = vmatmul.mubr.msk.f32.gmra.mxu0 %vm664_vm8, %v7932_v58  ;;  %v8054_v9 = vsel %vm664_vm8, %v8046_v43, 0.0  ;;  %v7941_v49 = vsel %vm664_vm8, %v7932_v58, 0.0 }
0x3002   :  { %8055 = vadd.xlane.f32.xlu0 %v8054_v9  ;;  %10582 = vmatprep.mubr.msk.f32.mxu0 %vm11058_vm4, %v11057_v2 }
0x3004   :  { %v8067_v15 = vpop.permute.xlu1 %8066 }
0x3005   :  { %v7934_v44 = vpop.permute.xlu0 %7933  ;;  %10588 = vmatpush3.msra.mxu1 %v8067_v15 }
0x3006   :  { %10583 = vmatmul.mubr.msk.f32.gmra.mxu0 %vm664_vm8, %v7934_v44  ;;  %10590 = vmatmul.mubr.msk.f32.vlgmr.msra.gmra.mxu1 %vm664_vm8, %v8046_v43  ;;  %v7944_v55 = vsel %vm12967_vm9, %v7934_v44, 0.0 }
0x3007   :  { %10602 = vmatprep.mubr.msk.f32.mxu0 %vm11058_vm4, %v11057_v2  ;;  %10592 = vmatprep.mubr.msk.f32.mxu1 %vm11058_vm4, %v11057_v2 }
0x3008   :  { %v8183_v29 = vpop.permute.xlu1 %8182  ;;  %10611 = vmatprep.subr.mxu1 %v11057_v2 }
0x3009   :  { %v8162_v21 = vpop.permute.xlu0 %8161  ;;  %10601 = vmatpush3.msra.mxu0 %v8183_v29  ;;  %10612 = vmatpush3.msra.mxu1 %v8325_v54 }
0x300a   :  { %10603 = vmatmul.mubr.msk.f32.vlgmr.msra.gmra.mxu0 %vm664_vm8, %v8162_v21  ;;  %v8170_v46 = vsel %vm664_vm8, %v8162_v21, 0.0  ;;  %10628 = vmatprep.subr.mxu0 %v11057_v2 }
0x300b   :  { %8171 = vadd.xlane.f32.xlu0 %v8170_v46  ;;  %10605 = vmatprep.mubr.msk.f32.mxu0 %vm11058_vm4, %v11057_v2 }
0x300c   :  { %v8048_v30 = vpop.permute.xlu1 %8047  ;;  %10613 = vmatprep.subr.mxu1 %v11057_v2 }
0x300d   :  { %v8164_v7 = vpop.permute.xlu0 %8163  ;;  %10593 = vmatmul.mubr.msk.f32.gmra.mxu1 %vm664_vm8, %v8048_v30  ;;  %v8057_v48 = vsel %vm664_vm8, %v8048_v30, 0.0 }
0x300e   :  { %10606 = vmatmul.mubr.msk.f32.gmra.mxu0 %vm664_vm8, %v8164_v7  ;;  %8058 = vadd.xlane.f32.xlu1 %v8057_v48  ;;  %v8173_v3 = vsel %vm664_vm8, %v8164_v7, 0.0 }
0x300f   :  { %7942 = vadd.xlane.f32.xlu0 %v7941_v49  ;;  %10595 = vmatprep.mubr.msk.f32.mxu1 %vm11058_vm4, %v11057_v2 }
0x3010   :  { %v8050_v13 = vpop.permute.xlu1 %8049  ;;  %10608 = vmatprep.mubr.msk.f32.mxu0 %vm11058_vm4, %v11057_v2  ;;  %10614 = vmatpush3.msra.mxu1 %v8324_v34 }
0x3011   :  { %v8166_v50 = vpop.permute.xlu0 %8165  ;;  %10596 = vmatmul.mubr.msk.f32.gmra.mxu1 %vm664_vm8, %v8050_v13  ;;  %v8060_v24 = vsel %vm12969_vm15, %v8050_v13, 0.0  ;;  %10615 = vmatprep.subr.mxu1 %v11057_v2 }
0x3012   :  { %10609 = vmatmul.mubr.msk.f32.gmra.mxu0 %vm664_vm8, %v8166_v50  ;;  %7945 = vadd.xlane.f32.xlu1 %v7944_v55  ;;  %v8176_v63 = vsel %vm12968_vm14, %v8166_v50, 0.0 }
0x3013   :  { %8174 = vadd.xlane.f32.xlu0 %v8173_v3  ;;  %10619 = vmatprep.mubr.msk.f32.mxu1 %vm11058_vm4, %v11057_v2 }
0x3014   :  { %10636 = vmatprep.mubr.msk.f32.mxu0 %vm11058_vm4, %v11057_v2  ;;  %10616 = vmatpush3.msra.mxu1 %v8323_v36 }
0x3015   :  { %10617 = vmatprep.subr.mxu1 %v11057_v2 }
0x3016   :  { %8177 = vadd.xlane.f32.xlu1 %v8176_v63  ;;  %10618 = vmatpush3.msra.mxu1 %v8322_v39 }
0x3017   :  { %8061 = vadd.xlane.f32.xlu0 %v8060_v24  ;;  %10645 = vmatprep.subr.mxu1 %v11057_v2 }
0x301a   :  { %7823 = vadd.xlane.f32.xlu1 %v7822_v56 }
0x301b   :  { %7820 = vadd.xlane.f32.xlu0 %v7819_v60 }
0x301f   :  { %7826 = vadd.xlane.f32.xlu0 %v7825_v0 }
0x304a   :  { %v12761_v62 = vpop.f32.mrf.mxu1 }
0x304c   :  { %v10565_v5 = vpop.f32.mrf.mxu1 }
0x304f   :  { %v12763_v11 = vpop.f32.mrf.mxu1 }
0x3051   :  { %v10568_v59 = vpop.f32.mrf.mxu1 }
0x3053   :  { %v12765_v61 = vpop.f32.mrf.mxu1 }
0x3055   :  { %v10571_v53 = vpop.f32.mrf.mxu1 }
0x3087   :  { %v7940_v12 = vpop.xlane.xlu1 %7939 }
0x3088   :  { %10964 = vrcp.f32 %v7940_v12 }
0x308b   :  { %v8056_v25 = vpop.xlane.xlu0 %8055 }
0x3094   :  { %v8172_v8 = vpop.xlane.xlu0 %8171 }
0x3095   :  { %v10965_v57 = vpop.eup %10964 }
0x3097   :  { %v8059_v16 = vpop.xlane.xlu1 %8058 }
0x3098   :  { %v7943_v51 = vpop.xlane.xlu0 %7942 }
0x3099   :  { %10966 = vrcp.f32 %v7943_v51 }
0x309a   :  { %10968 = vrcp.f32 %v8056_v25 }
0x309b   :  { %10970 = vrcp.f32 %v8059_v16  ;;  %v7946_v33 = vpop.xlane.xlu1 %7945 }
0x309c   :  { %v8175_v31 = vpop.xlane.xlu0 %8174 }
0x309d   :  { %10972 = vrcp.f32 %v8175_v31 }
0x309e   :  { %10974 = vrcp.f32 %v8172_v8 }
0x309f   :  { %v8178_v19 = vpop.xlane.xlu1 %8177 }
0x30a0   :  { %v8062_v27 = vpop.xlane.xlu0 %8061 }
0x30a1   :  { %10976 = vrcp.f32 %v8062_v27 }
0x30a2   :  { %10978 = vrcp.f32 %v7946_v33 }
0x30a3   :  { %10980 = vrcp.f32 %v8178_v19  ;;  %v7824_v24 = vpop.xlane.xlu1 %7823 }
0x30a4   :  { %v7821_v63 = vpop.xlane.xlu0 %7820 }
0x30a5   :  { %10982 = vrcp.f32 %v7821_v63  ;;  %v8606_v63 = vld [vmem:[#allocation2 + $0x4a8] sm:$0xff] }
0x30a6   :  { %v10967_v26 = vpop.eup %10966  ;;  %10984 = vrcp.f32 %v7824_v24  ;;  %v8605_v24 = vld [vmem:[#allocation2 + $0x4a0] sm:$0xff] }
0x30a7   :  { %v10969_v45 = vpop.eup %10968 }
0x30a8   :  { %v10971_v41 = vpop.eup %10970  ;;  %v7827_v56 = vpop.xlane.xlu0 %7826 }
0x30a9   :  { %10986 = vrcp.f32 %v7827_v56  ;;  %v8604_v56 = vld [vmem:[#allocation2 + $0x498] sm:$0xff] }
0x30aa   :  { %v10973_v22 = vpop.eup %10972 }
0x30ab   :  { %v10975_v15 = vpop.eup %10974 }
0x30ae   :  { %v10977_v29 = vpop.eup %10976 }
0x30af   :  { %v10979_v13 = vpop.eup %10978 }
0x30b0   :  { %v10981_v55 = vpop.eup %10980 }
0x30b2   :  { %v10983_v5 = vpop.eup %10982 }
0x30b3   :  { %v10985_v59 = vpop.eup %10984  ;;  %v7926_v25 = vmul.f32 %v10983_v5, %v12761_v62 }
0x30b4   :  { %v7927_v51 = vmul.f32 %v10985_v59, %v12763_v11 }
0x30b6   :  { %v10987_v31 = vpop.eup %10986 }
0x30b7   :  { %v7928_v62 = vmul.f32 %v10987_v31, %v12765_v61  ;;  %v9302_v61 = vld [vmem:[#allocation2 + $0x438] ss:$0 sm:$0xff] }
0x30bd   :  { %v8028_v17 = vpop.f32.mrf.mxu0 }
0x30be   :  { %v8042_v18 = vmul.f32 %v10965_v57, %v8028_v17 }
0x30bf   :  { %v10578_v10 = vpop.f32.mrf.mxu0 }
0x30c0   :  { %8280 = vrot.lane.b32.xlu1 %v8042_v18, %s11042_s13 }
0x30c1   :  { %v8033_v28 = vpop.f32.mrf.mxu0 }
0x30c2   :  { %v8043_v32 = vmul.f32 %v10967_v26, %v8033_v28 }
0x30c3   :  { %v10581_v23 = vpop.f32.mrf.mxu0 }
0x30c4   :  { %8282 = vrot.lane.b32.xlu1 %v8043_v32, %s11042_s13 }
0x30c6   :  { %v8038_v37 = vpop.f32.mrf.mxu0  ;;  %v8144_v38 = vpop.f32.mrf.mxu1 }
0x30c7   :  { %v8158_v6 = vmul.f32 %v10969_v45, %v8144_v38  ;;  %v8044_v50 = vmul.f32 %v10979_v13, %v8038_v37  ;;  %v8501_v13 = vld [vmem:[#allocation2 + $0x460] sm:$0xff] }
0x30c8   :  { %v10584_v47 = vpop.f32.mrf.mxu0  ;;  %v10591_v40 = vpop.f32.mrf.mxu1 }
0x30c9   :  { %8292 = vrot.lane.b32.xlu0 %v8158_v6, %s11050_s26 }
0x30ca   :  { %v8260_v14 = vpop.f32.mrf.mxu0 }
0x30cb   :  { %v8274_v46 = vmul.f32 %v10975_v15, %v8260_v14 }
0x30cc   :  { %v10604_v4 = vpop.f32.mrf.mxu0 }
0x30cd   :  { %v8149_v42 = vpop.f32.mrf.mxu1 }
0x30ce   :  { %v8159_v20 = vmul.f32 %v10971_v41, %v8149_v42  ;;  %v8265_v43 = vpop.f32.mrf.mxu0 }
0x30cf   :  { %v8275_v58 = vmul.f32 %v10973_v22, %v8265_v43  ;;  %v10594_v9 = vpop.f32.mrf.mxu1 }
0x30d0   :  { %v10607_v44 = vpop.f32.mrf.mxu0  ;;  %8294 = vrot.lane.b32.xlu1 %v8159_v20, %s11050_s26 }
0x30d1   :  { %v8154_v21 = vpop.f32.mrf.mxu1  ;;  %8306 = vrot.lane.b32.xlu0 %v8275_v58, %s11056_s4 }
0x30d2   :  { %v8160_v30 = vmul.f32 %v10977_v29, %v8154_v21  ;;  %v8270_v7 = vpop.f32.mrf.mxu0 }
0x30d3   :  { %v10597_v48 = vpop.f32.mrf.mxu1  ;;  %v8276_v3 = vmul.f32 %v10981_v55, %v8270_v7  ;;  %v8499_v55 = vld [vmem:[#allocation2 + $0x450] sm:$0xff] }
0x30d4   :  { %v10610_v49 = vpop.f32.mrf.mxu0  ;;  %8304 = vrot.lane.b32.xlu1 %v8274_v46, %s11056_s4 }
0x30d5   :  { %8296 = vrot.lane.b32.xlu0 %v8160_v30, %s11050_s26  ;;  %v8502_v49 = vld [vmem:[#allocation2 + $0x468] sm:$0xff] }
0x30d6   :  { %10629 = vmatpush3.msra.mxu0 %v8502_v49 }
0x30d7   :  { %10630 = vmatprep.subr.mxu0 %v11057_v2 }
0x30d8   :  { %8284 = vrot.lane.b32.xlu1 %v8044_v50, %s11042_s13  ;;  %v8500_v50 = vld [vmem:[#allocation2 + $0x458] sm:$0xff]  ;;  %10631 = vmatpush3.msra.mxu0 %v8501_v13  ;;  %s11065_s13 = smov 2  }
0x30d9   :  { %10632 = vmatprep.subr.mxu0 %v11057_v2 }
0x30da   :  { %10633 = vmatpush3.msra.mxu0 %v8500_v50 }
0x30db   :  { %10634 = vmatprep.subr.mxu0 %v11057_v2 }
0x30dc   :  { %8308 = vrot.lane.b32.xlu1 %v8276_v3, %s11056_s4  ;;  %10635 = vmatpush3.msra.mxu0 %v8499_v55  ;;  %v8607_v3 = vld [vmem:[#allocation2 + $0x4b0] sm:$0xff]  ;;  %v9312_v55 = vld [vmem:[#allocation2 + $0x4b8] ss:$0 sm:$0xff] }
0x30dd   :  { %10670 = vmatprep.subr.mxu0 %v11057_v2 }
0x3132   :  { %v8281_v60 = vpop.permute.xlu1 %8280 }
0x3133   :  { %v8313_v12 = vsel %vm283_vm7, %v7926_v25, %v8281_v60  ;;  %v8603_v60 = vld [vmem:[#allocation2 + $0x490] sm:$0xff] }
0x3136   :  { %v8283_v0 = vpop.permute.xlu1 %8282 }
0x3137   :  { %v8314_v16 = vsel %vm283_vm7, %v7927_v51, %v8283_v0 }
0x313b   :  { %v8293_v8 = vpop.permute.xlu0 %8292 }
0x313c   :  { %v8316_v54 = vsel %vm664_vm8, %v8313_v12, %v8293_v8 }
0x3142   :  { %v8295_v53 = vpop.permute.xlu1 %8294 }
0x3143   :  { %v8307_v17 = vpop.permute.xlu0 %8306  ;;  %v8317_v10 = vsel %vm664_vm8, %v8314_v16, %v8295_v53 }
0x3144   :  { %v8320_v11 = vsel %vm1117_vm11, %v8317_v10, %v8307_v17 }
0x3146   :  { %v8305_v57 = vpop.permute.xlu1 %8304 }
0x3147   :  { %v8319_v18 = vsel %vm1117_vm11, %v8316_v54, %v8305_v57  ;;  %v8297_v28 = vpop.permute.xlu0 %8296 }
0x3148   :  { %10620 = vmatmul.mubr.msk.f32.vlgmr.msra.gmra.mxu1 %vm131_vm2, %v8319_v18 }
0x3149   :  { %10622 = vmatprep.mubr.msk.f32.mxu1 %vm11058_vm4, %v11057_v2  ;;  %10646 = vmatpush3.msra.mxu1 %v8607_v3 }
0x314a   :  { %v8285_v26 = vpop.permute.xlu1 %8284  ;;  %10647 = vmatprep.subr.mxu1 %v11057_v2 }
0x314b   :  { %v8315_v27 = vsel %vm283_vm7, %v7928_v62, %v8285_v26  ;;  %10648 = vmatpush3.msra.mxu1 %v8606_v63 }
0x314c   :  { %10623 = vmatmul.mubr.msk.f32.gmra.mxu1 %vm131_vm2, %v8320_v11  ;;  %v8318_v32 = vsel %vm664_vm8, %v8315_v27, %v8297_v28  ;;  %10649 = vmatprep.subr.mxu1 %v11057_v2 }
0x314d   :  { %10625 = vmatprep.mubr.msk.f32.mxu1 %vm11058_vm4, %v11057_v2  ;;  %10650 = vmatpush3.msra.mxu1 %v8605_v24 }
0x314e   :  { %v8309_v33 = vpop.permute.xlu1 %8308  ;;  %10651 = vmatprep.subr.mxu1 %v11057_v2 }
0x314f   :  { %v8321_v23 = vsel %vm1117_vm11, %v8318_v32, %v8309_v33  ;;  %10652 = vmatpush3.msra.mxu1 %v8604_v56 }
0x3150   :  { %10626 = vmatmul.mubr.msk.f32.gmra.mxu1 %vm131_vm2, %v8321_v23  ;;  %10653 = vmatprep.subr.mxu1 %v11057_v2 }
0x3151   :  { %10661 = vmatprep.mubr.msk.f32.mxu1 %vm11058_vm4, %v11057_v2  ;;  %10654 = vmatpush3.msra.mxu1 %v8603_v60 }
0x3152   :  { %10655 = vmatprep.subr.mxu1 %v11057_v2 }
0x3208   :  { %v8406_v34 = vpop.f32.mrf.mxu1 }
0x3209   :  { %v8407_v36 = vadd.f32 %v9302_v61, %v8406_v34  ;;  %v9306_v34 = vld [vmem:[#allocation2 + $0x440] ss:$0 sm:$0xff] }
0x320a   :  { %v10621_v45 = vpop.f32.mrf.mxu1 }
0x320b   :  { %v12802_v37 = vadd.f32 %v8407_v36, %v12511_v35 }
0x320c   :  { %v8411_v38 = vpop.f32.mrf.mxu1 }
0x320d   :  { %v8412_v6 = vadd.f32 %v9302_v61, %v8411_v38  ;;  %v8423_v39 = vsel %vm131_vm2, %v12802_v37, 0.0  ;;  %v9307_v38 = vld [vmem:[#allocation2 + $0x448] ss:$0 sm:$0xff] }
0x320e   :  { %8424 = vadd.xlane.f32.xlu0 %v8423_v39  ;;  %v10624_v47 = vpop.f32.mrf.mxu1 }
0x320f   :  { %v12807_v40 = vadd.f32 %v8412_v6, %v12516_v52 }
0x3210   :  { %v8416_v19 = vpop.f32.mrf.mxu1 }
0x3211   :  { %v8417_v14 = vadd.f32 %v9302_v61, %v8416_v19  ;;  %v8426_v4 = vsel %vm131_vm2, %v12807_v40, 0.0 }
0x3212   :  { %8427 = vadd.xlane.f32.xlu1 %v8426_v4  ;;  %v10627_v41 = vpop.f32.mrf.mxu1 }
0x3213   :  { %v12812_v35 = vadd.f32 %v8417_v14, %v12521_v1 }
0x3215   :  { %v8429_v42 = vsel %vm2934_vm6, %v12812_v35, 0.0 }
0x3216   :  { %8430 = vadd.xlane.f32.xlu0 %v8429_v42 }
0x3297   :  { %v8425_v22 = vpop.xlane.xlu0 %8424 }
0x3298   :  { %v8432_v20 = vmul.f32 0.03125, %v8425_v22 }
0x329a   :  { %v12817_v43 = vsub.f32 %v12802_v37, %v8432_v20 }
0x329b   :  { %v8428_v52 = vpop.xlane.xlu1 %8427 }
0x329c   :  { %v8433_v58 = vmul.f32 0.03125, %v8428_v52  ;;  %v8438_v9 = vmul.f32 %v12817_v43, %v12817_v43  ;;  %v8485_v36 = vmul.f32 %v9306_v34, %v12817_v43  ;;  %v8602_v43 = vld [vmem:[#allocation2 + $0x488] sm:$0xff]  ;;  %v8601_v52 = vld [vmem:[#allocation2 + $0x480] sm:$0xff] }
0x329d   :  { %10656 = vmatpush3.msra.mxu1 %v8602_v43 }
0x329e   :  { %v12822_v15 = vsub.f32 %v12807_v40, %v8433_v58  ;;  %v8441_v1 = vsel %vm131_vm2, %v8438_v9, 0.0  ;;  %10657 = vmatprep.subr.mxu1 %v11057_v2  ;;  %v8600_v58 = vld [vmem:[#allocation2 + $0x478] sm:$0xff]  ;;  %v9308_v9 = vld [vmem:[#allocation2 + $0x470] ss:$0 sm:$0xff] }
0x329f   :  { %8442 = vadd.xlane.f32.xlu0 %v8441_v1  ;;  %v8431_v44 = vpop.xlane.xlu0 %8430  ;;  %10658 = vmatpush3.msra.mxu1 %v8601_v52 }
0x32a0   :  { %v8434_v29 = vmul.f32 0.03125, %v8431_v44  ;;  %v8439_v21 = vmul.f32 %v12822_v15, %v12822_v15  ;;  %v8486_v39 = vmul.f32 %v9306_v34, %v12822_v15  ;;  %10659 = vmatprep.subr.mxu1 %v11057_v2 }
0x32a1   :  { %10660 = vmatpush3.msra.mxu1 %v8600_v58 }
0x32a2   :  { %v12828_v46 = vsub.f32 %v12812_v35, %v8434_v29  ;;  %v8444_v30 = vsel %vm131_vm2, %v8439_v21, 0.0  ;;  %10687 = vmatprep.subr.mxu1 %v11057_v2 }
0x32a3   :  { %8445 = vadd.xlane.f32.xlu0 %v8444_v30 }
0x32a4   :  { %v8440_v7 = vmul.f32 %v12828_v46, %v12828_v46  ;;  %v8487_v4 = vmul.f32 %v9306_v34, %v12828_v46  ;;  %v8782_v34 = vld [vmem:[#allocation2 + $0x4d8] sm:$0xff] }
0x32a6   :  { %v8447_v48 = vsel %vm2934_vm6, %v8440_v7, 0.0 }
0x32a7   :  { %8448 = vadd.xlane.f32.xlu1 %v8447_v48 }
0x3328   :  { %v8443_v0 = vpop.xlane.xlu0 %8442 }
0x3329   :  { %v8450_v5 = vmul.f32 0.032258064, %v8443_v0 }
0x332b   :  { %10988 = vrsqrt.f32 %v8450_v5  ;;  %vm8455_vm7 = vcmp.eq.f32.partialorder %v8450_v5, inf  ;;  %v8458_v31 = vand.u32 2147483648, %v8450_v5  ;;  %vm8457_vm8 = vcmp.eq.f32.partialorder %v8450_v5, 0.0 }
0x332c   :  { %v8446_v59 = vpop.xlane.xlu0 %8445 }
0x332d   :  { %v8451_v53 = vmul.f32 0.032258064, %v8446_v59 }
0x332f   :  { %10990 = vrsqrt.f32 %v8451_v53  ;;  %vm8462_vm11 = vcmp.eq.f32.partialorder %v8451_v53, inf  ;;  %v8465_v10 = vand.u32 2147483648, %v8451_v53  ;;  %vm8464_vm1 = vcmp.eq.f32.partialorder %v8451_v53, 0.0 }
0x3330   :  { %v8449_v25 = vpop.xlane.xlu1 %8448 }
0x3331   :  { %v8452_v8 = vmul.f32 0.032258064, %v8449_v25 }
0x3333   :  { %10992 = vrsqrt.f32 %v8452_v8  ;;  %vm8469_vm3 = vcmp.eq.f32.partialorder %v8452_v8, inf  ;;  %v8472_v32 = vand.u32 2147483648, %v8452_v8  ;;  %vm8471_vm5 = vcmp.eq.f32.partialorder %v8452_v8, 0.0 }
0x3338   :  { %v10989_v12 = vpop.eup %10988 }
0x3339   :  { %v8454_v51 = vmul.f32 %v10989_v12, %v8450_v5 }
0x333b   :  { %v8456_v54 = vsel %vm8455_vm7, %v8450_v5, %v8454_v51  ;;  %vm12972_vm7 = vcmask 15360  }
0x333c   :  { %v10991_v57 = vpop.eup %10990  ;;  %v8459_v16 = vsel %vm8457_vm8, %v8458_v31, %v8456_v54 }
0x333d   :  { %v8474_v17 = vadd.f32 1e-06, %v8459_v16  ;;  %v8461_v18 = vmul.f32 %v10991_v57, %v8451_v53 }
0x333f   :  { %10994 = vrcp.f32 %v8474_v17  ;;  %v8463_v62 = vsel %vm8462_vm11, %v8451_v53, %v8461_v18 }
0x3340   :  { %v10993_v26 = vpop.eup %10992  ;;  %v8466_v11 = vsel %vm8464_vm1, %v8465_v10, %v8463_v62 }
0x3341   :  { %v8475_v27 = vadd.f32 1e-06, %v8466_v11  ;;  %v8468_v28 = vmul.f32 %v10993_v26, %v8452_v8 }
0x3343   :  { %10996 = vrcp.f32 %v8475_v27  ;;  %v8470_v33 = vsel %vm8469_vm3, %v8452_v8, %v8468_v28 }
0x3344   :  { %v8473_v23 = vsel %vm8471_vm5, %v8472_v32, %v8470_v33 }
0x3345   :  { %v8476_v61 = vadd.f32 1e-06, %v8473_v23  ;;  %v8784_v23 = vld [vmem:[#allocation2 + $0x4e8] sm:$0xff] }
0x3347   :  { %10998 = vrcp.f32 %v8476_v61  ;;  %v8783_v61 = vld [vmem:[#allocation2 + $0x4e0] sm:$0xff] }
0x334c   :  { %v10995_v45 = vpop.eup %10994 }
0x334d   :  { %v8488_v6 = vmul.f32 %v10995_v45, %v8485_v36  ;;  %v8781_v36 = vld [vmem:[#allocation2 + $0x4d0] sm:$0xff] }
0x334f   :  { %v8496_v47 = vadd.f32 %v9307_v38, %v8488_v6 }
0x3350   :  { %v10997_v19 = vpop.eup %10996 }
0x3351   :  { %10637 = vmatmul.mubr.msk.f32.vlgmr.msra.gmra.mxu0 %vm131_vm2, %v8496_v47  ;;  %v8489_v14 = vmul.f32 %v10997_v19, %v8486_v39 }
0x3352   :  { %10639 = vmatprep.mubr.msk.f32.mxu0 %vm11058_vm4, %v11057_v2  ;;  %10671 = vmatpush3.msra.mxu0 %v8784_v23  ;;  %v30_v23 = vld [vmem:[%s12941_s0 + $0x28] sm:$0xff] }
0x3353   :  { %v8497_v41 = vadd.f32 %v9307_v38, %v8489_v14  ;;  %10672 = vmatprep.subr.mxu0 %v11057_v2 }
0x3354   :  { %v10999_v42 = vpop.eup %10998  ;;  %10673 = vmatpush3.msra.mxu0 %v8783_v61 }
0x3355   :  { %10640 = vmatmul.mubr.msk.f32.gmra.mxu0 %vm131_vm2, %v8497_v41  ;;  %v8490_v22 = vmul.f32 %v10999_v42, %v8487_v4  ;;  %10674 = vmatprep.subr.mxu0 %v11057_v2 }
0x3356   :  { %10642 = vmatprep.mubr.msk.f32.mxu0 %vm11058_vm4, %v11057_v2  ;;  %10675 = vmatpush3.msra.mxu0 %v8782_v34 }
0x3357   :  { %v8498_v20 = vadd.f32 %v9307_v38, %v8490_v22  ;;  %10676 = vmatprep.subr.mxu0 %v11057_v2 }
0x3358   :  { %10677 = vmatpush3.msra.mxu0 %v8781_v36 }
0x3359   :  { %10643 = vmatmul.mubr.msk.f32.gmra.mxu0 %vm131_vm2, %v8498_v20 }
0x335a   :  { %10678 = vmatprep.mubr.msk.f32.mxu0 %vm11058_vm4, %v11057_v2 }
0x3411   :  { %v8583_v15 = vpop.f32.mrf.mxu0 }
0x3412   :  { %v8584_v1 = vadd.f32 %v9308_v9, %v8583_v15 }
0x3413   :  { %v10638_v44 = vpop.f32.mrf.mxu0 }
0x3414   :  { %v8597_v29 = vmax.f32 %v8584_v1, 0.0 }
0x3415   :  { %v8588_v21 = vpop.f32.mrf.mxu0 }
0x3416   :  { %v8589_v46 = vadd.f32 %v9308_v9, %v8588_v21  ;;  %10662 = vmatmul.mubr.msk.f32.vlgmr.msra.gmra.mxu1 %vm676_vm10, %v8597_v29 }
0x3417   :  { %v10641_v30 = vpop.f32.mrf.mxu0  ;;  %10664 = vmatprep.mubr.msk.f32.mxu1 %vm11058_vm4, %v11057_v2 }
0x3418   :  { %v8598_v7 = vmax.f32 %v8589_v46, 0.0 }
0x3419   :  { %v8593_v48 = vpop.f32.mrf.mxu0 }
0x341a   :  { %v8594_v49 = vadd.f32 %v9308_v9, %v8593_v48  ;;  %10665 = vmatmul.mubr.msk.f32.gmra.mxu1 %vm676_vm10, %v8598_v7  ;;  %v9316_v48 = vld [vmem:[#allocation2 + $0x4c0] ss:$0 sm:$0xff] }
0x341b   :  { %v10644_v13 = vpop.f32.mrf.mxu0  ;;  %10667 = vmatprep.mubr.msk.f32.mxu1 %vm11058_vm4, %v11057_v2 }
0x341c   :  { %v8599_v50 = vmax.f32 %v8594_v49, 0.0 }
0x341e   :  { %10668 = vmatmul.mubr.msk.f32.gmra.mxu1 %vm676_vm10, %v8599_v50  ;;  %v9317_v50 = vld [vmem:[#allocation2 + $0x4c8] ss:$0 sm:$0xff] }
0x341f   :  { %10693 = vmatprep.mubr.msk.f32.mxu1 %vm11058_vm4, %v11057_v2 }
0x34d6   :  { %v8688_v3 = vpop.f32.mrf.mxu1 }
0x34d7   :  { %v8689_v63 = vadd.f32 %v9312_v55, %v8688_v3 }
0x34d8   :  { %v10663_v24 = vpop.f32.mrf.mxu1 }
0x34d9   :  { %v8702_v56 = vadd.f32 %v8689_v63, %v12802_v37 }
0x34da   :  { %v8693_v60 = vpop.f32.mrf.mxu1 }
0x34db   :  { %v8694_v0 = vadd.f32 %v9312_v55, %v8693_v60  ;;  %v8705_v5 = vsel %vm131_vm2, %v8702_v56, 0.0 }
0x34dc   :  { %8706 = vadd.xlane.f32.xlu0 %v8705_v5  ;;  %v10666_v59 = vpop.f32.mrf.mxu1 }
0x34dd   :  { %v8703_v53 = vadd.f32 %v8694_v0, %v12807_v40 }
0x34de   :  { %v8698_v25 = vpop.f32.mrf.mxu1 }
0x34df   :  { %v8699_v8 = vadd.f32 %v9312_v55, %v8698_v25  ;;  %v8708_v12 = vsel %vm131_vm2, %v8703_v53, 0.0  ;;  %v9318_v25 = vld [vmem:[#allocation2 + $0x4f0] ss:$0 sm:$0xff] }
0x34e0   :  { %8709 = vadd.xlane.f32.xlu1 %v8708_v12  ;;  %v10669_v51 = vpop.f32.mrf.mxu1 }
0x34e1   :  { %v8704_v31 = vadd.f32 %v8699_v8, %v12812_v35 }
0x34e3   :  { %v8711_v54 = vsel %vm2934_vm6, %v8704_v31, 0.0 }
0x34e4   :  { %8712 = vadd.xlane.f32.xlu0 %v8711_v54 }
0x3565   :  { %v8707_v37 = vpop.xlane.xlu0 %8706 }
0x3566   :  { %v8714_v57 = vmul.f32 0.03125, %v8707_v37 }
0x3568   :  { %v12873_v16 = vsub.f32 %v8702_v56, %v8714_v57 }
0x3569   :  { %v8710_v17 = vpop.xlane.xlu1 %8709 }
0x356a   :  { %v8715_v18 = vmul.f32 0.03125, %v8710_v17  ;;  %v8720_v40 = vmul.f32 %v12873_v16, %v12873_v16  ;;  %v8767_v49 = vmul.f32 %v9316_v48, %v12873_v16  ;;  %v9322_v17 = vld [vmem:[%s12941_s0 + $0x41] ss:$0 sm:$0xff] }
0x356c   :  { %v12877_v10 = vsub.f32 %v8703_v53, %v8715_v18  ;;  %v8723_v62 = vsel %vm131_vm2, %v8720_v40, 0.0 }
0x356d   :  { %8724 = vadd.xlane.f32.xlu1 %v8723_v62  ;;  %v8713_v26 = vpop.xlane.xlu0 %8712  ;;  %v9323_v62 = vld [vmem:[%s12941_s0 + $0x40] ss:$0 sm:$0xff] }
0x356e   :  { %v8716_v11 = vmul.f32 0.03125, %v8713_v26  ;;  %v8721_v35 = vmul.f32 %v12877_v10, %v12877_v10  ;;  %v8768_v3 = vmul.f32 %v9316_v48, %v12877_v10 }
0x3570   :  { %v12882_v27 = vsub.f32 %v8704_v31, %v8716_v11  ;;  %v8726_v28 = vsel %vm131_vm2, %v8721_v35, 0.0 }
0x3571   :  { %8727 = vadd.xlane.f32.xlu0 %v8726_v28  ;;  %v8893_v28 = vld [vmem:[#allocation2 + $0x560] sm:$0xff] }
0x3572   :  { %v8722_v32 = vmul.f32 %v12882_v27, %v12882_v27  ;;  %v8769_v60 = vmul.f32 %v9316_v48, %v12882_v27 }
0x3574   :  { %v8729_v33 = vsel %vm2934_vm6, %v8722_v32, 0.0  ;;  %v8894_v32 = vld [vmem:[#allocation2 + $0x568] sm:$0xff] }
0x3575   :  { %8730 = vadd.xlane.f32.xlu1 %v8729_v33  ;;  %v8895_v33 = vld [vmem:[#allocation2 + $0x570] sm:$0x3] }
0x35f6   :  { %v8725_v45 = vpop.xlane.xlu1 %8724 }
0x35f7   :  { %v8732_v38 = vmul.f32 0.032258064, %v8725_v45 }
0x35f9   :  { %11000 = vrsqrt.f32 %v8732_v38  ;;  %vm8737_vm10 = vcmp.eq.f32.partialorder %v8732_v38, inf  ;;  %v8740_v41 = vand.u32 2147483648, %v8732_v38  ;;  %vm8739_vm6 = vcmp.eq.f32.partialorder %v8732_v38, 0.0 }
0x35fa   :  { %v8728_v6 = vpop.xlane.xlu0 %8727 }
0x35fb   :  { %v8733_v39 = vmul.f32 0.032258064, %v8728_v6 }
0x35fd   :  { %11002 = vrsqrt.f32 %v8733_v39  ;;  %vm8744_vm13 = vcmp.eq.f32.partialorder %v8733_v39, inf  ;;  %v8747_v58 = vand.u32 2147483648, %v8733_v39  ;;  %vm8746_vm9 = vcmp.eq.f32.partialorder %v8733_v39, 0.0 }
0x35fe   :  { %v8731_v47 = vpop.xlane.xlu1 %8730 }
0x35ff   :  { %v8734_v19 = vmul.f32 0.032258064, %v8731_v47 }
0x3601   :  { %11004 = vrsqrt.f32 %v8734_v19  ;;  %vm8751_vm14 = vcmp.eq.f32.partialorder %v8734_v19, inf  ;;  %v8754_v21 = vand.u32 2147483648, %v8734_v19  ;;  %vm8753_vm15 = vcmp.eq.f32.partialorder %v8734_v19, 0.0 }
0x3606   :  { %v11001_v14 = vpop.eup %11000 }
0x3607   :  { %v8736_v4 = vmul.f32 %v11001_v14, %v8732_v38 }
0x3609   :  { %v8738_v42 = vsel %vm8737_vm10, %v8732_v38, %v8736_v4  ;;  %v31_v38 = vld [vmem:[%s12941_s0 + $0x30] sm:$0xff]  ;;  %v32_v4 = vld [vmem:[%s12941_s0 + $0x38] sm:$0x3] }
0x360a   :  { %v11003_v22 = vpop.eup %11002  ;;  %v8741_v20 = vsel %vm8739_vm6, %v8740_v41, %v8738_v42 }
0x360b   :  { %v8756_v43 = vadd.f32 1e-06, %v8741_v20  ;;  %v8743_v52 = vmul.f32 %v11003_v22, %v8733_v39 }
0x360d   :  { %11006 = vrcp.f32 %v8756_v43  ;;  %v8745_v9 = vsel %vm8744_vm13, %v8733_v39, %v8743_v52 }
0x360e   :  { %v11005_v15 = vpop.eup %11004  ;;  %v8748_v1 = vsel %vm8746_vm9, %v8747_v58, %v8745_v9 }
0x360f   :  { %v8757_v44 = vadd.f32 1e-06, %v8748_v1  ;;  %v8750_v29 = vmul.f32 %v11005_v15, %v8734_v19 }
0x3611   :  { %11008 = vrcp.f32 %v8757_v44  ;;  %v8752_v46 = vsel %vm8751_vm14, %v8734_v19, %v8750_v29 }
0x3612   :  { %v8755_v30 = vsel %vm8753_vm15, %v8754_v21, %v8752_v46 }
0x3613   :  { %v8758_v7 = vadd.f32 1e-06, %v8755_v30 }
0x3615   :  { %11010 = vrcp.f32 %v8758_v7 }
0x361a   :  { %v11007_v13 = vpop.eup %11006 }
0x361b   :  { %v8770_v55 = vmul.f32 %v11007_v13, %v8767_v49 }
0x361d   :  { %v8778_v63 = vadd.f32 %v9317_v50, %v8770_v55 }
0x361e   :  { %v11009_v24 = vpop.eup %11008 }
0x361f   :  { %10679 = vmatmul.mubr.msk.f32.vlgmr.msra.gmra.mxu0 %vm131_vm2, %v8778_v63  ;;  %v8771_v56 = vmul.f32 %v11009_v24, %v8768_v3 }
0x3620   :  { %10681 = vmatprep.mubr.msk.f32.mxu0 %vm11058_vm4, %v11057_v2 }
0x3621   :  { %v8779_v0 = vadd.f32 %v9317_v50, %v8771_v56 }
0x3622   :  { %v11011_v5 = vpop.eup %11010 }
0x3623   :  { %10682 = vmatmul.mubr.msk.f32.gmra.mxu0 %vm131_vm2, %v8779_v0  ;;  %v8772_v59 = vmul.f32 %v11011_v5, %v8769_v60 }
0x3624   :  { %10684 = vmatprep.mubr.msk.f32.mxu0 %vm11058_vm4, %v11057_v2 }
0x3625   :  { %v8780_v53 = vadd.f32 %v9317_v50, %v8772_v59 }
0x3627   :  { %10685 = vmatmul.mubr.msk.f32.gmra.mxu0 %vm131_vm2, %v8780_v53  ;;  %vm12971_vm2 = vcmask 1041408  }
0x36df   :  { %v8865_v8 = vpop.f32.mrf.mxu0 }
0x36e0   :  { %v8866_v12 = vadd.f32 %v9318_v25, %v8865_v8 }
0x36e1   :  { %v10680_v51 = vpop.f32.mrf.mxu0 }
0x36e2   :  { %8991 = vrot.lane.b32.xlu0 %v8866_v12, %s11065_s13  ;;  %v8883_v26 = vmul.f32 %v9322_v17, %v8866_v12 }
0x36e3   :  { %v8870_v31 = vpop.f32.mrf.mxu0 }
0x36e4   :  { %v8871_v54 = vadd.f32 %v9318_v25, %v8870_v31  ;;  %v8890_v27 = vadd.f32 %v9323_v62, %v8883_v26 }
0x36e5   :  { %v10683_v37 = vpop.f32.mrf.mxu0 }
0x36e6   :  { %8993 = vrot.lane.b32.xlu1 %v8871_v54, %s11065_s13  ;;  %v8884_v40 = vmul.f32 %v9322_v17, %v8871_v54 }
0x36e7   :  { %v8875_v57 = vpop.f32.mrf.mxu0 }
0x36e8   :  { %v8876_v16 = vadd.f32 %v9318_v25, %v8875_v57  ;;  %v8891_v35 = vadd.f32 %v9323_v62, %v8884_v40 }
0x36e9   :  { %v10686_v18 = vpop.f32.mrf.mxu0 }
0x36ea   :  { %v8885_v10 = vmul.f32 %v9322_v17, %v8876_v16  ;;  %8995 = vrot.lane.b32.xlu1 %v8876_v16, %s11065_s13 }
0x36ec   :  { %v8892_v11 = vadd.f32 %v9323_v62, %v8885_v10 }
0x36ee   :  { %10688 = vmatpush3.msk.msra.mxu1 %vm12971_vm2, %v8892_v11 }
0x36ef   :  { %10689 = vmatprep.subr.mxu1 %v11057_v2 }
0x36f0   :  { %10690 = vmatpush3.msra.mxu1 %v8891_v35 }
0x36f1   :  { %10691 = vmatprep.subr.mxu1 %v11057_v2 }
0x36f2   :  { %10692 = vmatpush3.msra.mxu1 %v8890_v27 }
0x36f3   :  { %10694 = vmatmul.mubr.msk.f32.vlgmr.msra.gmra.mxu1 %vm3552_vm12, %v8893_v28 }
0x36f4   :  { %10696 = vmatprep.mubr.msk.f32.mxu1 %vm11058_vm4, %v11057_v2 }
0x36f7   :  { %10697 = vmatmul.mubr.msk.f32.gmra.mxu1 %vm3552_vm12, %v8894_v32 }
0x36f8   :  { %10699 = vmatprep.mubr.msk.f32.mxu1 %vm11058_vm4, %v11057_v2  ;;  %vm12973_vm4 = vmmov %vm12972_vm7 }
0x36fb   :  { %10700 = vmatmul.mubr.msk.f32.gmra.mxu1 %vm3552_vm12, %v8895_v33  ;;  %vm12974_vm12 = vmmov %vm12973_vm4 }
0x3754   :  { %v8992_v36 = vpop.permute.xlu0 %8991 }
0x3758   :  { %v8994_v39 = vpop.permute.xlu1 %8993 }
0x375c   :  { %v8996_v43 = vpop.permute.xlu1 %8995 }
0x37b3   :  { %v8974_v61 = vpop.f32.mrf.mxu1 }
0x37b4   :  { %v8975_v34 = vadd.f32 %v8974_v61, %v30_v23 }
0x37b5   :  { %v10695_v45 = vpop.f32.mrf.mxu1 }
0x37b6   :  { %v9000_v6 = vsel %vm12972_vm7, %v8975_v34, %v8992_v36 }
0x37b7   :  { %v9004_v2 = vsel %vm9003_vm0, %v9000_v6, 0.0  ;;  %v8979_v47 = vpop.f32.mrf.mxu1 }
0x37b8   :  { %9007 = vst [vmem:[%s12943_s2] sm:$0xff] %v9004_v2  ;;  %v8980_v19 = vadd.f32 %v8979_v47, %v31_v38 }
0x37b9   :  { %v10698_v14 = vpop.f32.mrf.mxu1 }
0x37ba   :  { %v9001_v41 = vsel %vm12973_vm4, %v8980_v19, %v8994_v39 }
0x37bb   :  { %v9005_v42 = vsel %vm9003_vm0, %v9001_v41, 0.0  ;;  %v8984_v22 = vpop.f32.mrf.mxu1 }
0x37bc   :  { %9008 = vst [vmem:[%s12943_s2 + $0x8] sm:$0xff] %v9005_v42  ;;  %v8985_v20 = vadd.f32 %v8984_v22, %v32_v4 }
0x37bd   :  { %v10701_v52 = vpop.f32.mrf.mxu1 }
0x37be   :  { %v9002_v58 = vsel %vm12974_vm12, %v8985_v20, %v8996_v43 }
0x37bf   :  { %v9006_v9 = vsel %vm9003_vm0, %v9002_v58, 0.0 }
0x37c0   :  { %9009 = vst [vmem:[%s12943_s2 + $0x10] sm:$0x3] %v9006_v9 }
0x37c1   :  { %9014 = vsyncpa [#allocation3], 1 }

</bundles_post_ra>
